<compile_context>
chip_gen: v7x
topology: tpu7x:2x2x1
jax: 0.10.0
libtpu: 0.0.40
codegen_flags: <defaults>
</compile_context>

<pallas_src>
from functools import partial

import numpy as np
import jax
import jax.numpy as jnp
from jax.experimental import pallas as pl
from jax.experimental.pallas import tpu as pltpu  # noqa: F401 (no TPU-specific params needed)

# ----------------------------- configuration --------------------------------
IN_CH = 4          # in_channels
HIDDEN = 32        # hidden_dimension
LAYERS = 2         # layers (must be even) -> LAYERS SwinBlocks total
DOWN = 2           # downscaling_factor
HEADS = 2          # num_heads
HEAD_DIM = 8       # head_dim
WINDOW = 4         # window_size
MLP_DIM = 4 * HIDDEN
INNER = HEADS * HEAD_DIM
# relative_pos_embedding = False (default): pos_embedding is (ws^2, ws^2)

LN_EPS = 1e-5
NEG_INF = -1e9     # exp() underflows to exactly 0.0 in f32 after row-max shift


# ------------------------------ small helpers -------------------------------
def _erf_approx(x):
    # Abramowitz & Stegun 7.1.26 (max abs err ~1.5e-7).
    # TODO(synk): lax.erf has no guaranteed Mosaic lowering; polynomial used to
    # reproduce torch.nn.GELU()'s exact (erf-based) semantics to ~1e-7.
    a1, a2, a3, a4, a5 = 0.254829592, -0.284496736, 1.421413741, -1.453152027, 1.061405429
    p = 0.3275911
    ax = jnp.abs(x)
    t = 1.0 / (1.0 + p * ax)
    poly = ((((a5 * t + a4) * t + a3) * t + a2) * t + a1) * t
    y = 1.0 - poly * jnp.exp(-ax * ax)
    return jnp.where(x < 0, -y, y)


def _gelu_exact(x):
    return 0.5 * x * (1.0 + _erf_approx(x * 0.7071067811865475))


def _layernorm(x, gamma, beta):
    # f32 statistics (v5e-safe), per-token.
    mu = jnp.mean(x, axis=-1, keepdims=True)
    var = jnp.mean(jnp.square(x - mu), axis=-1, keepdims=True)
    return (x - mu) * jax.lax.rsqrt(var + LN_EPS) * gamma + beta


def _mm(a, b):
    """MXU matmul: bf16 operands (no-op cast if already bf16), f32 accumulation."""
    return jnp.dot(a.astype(jnp.bfloat16), b.astype(jnp.bfloat16),
                   preferred_element_type=jnp.float32)


def _mm_nt(a, b):
    """a @ b.T with bf16 operands, f32 accumulation (a: (M,K), b: (N,K))."""
    return jax.lax.dot_general(
        a.astype(jnp.bfloat16), b.astype(jnp.bfloat16),
        (((1,), (1,)), ((), ())), preferred_element_type=jnp.float32)


# ------------------------- fused stage Pallas kernel -------------------------
def _stage_kernel(patches_ref, pm_w_ref, pm_b_ref,
                  ln1_g_ref, ln1_b_ref, wqkv_ref, wout_ref, bout_ref, bias_ref,
                  ln2_g_ref, ln2_b_ref, w1_ref, b1_ref, w2_ref, b2_ref,
                  o_ref, *, num_blocks, heads, head_dim, batch, tokens, hidden):
    inner = heads * head_dim

    # PatchMerging linear: (B*T, C*df*df) @ (C*df*df, D) + b  -> (B*T, D), f32
    x = _mm(patches_ref[...], pm_w_ref[...]) + pm_b_ref[...]

    for blk in range(num_blocks):
        # ---------- window-attention sub-block (Residual(PreNorm(.))) -------
        xn = _layernorm(x, ln1_g_ref[blk], ln1_b_ref[blk])

        # One fused QKV matmul for both heads; 1/sqrt(head_dim) already folded
        # into the Q columns of wqkv.  One bf16 cast of the (B*T, 3*inner) slab.
        qkv = _mm(xn, wqkv_ref[blk]).astype(jnp.bfloat16)     # (BT, 3*inner)
        bias = bias_ref[blk]                                  # (BT, BT) f32

        proj = None
        for h in range(heads):
            q = qkv[:, h * head_dim:(h + 1) * head_dim]                    # (BT, hd)
            k = qkv[:, inner + h * head_dim:inner + (h + 1) * head_dim]
            v = qkv[:, 2 * inner + h * head_dim:2 * inner + (h + 1) * head_dim]

            dots = _mm_nt(q, k) + bias                        # (BT, BT), f32
            dots = dots - jnp.max(dots, axis=-1, keepdims=True)
            p = jnp.exp(dots)
            inv = pl.reciprocal(jnp.sum(p, axis=-1, keepdims=True), approx=True)
            attn = p * inv                                    # f32 softmax (EUP recip)
            # accumulate per-head slice of the output projection (no concat)
            contrib = _mm(_mm(attn, v), wout_ref[blk, h])     # (BT, D)
            proj = contrib if proj is None else proj + contrib
        x = x + proj + bout_ref[blk]

        # ---------- MLP sub-block (Residual(PreNorm(.))) ---------------------
        xn = _layernorm(x, ln2_g_ref[blk], ln2_b_ref[blk])
        h1 = _gelu_exact(_mm(xn, w1_ref[blk]) + b1_ref[blk])  # (BT, 4D), f32
        x = x + _mm(h1, w2_ref[blk]) + b2_ref[blk]

    # Fold the final permute(0, 3, 1, 2): one XLU transpose of the resident
    # (B*T, D) slab, then per-batch stores -> output is NCHW-contiguous.
    xt = jnp.transpose(x)                                     # (D, B*T)
    for b in range(batch):
        o_ref[b * hidden:(b + 1) * hidden, :] = (
            xt[:, b * tokens:(b + 1) * tokens].astype(o_ref.dtype))


# --------------- static window-layout constants (raster tokens) --------------
def _window_layout(batch, hp, wp, ws, *, shifted):
    """Per-token position-in-(shifted)-window index and additive attention mask
    with tokens kept in raster order — the cyclic shift / window partition are
    folded into these constants instead of moving any data."""
    disp = ws // 2
    t = hp * wp
    nw_h, nw_w = hp // ws, wp // ws

    r = np.arange(t) // wp
    c = np.arange(t) % wp
    if shifted:                      # position after torch.roll(x, (-disp,-disp))
        r = (r - disp) % hp
        c = (c - disp) % wp
    win_r, win_c = r // ws, c // ws
    wr, wc = r % ws, c % ws

    pos = np.tile(wr * ws + wc, batch)                       # index within window
    win_id = np.tile(win_r * nw_w + win_c, batch)
    tok_b = np.repeat(np.arange(batch), t)
    same = (tok_b[:, None] == tok_b[None, :]) & (win_id[:, None] == win_id[None, :])
    mask = np.where(same, 0.0, NEG_INF).astype(np.float32)

    if shifted:
        up = np.tile(wr >= ws - disp, batch)                 # lower half of window rows
        lf = np.tile(wc >= ws - disp, batch)                 # right half of window cols
        last_row = np.tile(win_r == nw_h - 1, batch)
        last_col = np.tile(win_c == nw_w - 1, batch)
        # upper/lower mask on the last row of windows; left/right on last column
        ul = same & last_row[:, None] & (up[:, None] != up[None, :])
        lr = same & last_col[:, None] & (lf[:, None] != lf[None, :])
        mask = mask + np.where(ul, NEG_INF, 0.0) + np.where(lr, NEG_INF, 0.0)

    return pos, mask


def build_bias(pos_embedding, batch, height, width):
    """bias[blk][i, j] = pos_embedding[blk][p(i), p(j)] + window/shift mask."""
    nh, nw = height // DOWN, width // DOWN
    pos_np = np.asarray(pos_embedding, np.float32)           # (LAYERS, ws^2, ws^2)
    out = []
    for blk in range(LAYERS):
        p_idx, mask = _window_layout(batch, nh, nw, WINDOW, shifted=(blk % 2 == 1))
        out.append(pos_np[blk][np.ix_(p_idx, p_idx)] + mask)
    return jnp.asarray(np.stack(out))                         # (LAYERS, B*T, B*T) f32


# ------------------------ one-time parameter preparation ----------------------
def prepare_stage(params, batch, height, width):
    """Run ONCE (outside jit): fuse Q/K/V + heads into one (D, 3*inner) bf16
    matrix with the 1/sqrt(head_dim) scale folded into the Q columns, pre-cast
    all matmul weights to bf16, and pre-expand the pos_embedding + window/shift
    masks into one additive (LAYERS, B*T, B*T) f32 attention bias."""
    scale = HEAD_DIM ** -0.5

    def fuse(w):  # (NB, HEADS, D, HD) -> (NB, D, HEADS*HD)
        return jnp.transpose(w, (0, 2, 1, 3)).reshape(LAYERS, HIDDEN, INNER)

    wqkv = jnp.concatenate(
        [fuse(params['wq']) * scale, fuse(params['wk']), fuse(params['wv'])],
        axis=-1)                                              # (NB, D, 3*inner)

    return {
        'pm_w': params['pm_w'].astype(jnp.bfloat16),
        'pm_b': params['pm_b'],
        'ln1_g': params['ln1_g'], 'ln1_b': params['ln1_b'],
        'wqkv': wqkv.astype(jnp.bfloat16),
        'wout': params['wout'].astype(jnp.bfloat16),
        'bout': params['bout'],
        'bias': build_bias(params['pos'], batch, height, width),
        'ln2_g': params['ln2_g'], 'ln2_b': params['ln2_b'],
        'w1': params['w1'].astype(jnp.bfloat16), 'b1': params['b1'],
        'w2': params['w2'].astype(jnp.bfloat16), 'b2': params['b2'],
    }


# ------------------------------- forward pass --------------------------------
@jax.jit
def stage_forward(x, prep):
    """x: (B, C, H, W) float32 -> (B, HIDDEN, H//DOWN, W//DOWN) float32."""
    B, C, H, W = x.shape
    nh, nw = H // DOWN, W // DOWN
    tokens = nh * nw
    bt = B * tokens

    # PatchMerging: nn.Unfold(k=DOWN, s=DOWN) feature order is (c, kh, kw).
    # TODO(synk): this is the one remaining wrapper-side XLA layout op (2048
    # elements); the output permute(0,3,1,2) is folded into the kernel below.
    patches = (x.reshape(B, C, nh, DOWN, nw, DOWN)
                .transpose(0, 2, 4, 1, 3, 5)
                .reshape(bt, C * DOWN * DOWN))

    kernel = partial(_stage_kernel, num_blocks=LAYERS, heads=HEADS,
                     head_dim=HEAD_DIM, batch=B, tokens=tokens, hidden=HIDDEN)
    out = pl.pallas_call(
        kernel,
        out_shape=jax.ShapeDtypeStruct((B * HIDDEN, tokens), jnp.float32),
        # single grid point: the whole (B*T, D) activation slab stays VMEM-resident
    )(patches, prep['pm_w'], prep['pm_b'],
      prep['ln1_g'], prep['ln1_b'], prep['wqkv'], prep['wout'], prep['bout'],
      prep['bias'],
      prep['ln2_g'], prep['ln2_b'], prep['w1'], prep['b1'], prep['w2'], prep['b2'])

    # (B*D, nh*nw) is already NCHW-contiguous: pure reshape, no data movement.
    return out.reshape(B, HIDDEN, nh, nw)


# ------------------------------ parameter init --------------------------------
def init_params(key):
    kit = iter(jax.random.split(key, 32))

    def nrm(shape, std=0.05):
        return std * jax.random.normal(next(kit), shape, jnp.float32)

    D, HD, NB, N = HIDDEN, HEAD_DIM, LAYERS, WINDOW * WINDOW
    # Blocks stacked on axis 0 in execution order: regular, shifted, regular, ...
    return {
        'pm_w': nrm((IN_CH * DOWN * DOWN, D)),
        'pm_b': nrm((1, D)),
        'ln1_g': jnp.ones((NB, 1, D), jnp.float32),
        'ln1_b': jnp.zeros((NB, 1, D), jnp.float32),
        'wq': nrm((NB, HEADS, D, HD)),        # to_qkv (bias=False), split per head
        'wk': nrm((NB, HEADS, D, HD)),
        'wv': nrm((NB, HEADS, D, HD)),
        'wout': nrm((NB, HEADS, HD, D)),      # to_out weight, split per head
        'bout': nrm((NB, 1, D)),
        'pos': nrm((NB, N, N), std=1.0),      # absolute (ws^2, ws^2) pos embedding
        'ln2_g': jnp.ones((NB, 1, D), jnp.float32),
        'ln2_b': jnp.zeros((NB, 1, D), jnp.float32),
        'w1': nrm((NB, D, MLP_DIM)),
        'b1': nrm((NB, 1, MLP_DIM)),
        'w2': nrm((NB, MLP_DIM, D)),
        'b2': nrm((NB, 1, D)),
    }


# ----------------------------------- main -------------------------------------
if __name__ == "__main__":
    B, C, H, W = 2, IN_CH, 16, 16
    x = jax.random.normal(jax.random.PRNGKey(0), (B, C, H, W), jnp.float32)
    params = init_params(jax.random.PRNGKey(1))
    prep = prepare_stage(params, B, H, W)     # one-time weight fusion / bias expansion

    out = jax.block_until_ready(stage_forward(x, prep))

    assert out.shape == (B, HIDDEN, H // DOWN, W // DOWN), out.shape
    assert bool(jnp.all(jnp.isfinite(out)))
    print("KERNEL_OK")
</pallas_src>

<mosaic_0001>
module attributes {stable_mosaic.version = 11 : i64} {
  func.func @_stage_kernel(%arg0: memref<128x16xf32, #tpu.memory_space<vmem>>, %arg1: memref<16x32xbf16, #tpu.memory_space<vmem>>, %arg2: memref<1x32xf32, #tpu.memory_space<vmem>>, %arg3: memref<2x1x32xf32, #tpu.memory_space<vmem>>, %arg4: memref<2x1x32xf32, #tpu.memory_space<vmem>>, %arg5: memref<2x32x48xbf16, #tpu.memory_space<vmem>>, %arg6: memref<2x2x8x32xbf16, #tpu.memory_space<vmem>>, %arg7: memref<2x1x32xf32, #tpu.memory_space<vmem>>, %arg8: memref<2x128x128xf32, #tpu.memory_space<vmem>>, %arg9: memref<2x1x32xf32, #tpu.memory_space<vmem>>, %arg10: memref<2x1x32xf32, #tpu.memory_space<vmem>>, %arg11: memref<2x32x128xbf16, #tpu.memory_space<vmem>>, %arg12: memref<2x1x128xf32, #tpu.memory_space<vmem>>, %arg13: memref<2x128x32xbf16, #tpu.memory_space<vmem>>, %arg14: memref<2x1x32xf32, #tpu.memory_space<vmem>>, %arg15: memref<64x64xf32, #tpu.memory_space<vmem>>) attributes {dimension_semantics = [], scalar_prefetch = 0 : i64, scratch_operands = 0 : i64, tpu.core_type = #tpu.core_type<tc>} {
    %c0 = arith.constant 0 : index
    %c0_0 = arith.constant 0 : index
    %0 = vector.load %arg0[%c0, %c0_0] : memref<128x16xf32, #tpu.memory_space<vmem>>, vector<128x16xf32>
    %c0_1 = arith.constant 0 : index
    %c0_2 = arith.constant 0 : index
    %1 = vector.load %arg1[%c0_1, %c0_2] : memref<16x32xbf16, #tpu.memory_space<vmem>>, vector<16x32xbf16>
    %2 = arith.truncf %0 : vector<128x16xf32> to vector<128x16xbf16>
    %cst = arith.constant dense<0.000000e+00> : vector<128x32xf32>
    %3 = tpu.matmul %2, %1, %cst {dimension_numbers = #tpu.dot_dimension_numbers<[1], [0], [0], [1], [0, 0, 1, 1], [], []>} : vector<128x16xbf16>, vector<16x32xbf16>, vector<128x32xf32> -> vector<128x32xf32>
    %c0_3 = arith.constant 0 : index
    %c0_4 = arith.constant 0 : index
    %4 = vector.load %arg2[%c0_3, %c0_4] : memref<1x32xf32, #tpu.memory_space<vmem>>, vector<1x32xf32>
    %5 = vector.broadcast %4 : vector<1x32xf32> to vector<128x32xf32>
    %6 = arith.addf %3, %5 : vector<128x32xf32>
    %c0_5 = arith.constant 0 : index
    %c0_6 = arith.constant 0 : index
    %c0_7 = arith.constant 0 : index
    %7 = vector.load %arg3[%c0_5, %c0_6, %c0_7] : memref<2x1x32xf32, #tpu.memory_space<vmem>>, vector<1x1x32xf32>
    %8 = vector.shape_cast %7 : vector<1x1x32xf32> to vector<1x32xf32>
    %c0_8 = arith.constant 0 : index
    %c0_9 = arith.constant 0 : index
    %c0_10 = arith.constant 0 : index
    %9 = vector.load %arg4[%c0_8, %c0_9, %c0_10] : memref<2x1x32xf32, #tpu.memory_space<vmem>>, vector<1x1x32xf32>
    %10 = vector.shape_cast %9 : vector<1x1x32xf32> to vector<1x32xf32>
    %cst_11 = arith.constant dense<0.000000e+00> : vector<128xf32>
    %11 = vector.multi_reduction <add>, %6, %cst_11 [1] : vector<128x32xf32> to vector<128xf32>
    %12 = vector.shape_cast %11 : vector<128xf32> to vector<128x1xf32>
    %cst_12 = arith.constant 3.200000e+01 : f32
    %13 = vector.broadcast %cst_12 : f32 to vector<128x1xf32>
    %14 = arith.divf %12, %13 : vector<128x1xf32>
    %15 = vector.broadcast %14 : vector<128x1xf32> to vector<128x32xf32>
    %16 = arith.subf %6, %15 : vector<128x32xf32>
    %17 = arith.mulf %16, %16 : vector<128x32xf32>
    %cst_13 = arith.constant dense<0.000000e+00> : vector<128xf32>
    %18 = vector.multi_reduction <add>, %17, %cst_13 [1] : vector<128x32xf32> to vector<128xf32>
    %19 = vector.shape_cast %18 : vector<128xf32> to vector<128x1xf32>
    %cst_14 = arith.constant 3.200000e+01 : f32
    %20 = vector.broadcast %cst_14 : f32 to vector<128x1xf32>
    %21 = arith.divf %19, %20 : vector<128x1xf32>
    %22 = vector.broadcast %14 : vector<128x1xf32> to vector<128x32xf32>
    %23 = arith.subf %6, %22 : vector<128x32xf32>
    %cst_15 = arith.constant 9.99999974E-6 : f32
    %24 = vector.broadcast %cst_15 : f32 to vector<128x1xf32>
    %25 = arith.addf %21, %24 : vector<128x1xf32>
    %26 = math.rsqrt %25 : vector<128x1xf32>
    %27 = vector.broadcast %26 : vector<128x1xf32> to vector<128x32xf32>
    %28 = arith.mulf %23, %27 : vector<128x32xf32>
    %29 = vector.broadcast %8 : vector<1x32xf32> to vector<128x32xf32>
    %30 = arith.mulf %28, %29 : vector<128x32xf32>
    %31 = vector.broadcast %10 : vector<1x32xf32> to vector<128x32xf32>
    %32 = arith.addf %30, %31 : vector<128x32xf32>
    %c0_16 = arith.constant 0 : index
    %c0_17 = arith.constant 0 : index
    %c0_18 = arith.constant 0 : index
    %33 = vector.load %arg5[%c0_16, %c0_17, %c0_18] : memref<2x32x48xbf16, #tpu.memory_space<vmem>>, vector<1x32x48xbf16>
    %34 = vector.shape_cast %33 : vector<1x32x48xbf16> to vector<32x48xbf16>
    %35 = arith.truncf %32 : vector<128x32xf32> to vector<128x32xbf16>
    %cst_19 = arith.constant dense<0.000000e+00> : vector<128x48xf32>
    %36 = tpu.matmul %35, %34, %cst_19 {dimension_numbers = #tpu.dot_dimension_numbers<[1], [0], [0], [1], [0, 0, 1, 1], [], []>} : vector<128x32xbf16>, vector<32x48xbf16>, vector<128x48xf32> -> vector<128x48xf32>
    %37 = arith.truncf %36 : vector<128x48xf32> to vector<128x48xbf16>
    %c0_20 = arith.constant 0 : index
    %c0_21 = arith.constant 0 : index
    %c0_22 = arith.constant 0 : index
    %38 = vector.load %arg8[%c0_20, %c0_21, %c0_22] : memref<2x128x128xf32, #tpu.memory_space<vmem>>, vector<1x128x128xf32>
    %39 = vector.shape_cast %38 : vector<1x128x128xf32> to vector<128x128xf32>
    %40 = vector.extract_strided_slice %37 {offsets = [0, 0], sizes = [128, 8], strides = [1, 1]} : vector<128x48xbf16> to vector<128x8xbf16>
    %41 = vector.extract_strided_slice %37 {offsets = [0, 16], sizes = [128, 8], strides = [1, 1]} : vector<128x48xbf16> to vector<128x8xbf16>
    %42 = vector.extract_strided_slice %37 {offsets = [0, 32], sizes = [128, 8], strides = [1, 1]} : vector<128x48xbf16> to vector<128x8xbf16>
    %cst_23 = arith.constant dense<0.000000e+00> : vector<128x128xf32>
    %43 = tpu.matmul %40, %41, %cst_23 {dimension_numbers = #tpu.dot_dimension_numbers<[1], [1], [0], [0], [0, 0, 1, 0], [], []>} : vector<128x8xbf16>, vector<128x8xbf16>, vector<128x128xf32> -> vector<128x128xf32>
    %44 = arith.addf %43, %39 : vector<128x128xf32>
    %cst_24 = arith.constant dense<0xFF800000> : vector<128xf32>
    %45 = vector.multi_reduction <maximumf>, %44, %cst_24 [1] : vector<128x128xf32> to vector<128xf32>
    %46 = vector.shape_cast %45 : vector<128xf32> to vector<128x1xf32>
    %47 = vector.broadcast %46 : vector<128x1xf32> to vector<128x128xf32>
    %48 = arith.subf %44, %47 : vector<128x128xf32>
    %49 = math.exp %48 : vector<128x128xf32>
    %cst_25 = arith.constant dense<0.000000e+00> : vector<128xf32>
    %50 = vector.multi_reduction <add>, %49, %cst_25 [1] : vector<128x128xf32> to vector<128xf32>
    %51 = vector.shape_cast %50 : vector<128xf32> to vector<128x1xf32>
    %52 = tpu.reciprocal %51 {approx = true} : vector<128x1xf32> -> vector<128x1xf32>
    %53 = vector.broadcast %52 : vector<128x1xf32> to vector<128x128xf32>
    %54 = arith.mulf %49, %53 : vector<128x128xf32>
    %55 = arith.truncf %54 : vector<128x128xf32> to vector<128x128xbf16>
    %cst_26 = arith.constant dense<0.000000e+00> : vector<128x8xf32>
    %56 = tpu.matmul %55, %42, %cst_26 {dimension_numbers = #tpu.dot_dimension_numbers<[1], [0], [0], [1], [0, 0, 1, 1], [], []>} : vector<128x128xbf16>, vector<128x8xbf16>, vector<128x8xf32> -> vector<128x8xf32>
    %c0_27 = arith.constant 0 : index
    %c0_28 = arith.constant 0 : index
    %c0_29 = arith.constant 0 : index
    %c0_30 = arith.constant 0 : index
    %57 = vector.load %arg6[%c0_27, %c0_28, %c0_29, %c0_30] : memref<2x2x8x32xbf16, #tpu.memory_space<vmem>>, vector<1x1x8x32xbf16>
    %58 = vector.shape_cast %57 : vector<1x1x8x32xbf16> to vector<8x32xbf16>
    %59 = arith.truncf %56 : vector<128x8xf32> to vector<128x8xbf16>
    %cst_31 = arith.constant dense<0.000000e+00> : vector<128x32xf32>
    %60 = tpu.matmul %59, %58, %cst_31 {dimension_numbers = #tpu.dot_dimension_numbers<[1], [0], [0], [1], [0, 0, 1, 1], [], []>} : vector<128x8xbf16>, vector<8x32xbf16>, vector<128x32xf32> -> vector<128x32xf32>
    %61 = vector.extract_strided_slice %37 {offsets = [0, 8], sizes = [128, 8], strides = [1, 1]} : vector<128x48xbf16> to vector<128x8xbf16>
    %62 = vector.extract_strided_slice %37 {offsets = [0, 24], sizes = [128, 8], strides = [1, 1]} : vector<128x48xbf16> to vector<128x8xbf16>
    %63 = vector.extract_strided_slice %37 {offsets = [0, 40], sizes = [128, 8], strides = [1, 1]} : vector<128x48xbf16> to vector<128x8xbf16>
    %cst_32 = arith.constant dense<0.000000e+00> : vector<128x128xf32>
    %64 = tpu.matmul %61, %62, %cst_32 {dimension_numbers = #tpu.dot_dimension_numbers<[1], [1], [0], [0], [0, 0, 1, 0], [], []>} : vector<128x8xbf16>, vector<128x8xbf16>, vector<128x128xf32> -> vector<128x128xf32>
    %65 = arith.addf %64, %39 : vector<128x128xf32>
    %cst_33 = arith.constant dense<0xFF800000> : vector<128xf32>
    %66 = vector.multi_reduction <maximumf>, %65, %cst_33 [1] : vector<128x128xf32> to vector<128xf32>
    %67 = vector.shape_cast %66 : vector<128xf32> to vector<128x1xf32>
    %68 = vector.broadcast %67 : vector<128x1xf32> to vector<128x128xf32>
    %69 = arith.subf %65, %68 : vector<128x128xf32>
    %70 = math.exp %69 : vector<128x128xf32>
    %cst_34 = arith.constant dense<0.000000e+00> : vector<128xf32>
    %71 = vector.multi_reduction <add>, %70, %cst_34 [1] : vector<128x128xf32> to vector<128xf32>
    %72 = vector.shape_cast %71 : vector<128xf32> to vector<128x1xf32>
    %73 = tpu.reciprocal %72 {approx = true} : vector<128x1xf32> -> vector<128x1xf32>
    %74 = vector.broadcast %73 : vector<128x1xf32> to vector<128x128xf32>
    %75 = arith.mulf %70, %74 : vector<128x128xf32>
    %76 = arith.truncf %75 : vector<128x128xf32> to vector<128x128xbf16>
    %cst_35 = arith.constant dense<0.000000e+00> : vector<128x8xf32>
    %77 = tpu.matmul %76, %63, %cst_35 {dimension_numbers = #tpu.dot_dimension_numbers<[1], [0], [0], [1], [0, 0, 1, 1], [], []>} : vector<128x128xbf16>, vector<128x8xbf16>, vector<128x8xf32> -> vector<128x8xf32>
    %c0_36 = arith.constant 0 : index
    %c1 = arith.constant 1 : index
    %c0_37 = arith.constant 0 : index
    %c0_38 = arith.constant 0 : index
    %78 = vector.load %arg6[%c0_36, %c1, %c0_37, %c0_38] : memref<2x2x8x32xbf16, #tpu.memory_space<vmem>>, vector<1x1x8x32xbf16>
    %79 = vector.shape_cast %78 : vector<1x1x8x32xbf16> to vector<8x32xbf16>
    %80 = arith.truncf %77 : vector<128x8xf32> to vector<128x8xbf16>
    %cst_39 = arith.constant dense<0.000000e+00> : vector<128x32xf32>
    %81 = tpu.matmul %80, %79, %cst_39 {dimension_numbers = #tpu.dot_dimension_numbers<[1], [0], [0], [1], [0, 0, 1, 1], [], []>} : vector<128x8xbf16>, vector<8x32xbf16>, vector<128x32xf32> -> vector<128x32xf32>
    %82 = arith.addf %60, %81 : vector<128x32xf32>
    %83 = arith.addf %6, %82 : vector<128x32xf32>
    %c0_40 = arith.constant 0 : index
    %c0_41 = arith.constant 0 : index
    %c0_42 = arith.constant 0 : index
    %84 = vector.load %arg7[%c0_40, %c0_41, %c0_42] : memref<2x1x32xf32, #tpu.memory_space<vmem>>, vector<1x1x32xf32>
    %85 = vector.shape_cast %84 : vector<1x1x32xf32> to vector<1x32xf32>
    %86 = vector.broadcast %85 : vector<1x32xf32> to vector<128x32xf32>
    %87 = arith.addf %83, %86 : vector<128x32xf32>
    %c0_43 = arith.constant 0 : index
    %c0_44 = arith.constant 0 : index
    %c0_45 = arith.constant 0 : index
    %88 = vector.load %arg9[%c0_43, %c0_44, %c0_45] : memref<2x1x32xf32, #tpu.memory_space<vmem>>, vector<1x1x32xf32>
    %89 = vector.shape_cast %88 : vector<1x1x32xf32> to vector<1x32xf32>
    %c0_46 = arith.constant 0 : index
    %c0_47 = arith.constant 0 : index
    %c0_48 = arith.constant 0 : index
    %90 = vector.load %arg10[%c0_46, %c0_47, %c0_48] : memref<2x1x32xf32, #tpu.memory_space<vmem>>, vector<1x1x32xf32>
    %91 = vector.shape_cast %90 : vector<1x1x32xf32> to vector<1x32xf32>
    %cst_49 = arith.constant dense<0.000000e+00> : vector<128xf32>
    %92 = vector.multi_reduction <add>, %87, %cst_49 [1] : vector<128x32xf32> to vector<128xf32>
    %93 = vector.shape_cast %92 : vector<128xf32> to vector<128x1xf32>
    %cst_50 = arith.constant 3.200000e+01 : f32
    %94 = vector.broadcast %cst_50 : f32 to vector<128x1xf32>
    %95 = arith.divf %93, %94 : vector<128x1xf32>
    %96 = vector.broadcast %95 : vector<128x1xf32> to vector<128x32xf32>
    %97 = arith.subf %87, %96 : vector<128x32xf32>
    %98 = arith.mulf %97, %97 : vector<128x32xf32>
    %cst_51 = arith.constant dense<0.000000e+00> : vector<128xf32>
    %99 = vector.multi_reduction <add>, %98, %cst_51 [1] : vector<128x32xf32> to vector<128xf32>
    %100 = vector.shape_cast %99 : vector<128xf32> to vector<128x1xf32>
    %cst_52 = arith.constant 3.200000e+01 : f32
    %101 = vector.broadcast %cst_52 : f32 to vector<128x1xf32>
    %102 = arith.divf %100, %101 : vector<128x1xf32>
    %103 = vector.broadcast %95 : vector<128x1xf32> to vector<128x32xf32>
    %104 = arith.subf %87, %103 : vector<128x32xf32>
    %cst_53 = arith.constant 9.99999974E-6 : f32
    %105 = vector.broadcast %cst_53 : f32 to vector<128x1xf32>
    %106 = arith.addf %102, %105 : vector<128x1xf32>
    %107 = math.rsqrt %106 : vector<128x1xf32>
    %108 = vector.broadcast %107 : vector<128x1xf32> to vector<128x32xf32>
    %109 = arith.mulf %104, %108 : vector<128x32xf32>
    %110 = vector.broadcast %89 : vector<1x32xf32> to vector<128x32xf32>
    %111 = arith.mulf %109, %110 : vector<128x32xf32>
    %112 = vector.broadcast %91 : vector<1x32xf32> to vector<128x32xf32>
    %113 = arith.addf %111, %112 : vector<128x32xf32>
    %c0_54 = arith.constant 0 : index
    %c0_55 = arith.constant 0 : index
    %c0_56 = arith.constant 0 : index
    %114 = vector.load %arg11[%c0_54, %c0_55, %c0_56] : memref<2x32x128xbf16, #tpu.memory_space<vmem>>, vector<1x32x128xbf16>
    %115 = vector.shape_cast %114 : vector<1x32x128xbf16> to vector<32x128xbf16>
    %116 = arith.truncf %113 : vector<128x32xf32> to vector<128x32xbf16>
    %cst_57 = arith.constant dense<0.000000e+00> : vector<128x128xf32>
    %117 = tpu.matmul %116, %115, %cst_57 {dimension_numbers = #tpu.dot_dimension_numbers<[1], [0], [0], [1], [0, 0, 1, 1], [], []>} : vector<128x32xbf16>, vector<32x128xbf16>, vector<128x128xf32> -> vector<128x128xf32>
    %c0_58 = arith.constant 0 : index
    %c0_59 = arith.constant 0 : index
    %c0_60 = arith.constant 0 : index
    %118 = vector.load %arg12[%c0_58, %c0_59, %c0_60] : memref<2x1x128xf32, #tpu.memory_space<vmem>>, vector<1x1x128xf32>
    %119 = vector.shape_cast %118 : vector<1x1x128xf32> to vector<1x128xf32>
    %120 = vector.broadcast %119 : vector<1x128xf32> to vector<128x128xf32>
    %121 = arith.addf %117, %120 : vector<128x128xf32>
    %cst_61 = arith.constant 5.000000e-01 : f32
    %122 = vector.broadcast %cst_61 : f32 to vector<128x128xf32>
    %123 = arith.mulf %122, %121 : vector<128x128xf32>
    %cst_62 = arith.constant 0.707106769 : f32
    %124 = vector.broadcast %cst_62 : f32 to vector<128x128xf32>
    %125 = arith.mulf %121, %124 : vector<128x128xf32>
    %126 = math.absf %125 : vector<128x128xf32>
    %cst_63 = arith.constant 0.327591091 : f32
    %127 = vector.broadcast %cst_63 : f32 to vector<128x128xf32>
    %128 = arith.mulf %127, %126 : vector<128x128xf32>
    %cst_64 = arith.constant 1.000000e+00 : f32
    %129 = vector.broadcast %cst_64 : f32 to vector<128x128xf32>
    %130 = arith.addf %129, %128 : vector<128x128xf32>
    %cst_65 = arith.constant 1.000000e+00 : f32
    %131 = vector.broadcast %cst_65 : f32 to vector<128x128xf32>
    %132 = arith.divf %131, %130 : vector<128x128xf32>
    %cst_66 = arith.constant 1.06140542 : f32
    %133 = vector.broadcast %cst_66 : f32 to vector<128x128xf32>
    %134 = arith.mulf %133, %132 : vector<128x128xf32>
    %cst_67 = arith.constant -1.45315206 : f32
    %135 = vector.broadcast %cst_67 : f32 to vector<128x128xf32>
    %136 = arith.addf %134, %135 : vector<128x128xf32>
    %137 = arith.mulf %136, %132 : vector<128x128xf32>
    %cst_68 = arith.constant 1.42141378 : f32
    %138 = vector.broadcast %cst_68 : f32 to vector<128x128xf32>
    %139 = arith.addf %137, %138 : vector<128x128xf32>
    %140 = arith.mulf %139, %132 : vector<128x128xf32>
    %cst_69 = arith.constant -0.284496725 : f32
    %141 = vector.broadcast %cst_69 : f32 to vector<128x128xf32>
    %142 = arith.addf %140, %141 : vector<128x128xf32>
    %143 = arith.mulf %142, %132 : vector<128x128xf32>
    %cst_70 = arith.constant 0.254829586 : f32
    %144 = vector.broadcast %cst_70 : f32 to vector<128x128xf32>
    %145 = arith.addf %143, %144 : vector<128x128xf32>
    %146 = arith.mulf %145, %132 : vector<128x128xf32>
    %cst_71 = arith.constant 0.000000e+00 : f32
    %147 = vector.broadcast %cst_71 : f32 to vector<128x128xf32>
    %148 = arith.subf %147, %126 : vector<128x128xf32>
    %149 = arith.mulf %148, %126 : vector<128x128xf32>
    %150 = math.exp %149 : vector<128x128xf32>
    %151 = arith.mulf %146, %150 : vector<128x128xf32>
    %cst_72 = arith.constant 1.000000e+00 : f32
    %152 = vector.broadcast %cst_72 : f32 to vector<128x128xf32>
    %153 = arith.subf %152, %151 : vector<128x128xf32>
    %cst_73 = arith.constant 0.000000e+00 : f32
    %154 = vector.broadcast %cst_73 : f32 to vector<128x128xf32>
    %155 = arith.cmpf olt, %125, %154 : vector<128x128xf32>
    %cst_74 = arith.constant 0.000000e+00 : f32
    %156 = vector.broadcast %cst_74 : f32 to vector<128x128xf32>
    %157 = arith.subf %156, %153 : vector<128x128xf32>
    %158 = arith.select %155, %157, %153 : vector<128x128xi1>, vector<128x128xf32>
    %cst_75 = arith.constant 1.000000e+00 : f32
    %159 = vector.broadcast %cst_75 : f32 to vector<128x128xf32>
    %160 = arith.addf %159, %158 : vector<128x128xf32>
    %161 = arith.mulf %123, %160 : vector<128x128xf32>
    %c0_76 = arith.constant 0 : index
    %c0_77 = arith.constant 0 : index
    %c0_78 = arith.constant 0 : index
    %162 = vector.load %arg13[%c0_76, %c0_77, %c0_78] : memref<2x128x32xbf16, #tpu.memory_space<vmem>>, vector<1x128x32xbf16>
    %163 = vector.shape_cast %162 : vector<1x128x32xbf16> to vector<128x32xbf16>
    %164 = arith.truncf %161 : vector<128x128xf32> to vector<128x128xbf16>
    %cst_79 = arith.constant dense<0.000000e+00> : vector<128x32xf32>
    %165 = tpu.matmul %164, %163, %cst_79 {dimension_numbers = #tpu.dot_dimension_numbers<[1], [0], [0], [1], [0, 0, 1, 1], [], []>} : vector<128x128xbf16>, vector<128x32xbf16>, vector<128x32xf32> -> vector<128x32xf32>
    %166 = arith.addf %87, %165 : vector<128x32xf32>
    %c0_80 = arith.constant 0 : index
    %c0_81 = arith.constant 0 : index
    %c0_82 = arith.constant 0 : index
    %167 = vector.load %arg14[%c0_80, %c0_81, %c0_82] : memref<2x1x32xf32, #tpu.memory_space<vmem>>, vector<1x1x32xf32>
    %168 = vector.shape_cast %167 : vector<1x1x32xf32> to vector<1x32xf32>
    %169 = vector.broadcast %168 : vector<1x32xf32> to vector<128x32xf32>
    %170 = arith.addf %166, %169 : vector<128x32xf32>
    %c1_83 = arith.constant 1 : index
    %c0_84 = arith.constant 0 : index
    %c0_85 = arith.constant 0 : index
    %171 = vector.load %arg3[%c1_83, %c0_84, %c0_85] : memref<2x1x32xf32, #tpu.memory_space<vmem>>, vector<1x1x32xf32>
    %172 = vector.shape_cast %171 : vector<1x1x32xf32> to vector<1x32xf32>
    %c1_86 = arith.constant 1 : index
    %c0_87 = arith.constant 0 : index
    %c0_88 = arith.constant 0 : index
    %173 = vector.load %arg4[%c1_86, %c0_87, %c0_88] : memref<2x1x32xf32, #tpu.memory_space<vmem>>, vector<1x1x32xf32>
    %174 = vector.shape_cast %173 : vector<1x1x32xf32> to vector<1x32xf32>
    %cst_89 = arith.constant dense<0.000000e+00> : vector<128xf32>
    %175 = vector.multi_reduction <add>, %170, %cst_89 [1] : vector<128x32xf32> to vector<128xf32>
    %176 = vector.shape_cast %175 : vector<128xf32> to vector<128x1xf32>
    %cst_90 = arith.constant 3.200000e+01 : f32
    %177 = vector.broadcast %cst_90 : f32 to vector<128x1xf32>
    %178 = arith.divf %176, %177 : vector<128x1xf32>
    %179 = vector.broadcast %178 : vector<128x1xf32> to vector<128x32xf32>
    %180 = arith.subf %170, %179 : vector<128x32xf32>
    %181 = arith.mulf %180, %180 : vector<128x32xf32>
    %cst_91 = arith.constant dense<0.000000e+00> : vector<128xf32>
    %182 = vector.multi_reduction <add>, %181, %cst_91 [1] : vector<128x32xf32> to vector<128xf32>
    %183 = vector.shape_cast %182 : vector<128xf32> to vector<128x1xf32>
    %cst_92 = arith.constant 3.200000e+01 : f32
    %184 = vector.broadcast %cst_92 : f32 to vector<128x1xf32>
    %185 = arith.divf %183, %184 : vector<128x1xf32>
    %186 = vector.broadcast %178 : vector<128x1xf32> to vector<128x32xf32>
    %187 = arith.subf %170, %186 : vector<128x32xf32>
    %cst_93 = arith.constant 9.99999974E-6 : f32
    %188 = vector.broadcast %cst_93 : f32 to vector<128x1xf32>
    %189 = arith.addf %185, %188 : vector<128x1xf32>
    %190 = math.rsqrt %189 : vector<128x1xf32>
    %191 = vector.broadcast %190 : vector<128x1xf32> to vector<128x32xf32>
    %192 = arith.mulf %187, %191 : vector<128x32xf32>
    %193 = vector.broadcast %172 : vector<1x32xf32> to vector<128x32xf32>
    %194 = arith.mulf %192, %193 : vector<128x32xf32>
    %195 = vector.broadcast %174 : vector<1x32xf32> to vector<128x32xf32>
    %196 = arith.addf %194, %195 : vector<128x32xf32>
    %c1_94 = arith.constant 1 : index
    %c0_95 = arith.constant 0 : index
    %c0_96 = arith.constant 0 : index
    %197 = vector.load %arg5[%c1_94, %c0_95, %c0_96] : memref<2x32x48xbf16, #tpu.memory_space<vmem>>, vector<1x32x48xbf16>
    %198 = vector.shape_cast %197 : vector<1x32x48xbf16> to vector<32x48xbf16>
    %199 = arith.truncf %196 : vector<128x32xf32> to vector<128x32xbf16>
    %cst_97 = arith.constant dense<0.000000e+00> : vector<128x48xf32>
    %200 = tpu.matmul %199, %198, %cst_97 {dimension_numbers = #tpu.dot_dimension_numbers<[1], [0], [0], [1], [0, 0, 1, 1], [], []>} : vector<128x32xbf16>, vector<32x48xbf16>, vector<128x48xf32> -> vector<128x48xf32>
    %201 = arith.truncf %200 : vector<128x48xf32> to vector<128x48xbf16>
    %c1_98 = arith.constant 1 : index
    %c0_99 = arith.constant 0 : index
    %c0_100 = arith.constant 0 : index
    %202 = vector.load %arg8[%c1_98, %c0_99, %c0_100] : memref<2x128x128xf32, #tpu.memory_space<vmem>>, vector<1x128x128xf32>
    %203 = vector.shape_cast %202 : vector<1x128x128xf32> to vector<128x128xf32>
    %204 = vector.extract_strided_slice %201 {offsets = [0, 0], sizes = [128, 8], strides = [1, 1]} : vector<128x48xbf16> to vector<128x8xbf16>
    %205 = vector.extract_strided_slice %201 {offsets = [0, 16], sizes = [128, 8], strides = [1, 1]} : vector<128x48xbf16> to vector<128x8xbf16>
    %206 = vector.extract_strided_slice %201 {offsets = [0, 32], sizes = [128, 8], strides = [1, 1]} : vector<128x48xbf16> to vector<128x8xbf16>
    %cst_101 = arith.constant dense<0.000000e+00> : vector<128x128xf32>
    %207 = tpu.matmul %204, %205, %cst_101 {dimension_numbers = #tpu.dot_dimension_numbers<[1], [1], [0], [0], [0, 0, 1, 0], [], []>} : vector<128x8xbf16>, vector<128x8xbf16>, vector<128x128xf32> -> vector<128x128xf32>
    %208 = arith.addf %207, %203 : vector<128x128xf32>
    %cst_102 = arith.constant dense<0xFF800000> : vector<128xf32>
    %209 = vector.multi_reduction <maximumf>, %208, %cst_102 [1] : vector<128x128xf32> to vector<128xf32>
    %210 = vector.shape_cast %209 : vector<128xf32> to vector<128x1xf32>
    %211 = vector.broadcast %210 : vector<128x1xf32> to vector<128x128xf32>
    %212 = arith.subf %208, %211 : vector<128x128xf32>
    %213 = math.exp %212 : vector<128x128xf32>
    %cst_103 = arith.constant dense<0.000000e+00> : vector<128xf32>
    %214 = vector.multi_reduction <add>, %213, %cst_103 [1] : vector<128x128xf32> to vector<128xf32>
    %215 = vector.shape_cast %214 : vector<128xf32> to vector<128x1xf32>
    %216 = tpu.reciprocal %215 {approx = true} : vector<128x1xf32> -> vector<128x1xf32>
    %217 = vector.broadcast %216 : vector<128x1xf32> to vector<128x128xf32>
    %218 = arith.mulf %213, %217 : vector<128x128xf32>
    %219 = arith.truncf %218 : vector<128x128xf32> to vector<128x128xbf16>
    %cst_104 = arith.constant dense<0.000000e+00> : vector<128x8xf32>
    %220 = tpu.matmul %219, %206, %cst_104 {dimension_numbers = #tpu.dot_dimension_numbers<[1], [0], [0], [1], [0, 0, 1, 1], [], []>} : vector<128x128xbf16>, vector<128x8xbf16>, vector<128x8xf32> -> vector<128x8xf32>
    %c1_105 = arith.constant 1 : index
    %c0_106 = arith.constant 0 : index
    %c0_107 = arith.constant 0 : index
    %c0_108 = arith.constant 0 : index
    %221 = vector.load %arg6[%c1_105, %c0_106, %c0_107, %c0_108] : memref<2x2x8x32xbf16, #tpu.memory_space<vmem>>, vector<1x1x8x32xbf16>
    %222 = vector.shape_cast %221 : vector<1x1x8x32xbf16> to vector<8x32xbf16>
    %223 = arith.truncf %220 : vector<128x8xf32> to vector<128x8xbf16>
    %cst_109 = arith.constant dense<0.000000e+00> : vector<128x32xf32>
    %224 = tpu.matmul %223, %222, %cst_109 {dimension_numbers = #tpu.dot_dimension_numbers<[1], [0], [0], [1], [0, 0, 1, 1], [], []>} : vector<128x8xbf16>, vector<8x32xbf16>, vector<128x32xf32> -> vector<128x32xf32>
    %225 = vector.extract_strided_slice %201 {offsets = [0, 8], sizes = [128, 8], strides = [1, 1]} : vector<128x48xbf16> to vector<128x8xbf16>
    %226 = vector.extract_strided_slice %201 {offsets = [0, 24], sizes = [128, 8], strides = [1, 1]} : vector<128x48xbf16> to vector<128x8xbf16>
    %227 = vector.extract_strided_slice %201 {offsets = [0, 40], sizes = [128, 8], strides = [1, 1]} : vector<128x48xbf16> to vector<128x8xbf16>
    %cst_110 = arith.constant dense<0.000000e+00> : vector<128x128xf32>
    %228 = tpu.matmul %225, %226, %cst_110 {dimension_numbers = #tpu.dot_dimension_numbers<[1], [1], [0], [0], [0, 0, 1, 0], [], []>} : vector<128x8xbf16>, vector<128x8xbf16>, vector<128x128xf32> -> vector<128x128xf32>
    %229 = arith.addf %228, %203 : vector<128x128xf32>
    %cst_111 = arith.constant dense<0xFF800000> : vector<128xf32>
    %230 = vector.multi_reduction <maximumf>, %229, %cst_111 [1] : vector<128x128xf32> to vector<128xf32>
    %231 = vector.shape_cast %230 : vector<128xf32> to vector<128x1xf32>
    %232 = vector.broadcast %231 : vector<128x1xf32> to vector<128x128xf32>
    %233 = arith.subf %229, %232 : vector<128x128xf32>
    %234 = math.exp %233 : vector<128x128xf32>
    %cst_112 = arith.constant dense<0.000000e+00> : vector<128xf32>
    %235 = vector.multi_reduction <add>, %234, %cst_112 [1] : vector<128x128xf32> to vector<128xf32>
    %236 = vector.shape_cast %235 : vector<128xf32> to vector<128x1xf32>
    %237 = tpu.reciprocal %236 {approx = true} : vector<128x1xf32> -> vector<128x1xf32>
    %238 = vector.broadcast %237 : vector<128x1xf32> to vector<128x128xf32>
    %239 = arith.mulf %234, %238 : vector<128x128xf32>
    %240 = arith.truncf %239 : vector<128x128xf32> to vector<128x128xbf16>
    %cst_113 = arith.constant dense<0.000000e+00> : vector<128x8xf32>
    %241 = tpu.matmul %240, %227, %cst_113 {dimension_numbers = #tpu.dot_dimension_numbers<[1], [0], [0], [1], [0, 0, 1, 1], [], []>} : vector<128x128xbf16>, vector<128x8xbf16>, vector<128x8xf32> -> vector<128x8xf32>
    %c1_114 = arith.constant 1 : index
    %c1_115 = arith.constant 1 : index
    %c0_116 = arith.constant 0 : index
    %c0_117 = arith.constant 0 : index
    %242 = vector.load %arg6[%c1_114, %c1_115, %c0_116, %c0_117] : memref<2x2x8x32xbf16, #tpu.memory_space<vmem>>, vector<1x1x8x32xbf16>
    %243 = vector.shape_cast %242 : vector<1x1x8x32xbf16> to vector<8x32xbf16>
    %244 = arith.truncf %241 : vector<128x8xf32> to vector<128x8xbf16>
    %cst_118 = arith.constant dense<0.000000e+00> : vector<128x32xf32>
    %245 = tpu.matmul %244, %243, %cst_118 {dimension_numbers = #tpu.dot_dimension_numbers<[1], [0], [0], [1], [0, 0, 1, 1], [], []>} : vector<128x8xbf16>, vector<8x32xbf16>, vector<128x32xf32> -> vector<128x32xf32>
    %246 = arith.addf %224, %245 : vector<128x32xf32>
    %247 = arith.addf %170, %246 : vector<128x32xf32>
    %c1_119 = arith.constant 1 : index
    %c0_120 = arith.constant 0 : index
    %c0_121 = arith.constant 0 : index
    %248 = vector.load %arg7[%c1_119, %c0_120, %c0_121] : memref<2x1x32xf32, #tpu.memory_space<vmem>>, vector<1x1x32xf32>
    %249 = vector.shape_cast %248 : vector<1x1x32xf32> to vector<1x32xf32>
    %250 = vector.broadcast %249 : vector<1x32xf32> to vector<128x32xf32>
    %251 = arith.addf %247, %250 : vector<128x32xf32>
    %c1_122 = arith.constant 1 : index
    %c0_123 = arith.constant 0 : index
    %c0_124 = arith.constant 0 : index
    %252 = vector.load %arg9[%c1_122, %c0_123, %c0_124] : memref<2x1x32xf32, #tpu.memory_space<vmem>>, vector<1x1x32xf32>
    %253 = vector.shape_cast %252 : vector<1x1x32xf32> to vector<1x32xf32>
    %c1_125 = arith.constant 1 : index
    %c0_126 = arith.constant 0 : index
    %c0_127 = arith.constant 0 : index
    %254 = vector.load %arg10[%c1_125, %c0_126, %c0_127] : memref<2x1x32xf32, #tpu.memory_space<vmem>>, vector<1x1x32xf32>
    %255 = vector.shape_cast %254 : vector<1x1x32xf32> to vector<1x32xf32>
    %cst_128 = arith.constant dense<0.000000e+00> : vector<128xf32>
    %256 = vector.multi_reduction <add>, %251, %cst_128 [1] : vector<128x32xf32> to vector<128xf32>
    %257 = vector.shape_cast %256 : vector<128xf32> to vector<128x1xf32>
    %cst_129 = arith.constant 3.200000e+01 : f32
    %258 = vector.broadcast %cst_129 : f32 to vector<128x1xf32>
    %259 = arith.divf %257, %258 : vector<128x1xf32>
    %260 = vector.broadcast %259 : vector<128x1xf32> to vector<128x32xf32>
    %261 = arith.subf %251, %260 : vector<128x32xf32>
    %262 = arith.mulf %261, %261 : vector<128x32xf32>
    %cst_130 = arith.constant dense<0.000000e+00> : vector<128xf32>
    %263 = vector.multi_reduction <add>, %262, %cst_130 [1] : vector<128x32xf32> to vector<128xf32>
    %264 = vector.shape_cast %263 : vector<128xf32> to vector<128x1xf32>
    %cst_131 = arith.constant 3.200000e+01 : f32
    %265 = vector.broadcast %cst_131 : f32 to vector<128x1xf32>
    %266 = arith.divf %264, %265 : vector<128x1xf32>
    %267 = vector.broadcast %259 : vector<128x1xf32> to vector<128x32xf32>
    %268 = arith.subf %251, %267 : vector<128x32xf32>
    %cst_132 = arith.constant 9.99999974E-6 : f32
    %269 = vector.broadcast %cst_132 : f32 to vector<128x1xf32>
    %270 = arith.addf %266, %269 : vector<128x1xf32>
    %271 = math.rsqrt %270 : vector<128x1xf32>
    %272 = vector.broadcast %271 : vector<128x1xf32> to vector<128x32xf32>
    %273 = arith.mulf %268, %272 : vector<128x32xf32>
    %274 = vector.broadcast %253 : vector<1x32xf32> to vector<128x32xf32>
    %275 = arith.mulf %273, %274 : vector<128x32xf32>
    %276 = vector.broadcast %255 : vector<1x32xf32> to vector<128x32xf32>
    %277 = arith.addf %275, %276 : vector<128x32xf32>
    %c1_133 = arith.constant 1 : index
    %c0_134 = arith.constant 0 : index
    %c0_135 = arith.constant 0 : index
    %278 = vector.load %arg11[%c1_133, %c0_134, %c0_135] : memref<2x32x128xbf16, #tpu.memory_space<vmem>>, vector<1x32x128xbf16>
    %279 = vector.shape_cast %278 : vector<1x32x128xbf16> to vector<32x128xbf16>
    %280 = arith.truncf %277 : vector<128x32xf32> to vector<128x32xbf16>
    %cst_136 = arith.constant dense<0.000000e+00> : vector<128x128xf32>
    %281 = tpu.matmul %280, %279, %cst_136 {dimension_numbers = #tpu.dot_dimension_numbers<[1], [0], [0], [1], [0, 0, 1, 1], [], []>} : vector<128x32xbf16>, vector<32x128xbf16>, vector<128x128xf32> -> vector<128x128xf32>
    %c1_137 = arith.constant 1 : index
    %c0_138 = arith.constant 0 : index
    %c0_139 = arith.constant 0 : index
    %282 = vector.load %arg12[%c1_137, %c0_138, %c0_139] : memref<2x1x128xf32, #tpu.memory_space<vmem>>, vector<1x1x128xf32>
    %283 = vector.shape_cast %282 : vector<1x1x128xf32> to vector<1x128xf32>
    %284 = vector.broadcast %283 : vector<1x128xf32> to vector<128x128xf32>
    %285 = arith.addf %281, %284 : vector<128x128xf32>
    %cst_140 = arith.constant 5.000000e-01 : f32
    %286 = vector.broadcast %cst_140 : f32 to vector<128x128xf32>
    %287 = arith.mulf %286, %285 : vector<128x128xf32>
    %cst_141 = arith.constant 0.707106769 : f32
    %288 = vector.broadcast %cst_141 : f32 to vector<128x128xf32>
    %289 = arith.mulf %285, %288 : vector<128x128xf32>
    %290 = math.absf %289 : vector<128x128xf32>
    %cst_142 = arith.constant 0.327591091 : f32
    %291 = vector.broadcast %cst_142 : f32 to vector<128x128xf32>
    %292 = arith.mulf %291, %290 : vector<128x128xf32>
    %cst_143 = arith.constant 1.000000e+00 : f32
    %293 = vector.broadcast %cst_143 : f32 to vector<128x128xf32>
    %294 = arith.addf %293, %292 : vector<128x128xf32>
    %cst_144 = arith.constant 1.000000e+00 : f32
    %295 = vector.broadcast %cst_144 : f32 to vector<128x128xf32>
    %296 = arith.divf %295, %294 : vector<128x128xf32>
    %cst_145 = arith.constant 1.06140542 : f32
    %297 = vector.broadcast %cst_145 : f32 to vector<128x128xf32>
    %298 = arith.mulf %297, %296 : vector<128x128xf32>
    %cst_146 = arith.constant -1.45315206 : f32
    %299 = vector.broadcast %cst_146 : f32 to vector<128x128xf32>
    %300 = arith.addf %298, %299 : vector<128x128xf32>
    %301 = arith.mulf %300, %296 : vector<128x128xf32>
    %cst_147 = arith.constant 1.42141378 : f32
    %302 = vector.broadcast %cst_147 : f32 to vector<128x128xf32>
    %303 = arith.addf %301, %302 : vector<128x128xf32>
    %304 = arith.mulf %303, %296 : vector<128x128xf32>
    %cst_148 = arith.constant -0.284496725 : f32
    %305 = vector.broadcast %cst_148 : f32 to vector<128x128xf32>
    %306 = arith.addf %304, %305 : vector<128x128xf32>
    %307 = arith.mulf %306, %296 : vector<128x128xf32>
    %cst_149 = arith.constant 0.254829586 : f32
    %308 = vector.broadcast %cst_149 : f32 to vector<128x128xf32>
    %309 = arith.addf %307, %308 : vector<128x128xf32>
    %310 = arith.mulf %309, %296 : vector<128x128xf32>
    %cst_150 = arith.constant 0.000000e+00 : f32
    %311 = vector.broadcast %cst_150 : f32 to vector<128x128xf32>
    %312 = arith.subf %311, %290 : vector<128x128xf32>
    %313 = arith.mulf %312, %290 : vector<128x128xf32>
    %314 = math.exp %313 : vector<128x128xf32>
    %315 = arith.mulf %310, %314 : vector<128x128xf32>
    %cst_151 = arith.constant 1.000000e+00 : f32
    %316 = vector.broadcast %cst_151 : f32 to vector<128x128xf32>
    %317 = arith.subf %316, %315 : vector<128x128xf32>
    %cst_152 = arith.constant 0.000000e+00 : f32
    %318 = vector.broadcast %cst_152 : f32 to vector<128x128xf32>
    %319 = arith.cmpf olt, %289, %318 : vector<128x128xf32>
    %cst_153 = arith.constant 0.000000e+00 : f32
    %320 = vector.broadcast %cst_153 : f32 to vector<128x128xf32>
    %321 = arith.subf %320, %317 : vector<128x128xf32>
    %322 = arith.select %319, %321, %317 : vector<128x128xi1>, vector<128x128xf32>
    %cst_154 = arith.constant 1.000000e+00 : f32
    %323 = vector.broadcast %cst_154 : f32 to vector<128x128xf32>
    %324 = arith.addf %323, %322 : vector<128x128xf32>
    %325 = arith.mulf %287, %324 : vector<128x128xf32>
    %c1_155 = arith.constant 1 : index
    %c0_156 = arith.constant 0 : index
    %c0_157 = arith.constant 0 : index
    %326 = vector.load %arg13[%c1_155, %c0_156, %c0_157] : memref<2x128x32xbf16, #tpu.memory_space<vmem>>, vector<1x128x32xbf16>
    %327 = vector.shape_cast %326 : vector<1x128x32xbf16> to vector<128x32xbf16>
    %328 = arith.truncf %325 : vector<128x128xf32> to vector<128x128xbf16>
    %cst_158 = arith.constant dense<0.000000e+00> : vector<128x32xf32>
    %329 = tpu.matmul %328, %327, %cst_158 {dimension_numbers = #tpu.dot_dimension_numbers<[1], [0], [0], [1], [0, 0, 1, 1], [], []>} : vector<128x128xbf16>, vector<128x32xbf16>, vector<128x32xf32> -> vector<128x32xf32>
    %330 = arith.addf %251, %329 : vector<128x32xf32>
    %c1_159 = arith.constant 1 : index
    %c0_160 = arith.constant 0 : index
    %c0_161 = arith.constant 0 : index
    %331 = vector.load %arg14[%c1_159, %c0_160, %c0_161] : memref<2x1x32xf32, #tpu.memory_space<vmem>>, vector<1x1x32xf32>
    %332 = vector.shape_cast %331 : vector<1x1x32xf32> to vector<1x32xf32>
    %333 = vector.broadcast %332 : vector<1x32xf32> to vector<128x32xf32>
    %334 = arith.addf %330, %333 : vector<128x32xf32>
    %335 = tpu.transpose %334, [1, 0] : vector<128x32xf32> -> vector<32x128xf32>
    %336 = vector.extract_strided_slice %335 {offsets = [0, 0], sizes = [32, 64], strides = [1, 1]} : vector<32x128xf32> to vector<32x64xf32>
    %c0_162 = arith.constant 0 : index
    %c0_163 = arith.constant 0 : index
    %337 = vector.load %arg15[%c0_162, %c0_163] : memref<64x64xf32, #tpu.memory_space<vmem>>, vector<32x64xf32>
    tpu.vector_store %arg15[%c0_162, %c0_163], %336 {strides = array<i32>} : memref<64x64xf32, #tpu.memory_space<vmem>>, vector<32x64xf32>,
    %338 = vector.extract_strided_slice %335 {offsets = [0, 64], sizes = [32, 64], strides = [1, 1]} : vector<32x128xf32> to vector<32x64xf32>
    %c32 = arith.constant 32 : index
    %c0_164 = arith.constant 0 : index
    %339 = vector.load %arg15[%c32, %c0_164] : memref<64x64xf32, #tpu.memory_space<vmem>>, vector<32x64xf32>
    tpu.vector_store %arg15[%c32, %c0_164], %338 {strides = array<i32>} : memref<64x64xf32, #tpu.memory_space<vmem>>, vector<32x64xf32>,
    return
  }
}

</mosaic_0001>

<bundles_post_ra>
// kernel: stage_forward.1
= control target key start
LH: loop header
LB: loop body
LE: loop exit
PB: predicated region body
PF: predicated region fallthrough
CT: control target
= control target key end

     0   :  { %vm90_vm0 = vcmask 130048   ;;  %vm214_vm1 = vcmask 261120   ;;  %vm661_vm2 = vcmask 64512   ;;  %s7180_s28 = smov 96   ;;  %s7181_s29 = smov 104   ;;  %vm1573_vm3 = vcmask 1043456   ;;  %s10416_s1 = inlined_call_operand.vmem [shape: bf16[16,32], index: 1, kind: input, shape index: {}]   ;;  %s10417_s0 = inlined_call_operand.vmem [shape: f32[128,16], index: 0, kind: input, shape index: {}]   ;;  %s10418_s2 = inlined_call_operand.vmem [shape: f32[1,32], index: 2, kind: input, shape index: {}]   ;;  %s10419_s5 = inlined_call_operand.vmem [shape: bf16[2,32,48], index: 5, kind: input, shape index: {}]   ;;  %s10420_s3 = inlined_call_operand.vmem [shape: f32[2,1,32], index: 3, kind: input, shape index: {}]   ;;  %s10421_s4 = inlined_call_operand.vmem [shape: f32[2,1,32], index: 4, kind: input, shape index: {}]   ;;  %s10422_s8 = inlined_call_operand.vmem [shape: f32[2,128,128], index: 8, kind: input, shape index: {}]   ;;  %s10423_s6 = inlined_call_operand.vmem [shape: bf16[2,2,8,32], index: 6, kind: input, shape index: {}]   ;;  %s10424_s7 = inlined_call_operand.vmem [shape: f32[2,1,32], index: 7, kind: input, shape index: {}]   ;;  %s10425_s11 = inlined_call_operand.vmem [shape: bf16[2,32,128], index: 11, kind: input, shape index: {}]   ;;  %s10426_s9 = inlined_call_operand.vmem [shape: f32[2,1,32], index: 9, kind: input, shape index: {}]   ;;  %s10427_s10 = inlined_call_operand.vmem [shape: f32[2,1,32], index: 10, kind: input, shape index: {}]   ;;  %s10428_s13 = inlined_call_operand.vmem [shape: bf16[2,128,32], index: 13, kind: input, shape index: {}]   ;;  %s10429_s12 = inlined_call_operand.vmem [shape: f32[2,1,128], index: 12, kind: input, shape index: {}]   ;;  %s10430_s14 = inlined_call_operand.vmem [shape: f32[2,1,32], index: 14, kind: input, shape index: {}]   ;;  %s10431_s15 = inlined_call_operand.vmem [shape: f32[64,64], index: 15, kind: output, shape index: {}]  }
   0x1   :  { %v6642_v0 = vld [vmem:[%s10416_s1] sm:$0xff]   ;;  %v52_v2 = vld [vmem:[%s10417_s0 + $0x8] sm:$0xff]  ;;  %v53_v3 = vld [vmem:[%s10417_s0 + $0x10] sm:$0xff]  ;;  %s7179_s1 = smov 112   ;;  %s7182_s17 = smov 120  }
   0x2   :  { %v51_v1 = vld [vmem:[%s10417_s0] sm:$0xff]  ;;  %6062 = vmatprep.subr.bf16.mxu0 %v6642_v0  ;;  %v54_v5 = vld [vmem:[%s10417_s0 + $0x18] sm:$0xff]  ;;  %v56_v7 = vld [vmem:[%s10417_s0 + $0x28] sm:$0xff]  ;;  %s7183_s18 = smov 88  }
   0x3   :  { %v69_v4 = vpack.c.bf16 %v52_v2, %v51_v1  ;;  %v55_v6 = vld [vmem:[%s10417_s0 + $0x20] sm:$0xff]  ;;  %6063 = vmatpush3.bf16.msra.mxu0 %v6642_v0  ;;  %v70_v8 = vpack.c.bf16 %v54_v5, %v53_v3  ;;  %v57_v10 = vld [vmem:[%s10417_s0 + $0x30] sm:$0xff]  ;;  %v58_v11 = vld [vmem:[%s10417_s0 + $0x38] sm:$0xff] }
   0x4   :  { %v71_v9 = vpack.c.bf16 %v56_v7, %v55_v6  ;;  %v59_v12 = vld [vmem:[%s10417_s0 + $0x40] sm:$0xff]  ;;  %v60_v13 = vld [vmem:[%s10417_s0 + $0x48] sm:$0xff]  ;;  %v72_v14 = vpack.c.bf16 %v58_v11, %v57_v10  ;;  %v61_v16 = vld [vmem:[%s10417_s0 + $0x50] sm:$0xff] }
   0x5   :  { %6064 = vmatprep.mubr.msk.bf16.mxu0 %vm90_vm0, %v69_v4  ;;  %v73_v15 = vpack.c.bf16 %v60_v13, %v59_v12  ;;  %v62_v17 = vld [vmem:[%s10417_s0 + $0x58] sm:$0xff]  ;;  %v63_v18 = vld [vmem:[%s10417_s0 + $0x60] sm:$0xff]  ;;  %v64_v19 = vld [vmem:[%s10417_s0 + $0x68] sm:$0xff] }
   0x6   :  { %6065 = vmatmul.mubr.msk.bf16.vlgmr.msra.gmra.mrb[0].mxu0 %vm90_vm0, %v70_v8  ;;  %v74_v20 = vpack.c.bf16 %v62_v17, %v61_v16  ;;  %v75_v21 = vpack.c.bf16 %v64_v19, %v63_v18  ;;  %v65_v22 = vld [vmem:[%s10417_s0 + $0x70] sm:$0xff]  ;;  %v66_v23 = vld [vmem:[%s10417_s0 + $0x78] sm:$0xff]  ;;  %v5623_v25 = vld [vmem:[%s10418_s2] ss:$0 sm:$0xff] }
   0x7   :  { %6068 = vmatprep.mubr.msk.bf16.mxu0 %vm90_vm0, %v71_v9  ;;  %v76_v24 = vpack.c.bf16 %v66_v23, %v65_v22 }
   0xe   :  { %6069 = vmatmul.mubr.msk.bf16.gmra.mrb[4].mxu0 %vm90_vm0, %v72_v14 }
   0xf   :  { %6072 = vmatprep.mubr.msk.bf16.mxu0 %vm90_vm0, %v73_v15 }
  0x16   :  { %6073 = vmatmul.mubr.msk.bf16.gmra.mrb[8].mxu0 %vm90_vm0, %v74_v20 }
  0x17   :  { %6076 = vmatprep.mubr.msk.bf16.mxu0 %vm90_vm0, %v75_v21 }
  0x1e   :  { %6077 = vmatmul.mubr.msk.bf16.gmra.mrb[12].mxu0 %vm90_vm0, %v76_v24 }
  0xd9   :  { %v6066_v26 = vpop.f32.mrb[0].mxu0 }
  0xda   :  { %v7327_v27 = vadd.f32 %v6066_v26, %v5623_v25  ;;  %v149_v28 = vpop.f32.mrb[1].mxu0 }
  0xdb   :  { %v7329_v29 = vadd.f32 %v5623_v25, %v149_v28  ;;  %v6067_v30 = vpop.f32.mrb[2].mxu0 }
  0xdc   :  { %v7331_v31 = vadd.f32 %v6067_v30, %v5623_v25  ;;  %v152_v32 = vpop.f32.mrb[3].mxu0  ;;  %v221_v33 = vsel %vm214_vm1, %v7327_v27, 0.0 }
  0xdd   :  { %v7335_v34 = vadd.f32 %v5623_v25, %v152_v32  ;;  %222 = vadd.xlane.f32.xlu1 %v221_v33  ;;  %v215_v35 = vsel %vm214_vm1, %v7329_v29, 0.0 }
  0xde   :  { %216 = vadd.xlane.f32.xlu0 %v215_v35  ;;  %v224_v36 = vsel %vm214_vm1, %v7331_v31, 0.0 }
  0xdf   :  { %v218_v38 = vsel %vm214_vm1, %v7335_v34, 0.0 }
  0xe1   :  { %225 = vadd.xlane.f32.xlu1 %v224_v36  ;;  %v6070_v37 = vpop.f32.mrb[4].mxu0 }
  0xe2   :  { %v165_v39 = vpop.f32.mrb[5].mxu0  ;;  %219 = vadd.xlane.f32.xlu0 %v218_v38  ;;  %v7343_v40 = vadd.f32 %v6070_v37, %v5623_v25 }
  0xe3   :  { %v7345_v41 = vadd.f32 %v5623_v25, %v165_v39  ;;  %v6071_v42 = vpop.f32.mrb[6].mxu0 }
  0xe4   :  { %10479 = vst [vmem:[#allocation2_spill] sm:$0xff] %v7343_v40  ;;  %v168_v43 = vpop.f32.mrb[7].mxu0  ;;  %v7347_v44 = vadd.f32 %v6071_v42, %v5623_v25  ;;  %v233_v48 = vsel %vm214_vm1, %v7343_v40, 0.0 }
  0xe5   :  { %10480 = vst [vmem:[#allocation3_spill] sm:$0xff] %v7345_v41  ;;  %v7349_v45 = vadd.f32 %v5623_v25, %v168_v43  ;;  %v227_v46 = vsel %vm214_vm1, %v7345_v41, 0.0 }
  0xe6   :  { %10481 = vst [vmem:[#allocation4_spill] sm:$0xff] %v7347_v44  ;;  %228 = vadd.xlane.f32.xlu0 %v227_v46  ;;  %v236_v50 = vsel %vm214_vm1, %v7347_v44, 0.0 }
  0xe7   :  { %10482 = vst [vmem:[#allocation5_spill] sm:$0xff] %v7349_v45  ;;  %v230_v47 = vsel %vm214_vm1, %v7349_v45, 0.0 }
  0xe8   :  { %231 = vadd.xlane.f32.xlu1 %v230_v47 }
  0xe9   :  { %v6074_v49 = vpop.f32.mrb[8].mxu0 }
  0xea   :  { %v181_v51 = vpop.f32.mrb[9].mxu0  ;;  %234 = vadd.xlane.f32.xlu0 %v233_v48  ;;  %v7359_v52 = vadd.f32 %v6074_v49, %v5623_v25 }
  0xeb   :  { %v7361_v53 = vadd.f32 %v5623_v25, %v181_v51  ;;  %v6075_v54 = vpop.f32.mrb[10].mxu0 }
  0xec   :  { %10483 = vst [vmem:[#allocation6_spill] sm:$0xff] %v7359_v52  ;;  %v184_v55 = vpop.f32.mrb[11].mxu0  ;;  %237 = vadd.xlane.f32.xlu1 %v236_v50  ;;  %v7363_v56 = vadd.f32 %v6075_v54, %v5623_v25  ;;  %v245_v60 = vsel %vm214_vm1, %v7359_v52, 0.0 }
  0xed   :  { %10484 = vst [vmem:[#allocation7_spill] sm:$0xff] %v7361_v53  ;;  %v7365_v57 = vadd.f32 %v5623_v25, %v184_v55  ;;  %v239_v58 = vsel %vm214_vm1, %v7361_v53, 0.0 }
  0xee   :  { %10485 = vst [vmem:[#allocation8_spill] sm:$0xff] %v7363_v56  ;;  %240 = vadd.xlane.f32.xlu0 %v239_v58  ;;  %v248_v62 = vsel %vm214_vm1, %v7363_v56, 0.0 }
  0xef   :  { %10486 = vst [vmem:[#allocation9_spill] sm:$0xff] %v7365_v57  ;;  %v242_v59 = vsel %vm214_vm1, %v7365_v57, 0.0 }
  0xf0   :  { %243 = vadd.xlane.f32.xlu1 %v242_v59 }
  0xf1   :  { %v6078_v61 = vpop.f32.mrb[12].mxu0 }
  0xf2   :  { %v197_v63 = vpop.f32.mrb[13].mxu0  ;;  %246 = vadd.xlane.f32.xlu0 %v245_v60  ;;  %v7375_v0 = vadd.f32 %v6078_v61, %v5623_v25 }
  0xf3   :  { %v7377_v1 = vadd.f32 %v5623_v25, %v197_v63  ;;  %v6079_v2 = vpop.f32.mrb[14].mxu0 }
  0xf4   :  { %10487 = vst [vmem:[#allocation10_spill] sm:$0xff] %v7375_v0  ;;  %v200_v3 = vpop.f32.mrb[15].mxu0  ;;  %249 = vadd.xlane.f32.xlu1 %v248_v62  ;;  %v7379_v4 = vadd.f32 %v6079_v2, %v5623_v25  ;;  %v257_v8 = vsel %vm214_vm1, %v7375_v0, 0.0 }
  0xf5   :  { %10488 = vst [vmem:[#allocation11_spill] sm:$0xff] %v7377_v1  ;;  %v7381_v5 = vadd.f32 %v5623_v25, %v200_v3  ;;  %v251_v6 = vsel %vm214_vm1, %v7377_v1, 0.0 }
  0xf6   :  { %10489 = vst [vmem:[#allocation12_spill] sm:$0xff] %v7379_v4  ;;  %252 = vadd.xlane.f32.xlu0 %v251_v6  ;;  %v260_v9 = vsel %vm214_vm1, %v7379_v4, 0.0 }
  0xf7   :  { %10490 = vst [vmem:[#allocation13_spill] sm:$0xff] %v7381_v5  ;;  %v254_v7 = vsel %vm214_vm1, %v7381_v5, 0.0 }
  0xf8   :  { %255 = vadd.xlane.f32.xlu1 %v254_v7 }
  0xfa   :  { %258 = vadd.xlane.f32.xlu0 %v257_v8 }
  0xfc   :  { %261 = vadd.xlane.f32.xlu1 %v260_v9 }
 0x16a   :  { %v223_v10 = vpop.xlane.xlu1 %222 }
 0x16b   :  { %v266_v11 = vmul.f32 0.03125, %v223_v10  ;;  %v217_v12 = vpop.xlane.xlu0 %216 }
 0x16c   :  { %v264_v13 = vmul.f32 0.03125, %v217_v12 }
 0x16d   :  { %v7392_v14 = vsub.f32 %v7327_v27, %v266_v11 }
 0x16e   :  { %v7395_v15 = vsub.f32 %v7329_v29, %v264_v13  ;;  %v226_v16 = vpop.xlane.xlu1 %225 }
 0x16f   :  { %v267_v17 = vmul.f32 0.03125, %v226_v16  ;;  %v220_v18 = vpop.xlane.xlu0 %219  ;;  %v298_v24 = vmul.f32 %v7392_v14, %v7392_v14 }
 0x170   :  { %v265_v19 = vmul.f32 0.03125, %v220_v18  ;;  %v296_v20 = vmul.f32 %v7395_v15, %v7395_v15 }
 0x171   :  { %v7400_v21 = vsub.f32 %v7331_v31, %v267_v17  ;;  %v318_v36 = vsel %vm214_vm1, %v298_v24, 0.0 }
 0x172   :  { %v7403_v22 = vsub.f32 %v7335_v34, %v265_v19  ;;  %v312_v23 = vsel %vm214_vm1, %v296_v20, 0.0 }
 0x173   :  { %313 = vadd.xlane.f32.xlu0 %v312_v23  ;;  %v229_v25 = vpop.xlane.xlu0 %228  ;;  %v299_v32 = vmul.f32 %v7400_v21, %v7400_v21 }
 0x174   :  { %v268_v26 = vmul.f32 0.03125, %v229_v25  ;;  %v297_v28 = vmul.f32 %v7403_v22, %v7403_v22 }
 0x175   :  { %v232_v30 = vpop.xlane.xlu1 %231  ;;  %v321_v47 = vsel %vm214_vm1, %v299_v32, 0.0 }
 0x176   :  { %v7413_v33 = vsub.f32 %v7345_v41, %v268_v26  ;;  %v269_v35 = vmul.f32 0.03125, %v232_v30  ;;  %v315_v37 = vsel %vm214_vm1, %v297_v28, 0.0 }
 0x177   :  { %319 = vadd.xlane.f32.xlu0 %v318_v36  ;;  %316 = vadd.xlane.f32.xlu1 %v315_v37  ;;  %v235_v38 = vpop.xlane.xlu0 %234 }
 0x178   :  { %v7418_v39 = vsub.f32 %v7349_v45, %v269_v35  ;;  %v270_v42 = vmul.f32 0.03125, %v235_v38  ;;  %v300_v43 = vmul.f32 %v7413_v33, %v7413_v33 }
 0x179   :  { %v238_v46 = vpop.xlane.xlu1 %237 }
 0x17a   :  { %v7424_v48 = vsub.f32 %v7343_v40, %v270_v42  ;;  %v271_v49 = vmul.f32 0.03125, %v238_v46  ;;  %v324_v50 = vsel %vm214_vm1, %v300_v43, 0.0  ;;  %v301_v51 = vmul.f32 %v7418_v39, %v7418_v39 }
 0x17b   :  { %322 = vadd.xlane.f32.xlu1 %v321_v47  ;;  %325 = vadd.xlane.f32.xlu0 %v324_v50  ;;  %v241_v54 = vpop.xlane.xlu0 %240 }
 0x17c   :  { %v7430_v55 = vsub.f32 %v7347_v44, %v271_v49  ;;  %v272_v58 = vmul.f32 0.03125, %v241_v54  ;;  %v302_v59 = vmul.f32 %v7424_v48, %v7424_v48  ;;  %v327_v61 = vsel %vm214_vm1, %v301_v51, 0.0 }
 0x17d   :  { %v244_v60 = vpop.xlane.xlu1 %243 }
 0x17e   :  { %v7436_v62 = vsub.f32 %v7361_v53, %v272_v58  ;;  %v273_v63 = vmul.f32 0.03125, %v244_v60  ;;  %v330_v2 = vsel %vm214_vm1, %v302_v59, 0.0  ;;  %v303_v3 = vmul.f32 %v7430_v55, %v7430_v55 }
 0x17f   :  { %328 = vadd.xlane.f32.xlu1 %v327_v61  ;;  %331 = vadd.xlane.f32.xlu0 %v330_v2  ;;  %v247_v6 = vpop.xlane.xlu0 %246  ;;  %v6644_v2 = vld [vmem:[%s10419_s5 + $0x8] sm:$0xff]  }
 0x180   :  { %v7442_v7 = vsub.f32 %v7365_v57, %v273_v63  ;;  %v274_v8 = vmul.f32 0.03125, %v247_v6  ;;  %v304_v9 = vmul.f32 %v7436_v62, %v7436_v62  ;;  %v333_v11 = vsel %vm214_vm1, %v303_v3, 0.0  ;;  %v6643_v63 = vld [vmem:[%s10419_s5] sm:$0xff]  }
 0x181   :  { %v250_v10 = vpop.xlane.xlu1 %249  ;;  %6080 = vmatprep.subr.bf16.mxu1 %v6643_v63 }
 0x182   :  { %v7448_v12 = vsub.f32 %v7359_v52, %v274_v8  ;;  %v275_v13 = vmul.f32 0.03125, %v250_v10  ;;  %v336_v16 = vsel %vm214_vm1, %v304_v9, 0.0  ;;  %v305_v17 = vmul.f32 %v7442_v7, %v7442_v7  ;;  %6081 = vmatpush3.bf16.msra.mxu1 %v6643_v63 }
 0x183   :  { %334 = vadd.xlane.f32.xlu1 %v333_v11  ;;  %337 = vadd.xlane.f32.xlu0 %v336_v16  ;;  %v253_v18 = vpop.xlane.xlu0 %252 }
 0x184   :  { %v7454_v19 = vsub.f32 %v7363_v56, %v275_v13  ;;  %v276_v20 = vmul.f32 0.03125, %v253_v18  ;;  %v306_v23 = vmul.f32 %v7448_v12, %v7448_v12  ;;  %v339_v25 = vsel %vm214_vm1, %v305_v17, 0.0  ;;  %6082 = vmatprep.subr.bf16.mxu1 %v6644_v2 }
 0x185   :  { %v256_v24 = vpop.xlane.xlu1 %255 }
 0x186   :  { %v7460_v26 = vsub.f32 %v7377_v1, %v276_v20  ;;  %v277_v28 = vmul.f32 0.03125, %v256_v24  ;;  %v342_v30 = vsel %vm214_vm1, %v306_v23, 0.0  ;;  %v307_v32 = vmul.f32 %v7454_v19, %v7454_v19  ;;  %6083 = vmatpush3.bf16.msra.mxu1 %v6644_v2 }
 0x187   :  { %340 = vadd.xlane.f32.xlu1 %v339_v25  ;;  %343 = vadd.xlane.f32.xlu0 %v342_v30  ;;  %v259_v35 = vpop.xlane.xlu0 %258 }
 0x188   :  { %v7466_v36 = vsub.f32 %v7381_v5, %v277_v28  ;;  %v278_v37 = vmul.f32 0.03125, %v259_v35  ;;  %v308_v38 = vmul.f32 %v7460_v26, %v7460_v26  ;;  %v345_v43 = vsel %vm214_vm1, %v307_v32, 0.0 }
 0x189   :  { %v262_v42 = vpop.xlane.xlu1 %261 }
 0x18a   :  { %v7472_v46 = vsub.f32 %v7375_v0, %v278_v37  ;;  %v279_v47 = vmul.f32 0.03125, %v262_v42  ;;  %v348_v49 = vsel %vm214_vm1, %v308_v38, 0.0  ;;  %v309_v50 = vmul.f32 %v7466_v36, %v7466_v36 }
 0x18b   :  { %346 = vadd.xlane.f32.xlu1 %v345_v43  ;;  %349 = vadd.xlane.f32.xlu0 %v348_v49 }
 0x18c   :  { %v7478_v51 = vsub.f32 %v7379_v4, %v279_v47  ;;  %v310_v54 = vmul.f32 %v7472_v46, %v7472_v46  ;;  %v351_v58 = vsel %vm214_vm1, %v309_v50, 0.0 }
 0x18e   :  { %v354_v59 = vsel %vm214_vm1, %v310_v54, 0.0  ;;  %v311_v60 = vmul.f32 %v7478_v51, %v7478_v51 }
 0x18f   :  { %352 = vadd.xlane.f32.xlu1 %v351_v58  ;;  %355 = vadd.xlane.f32.xlu0 %v354_v59  ;;  %v7497_v59 = vld [vmem:[%s10420_s3] ss:$0 sm:$0xff] }
 0x190   :  { %v357_v61 = vsel %vm214_vm1, %v311_v60, 0.0 }
 0x193   :  { %358 = vadd.xlane.f32.xlu1 %v357_v61 }
 0x200   :  { %v314_v3 = vpop.xlane.xlu0 %313 }
 0x201   :  { %v360_v6 = vmul.f32 0.03125, %v314_v3 }
 0x203   :  { %v376_v8 = vadd.f32 1e-05, %v360_v6 }
 0x204   :  { %v317_v9 = vpop.xlane.xlu1 %316  ;;  %v320_v10 = vpop.xlane.xlu0 %319 }
 0x205   :  { %6667 = vrsqrt.f32 %v376_v8  ;;  %v361_v11 = vmul.f32 0.03125, %v317_v9  ;;  %v362_v13 = vmul.f32 0.03125, %v320_v10 }
 0x207   :  { %v377_v16 = vadd.f32 1e-05, %v361_v11  ;;  %v378_v17 = vadd.f32 1e-05, %v362_v13  ;;  %v7504_v11 = vld [vmem:[%s10421_s4] ss:$0 sm:$0xff] }
 0x208   :  { %v323_v18 = vpop.xlane.xlu1 %322  ;;  %v326_v20 = vpop.xlane.xlu0 %325 }
 0x209   :  { %6669 = vrsqrt.f32 %v377_v16  ;;  %v363_v23 = vmul.f32 0.03125, %v323_v18  ;;  %v364_v24 = vmul.f32 0.03125, %v326_v20 }
 0x20a   :  { %6671 = vrsqrt.f32 %v378_v17 }
 0x20b   :  { %v379_v25 = vadd.f32 1e-05, %v363_v23  ;;  %v380_v28 = vadd.f32 1e-05, %v364_v24 }
 0x20c   :  { %v329_v30 = vpop.xlane.xlu1 %328  ;;  %v332_v32 = vpop.xlane.xlu0 %331 }
 0x20d   :  { %6673 = vrsqrt.f32 %v379_v25  ;;  %v365_v35 = vmul.f32 0.03125, %v329_v30  ;;  %v366_v37 = vmul.f32 0.03125, %v332_v32 }
 0x20e   :  { %6675 = vrsqrt.f32 %v380_v28 }
 0x20f   :  { %v6668_v38 = vpop.eup %6667  ;;  %v381_v42 = vadd.f32 1e-05, %v365_v35  ;;  %v382_v43 = vadd.f32 1e-05, %v366_v37 }
 0x210   :  { %v335_v47 = vpop.xlane.xlu1 %334  ;;  %v338_v49 = vpop.xlane.xlu0 %337  ;;  %v408_v50 = vmul.f32 %v6668_v38, %v7395_v15 }
 0x211   :  { %6677 = vrsqrt.f32 %v381_v42  ;;  %v367_v54 = vmul.f32 0.03125, %v335_v47  ;;  %v368_v58 = vmul.f32 0.03125, %v338_v49 }
 0x212   :  { %6679 = vrsqrt.f32 %v382_v43  ;;  %v430_v9 = vmul.f32 %v7497_v59, %v408_v50 }
 0x213   :  { %v6670_v60 = vpop.eup %6669  ;;  %v383_v61 = vadd.f32 1e-05, %v367_v54  ;;  %v384_v63 = vadd.f32 1e-05, %v368_v58 }
 0x214   :  { %v6672_v2 = vpop.eup %6671  ;;  %v341_v3 = vpop.xlane.xlu1 %340  ;;  %v409_v8 = vmul.f32 %v6670_v60, %v7403_v22  ;;  %v452_v25 = vadd.f32 %v7504_v11, %v430_v9 }
 0x215   :  { %v344_v6 = vpop.xlane.xlu0 %343  ;;  %6681 = vrsqrt.f32 %v383_v61  ;;  %v369_v15 = vmul.f32 0.03125, %v341_v3  ;;  %v410_v13 = vmul.f32 %v6672_v2, %v7392_v14 }
 0x216   :  { %v370_v10 = vmul.f32 0.03125, %v344_v6  ;;  %6683 = vrsqrt.f32 %v384_v63  ;;  %v431_v16 = vmul.f32 %v7497_v59, %v409_v8 }
 0x217   :  { %v6674_v17 = vpop.eup %6673  ;;  %v385_v18 = vadd.f32 1e-05, %v369_v15  ;;  %v432_v32 = vmul.f32 %v7497_v59, %v410_v13 }
 0x218   :  { %v386_v20 = vadd.f32 1e-05, %v370_v10  ;;  %v6676_v23 = vpop.eup %6675  ;;  %v347_v22 = vpop.xlane.xlu1 %346  ;;  %v453_v28 = vadd.f32 %v7504_v11, %v431_v16  ;;  %v411_v30 = vmul.f32 %v6674_v17, %v7400_v21 }
 0x219   :  { %v350_v24 = vpop.xlane.xlu0 %349  ;;  %6685 = vrsqrt.f32 %v385_v18  ;;  %v371_v35 = vmul.f32 0.03125, %v347_v22  ;;  %v412_v42 = vmul.f32 %v6676_v23, %v7413_v33  ;;  %v454_v21 = vadd.f32 %v7504_v11, %v432_v32 }
 0x21a   :  { %v372_v14 = vmul.f32 0.03125, %v350_v24  ;;  %6687 = vrsqrt.f32 %v386_v20  ;;  %v472_v37 = vpack.c.bf16 %v453_v28, %v452_v25  ;;  %v433_v38 = vmul.f32 %v7497_v59, %v411_v30 }
 0x21b   :  { %v6678_v43 = vpop.eup %6677  ;;  %v387_v47 = vadd.f32 1e-05, %v371_v35  ;;  %v434_v63 = vmul.f32 %v7497_v59, %v412_v42 }
 0x21c   :  { %v388_v49 = vadd.f32 1e-05, %v372_v14  ;;  %v6680_v50 = vpop.eup %6679  ;;  %v353_v54 = vpop.xlane.xlu1 %352  ;;  %6084 = vmatprep.mubr.msk.bf16.mxu1 %vm214_vm1, %v472_v37  ;;  %v455_v60 = vadd.f32 %v7504_v11, %v433_v38  ;;  %v413_v61 = vmul.f32 %v6678_v43, %v7418_v39 }
 0x21d   :  { %v356_v58 = vpop.xlane.xlu0 %355  ;;  %6689 = vrsqrt.f32 %v387_v47  ;;  %v373_v2 = vmul.f32 0.03125, %v353_v54  ;;  %v414_v33 = vmul.f32 %v6680_v50, %v7424_v48  ;;  %v456_v39 = vadd.f32 %v7504_v11, %v434_v63 }
 0x21e   :  { %v374_v3 = vmul.f32 0.03125, %v356_v58  ;;  %6691 = vrsqrt.f32 %v388_v49  ;;  %v473_v6 = vpack.c.bf16 %v455_v60, %v454_v21  ;;  %v435_v8 = vmul.f32 %v7497_v59, %v413_v61 }
 0x21f   :  { %v6682_v9 = vpop.eup %6681  ;;  %v389_v15 = vadd.f32 1e-05, %v373_v2  ;;  %v436_v20 = vmul.f32 %v7497_v59, %v414_v33 }
 0x220   :  { %v390_v10 = vadd.f32 1e-05, %v374_v3  ;;  %v6684_v13 = vpop.eup %6683  ;;  %v359_v16 = vpop.xlane.xlu1 %358  ;;  %6085 = vmatmul.mubr.msk.bf16.vlgmr.msra.gmra.mrb[0].mxu1 %vm214_vm1, %v473_v6  ;;  %v457_v17 = vadd.f32 %v7504_v11, %v435_v8  ;;  %v415_v18 = vmul.f32 %v6682_v9, %v7430_v55 }
 0x221   :  { %6693 = vrsqrt.f32 %v389_v15  ;;  %v375_v48 = vmul.f32 0.03125, %v359_v16  ;;  %v416_v23 = vmul.f32 %v6684_v13, %v7436_v62  ;;  %v458_v32 = vadd.f32 %v7504_v11, %v436_v20 }
 0x222   :  { %6695 = vrsqrt.f32 %v390_v10  ;;  %v474_v22 = vpack.c.bf16 %v457_v17, %v456_v39  ;;  %v437_v24 = vmul.f32 %v7497_v59, %v415_v18 }
 0x223   :  { %v6686_v25 = vpop.eup %6685  ;;  %v391_v28 = vadd.f32 1e-05, %v375_v48  ;;  %v438_v14 = vmul.f32 %v7497_v59, %v416_v23 }
 0x224   :  { %v6688_v30 = vpop.eup %6687  ;;  %6088 = vmatprep.mubr.msk.bf16.mxu1 %vm214_vm1, %v474_v22  ;;  %v459_v35 = vadd.f32 %v7504_v11, %v437_v24  ;;  %v417_v55 = vmul.f32 %v6686_v25, %v7442_v7 }
 0x225   :  { %6697 = vrsqrt.f32 %v391_v28  ;;  %v418_v62 = vmul.f32 %v6688_v30, %v7448_v12  ;;  %v460_v47 = vadd.f32 %v7504_v11, %v438_v14 }
 0x226   :  { %v475_v37 = vpack.c.bf16 %v459_v35, %v458_v32  ;;  %v439_v38 = vmul.f32 %v7497_v59, %v417_v55 }
 0x227   :  { %v6690_v42 = vpop.eup %6689  ;;  %v440_v7 = vmul.f32 %v7497_v59, %v418_v62 }
 0x228   :  { %v6692_v43 = vpop.eup %6691  ;;  %6089 = vmatmul.mubr.msk.bf16.gmra.mrb[4].mxu1 %vm214_vm1, %v475_v37  ;;  %v461_v49 = vadd.f32 %v7504_v11, %v439_v38  ;;  %v419_v50 = vmul.f32 %v6690_v42, %v7454_v19 }
 0x229   :  { %v420_v54 = vmul.f32 %v6692_v43, %v7460_v26  ;;  %v462_v61 = vadd.f32 %v7504_v11, %v440_v7 }
 0x22a   :  { %v476_v58 = vpack.c.bf16 %v461_v49, %v460_v47  ;;  %v441_v12 = vmul.f32 %v7497_v59, %v419_v50 }
 0x22b   :  { %v6694_v21 = vpop.eup %6693  ;;  %v442_v3 = vmul.f32 %v7497_v59, %v420_v54 }
 0x22c   :  { %v6696_v60 = vpop.eup %6695  ;;  %6092 = vmatprep.mubr.msk.bf16.mxu1 %vm214_vm1, %v476_v58  ;;  %v463_v63 = vadd.f32 %v7504_v11, %v441_v12  ;;  %v421_v2 = vmul.f32 %v6694_v21, %v7466_v36 }
 0x22d   :  { %v422_v19 = vmul.f32 %v6696_v60, %v7472_v46  ;;  %v464_v8 = vadd.f32 %v7504_v11, %v442_v3 }
 0x22e   :  { %v477_v33 = vpack.c.bf16 %v463_v63, %v462_v61  ;;  %v443_v26 = vmul.f32 %v7497_v59, %v421_v2 }
 0x22f   :  { %v6698_v6 = vpop.eup %6697  ;;  %v444_v10 = vmul.f32 %v7497_v59, %v422_v19 }
 0x230   :  { %6093 = vmatmul.mubr.msk.bf16.gmra.mrb[8].mxu1 %vm214_vm1, %v477_v33  ;;  %v465_v9 = vadd.f32 %v7504_v11, %v443_v26  ;;  %v423_v15 = vmul.f32 %v6698_v6, %v7478_v51 }
 0x231   :  { %v466_v46 = vadd.f32 %v7504_v11, %v444_v10 }
 0x232   :  { %v478_v13 = vpack.c.bf16 %v465_v9, %v464_v8  ;;  %v445_v36 = vmul.f32 %v7497_v59, %v423_v15 }
 0x234   :  { %6096 = vmatprep.mubr.msk.bf16.mxu1 %vm214_vm1, %v478_v13  ;;  %v467_v16 = vadd.f32 %v7504_v11, %v445_v36 }
 0x236   :  { %v479_v39 = vpack.c.bf16 %v467_v16, %v466_v46 }
 0x238   :  { %6097 = vmatmul.mubr.msk.bf16.gmra.mrb[12].mxu1 %vm214_vm1, %v479_v39 }
 0x2f3   :  { %v6086_v17 = vpop.f32.mrb[0].mxu1 }
 0x2f4   :  { %v550_v18 = vpop.f32.mrb[1].mxu1 }
 0x2f5   :  { %v6087_v20 = vpop.f32.mrb[2].mxu1 }
 0x2f6   :  { %v7559_v48 = vpack.c.bf16 %v6087_v20, %v6086_v17  ;;  %v553_v51 = vpop.f32.mrb[3].mxu1 }
 0x2f7   :  { %v7561_v23 = vpack.c.bf16 %v553_v51, %v550_v18  ;;  %v7650_v18 = vld [vmem:[%s10422_s8 + $0x10] sm:$0xff] }
 0x2f8   :  { %647 = vrot.lane.b32.xlu1 %v7559_v48, %s7179_s1 }
 0x2f9   :  { %645 = vrot.lane.b32.xlu0 %v7561_v23, %s7179_s1  ;;  %6116 = vmatprep.mubr.msk.bf16.mxu0 %vm661_vm2, %v7561_v23 }
 0x2fb   :  { %v6090_v59 = vpop.f32.mrb[4].mxu1 }
 0x2fc   :  { %v566_v11 = vpop.f32.mrb[5].mxu1 }
 0x2fd   :  { %v6091_v22 = vpop.f32.mrb[6].mxu1 }
 0x2fe   :  { %v7569_v24 = vpack.c.bf16 %v6091_v22, %v6090_v59  ;;  %v569_v25 = vpop.f32.mrb[7].mxu1  ;;  %v7663_v22 = vld [vmem:[%s10422_s8] sm:$0xff] }
 0x2ff   :  { %v7571_v28 = vpack.c.bf16 %v569_v25, %v566_v11  ;;  %v7658_v11 = vld [vmem:[%s10422_s8 + $0x8] sm:$0xff] }
 0x301   :  { %649 = vrot.lane.b32.xlu1 %v7571_v28, %s7179_s1 }
 0x303   :  { %v6094_v30 = vpop.f32.mrb[8].mxu1 }
 0x304   :  { %v582_v32 = vpop.f32.mrb[9].mxu1 }
 0x305   :  { %651 = vrot.lane.b32.xlu1 %v7569_v24, %s7179_s1  ;;  %v6095_v35 = vpop.f32.mrb[10].mxu1 }
 0x306   :  { %v7577_v55 = vpack.c.bf16 %v6095_v35, %v6094_v30  ;;  %v585_v14 = vpop.f32.mrb[11].mxu1 }
 0x307   :  { %v7579_v62 = vpack.c.bf16 %v585_v14, %v582_v32  ;;  %v7675_v14 = vld [vmem:[%s10422_s8 + $0x18] sm:$0xff] }
 0x309   :  { %655 = vrot.lane.b32.xlu1 %v7577_v55, %s7179_s1  ;;  %653 = vrot.lane.b32.xlu0 %v7579_v62, %s7179_s1 }
 0x30b   :  { %v6098_v37 = vpop.f32.mrb[12].mxu1 }
 0x30c   :  { %v598_v38 = vpop.f32.mrb[13].mxu1 }
 0x30d   :  { %v6099_v42 = vpop.f32.mrb[14].mxu1 }
 0x30e   :  { %v7585_v43 = vpack.c.bf16 %v6099_v42, %v6098_v37  ;;  %v601_v47 = vpop.f32.mrb[15].mxu1 }
 0x30f   :  { %v7587_v49 = vpack.c.bf16 %v601_v47, %v598_v38  ;;  %v7682_v38 = vld [vmem:[%s10422_s8 + $0x38] sm:$0xff] }
 0x310   :  { %659 = vrot.lane.b32.xlu1 %v7585_v43, %s7179_s1 }
 0x311   :  { %657 = vrot.lane.b32.xlu0 %v7587_v49, %s7179_s1 }
 0x314   :  { %961 = vrot.lane.b32.xlu1 %v7559_v48, %s7180_s28 }
 0x315   :  { %959 = vrot.lane.b32.xlu0 %v7561_v23, %s7180_s28 }
 0x318   :  { %965 = vrot.lane.b32.xlu1 %v7569_v24, %s7180_s28 }
 0x319   :  { %963 = vrot.lane.b32.xlu0 %v7571_v28, %s7180_s28 }
 0x31c   :  { %969 = vrot.lane.b32.xlu1 %v7577_v55, %s7180_s28 }
 0x31d   :  { %967 = vrot.lane.b32.xlu0 %v7579_v62, %s7180_s28 }
 0x320   :  { %973 = vrot.lane.b32.xlu1 %v7585_v43, %s7180_s28 }
 0x321   :  { %1105 = vrot.lane.b32.xlu0 %v7561_v23, %s7181_s29 }
 0x324   :  { %1107 = vrot.lane.b32.xlu1 %v7559_v48, %s7181_s29 }
 0x325   :  { %971 = vrot.lane.b32.xlu0 %v7587_v49, %s7180_s28 }
 0x36a   :  { %v648_v54 = vpop.permute.xlu1 %647 }
 0x36b   :  { %v646_v50 = vpop.permute.xlu0 %645  ;;  %v690_v12 = vsel %vm661_vm2, %v648_v54, 0 }
 0x36c   :  { %6600 = vmatprep.subr.msk.bf16.mxu0 %vm661_vm2, %v646_v50  ;;  %v687_v7 = vsel %vm661_vm2, %v646_v50, 0  ;;  %v7690_v50 = vld [vmem:[%s10422_s8 + $0x30] sm:$0xff] }
 0x36d   :  { %6101 = vmatpush3.bf16.xpose.msra.mxu0 %v687_v7 }
 0x36e   :  { %6601 = vmatprep.subr.msk.bf16.mxu0 %vm661_vm2, %v648_v54 }
 0x373   :  { %v650_v58 = vpop.permute.xlu1 %649 }
 0x374   :  { %v693_v60 = vsel %vm661_vm2, %v650_v58, 0 }
 0x375   :  { %6103 = vmatpush3.bf16.xpose.msra.mxu0 %v690_v12  ;;  %v7699_v12 = vld [vmem:[%s10422_s8 + $0x28] sm:$0xff] }
 0x376   :  { %6602 = vmatprep.subr.msk.bf16.mxu0 %vm661_vm2, %v650_v58 }
 0x377   :  { %v652_v21 = vpop.permute.xlu1 %651 }
 0x378   :  { %v696_v19 = vsel %vm661_vm2, %v652_v21, 0 }
 0x37b   :  { %v656_v61 = vpop.permute.xlu1 %655  ;;  %v654_v63 = vpop.permute.xlu0 %653 }
 0x37c   :  { %v699_v8 = vsel %vm661_vm2, %v654_v63, 0  ;;  %v702_v10 = vsel %vm661_vm2, %v656_v61, 0 }
 0x37d   :  { %6105 = vmatpush3.bf16.xpose.msra.mxu0 %v693_v60  ;;  %v7708_v60 = vld [vmem:[%s10422_s8 + $0x20] sm:$0xff] }
 0x37e   :  { %6603 = vmatprep.subr.msk.bf16.mxu0 %vm661_vm2, %v652_v21 }
 0x382   :  { %v660_v2 = vpop.permute.xlu1 %659 }
 0x383   :  { %v658_v3 = vpop.permute.xlu0 %657  ;;  %v708_v17 = vsel %vm661_vm2, %v660_v2, 0 }
 0x384   :  { %v705_v46 = vsel %vm661_vm2, %v658_v3, 0 }
 0x385   :  { %6107 = vmatpush3.bf16.xpose.msra.mxu0 %v696_v19 }
 0x386   :  { %6604 = vmatprep.subr.msk.bf16.mxu0 %vm661_vm2, %v654_v63  ;;  %v962_v26 = vpop.permute.xlu1 %961 }
 0x387   :  { %v960_v33 = vpop.permute.xlu0 %959 }
 0x388   :  { %6132 = vmatprep.subr.bf16.mxu1 %v960_v33 }
 0x389   :  { %6133 = vmatpush3.bf16.msra.mxu1 %v960_v33  ;;  %v7726_v33 = vld [vmem:[%s10422_s8 + $0x50] sm:$0xff] }
 0x38a   :  { %6134 = vmatprep.subr.bf16.mxu1 %v962_v26  ;;  %v966_v9 = vpop.permute.xlu1 %965 }
 0x38b   :  { %v964_v6 = vpop.permute.xlu0 %963 }
 0x38d   :  { %6109 = vmatpush3.bf16.xpose.msra.mxu0 %v699_v8  ;;  %6135 = vmatpush3.bf16.msra.mxu1 %v962_v26 }
 0x38e   :  { %6605 = vmatprep.subr.msk.bf16.mxu0 %vm661_vm2, %v656_v61  ;;  %6136 = vmatprep.subr.bf16.mxu1 %v964_v6  ;;  %v970_v36 = vpop.permute.xlu1 %969 }
 0x38f   :  { %v968_v15 = vpop.permute.xlu0 %967 }
 0x391   :  { %6137 = vmatpush3.bf16.msra.mxu1 %v964_v6 }
 0x392   :  { %6138 = vmatprep.subr.bf16.mxu1 %v966_v9  ;;  %v974_v39 = vpop.permute.xlu1 %973 }
 0x393   :  { %v7626_v13 = vpop.permute.xlu0 %1105 }
 0x395   :  { %6111 = vmatpush3.bf16.xpose.msra.mxu0 %v702_v10  ;;  %6139 = vmatpush3.bf16.msra.mxu1 %v966_v9  ;;  %v7735_v9 = vld [vmem:[%s10422_s8 + $0x48] sm:$0xff]  ;;  %v7744_v10 = vld [vmem:[%s10422_s8 + $0x40] sm:$0xff] }
 0x396   :  { %6606 = vmatprep.subr.msk.bf16.mxu0 %vm661_vm2, %v658_v3  ;;  %6140 = vmatprep.subr.bf16.mxu1 %v968_v15 }
 0x397   :  { %v972_v16 = vpop.permute.xlu0 %971 }
 0x399   :  { %6141 = vmatpush3.bf16.msra.mxu1 %v968_v15 }
 0x39a   :  { %6142 = vmatprep.subr.bf16.mxu1 %v970_v36 }
 0x39d   :  { %6113 = vmatpush3.bf16.xpose.msra.mxu0 %v705_v46  ;;  %6143 = vmatpush3.bf16.msra.mxu1 %v970_v36 }
 0x39e   :  { %6607 = vmatprep.subr.msk.bf16.mxu0 %vm661_vm2, %v660_v2  ;;  %6144 = vmatprep.subr.bf16.mxu1 %v972_v16  ;;  %v7717_v2 = vld [vmem:[%s10422_s8 + $0x58] sm:$0xff] }
 0x3a1   :  { %6145 = vmatpush3.bf16.msra.mxu1 %v972_v16 }
 0x3a2   :  { %6146 = vmatprep.subr.bf16.mxu1 %v974_v39 }
 0x3a5   :  { %6115 = vmatpush3.bf16.xpose.msra.mxu0 %v708_v17  ;;  %6147 = vmatpush3.bf16.msra.mxu1 %v974_v39  ;;  %v7757_v17 = vld [vmem:[%s10422_s8 + $0x70] sm:$0xff] }
 0x3a6   :  { %6608 = vmatprep.subr.msk.bf16.mxu1 %vm661_vm2, %v7626_v13 }
 0x3ac   :  { %6117 = vmatmul.mubr.msk.bf16.vlgmr.msra.gmra.mrb[16].mxu0 %vm661_vm2, %v7559_v48 }
 0x3ad   :  { %6120 = vmatprep.mubr.msk.bf16.mxu0 %vm661_vm2, %v7571_v28 }
 0x3b4   :  { %6121 = vmatmul.mubr.msk.bf16.gmra.mrb[20].mxu0 %vm661_vm2, %v7569_v24 }
 0x3b5   :  { %6124 = vmatprep.mubr.msk.bf16.mxu0 %vm661_vm2, %v7579_v62 }
 0x3bc   :  { %6125 = vmatmul.mubr.msk.bf16.gmra.mrb[24].mxu0 %vm661_vm2, %v7577_v55 }
 0x3bd   :  { %6128 = vmatprep.mubr.msk.bf16.mxu0 %vm661_vm2, %v7587_v49 }
 0x3c4   :  { %6129 = vmatmul.mubr.msk.bf16.gmra.mrb[28].mxu0 %vm661_vm2, %v7585_v43 }
 0x47f   :  { %v6118_v20 = vpop.f32.mrb[16].mxu0 }
 0x480   :  { %v7653_v51 = vadd.f32 %v6118_v20, %v7650_v18  ;;  %v744_v59 = vpop.f32.mrb[17].mxu0 }
 0x481   :  { %v6119_v25 = vpop.f32.mrb[18].mxu0  ;;  %v7670_v35 = vadd.f32 %v744_v59, %v7663_v22 }
 0x482   :  { %811 = vmax.xlane.f32.xlu0 %v7653_v51  ;;  %v747_v30 = vpop.f32.mrb[19].mxu0  ;;  %v7685_v42 = vadd.f32 %v6119_v25, %v7675_v14 }
 0x483   :  { %v7667_v32 = vadd.f32 %v747_v30, %v7658_v11  ;;  %v7766_v30 = vld [vmem:[%s10422_s8 + $0x60] sm:$0xff] }
 0x485   :  { %809 = vmax.xlane.f32.xlu1 %v7667_v32 }
 0x486   :  { %807 = vmax.xlane.f32.xlu0 %v7670_v35 }
 0x487   :  { %v6122_v37 = vpop.f32.mrb[20].mxu0 }
 0x488   :  { %v760_v47 = vpop.f32.mrb[21].mxu0  ;;  %v7702_v21 = vadd.f32 %v6122_v37, %v7690_v50 }
 0x489   :  { %v6123_v7 = vpop.f32.mrb[22].mxu0  ;;  %v7720_v3 = vadd.f32 %v760_v47, %v7708_v60  ;;  %v7780_v47 = vld [vmem:[%s10422_s8 + $0x78] sm:$0xff] }
 0x48a   :  { %v7693_v54 = vadd.f32 %v6123_v7, %v7682_v38  ;;  %v763_v58 = vpop.f32.mrb[23].mxu0  ;;  %813 = vmax.xlane.f32.xlu0 %v7685_v42 }
 0x48b   :  { %v7711_v61 = vadd.f32 %v763_v58, %v7699_v12  ;;  %v7788_v58 = vld [vmem:[%s10422_s8 + $0x68] sm:$0xff] }
 0x48c   :  { %821 = vmax.xlane.f32.xlu1 %v7693_v54 }
 0x48e   :  { %819 = vmax.xlane.f32.xlu0 %v7702_v21 }
 0x48f   :  { %v6126_v63 = vpop.f32.mrb[24].mxu0 }
 0x490   :  { %v776_v19 = vpop.f32.mrb[25].mxu0  ;;  %817 = vmax.xlane.f32.xlu1 %v7711_v61  ;;  %v7738_v15 = vadd.f32 %v6126_v63, %v7726_v33 }
 0x491   :  { %v6127_v26 = vpop.f32.mrb[26].mxu0  ;;  %v7751_v16 = vadd.f32 %v776_v19, %v7744_v10  ;;  %v7795_v19 = vpop.permute.xlu1 %1107 }
 0x492   :  { %v7729_v6 = vadd.f32 %v6127_v26, %v7717_v2  ;;  %v779_v8 = vpop.f32.mrb[27].mxu0  ;;  %815 = vmax.xlane.f32.xlu0 %v7720_v3 }
 0x493   :  { %v7747_v36 = vadd.f32 %v779_v8, %v7735_v9 }
 0x494   :  { %829 = vmax.xlane.f32.xlu1 %v7729_v6 }
 0x496   :  { %827 = vmax.xlane.f32.xlu0 %v7738_v15 }
 0x497   :  { %v6130_v46 = vpop.f32.mrb[28].mxu0 }
 0x498   :  { %v792_v39 = vpop.f32.mrb[29].mxu0  ;;  %825 = vmax.xlane.f32.xlu1 %v7747_v36  ;;  %v7761_v25 = vadd.f32 %v6130_v46, %v7757_v17 }
 0x499   :  { %v6131_v20 = vpop.f32.mrb[30].mxu0  ;;  %v7770_v37 = vadd.f32 %v792_v39, %v7766_v30 }
 0x49a   :  { %v795_v59 = vpop.f32.mrb[31].mxu0  ;;  %823 = vmax.xlane.f32.xlu0 %v7751_v16  ;;  %v7783_v7 = vadd.f32 %v6131_v20, %v7780_v47 }
 0x49b   :  { %v7792_v63 = vadd.f32 %v795_v59, %v7788_v58 }
 0x49e   :  { %835 = vmax.xlane.f32.xlu0 %v7761_v25 }
 0x4a2   :  { %831 = vmax.xlane.f32.xlu0 %v7770_v37 }
 0x4a9   :  { %1111 = vrot.lane.b32.xlu1 %v7569_v24, %s7181_s29 }
 0x4b8   :  { %1109 = vrot.lane.b32.xlu0 %v7571_v28, %s7181_s29 }
 0x4cd   :  { %837 = vmax.xlane.f32.xlu1 %v7783_v7 }
 0x4d1   :  { %833 = vmax.xlane.f32.xlu1 %v7792_v63 }
 0x50f   :  { %v812_v26 = vpop.xlane.xlu0 %811 }
 0x510   :  { %v841_v8 = vsub.f32 %v7653_v51, %v812_v26 }
 0x512   :  { %v859_v46 = vmul.f32 1.442695, %v841_v8  ;;  %v810_v39 = vpop.xlane.xlu1 %809 }
 0x513   :  { %v840_v20 = vsub.f32 %v7667_v32, %v810_v39  ;;  %v808_v4 = vpop.xlane.xlu0 %807 }
 0x514   :  { %6699 = vpow2.f32 %v859_v46  ;;  %v839_v5 = vsub.f32 %v7670_v35, %v808_v4 }
 0x515   :  { %v857_v1 = vmul.f32 1.442695, %v840_v20 }
 0x516   :  { %v855_v56 = vmul.f32 1.442695, %v839_v5 }
 0x517   :  { %6701 = vpow2.f32 %v857_v1  ;;  %v814_v59 = vpop.xlane.xlu0 %813 }
 0x518   :  { %6703 = vpow2.f32 %v855_v56  ;;  %v842_v57 = vsub.f32 %v7685_v42, %v814_v59 }
 0x51a   :  { %v861_v53 = vmul.f32 1.442695, %v842_v57  ;;  %v822_v57 = vpop.xlane.xlu1 %821 }
 0x51b   :  { %v820_v56 = vpop.xlane.xlu0 %819  ;;  %v846_v59 = vsub.f32 %v7693_v54, %v822_v57 }
 0x51c   :  { %6705 = vpow2.f32 %v861_v53  ;;  %v845_v5 = vsub.f32 %v7702_v21, %v820_v56 }
 0x51d   :  { %v869_v40 = vmul.f32 1.442695, %v846_v59 }
 0x51e   :  { %v7801_v0 = vpop.eup %6699  ;;  %v818_v35 = vpop.xlane.xlu1 %817  ;;  %v867_v26 = vmul.f32 1.442695, %v845_v5 }
 0x51f   :  { %891 = vadd.xlane.f32.xlu1 %v7801_v0  ;;  %v816_v53 = vpop.xlane.xlu0 %815  ;;  %v844_v46 = vsub.f32 %v7711_v61, %v818_v35 }
 0x520   :  { %v843_v8 = vsub.f32 %v7720_v3, %v816_v53  ;;  %6707 = vpow2.f32 %v867_v26 }
 0x521   :  { %v7804_v51 = vpop.eup %6701  ;;  %v865_v44 = vmul.f32 1.442695, %v844_v46 }
 0x522   :  { %v7806_v32 = vpop.eup %6703  ;;  %889 = vadd.xlane.f32.xlu0 %v7804_v51  ;;  %v830_v39 = vpop.xlane.xlu1 %829  ;;  %v863_v52 = vmul.f32 1.442695, %v843_v8 }
 0x523   :  { %887 = vadd.xlane.f32.xlu1 %v7806_v32  ;;  %v828_v1 = vpop.xlane.xlu0 %827  ;;  %v850_v54 = vsub.f32 %v7729_v6, %v830_v39 }
 0x524   :  { %v849_v45 = vsub.f32 %v7738_v15, %v828_v1  ;;  %6709 = vpow2.f32 %v863_v52 }
 0x525   :  { %6711 = vpow2.f32 %v865_v44 }
 0x526   :  { %v7810_v4 = vpop.eup %6705  ;;  %v826_v41 = vpop.xlane.xlu1 %825  ;;  %v875_v56 = vmul.f32 1.442695, %v849_v45  ;;  %6713 = vpow2.f32 %v869_v40  ;;  %v877_v45 = vmul.f32 1.442695, %v850_v54 }
 0x527   :  { %893 = vadd.xlane.f32.xlu1 %v7810_v4  ;;  %v824_v42 = vpop.xlane.xlu0 %823  ;;  %v848_v52 = vsub.f32 %v7747_v36, %v826_v41 }
 0x528   :  { %v847_v3 = vsub.f32 %v7751_v16, %v824_v42  ;;  %6715 = vpow2.f32 %v875_v56 }
 0x52a   :  { %v871_v57 = vmul.f32 1.442695, %v847_v3  ;;  %v7826_v35 = vpop.eup %6707  ;;  %v7828_v15 = vpop.permute.xlu1 %1111 }
 0x52b   :  { %v836_v20 = vpop.xlane.xlu0 %835 }
 0x52c   :  { %v853_v21 = vsub.f32 %v7761_v25, %v836_v20 }
 0x52e   :  { %v883_v61 = vmul.f32 1.442695, %v853_v21  ;;  %v7832_v40 = vpop.eup %6709 }
 0x52f   :  { %v832_v53 = vpop.xlane.xlu0 %831  ;;  %v7834_v25 = vpop.eup %6711 }
 0x530   :  { %v851_v5 = vsub.f32 %v7770_v37, %v832_v53  ;;  %6717 = vpow2.f32 %v883_v61  ;;  %v873_v37 = vmul.f32 1.442695, %v848_v52  ;;  %v7839_v42 = vpop.eup %6713 }
 0x531   :  { %6719 = vpow2.f32 %v871_v57 }
 0x532   :  { %v879_v44 = vmul.f32 1.442695, %v851_v5  ;;  %v7841_v41 = vpop.eup %6715 }
 0x533   :  { %v1110_v56 = vpop.permute.xlu0 %1109 }
 0x534   :  { %6721 = vpow2.f32 %v879_v44 }
 0x535   :  { %6723 = vpow2.f32 %v877_v45 }
 0x538   :  { %1113 = vrot.lane.b32.xlu0 %v7579_v62, %s7181_s29  ;;  %1115 = vrot.lane.b32.xlu1 %v7577_v55, %s7181_s29 }
 0x53a   :  { %v7846_v8 = vpop.eup %6717 }
 0x53b   :  { %v7848_v46 = vpop.eup %6719 }
 0x53e   :  { %v7852_v39 = vpop.eup %6721 }
 0x53f   :  { %v7854_v20 = vpop.eup %6723 }
 0x557   :  { %899 = vadd.xlane.f32.xlu0 %v7826_v35 }
 0x55a   :  { %v838_v16 = vpop.xlane.xlu1 %837 }
 0x55b   :  { %v854_v6 = vsub.f32 %v7783_v7, %v838_v16  ;;  %895 = vadd.xlane.f32.xlu0 %v7832_v40 }
 0x55c   :  { %897 = vadd.xlane.f32.xlu1 %v7834_v25 }
 0x55d   :  { %v885_v1 = vmul.f32 1.442695, %v854_v6 }
 0x55e   :  { %v834_v26 = vpop.xlane.xlu1 %833 }
 0x55f   :  { %6725 = vpow2.f32 %v885_v1  ;;  %v852_v36 = vsub.f32 %v7792_v63, %v834_v26  ;;  %901 = vadd.xlane.f32.xlu0 %v7839_v42 }
 0x560   :  { %907 = vadd.xlane.f32.xlu1 %v7841_v41  ;;  %6727 = vpow2.f32 %v873_v37  ;;  %v1146_v37 = vsel %vm661_vm2, %v7626_v13, 0 }
 0x561   :  { %v881_v7 = vmul.f32 1.442695, %v852_v36 }
 0x563   :  { %915 = vadd.xlane.f32.xlu0 %v7846_v8  ;;  %6729 = vpow2.f32 %v881_v7 }
 0x564   :  { %903 = vadd.xlane.f32.xlu1 %v7848_v46 }
 0x567   :  { %911 = vadd.xlane.f32.xlu0 %v7852_v39 }
 0x568   :  { %909 = vadd.xlane.f32.xlu1 %v7854_v20 }
 0x569   :  { %v7858_v63 = vpop.eup %6725 }
 0x56a   :  { %v7860_v59 = vpop.eup %6727 }
 0x56b   :  { %917 = vadd.xlane.f32.xlu0 %v7858_v63 }
 0x56c   :  { %905 = vadd.xlane.f32.xlu1 %v7860_v59 }
 0x56d   :  { %v7864_v21 = vpop.eup %6729 }
 0x570   :  { %913 = vadd.xlane.f32.xlu1 %v7864_v21 }
 0x581   :  { %1119 = vrot.lane.b32.xlu1 %v7585_v43, %s7181_s29  ;;  %1117 = vrot.lane.b32.xlu0 %v7587_v49, %s7181_s29 }
 0x585   :  { %1091 = vrot.lane.b32.xlu1 %v7559_v48, %s7182_s17  ;;  %1089 = vrot.lane.b32.xlu0 %v7561_v23, %s7182_s17 }
 0x589   :  { %1095 = vrot.lane.b32.xlu1 %v7569_v24, %s7182_s17  ;;  %1093 = vrot.lane.b32.xlu0 %v7571_v28, %s7182_s17 }
 0x58d   :  { %1099 = vrot.lane.b32.xlu1 %v7577_v55, %s7182_s17  ;;  %1097 = vrot.lane.b32.xlu0 %v7579_v62, %s7182_s17 }
 0x591   :  { %1103 = vrot.lane.b32.xlu1 %v7585_v43, %s7182_s17  ;;  %1101 = vrot.lane.b32.xlu0 %v7587_v49, %s7182_s17 }
 0x595   :  { %1420 = vrot.lane.b32.xlu1 %v7559_v48, %s7183_s18  ;;  %1418 = vrot.lane.b32.xlu0 %v7561_v23, %s7183_s18 }
 0x599   :  { %1422 = vrot.lane.b32.xlu0 %v7571_v28, %s7183_s18 }
 0x5ac   :  { %v892_v3 = vpop.xlane.xlu1 %891 }
 0x5af   :  { %v890_v53 = vpop.xlane.xlu0 %889 }
 0x5b0   :  { %6731 = vrcp.f32 %v890_v53  ;;  %v888_v61 = vpop.xlane.xlu1 %887 }
 0x5b1   :  { %6733 = vrcp.f32 %v888_v61 }
 0x5b2   :  { %6735 = vrcp.f32 %v892_v3 }
 0x5b3   :  { %v1114_v13 = vpop.permute.xlu0 %1113 }
 0x5b4   :  { %v894_v5 = vpop.xlane.xlu1 %893 }
 0x5b5   :  { %6737 = vrcp.f32 %v894_v5 }
 0x5ba   :  { %v6732_v54 = vpop.eup %6731 }
 0x5bb   :  { %v6734_v57 = vpop.eup %6733  ;;  %v936_v44 = vmul.f32 %v6732_v54, %v7804_v51  ;;  %v1149_v51 = vsel %vm661_vm2, %v7795_v19, 0 }
 0x5bc   :  { %v935_v48 = vmul.f32 %v6734_v57, %v7806_v32  ;;  %v6736_v45 = vpop.eup %6735  ;;  %v1155_v32 = vsel %vm661_vm2, %v7828_v15, 0 }
 0x5bd   :  { %v937_v28 = vmul.f32 %v6736_v45, %v7801_v0  ;;  %v1152_v0 = vsel %vm661_vm2, %v1110_v56, 0 }
 0x5be   :  { %v951_v23 = vpack.c.bf16 %v936_v44, %v935_v48 }
 0x5bf   :  { %v6738_v52 = vpop.eup %6737 }
 0x5c0   :  { %v938_v16 = vmul.f32 %v6738_v52, %v7810_v4  ;;  %6148 = vmatprep.mubr.bf16.mxu1 %v951_v23  ;;  %v1158_v4 = vsel %vm661_vm2, %v1114_v13, 0 }
 0x5c2   :  { %v952_v6 = vpack.c.bf16 %v938_v16, %v937_v28 }
 0x5c4   :  { %6149 = vmatmul.mubr.bf16.vlgmr.msra.gmra.mrb[16].mxu1 %v952_v6 }
 0x5c5   :  { %6165 = vmatpush3.bf16.xpose.msra.mxu1 %v1146_v37 }
 0x5c6   :  { %6609 = vmatprep.subr.msk.bf16.mxu1 %vm661_vm2, %v7795_v19  ;;  %v1116_v19 = vpop.permute.xlu1 %1115 }
 0x5c7   :  { %v1161_v7 = vsel %vm661_vm2, %v1116_v19, 0 }
 0x5cd   :  { %6167 = vmatpush3.bf16.xpose.msra.mxu1 %v1149_v51 }
 0x5ce   :  { %6610 = vmatprep.subr.msk.bf16.mxu1 %vm661_vm2, %v1110_v56 }
 0x5d5   :  { %6169 = vmatpush3.bf16.xpose.msra.mxu1 %v1152_v0 }
 0x5d6   :  { %6611 = vmatprep.subr.msk.bf16.mxu1 %vm661_vm2, %v7828_v15 }
 0x5dd   :  { %6171 = vmatpush3.bf16.xpose.msra.mxu1 %v1155_v32 }
 0x5de   :  { %6612 = vmatprep.subr.msk.bf16.mxu1 %vm661_vm2, %v1114_v13 }
 0x5e4   :  { %v900_v1 = vpop.xlane.xlu0 %899 }
 0x5e5   :  { %6173 = vmatpush3.bf16.xpose.msra.mxu1 %v1158_v4 }
 0x5e6   :  { %6613 = vmatprep.subr.msk.bf16.mxu1 %vm661_vm2, %v1116_v19 }
 0x5e8   :  { %v896_v26 = vpop.xlane.xlu0 %895 }
 0x5e9   :  { %6739 = vrcp.f32 %v896_v26  ;;  %v898_v36 = vpop.xlane.xlu1 %897 }
 0x5ea   :  { %6741 = vrcp.f32 %v898_v36 }
 0x5eb   :  { %6743 = vrcp.f32 %v900_v1 }
 0x5ec   :  { %v902_v56 = vpop.xlane.xlu0 %901 }
 0x5ed   :  { %6175 = vmatpush3.bf16.xpose.msra.mxu1 %v1161_v7  ;;  %6745 = vrcp.f32 %v902_v56  ;;  %v908_v15 = vpop.xlane.xlu1 %907 }
 0x5f0   :  { %v916_v3 = vpop.xlane.xlu0 %915 }
 0x5f1   :  { %v904_v53 = vpop.xlane.xlu1 %903 }
 0x5f3   :  { %v6740_v61 = vpop.eup %6739 }
 0x5f4   :  { %v6742_v5 = vpop.eup %6741  ;;  %v912_v54 = vpop.xlane.xlu0 %911  ;;  %v939_v57 = vmul.f32 %v6740_v61, %v7832_v40 }
 0x5f5   :  { %v6744_v44 = vpop.eup %6743  ;;  %v910_v48 = vpop.xlane.xlu1 %909  ;;  %v940_v45 = vmul.f32 %v6742_v5, %v7834_v25 }
 0x5f6   :  { %6747 = vrcp.f32 %v910_v48  ;;  %v941_v16 = vmul.f32 %v6744_v44, %v7826_v35 }
 0x5f7   :  { %v6746_v23 = vpop.eup %6745  ;;  %v953_v52 = vpack.c.bf16 %v940_v45, %v939_v57  ;;  %6749 = vrcp.f32 %v904_v53 }
 0x5f8   :  { %v918_v28 = vpop.xlane.xlu0 %917  ;;  %v942_v6 = vmul.f32 %v6746_v23, %v7839_v42  ;;  %6751 = vrcp.f32 %v908_v15 }
 0x5f9   :  { %v906_v37 = vpop.xlane.xlu1 %905  ;;  %6152 = vmatprep.mubr.bf16.mxu1 %v953_v52 }
 0x5fa   :  { %6753 = vrcp.f32 %v906_v37  ;;  %v954_v51 = vpack.c.bf16 %v942_v6, %v941_v16 }
 0x5fb   :  { %6755 = vrcp.f32 %v912_v54 }
 0x5fc   :  { %6153 = vmatmul.mubr.bf16.gmra.mrb[20].mxu1 %v954_v51  ;;  %v1118_v40 = vpop.permute.xlu0 %1117 }
 0x5fd   :  { %v914_v0 = vpop.xlane.xlu1 %913  ;;  %6614 = vmatprep.subr.msk.bf16.mxu1 %vm661_vm2, %v1118_v40  ;;  %v1164_v25 = vsel %vm661_vm2, %v1118_v40, 0 }
 0x5fe   :  { %6757 = vrcp.f32 %v914_v0  ;;  %6177 = vmatpush3.bf16.xpose.msra.mxu1 %v1164_v25 }
 0x5ff   :  { %6759 = vrcp.f32 %v918_v28 }
 0x600   :  { %v1090_v32 = vpop.permute.xlu0 %1089  ;;  %v6748_v35 = vpop.eup %6747  ;;  %6761 = vrcp.f32 %v916_v3 }
 0x601   :  { %v1120_v42 = vpop.permute.xlu1 %1119  ;;  %v6750_v13 = vpop.eup %6749  ;;  %v946_v26 = vmul.f32 %v6748_v35, %v7854_v20 }
 0x602   :  { %6615 = vmatprep.subr.msk.bf16.mxu1 %vm661_vm2, %v1120_v42  ;;  %v6752_v4 = vpop.eup %6751  ;;  %v1167_v7 = vsel %vm661_vm2, %v1120_v42, 0  ;;  %v943_v56 = vmul.f32 %v6750_v13, %v7848_v46 }
 0x603   :  { %v945_v3 = vmul.f32 %v6752_v4, %v7841_v41 }
 0x604   :  { %v6754_v1 = vpop.eup %6753  ;;  %v1094_v19 = vpop.permute.xlu0 %1093 }
 0x605   :  { %v1092_v36 = vpop.permute.xlu1 %1091  ;;  %v944_v15 = vmul.f32 %v6754_v1, %v7860_v59  ;;  %v6756_v53 = vpop.eup %6755  ;;  %v956_v57 = vpack.c.bf16 %v946_v26, %v945_v3 }
 0x606   :  { %6179 = vmatpush3.bf16.xpose.msra.mxu1 %v1167_v7  ;;  %v947_v20 = vmul.f32 %v6756_v53, %v7852_v39 }
 0x607   :  { %v955_v61 = vpack.c.bf16 %v944_v15, %v943_v56 }
 0x608   :  { %v6758_v5 = vpop.eup %6757  ;;  %v1098_v54 = vpop.permute.xlu0 %1097 }
 0x609   :  { %v6760_v44 = vpop.eup %6759  ;;  %v1096_v48 = vpop.permute.xlu1 %1095  ;;  %6156 = vmatprep.mubr.bf16.mxu1 %v955_v61  ;;  %v948_v45 = vmul.f32 %v6758_v5, %v7864_v21 }
 0x60a   :  { %6157 = vmatmul.mubr.bf16.gmra.mrb[24].mxu1 %v956_v57  ;;  %v6762_v23 = vpop.eup %6761  ;;  %v950_v59 = vmul.f32 %v6760_v44, %v7858_v63 }
 0x60b   :  { %v957_v46 = vpack.c.bf16 %v948_v45, %v947_v20  ;;  %v949_v41 = vmul.f32 %v6762_v23, %v7846_v8 }
 0x60c   :  { %v1102_v52 = vpop.permute.xlu0 %1101 }
 0x60d   :  { %v1100_v28 = vpop.permute.xlu1 %1099  ;;  %6160 = vmatprep.mubr.bf16.mxu1 %v957_v46  ;;  %v958_v6 = vpack.c.bf16 %v950_v59, %v949_v41 }
 0x610   :  { %v1419_v16 = vpop.permute.xlu0 %1418 }
 0x611   :  { %v1104_v37 = vpop.permute.xlu1 %1103  ;;  %6196 = vmatprep.subr.bf16.mxu0 %v1419_v16  ;;  %6552 = vmatprep.subr.bf16.mxu1 %v1419_v16 }
 0x612   :  { %6161 = vmatmul.mubr.bf16.gmra.mrb[28].mxu1 %v958_v6  ;;  %6197 = vmatpush3.bf16.msra.mxu0 %v1419_v16 }
 0x613   :  { %6180 = vmatprep.mubr.msk.bf16.mxu1 %vm661_vm2, %v1090_v32 }
 0x614   :  { %v1423_v21 = vpop.permute.xlu0 %1422 }
 0x615   :  { %v1421_v39 = vpop.permute.xlu1 %1420 }
 0x616   :  { %6198 = vmatprep.subr.bf16.mxu0 %v1421_v39 }
 0x617   :  { %6199 = vmatpush3.bf16.msra.mxu0 %v1421_v39 }
 0x618   :  { %6200 = vmatprep.subr.bf16.mxu0 %v1423_v21 }
 0x61a   :  { %6181 = vmatmul.mubr.msk.bf16.vlgmr.msra.gmra.mrb[32].mxu1 %vm661_vm2, %v1092_v36 }
 0x61b   :  { %6560 = vmatpush3.bf16.msra.mxu1 %v1419_v16  ;;  %6184 = vmatprep.mubr.msk.bf16.mxu1 %vm661_vm2, %v1094_v19 }
 0x61c   :  { %6553 = vmatprep.subr.bf16.mxu1 %v1421_v39  ;;  %6201 = vmatpush3.bf16.msra.mxu0 %v1423_v21 }
 0x61f   :  { %6561 = vmatpush3.bf16.msra.mxu1 %v1421_v39 }
 0x620   :  { %6554 = vmatprep.subr.bf16.mxu1 %v1423_v21 }
 0x622   :  { %6185 = vmatmul.mubr.msk.bf16.gmra.mrb[36].mxu1 %vm661_vm2, %v1096_v48 }
 0x623   :  { %6562 = vmatpush3.bf16.msra.mxu1 %v1423_v21  ;;  %6188 = vmatprep.mubr.msk.bf16.mxu1 %vm661_vm2, %v1098_v54 }
 0x62a   :  { %6189 = vmatmul.mubr.msk.bf16.gmra.mrb[40].mxu1 %vm661_vm2, %v1100_v28 }
 0x62b   :  { %6192 = vmatprep.mubr.msk.bf16.mxu1 %vm661_vm2, %v1102_v52 }
 0x632   :  { %6193 = vmatmul.mubr.msk.bf16.gmra.mrb[44].mxu1 %vm661_vm2, %v1104_v37 }
 0x697   :  { %v7937_v8 = vpop.f32.mrb[16].mxu1 }
 0x698   :  { %v7939_v63 = vpop.f32.mrb[17].mxu1 }
 0x699   :  { %v7941_v51 = vpop.f32.mrb[18].mxu1 }
 0x69a   :  { %v1082_v40 = vpack.c.bf16 %v7941_v51, %v7937_v8  ;;  %v7945_v0 = vpop.f32.mrb[19].mxu1  ;;  %v8160_v51 = vld [vmem:[%s10424_s7] ss:$0 sm:$0xff] }
 0x69b   :  { %v1081_v25 = vpack.c.bf16 %v7945_v0, %v7939_v63 }
 0x6cf   :  { %v7949_v32 = vpop.f32.mrb[20].mxu1 }
 0x6d0   :  { %v7951_v35 = vpop.f32.mrb[21].mxu1 }
 0x6d1   :  { %v7953_v42 = vpop.f32.mrb[22].mxu1 }
 0x6d2   :  { %v1084_v13 = vpack.c.bf16 %v7953_v42, %v7949_v32  ;;  %v7957_v4 = vpop.f32.mrb[23].mxu1 }
 0x6d3   :  { %v1083_v1 = vpack.c.bf16 %v7957_v4, %v7951_v35 }
 0x6dd   :  { %v7961_v19 = vpop.f32.mrb[24].mxu1 }
 0x6de   :  { %v7963_v26 = vpop.f32.mrb[25].mxu1 }
 0x6df   :  { %v7965_v36 = vpop.f32.mrb[26].mxu1 }
 0x6e0   :  { %v1086_v7 = vpack.c.bf16 %v7965_v36, %v7961_v19  ;;  %v7969_v56 = vpop.f32.mrb[27].mxu1 }
 0x6e1   :  { %v1085_v15 = vpack.c.bf16 %v7969_v56, %v7963_v26 }
 0x6e5   :  { %v7973_v53 = vpop.f32.mrb[28].mxu1 }
 0x6e6   :  { %v7975_v3 = vpop.f32.mrb[29].mxu1 }
 0x6e7   :  { %v7977_v61 = vpop.f32.mrb[30].mxu1 }
 0x6e8   :  { %v7981_v54 = vpop.f32.mrb[31].mxu1  ;;  %v10491_v8 = vpack.c.bf16 %v7977_v61, %v7973_v53  ;;  %v10494_v61 = vld [vmem:[#allocation2_spill] sm:$0xff] }
 0x6e9   :  { %v1087_v57 = vpack.c.bf16 %v7981_v54, %v7975_v3 }
 0x6ed   :  { %v6182_v44 = vpop.f32.mrb[32].mxu1 }
 0x6ee   :  { %v1212_v48 = vadd.f32 %v6182_v44, %v7650_v18  ;;  %v1203_v20 = vpop.f32.mrb[33].mxu1 }
 0x6ef   :  { %v6183_v45 = vpop.f32.mrb[34].mxu1  ;;  %v1204_v52 = vadd.f32 %v1203_v20, %v7663_v22 }
 0x6f0   :  { %1270 = vmax.xlane.f32.xlu0 %v1212_v48  ;;  %v1206_v23 = vpop.f32.mrb[35].mxu1  ;;  %v1215_v28 = vadd.f32 %v6183_v45, %v7675_v14 }
 0x6f1   :  { %v1207_v46 = vadd.f32 %v1206_v23, %v7658_v11 }
 0x6f3   :  { %1268 = vmax.xlane.f32.xlu1 %v1207_v46 }
 0x6f4   :  { %1266 = vmax.xlane.f32.xlu0 %v1204_v52 }
 0x6f5   :  { %v6186_v59 = vpop.f32.mrb[36].mxu1 }
 0x6f6   :  { %v1219_v41 = vpop.f32.mrb[37].mxu1  ;;  %v1228_v37 = vadd.f32 %v6186_v59, %v7690_v50 }
 0x6f7   :  { %v6187_v16 = vpop.f32.mrb[38].mxu1  ;;  %v1220_v39 = vadd.f32 %v1219_v41, %v7708_v60 }
 0x6f8   :  { %v7990_v6 = vadd.f32 %v6187_v16, %v7682_v38  ;;  %1272 = vmax.xlane.f32.xlu0 %v1215_v28  ;;  %v1222_v18 = vpop.f32.mrb[39].mxu1 }
 0x6f9   :  { %v1223_v11 = vadd.f32 %v1222_v18, %v7699_v12 }
 0x6fa   :  { %1280 = vmax.xlane.f32.xlu1 %v7990_v6 }
 0x6fc   :  { %1278 = vmax.xlane.f32.xlu0 %v1228_v37 }
 0x6fd   :  { %v6190_v22 = vpop.f32.mrb[40].mxu1 }
 0x6fe   :  { %1276 = vmax.xlane.f32.xlu1 %v1223_v11  ;;  %v1235_v21 = vpop.f32.mrb[41].mxu1  ;;  %v1244_v20 = vadd.f32 %v6190_v22, %v7726_v33 }
 0x6ff   :  { %v6191_v14 = vpop.f32.mrb[42].mxu1  ;;  %v8005_v45 = vadd.f32 %v1235_v21, %v7744_v10 }
 0x700   :  { %v7997_v44 = vadd.f32 %v6191_v14, %v7717_v2  ;;  %1274 = vmax.xlane.f32.xlu0 %v1220_v39  ;;  %v1238_v38 = vpop.f32.mrb[43].mxu1 }
 0x701   :  { %v8002_v50 = vadd.f32 %v1238_v38, %v7735_v9 }
 0x702   :  { %1288 = vmax.xlane.f32.xlu1 %v7997_v44 }
 0x704   :  { %1286 = vmax.xlane.f32.xlu0 %v1244_v20 }
 0x705   :  { %v6194_v12 = vpop.f32.mrb[44].mxu1 }
 0x706   :  { %1284 = vmax.xlane.f32.xlu1 %v8002_v50  ;;  %v1251_v60 = vpop.f32.mrb[45].mxu1  ;;  %v8010_v59 = vadd.f32 %v6194_v12, %v7757_v17 }
 0x707   :  { %v6195_v23 = vpop.f32.mrb[46].mxu1  ;;  %v8014_v33 = vadd.f32 %v1251_v60, %v7766_v30 }
 0x708   :  { %1282 = vmax.xlane.f32.xlu0 %v8005_v45  ;;  %v1254_v2 = vpop.f32.mrb[47].mxu1  ;;  %v8022_v9 = vadd.f32 %v6195_v23, %v7780_v47 }
 0x709   :  { %v8026_v10 = vadd.f32 %v1254_v2, %v7788_v58 }
 0x70c   :  { %1294 = vmax.xlane.f32.xlu0 %v8010_v59 }
 0x710   :  { %1290 = vmax.xlane.f32.xlu0 %v8014_v33 }
 0x717   :  { %1426 = vrot.lane.b32.xlu1 %v7579_v62, %s7183_s18 }
 0x726   :  { %1424 = vrot.lane.b32.xlu0 %v7569_v24, %s7183_s18 }
 0x73b   :  { %1296 = vmax.xlane.f32.xlu1 %v8022_v9 }
 0x73f   :  { %1292 = vmax.xlane.f32.xlu1 %v8026_v10 }
 0x750   :  { %1428 = vrot.lane.b32.xlu1 %v7577_v55, %s7183_s18 }
 0x77d   :  { %v1271_v17 = vpop.xlane.xlu0 %1270 }
 0x77e   :  { %v1300_v30 = vsub.f32 %v1212_v48, %v1271_v17 }
 0x780   :  { %v1318_v41 = vmul.f32 1.442695, %v1300_v30  ;;  %v1269_v16 = vpop.xlane.xlu1 %1268 }
 0x781   :  { %v1267_v62 = vpop.xlane.xlu0 %1266  ;;  %v1299_v47 = vsub.f32 %v1207_v46, %v1269_v16 }
 0x782   :  { %6763 = vpow2.f32 %v1318_v41  ;;  %v1298_v24 = vsub.f32 %v1204_v52, %v1267_v62 }
 0x783   :  { %v1316_v38 = vmul.f32 1.442695, %v1299_v47 }
 0x784   :  { %v1314_v18 = vmul.f32 1.442695, %v1298_v24 }
 0x785   :  { %v1273_v22 = vpop.xlane.xlu0 %1272 }
 0x786   :  { %6765 = vpow2.f32 %v1314_v18  ;;  %v1301_v21 = vsub.f32 %v1215_v28, %v1273_v22 }
 0x787   :  { %v1281_v14 = vpop.xlane.xlu1 %1280 }
 0x788   :  { %v1320_v58 = vmul.f32 1.442695, %v1301_v21  ;;  %v1305_v46 = vsub.f32 %v7990_v6, %v1281_v14 }
 0x789   :  { %v1279_v12 = vpop.xlane.xlu0 %1278 }
 0x78a   :  { %6767 = vpow2.f32 %v1320_v58  ;;  %v1304_v60 = vsub.f32 %v1228_v37, %v1279_v12  ;;  %v1328_v16 = vmul.f32 1.442695, %v1305_v46 }
 0x78b   :  { %v1277_v23 = vpop.xlane.xlu1 %1276  ;;  %6769 = vpow2.f32 %v1316_v38 }
 0x78c   :  { %v8031_v55 = vpop.eup %6763  ;;  %v1326_v48 = vmul.f32 1.442695, %v1304_v60  ;;  %v1303_v2 = vsub.f32 %v1223_v11, %v1277_v23 }
 0x78d   :  { %1350 = vadd.xlane.f32.xlu1 %v8031_v55  ;;  %v1275_v52 = vpop.xlane.xlu0 %1274 }
 0x78e   :  { %6771 = vpow2.f32 %v1326_v48  ;;  %v1324_v17 = vmul.f32 1.442695, %v1303_v2  ;;  %v1302_v28 = vsub.f32 %v1220_v39, %v1275_v52 }
 0x78f   :  { %v1289_v62 = vpop.xlane.xlu1 %1288 }
 0x790   :  { %v8035_v30 = vpop.eup %6765  ;;  %v1322_v41 = vmul.f32 1.442695, %v1302_v28  ;;  %6773 = vpow2.f32 %v1324_v17  ;;  %v1309_v18 = vsub.f32 %v7997_v44, %v1289_v62 }
 0x791   :  { %1346 = vadd.xlane.f32.xlu1 %v8035_v30  ;;  %v1287_v37 = vpop.xlane.xlu0 %1286 }
 0x792   :  { %6775 = vpow2.f32 %v1322_v41  ;;  %v1308_v11 = vsub.f32 %v1244_v20, %v1287_v37  ;;  %v1336_v38 = vmul.f32 1.442695, %v1309_v18 }
 0x793   :  { %6777 = vpow2.f32 %v1328_v16  ;;  %v1285_v39 = vpop.xlane.xlu1 %1284 }
 0x794   :  { %v8038_v24 = vpop.eup %6767  ;;  %v1334_v47 = vmul.f32 1.442695, %v1308_v11  ;;  %v1307_v20 = vsub.f32 %v8002_v50, %v1285_v39 }
 0x795   :  { %1352 = vadd.xlane.f32.xlu1 %v8038_v24  ;;  %v1283_v6 = vpop.xlane.xlu0 %1282  ;;  %v8043_v21 = vpop.eup %6769 }
 0x796   :  { %v1306_v22 = vsub.f32 %v8005_v45, %v1283_v6  ;;  %6779 = vpow2.f32 %v1334_v47  ;;  %v1332_v48 = vmul.f32 1.442695, %v1307_v20 }
 0x797   :  { %v1427_v28 = vpop.permute.xlu1 %1426 }
 0x798   :  { %v8045_v14 = vpop.eup %6771  ;;  %v1330_v58 = vmul.f32 1.442695, %v1306_v22 }
 0x799   :  { %1348 = vadd.xlane.f32.xlu1 %v8043_v21  ;;  %1358 = vadd.xlane.f32.xlu0 %v8045_v14  ;;  %v1295_v44 = vpop.xlane.xlu0 %1294 }
 0x79a   :  { %6781 = vpow2.f32 %v1330_v58  ;;  %v1312_v12 = vsub.f32 %v8010_v59, %v1295_v44  ;;  %v8051_v60 = vpop.eup %6773 }
 0x79b   :  { %6783 = vpow2.f32 %v1336_v38 }
 0x79c   :  { %v8053_v45 = vpop.eup %6775  ;;  %v1342_v23 = vmul.f32 1.442695, %v1312_v12 }
 0x79d   :  { %1356 = vadd.xlane.f32.xlu1 %v8051_v60  ;;  %1354 = vadd.xlane.f32.xlu0 %v8053_v45  ;;  %v1291_v50 = vpop.xlane.xlu0 %1290  ;;  %v8058_v52 = vpop.eup %6777 }
 0x79e   :  { %6785 = vpow2.f32 %v1342_v23  ;;  %v1310_v2 = vsub.f32 %v8014_v33, %v1291_v50 }
 0x79f   :  { %6787 = vpow2.f32 %v1332_v48 }
 0x7a0   :  { %v1338_v46 = vmul.f32 1.442695, %v1310_v2  ;;  %v8061_v17 = vpop.eup %6779 }
 0x7a1   :  { %1360 = vadd.xlane.f32.xlu0 %v8058_v52  ;;  %v1425_v59 = vpop.permute.xlu0 %1424 }
 0x7a2   :  { %6789 = vpow2.f32 %v1338_v46  ;;  %6202 = vmatprep.subr.bf16.mxu0 %v1425_v59  ;;  %6555 = vmatprep.subr.bf16.mxu1 %v1425_v59 }
 0x7a3   :  { %6203 = vmatpush3.bf16.msra.mxu0 %v1425_v59  ;;  %6563 = vmatpush3.bf16.msra.mxu1 %v1425_v59 }
 0x7a4   :  { %v8063_v41 = vpop.eup %6781  ;;  %6204 = vmatprep.subr.bf16.mxu0 %v1427_v28  ;;  %6556 = vmatprep.subr.bf16.mxu1 %v1427_v28 }
 0x7a5   :  { %1366 = vadd.xlane.f32.xlu0 %v8061_v17  ;;  %1362 = vadd.xlane.f32.xlu1 %v8063_v41  ;;  %v8067_v33 = vpop.eup %6783 }
 0x7a7   :  { %6205 = vmatpush3.bf16.msra.mxu0 %v1427_v28  ;;  %6564 = vmatpush3.bf16.msra.mxu1 %v1427_v28 }
 0x7a8   :  { %v8069_v62 = vpop.eup %6785 }
 0x7a9   :  { %1368 = vadd.xlane.f32.xlu0 %v8067_v33  ;;  %1374 = vadd.xlane.f32.xlu1 %v8069_v62  ;;  %v8073_v37 = vpop.eup %6787 }
 0x7ac   :  { %v8075_v16 = vpop.eup %6789 }
 0x7ad   :  { %1364 = vadd.xlane.f32.xlu0 %v8073_v37  ;;  %1370 = vadd.xlane.f32.xlu1 %v8075_v16 }
 0x7be   :  { %1432 = vrot.lane.b32.xlu1 %v7585_v43, %s7183_s18 }
 0x7c3   :  { %1430 = vrot.lane.b32.xlu0 %v7587_v49, %s7183_s18 }
 0x7c8   :  { %v1297_v11 = vpop.xlane.xlu1 %1296 }
 0x7c9   :  { %v1313_v39 = vsub.f32 %v8022_v9, %v1297_v11 }
 0x7cb   :  { %v1344_v58 = vmul.f32 1.442695, %v1313_v39 }
 0x7cc   :  { %v1293_v18 = vpop.xlane.xlu1 %1292 }
 0x7cd   :  { %v1311_v47 = vsub.f32 %v8026_v10, %v1293_v18 }
 0x7cf   :  { %v1340_v22 = vmul.f32 1.442695, %v1311_v47 }
 0x7d0   :  { %v1429_v6 = vpop.permute.xlu1 %1428 }
 0x7d1   :  { %6206 = vmatprep.subr.bf16.mxu0 %v1429_v6  ;;  %6557 = vmatprep.subr.bf16.mxu1 %v1429_v6  ;;  %6791 = vpow2.f32 %v1340_v22 }
 0x7d2   :  { %6207 = vmatpush3.bf16.msra.mxu0 %v1429_v6  ;;  %6565 = vmatpush3.bf16.msra.mxu1 %v1429_v6  ;;  %6793 = vpow2.f32 %v1344_v58 }
 0x7db   :  { %v8085_v38 = vpop.eup %6791 }
 0x7dc   :  { %v8088_v43 = vpop.eup %6793 }
 0x7e2   :  { %1372 = vadd.xlane.f32.xlu0 %v8085_v38 }
 0x7e6   :  { %1376 = vadd.xlane.f32.xlu0 %v8088_v43 }
 0x81a   :  { %v1351_v49 = vpop.xlane.xlu1 %1350 }
 0x81e   :  { %v1347_v10 = vpop.xlane.xlu1 %1346 }
 0x81f   :  { %6795 = vrcp.f32 %v1347_v10 }
 0x822   :  { %v1353_v20 = vpop.xlane.xlu1 %1352 }
 0x826   :  { %v1349_v44 = vpop.xlane.xlu1 %1348  ;;  %v1359_v12 = vpop.xlane.xlu0 %1358 }
 0x827   :  { %6797 = vrcp.f32 %v1349_v44 }
 0x828   :  { %6799 = vrcp.f32 %v1353_v20 }
 0x829   :  { %v6796_v50 = vpop.eup %6795 }
 0x82a   :  { %v1355_v9 = vpop.xlane.xlu0 %1354  ;;  %v1357_v23 = vpop.xlane.xlu1 %1356  ;;  %v1394_v28 = vmul.f32 %v6796_v50, %v8035_v30 }
 0x82b   :  { %6801 = vrcp.f32 %v1357_v23 }
 0x82c   :  { %6803 = vrcp.f32 %v1355_v9 }
 0x82d   :  { %6805 = vrcp.f32 %v1351_v49 }
 0x82e   :  { %v1361_v48 = vpop.xlane.xlu0 %1360 }
 0x82f   :  { %6807 = vrcp.f32 %v1361_v48 }
 0x831   :  { %v6798_v2 = vpop.eup %6797 }
 0x832   :  { %v1363_v46 = vpop.xlane.xlu1 %1362  ;;  %v1367_v59 = vpop.xlane.xlu0 %1366  ;;  %v1395_v11 = vmul.f32 %v6798_v2, %v8043_v21 }
 0x833   :  { %v6800_v58 = vpop.eup %6799 }
 0x834   :  { %v1410_v18 = vpack.c.bf16 %v1395_v11, %v1394_v28  ;;  %v1397_v49 = vmul.f32 %v6800_v58, %v8038_v24 }
 0x835   :  { %v6802_v10 = vpop.eup %6801 }
 0x836   :  { %6212 = vmatprep.mubr.bf16.mxu0 %v1410_v18  ;;  %v1375_v47 = vpop.xlane.xlu1 %1374  ;;  %v1369_v6 = vpop.xlane.xlu0 %1368  ;;  %v1399_v9 = vmul.f32 %v6802_v10, %v8051_v60 }
 0x837   :  { %v6804_v5 = vpop.eup %6803 }
 0x838   :  { %v6806_v30 = vpop.eup %6805  ;;  %v1398_v20 = vmul.f32 %v6804_v5, %v8053_v45 }
 0x839   :  { %v1396_v23 = vmul.f32 %v6806_v30, %v8031_v55  ;;  %v6808_v48 = vpop.eup %6807 }
 0x83a   :  { %v1371_v39 = vpop.xlane.xlu1 %1370  ;;  %v1365_v22 = vpop.xlane.xlu0 %1364  ;;  %v1412_v50 = vpack.c.bf16 %v1399_v9, %v1398_v20  ;;  %v1401_v28 = vmul.f32 %v6808_v48, %v8058_v52 }
 0x83b   :  { %6809 = vrcp.f32 %v1365_v22 }
 0x83c   :  { %6811 = vrcp.f32 %v1359_v12  ;;  %v1411_v12 = vpack.c.bf16 %v1397_v49, %v1396_v23 }
 0x83d   :  { %6813 = vrcp.f32 %v1363_v46 }
 0x83e   :  { %v1431_v44 = vpop.permute.xlu0 %1430  ;;  %v1433_v21 = vpop.permute.xlu1 %1432  ;;  %6815 = vrcp.f32 %v1369_v6 }
 0x83f   :  { %6208 = vmatprep.subr.bf16.mxu0 %v1431_v44  ;;  %6558 = vmatprep.subr.bf16.mxu1 %v1431_v44  ;;  %6817 = vrcp.f32 %v1367_v59 }
 0x840   :  { %6209 = vmatpush3.bf16.msra.mxu0 %v1431_v44  ;;  %6566 = vmatpush3.bf16.msra.mxu1 %v1431_v44  ;;  %6819 = vrcp.f32 %v1371_v39 }
 0x841   :  { %6210 = vmatprep.subr.bf16.mxu0 %v1433_v21  ;;  %6559 = vmatprep.subr.bf16.mxu1 %v1433_v21 }
 0x844   :  { %6211 = vmatpush3.bf16.msra.mxu0 %v1433_v21  ;;  %6567 = vmatpush3.bf16.msra.mxu1 %v1433_v21 }
 0x845   :  { %v6810_v2 = vpop.eup %6809 }
 0x846   :  { %v6812_v46 = vpop.eup %6811  ;;  %v1403_v5 = vmul.f32 %v6810_v2, %v8073_v37 }
 0x847   :  { %6213 = vmatmul.mubr.bf16.vlgmr.msra.gmra.mrb[32].mxu0 %v1411_v12  ;;  %v6814_v24 = vpop.eup %6813  ;;  %v1400_v60 = vmul.f32 %v6812_v46, %v8045_v14 }
 0x848   :  { %6216 = vmatprep.mubr.bf16.mxu0 %v1412_v50  ;;  %v1402_v55 = vmul.f32 %v6814_v24, %v8063_v41  ;;  %v6816_v11 = vpop.eup %6815 }
 0x849   :  { %v1413_v45 = vpack.c.bf16 %v1401_v28, %v1400_v60  ;;  %v6818_v6 = vpop.eup %6817  ;;  %v1405_v59 = vmul.f32 %v6816_v11, %v8067_v33 }
 0x84a   :  { %v1414_v18 = vpack.c.bf16 %v1403_v5, %v1402_v55  ;;  %v1404_v22 = vmul.f32 %v6818_v6, %v8061_v17  ;;  %v6820_v14 = vpop.eup %6819 }
 0x84b   :  { %v1406_v10 = vmul.f32 %v6820_v14, %v8075_v16 }
 0x84c   :  { %v1415_v58 = vpack.c.bf16 %v1405_v59, %v1404_v22 }
 0x84f   :  { %6217 = vmatmul.mubr.bf16.gmra.mrb[36].mxu0 %v1413_v45 }
 0x850   :  { %6220 = vmatprep.mubr.bf16.mxu0 %v1414_v18 }
 0x857   :  { %6221 = vmatmul.mubr.bf16.gmra.mrb[40].mxu0 %v1415_v58 }
 0x86f   :  { %v1373_v52 = vpop.xlane.xlu0 %1372 }
 0x870   :  { %6821 = vrcp.f32 %v1373_v52 }
 0x871   :  { %6823 = vrcp.f32 %v1375_v47  ;;  %v5661_v47 = vld [vmem:[%s10423_s6 + $0x4] sm:$0xf] }
 0x872   :  { %6616 = vmatprep.subr.msk.bf16.mxu0 %vm1573_vm3, %v5661_v47  ;;  %v1575_v16 = vsel %vm1573_vm3, %v5661_v47, 0 }
 0x873   :  { %v1377_v37 = vpop.xlane.xlu0 %1376  ;;  %6229 = vmatpush3.bf16.msra.mxu0 %v1575_v16 }
 0x874   :  { %6825 = vrcp.f32 %v1377_v37 }
 0x87a   :  { %v6822_v41 = vpop.eup %6821 }
 0x87b   :  { %v1407_v44 = vmul.f32 %v6822_v41, %v8085_v38  ;;  %v6824_v30 = vpop.eup %6823  ;;  %v1080_v38 = vld [vmem:[%s10423_s6] sm:$0xf] }
 0x87c   :  { %v1408_v33 = vmul.f32 %v6824_v30, %v8069_v62  ;;  %6617 = vmatprep.subr.msk.bf16.mxu0 %vm1573_vm3, %v1080_v38  ;;  %v1699_v48 = vsel %vm1573_vm3, %v1080_v38, 0 }
 0x87d   :  { %v1416_v21 = vpack.c.bf16 %v1407_v44, %v1406_v10  ;;  %v10496_v44 = vld [vmem:[#allocation5_spill] sm:$0xff] }
 0x87e   :  { %v6826_v49 = vpop.eup %6825 }
 0x87f   :  { %v1409_v17 = vmul.f32 %v6826_v49, %v8088_v43  ;;  %6224 = vmatprep.mubr.bf16.mxu1 %v1416_v21 }
 0x881   :  { %v1417_v39 = vpack.c.bf16 %v1409_v17, %v1408_v33 }
 0x883   :  { %6225 = vmatmul.mubr.bf16.vlgmr.msra.gmra.mrb[48].mxu1 %v1417_v39  ;;  %v10497_v39 = vld [vmem:[#allocation4_spill] sm:$0xff] }
 0x91a   :  { %v6214_v62 = vpop.f32.mrb[32].mxu0 }
 0x91b   :  { %v1476_v43 = vpop.f32.mrb[33].mxu0 }
 0x91c   :  { %v6215_v20 = vpop.f32.mrb[34].mxu0 }
 0x91d   :  { %v1542_v9 = vpack.c.bf16 %v6215_v20, %v6214_v62  ;;  %v1479_v23 = vpop.f32.mrb[35].mxu0  ;;  %v10500_v20 = vld [vmem:[#allocation6_spill] sm:$0xff] }
 0x91e   :  { %v1541_v12 = vpack.c.bf16 %v1479_v23, %v1476_v43  ;;  %v10501_v23 = vld [vmem:[#allocation10_spill] sm:$0xff] }
 0x920   :  { %6230 = vmatprep.mubr.msk.bf16.mxu0 %vm661_vm2, %v1541_v12 }
 0x921   :  { %6231 = vmatmul.mubr.msk.bf16.vlgmr.msra.gmra.mrb[44].mxu0 %vm661_vm2, %v1542_v9 }
 0x922   :  { %v6218_v50 = vpop.f32.mrb[36].mxu0  ;;  %6247 = vmatpush3.bf16.msra.mxu0 %v1699_v48 }
 0x923   :  { %v1492_v2 = vpop.f32.mrb[37].mxu0 }
 0x924   :  { %v6219_v46 = vpop.f32.mrb[38].mxu0 }
 0x925   :  { %v1544_v24 = vpack.c.bf16 %v6219_v46, %v6218_v50  ;;  %v1495_v28 = vpop.f32.mrb[39].mxu0 }
 0x926   :  { %v1543_v5 = vpack.c.bf16 %v1495_v28, %v1492_v2 }
 0x928   :  { %6234 = vmatprep.mubr.msk.bf16.mxu0 %vm661_vm2, %v1543_v5  ;;  %v10504_v5 = vld [vmem:[#allocation7_spill] sm:$0xff] }
 0x929   :  { %6235 = vmatmul.mubr.msk.bf16.gmra.mrb[48].mxu0 %vm661_vm2, %v1544_v24 }
 0x92a   :  { %v6222_v60 = vpop.f32.mrb[40].mxu0 }
 0x92b   :  { %v1508_v55 = vpop.f32.mrb[41].mxu0 }
 0x92c   :  { %v6223_v45 = vpop.f32.mrb[42].mxu0 }
 0x92d   :  { %v1546_v11 = vpack.c.bf16 %v6223_v45, %v6222_v60  ;;  %v1511_v18 = vpop.f32.mrb[43].mxu0 }
 0x92e   :  { %v1545_v6 = vpack.c.bf16 %v1511_v18, %v1508_v55  ;;  %v10506_v18 = vld [vmem:[#allocation9_spill] sm:$0xff] }
 0x930   :  { %6238 = vmatprep.mubr.msk.bf16.mxu0 %vm661_vm2, %v1545_v6 }
 0x931   :  { %6239 = vmatmul.mubr.msk.bf16.gmra.mrb[52].mxu0 %vm661_vm2, %v1546_v11 }
 0x956   :  { %v6226_v59 = vpop.f32.mrb[48].mxu1 }
 0x957   :  { %v1524_v22 = vpop.f32.mrb[49].mxu1 }
 0x958   :  { %v6227_v58 = vpop.f32.mrb[50].mxu1 }
 0x959   :  { %v1548_v52 = vpack.c.bf16 %v6227_v58, %v6226_v59  ;;  %v1527_v37 = vpop.f32.mrb[51].mxu1 }
 0x95a   :  { %v1547_v14 = vpack.c.bf16 %v1527_v37, %v1524_v22  ;;  %v10507_v22 = vld [vmem:[#allocation8_spill] sm:$0xff] }
 0x95c   :  { %6242 = vmatprep.mubr.msk.bf16.mxu0 %vm661_vm2, %v1547_v14 }
 0x95d   :  { %6243 = vmatmul.mubr.msk.bf16.gmra.mrb[56].mxu0 %vm661_vm2, %v1548_v52 }
 0x95e   :  { %6248 = vmatprep.mubr.msk.bf16.mxu0 %vm661_vm2, %v1081_v25 }
 0x965   :  { %6249 = vmatmul.mubr.msk.bf16.vlgmr.msra.gmra.mrb[44].mxu0 %vm661_vm2, %v1082_v40 }
 0x966   :  { %6252 = vmatprep.mubr.msk.bf16.mxu0 %vm661_vm2, %v1083_v1 }
 0x96d   :  { %6253 = vmatmul.mubr.msk.bf16.gmra.mrb[48].mxu0 %vm661_vm2, %v1084_v13 }
 0x96e   :  { %6256 = vmatprep.mubr.msk.bf16.mxu0 %vm661_vm2, %v1085_v15 }
 0x975   :  { %6257 = vmatmul.mubr.msk.bf16.gmra.mrb[52].mxu0 %vm661_vm2, %v1086_v7  ;;  %v10492_v7 = vld [vmem:[#allocation3_spill] sm:$0xff] }
 0x976   :  { %6260 = vmatprep.mubr.msk.bf16.mxu0 %vm661_vm2, %v1087_v57 }
 0x97d   :  { %6261 = vmatmul.mubr.msk.bf16.gmra.mrb[56].mxu0 %vm661_vm2, %v10491_v8  ;;  %v10510_v8 = vld [vmem:[#allocation11_spill] sm:$0xff] }
 0xa38   :  { %v6250_v63 = vpop.f32.mrb[44].mxu0 }
 0xa39   :  { %v1800_v40 = vadd.f32 %v6250_v63, %v7327_v27  ;;  %v1735_v0 = vpop.f32.mrb[45].mxu0 }
 0xa3a   :  { %v1798_v25 = vadd.f32 %v1735_v0, %v7329_v29  ;;  %v6251_v32 = vpop.f32.mrb[46].mxu0 }
 0xa3b   :  { %v8165_v35 = vadd.f32 %v8160_v51, %v1800_v40  ;;  %v1738_v42 = vpop.f32.mrb[47].mxu0  ;;  %v1801_v27 = vadd.f32 %v6251_v32, %v7331_v31 }
 0xa3c   :  { %v8168_v13 = vadd.f32 %v8160_v51, %v1798_v25  ;;  %v1799_v4 = vadd.f32 %v1738_v42, %v7335_v34  ;;  %v10512_v25 = vld [vmem:[#allocation13_spill] sm:$0xff] }
 0xa3d   :  { %v1845_v1 = vsel %vm214_vm1, %v8165_v35, 0.0  ;;  %v8184_v3 = vadd.f32 %v8160_v51, %v1801_v27 }
 0xa3e   :  { %1846 = vadd.xlane.f32.xlu0 %v1845_v1  ;;  %v8175_v26 = vadd.f32 %v8160_v51, %v1799_v4  ;;  %v1839_v36 = vsel %vm214_vm1, %v8168_v13, 0.0  ;;  %v10513_v4 = vld [vmem:[#allocation12_spill] sm:$0xff] }
 0xa3f   :  { %v1848_v49 = vsel %vm214_vm1, %v8184_v3, 0.0 }
 0xa40   :  { %v6254_v19 = vpop.f32.mrb[48].mxu0  ;;  %v1842_v54 = vsel %vm214_vm1, %v8175_v26, 0.0 }
 0xa41   :  { %v1751_v29 = vpop.f32.mrb[49].mxu0  ;;  %v1804_v31 = vadd.f32 %v6254_v19, %v10494_v61 }
 0xa42   :  { %v1802_v56 = vadd.f32 %v1751_v29, %v10492_v7  ;;  %1840 = vadd.xlane.f32.xlu0 %v1839_v36  ;;  %v6255_v15 = vpop.f32.mrb[50].mxu0 }
 0xa43   :  { %v1754_v53 = vpop.f32.mrb[51].mxu0  ;;  %v8192_v10 = vadd.f32 %v8160_v51, %v1804_v31  ;;  %v1805_v47 = vadd.f32 %v6255_v15, %v10497_v39 }
 0xa44   :  { %v8181_v34 = vadd.f32 %v8160_v51, %v1802_v56  ;;  %v1803_v30 = vadd.f32 %v1754_v53, %v10496_v44 }
 0xa45   :  { %10495 = vst [vmem:[#allocation2_spill] sm:$0xff] %v8192_v10  ;;  %v1857_v38 = vsel %vm214_vm1, %v8192_v10, 0.0  ;;  %v8204_v43 = vadd.f32 %v8160_v51, %v1805_v47 }
 0xa46   :  { %10493 = vst [vmem:[#allocation3_spill] sm:$0xff] %v8181_v34  ;;  %1843 = vadd.xlane.f32.xlu0 %v1842_v54  ;;  %v1851_v57 = vsel %vm214_vm1, %v8181_v34, 0.0  ;;  %v8199_v16 = vadd.f32 %v8160_v51, %v1803_v30 }
 0xa47   :  { %1852 = vadd.xlane.f32.xlu1 %v1851_v57  ;;  %10499 = vst [vmem:[#allocation4_spill] sm:$0xff] %v8204_v43  ;;  %v1860_v55 = vsel %vm214_vm1, %v8204_v43, 0.0 }
 0xa48   :  { %v6258_v41 = vpop.f32.mrb[52].mxu0  ;;  %10498 = vst [vmem:[#allocation5_spill] sm:$0xff] %v8199_v16  ;;  %v1854_v50 = vsel %vm214_vm1, %v8199_v16, 0.0 }
 0xa49   :  { %v1767_v21 = vpop.f32.mrb[53].mxu0  ;;  %v1808_v9 = vadd.f32 %v6258_v41, %v10500_v20 }
 0xa4a   :  { %1849 = vadd.xlane.f32.xlu0 %v1848_v49  ;;  %v6259_v33 = vpop.f32.mrb[54].mxu0  ;;  %v1806_v60 = vadd.f32 %v1767_v21, %v10504_v5 }
 0xa4b   :  { %v1770_v17 = vpop.f32.mrb[55].mxu0  ;;  %v8214_v28 = vadd.f32 %v8160_v51, %v1808_v9  ;;  %v1809_v58 = vadd.f32 %v6259_v33, %v10507_v22 }
 0xa4c   :  { %v8222_v11 = vadd.f32 %v8160_v51, %v1806_v60  ;;  %v1807_v6 = vadd.f32 %v1770_v17, %v10506_v18 }
 0xa4d   :  { %10503 = vst [vmem:[#allocation10_spill] sm:$0xff] %v8214_v28  ;;  %v1869_v59 = vsel %vm214_vm1, %v8214_v28, 0.0  ;;  %v8234_v14 = vadd.f32 %v8160_v51, %v1809_v58 }
 0xa4e   :  { %1858 = vadd.xlane.f32.xlu0 %v1857_v38  ;;  %10505 = vst [vmem:[#allocation7_spill] sm:$0xff] %v8222_v11  ;;  %v8229_v52 = vadd.f32 %v8160_v51, %v1807_v6  ;;  %v1863_v37 = vsel %vm214_vm1, %v8222_v11, 0.0 }
 0xa4f   :  { %10509 = vst [vmem:[#allocation8_spill] sm:$0xff] %v8234_v14  ;;  %v1872_v42 = vsel %vm214_vm1, %v8234_v14, 0.0 }
 0xa50   :  { %v6262_v62 = vpop.f32.mrb[56].mxu0  ;;  %10508 = vst [vmem:[#allocation9_spill] sm:$0xff] %v8229_v52  ;;  %v1866_v40 = vsel %vm214_vm1, %v8229_v52, 0.0 }
 0xa51   :  { %v1812_v12 = vadd.f32 %v6262_v62, %v10501_v23  ;;  %v1783_v48 = vpop.f32.mrb[57].mxu0 }
 0xa52   :  { %1855 = vadd.xlane.f32.xlu0 %v1854_v50  ;;  %v6263_v2 = vpop.f32.mrb[58].mxu0  ;;  %v1810_v63 = vadd.f32 %v1783_v48, %v10510_v8 }
 0xa53   :  { %v8211_v46 = vadd.f32 %v8160_v51, %v1812_v12  ;;  %v1786_v24 = vpop.f32.mrb[59].mxu0  ;;  %v1813_v1 = vadd.f32 %v6263_v2, %v10513_v4 }
 0xa54   :  { %v8240_v0 = vadd.f32 %v8160_v51, %v1810_v63  ;;  %v1811_v32 = vadd.f32 %v1786_v24, %v10512_v25 }
 0xa55   :  { %10502 = vst [vmem:[#allocation6_spill] sm:$0xff] %v8211_v46  ;;  %v1881_v45 = vsel %vm214_vm1, %v8211_v46, 0.0  ;;  %v8252_v29 = vadd.f32 %v8160_v51, %v1813_v1 }
 0xa56   :  { %1861 = vadd.xlane.f32.xlu0 %v1860_v55  ;;  %1882 = vadd.xlane.f32.xlu1 %v1881_v45  ;;  %10511 = vst [vmem:[#allocation11_spill] sm:$0xff] %v8240_v0  ;;  %v8247_v19 = vadd.f32 %v8160_v51, %v1811_v32  ;;  %v1875_v27 = vsel %vm214_vm1, %v8240_v0, 0.0 }
 0xa57   :  { %10515 = vst [vmem:[#allocation12_spill] sm:$0xff] %v8252_v29  ;;  %v1884_v7 = vsel %vm214_vm1, %v8252_v29, 0.0 }
 0xa58   :  { %10514 = vst [vmem:[#allocation13_spill] sm:$0xff] %v8247_v19  ;;  %v1878_v36 = vsel %vm214_vm1, %v8247_v19, 0.0 }
 0xa5a   :  { %1870 = vadd.xlane.f32.xlu0 %v1869_v59 }
 0xa5e   :  { %1864 = vadd.xlane.f32.xlu0 %v1863_v37 }
 0xa62   :  { %1867 = vadd.xlane.f32.xlu0 %v1866_v40 }
 0xa66   :  { %1873 = vadd.xlane.f32.xlu0 %v1872_v42 }
 0xa6a   :  { %1876 = vadd.xlane.f32.xlu0 %v1875_v27 }
 0xa6e   :  { %1879 = vadd.xlane.f32.xlu0 %v1878_v36 }
 0xa72   :  { %1885 = vadd.xlane.f32.xlu0 %v1884_v7 }
 0xacb   :  { %v1847_v56 = vpop.xlane.xlu0 %1846 }
 0xacc   :  { %v1889_v15 = vmul.f32 0.03125, %v1847_v56 }
 0xace   :  { %v8259_v31 = vsub.f32 %v8165_v35, %v1889_v15 }
 0xacf   :  { %v1841_v53 = vpop.xlane.xlu0 %1840 }
 0xad0   :  { %v1887_v61 = vmul.f32 0.03125, %v1841_v53  ;;  %v1921_v33 = vmul.f32 %v8259_v31, %v8259_v31 }
 0xad2   :  { %v8262_v54 = vsub.f32 %v8168_v13, %v1887_v61  ;;  %v1941_v20 = vsel %vm214_vm1, %v1921_v33, 0.0 }
 0xad3   :  { %v1844_v51 = vpop.xlane.xlu0 %1843 }
 0xad4   :  { %v1888_v57 = vmul.f32 0.03125, %v1844_v51  ;;  %v1853_v41 = vpop.xlane.xlu1 %1852  ;;  %v1919_v44 = vmul.f32 %v8262_v54, %v8262_v54 }
 0xad5   :  { %v1891_v30 = vmul.f32 0.03125, %v1853_v41 }
 0xad6   :  { %v8267_v21 = vsub.f32 %v8175_v26, %v1888_v57  ;;  %v1935_v49 = vsel %vm214_vm1, %v1919_v44, 0.0 }
 0xad7   :  { %v8273_v17 = vsub.f32 %v8181_v34, %v1891_v30  ;;  %v1850_v39 = vpop.xlane.xlu0 %1849  ;;  %1936 = vadd.xlane.f32.xlu1 %v1935_v49 }
 0xad8   :  { %v1890_v47 = vmul.f32 0.03125, %v1850_v39  ;;  %v1920_v38 = vmul.f32 %v8267_v21, %v8267_v21 }
 0xad9   :  { %v1923_v23 = vmul.f32 %v8273_v17, %v8273_v17 }
 0xada   :  { %v8278_v62 = vsub.f32 %v8184_v3, %v1890_v47  ;;  %v1938_v9 = vsel %vm214_vm1, %v1920_v38, 0.0 }
 0xadb   :  { %v1859_v12 = vpop.xlane.xlu0 %1858  ;;  %1942 = vadd.xlane.f32.xlu1 %v1941_v20  ;;  %1939 = vadd.xlane.f32.xlu0 %v1938_v9  ;;  %v1947_v24 = vsel %vm214_vm1, %v1923_v23, 0.0 }
 0xadc   :  { %v1893_v48 = vmul.f32 0.03125, %v1859_v12  ;;  %v1922_v50 = vmul.f32 %v8278_v62, %v8278_v62 }
 0xade   :  { %v8287_v2 = vsub.f32 %v8192_v10, %v1893_v48  ;;  %v1944_v5 = vsel %vm214_vm1, %v1922_v50, 0.0 }
 0xadf   :  { %v1856_v60 = vpop.xlane.xlu0 %1855  ;;  %1948 = vadd.xlane.f32.xlu1 %v1947_v24  ;;  %1945 = vadd.xlane.f32.xlu0 %v1944_v5  ;;  %v6645_v5 = vld [vmem:[%s10425_s11] sm:$0xff]  }
 0xae0   :  { %v1892_v55 = vmul.f32 0.03125, %v1856_v60  ;;  %v1925_v45 = vmul.f32 %v8287_v2, %v8287_v2  ;;  %6264 = vmatprep.subr.bf16.mxu1 %v6645_v5 }
 0xae1   :  { %6265 = vmatpush3.bf16.msra.mxu1 %v6645_v5  ;;  %v8364_v5 = vld [vmem:[%s10426_s9] ss:$0 sm:$0xff] }
 0xae2   :  { %v8294_v18 = vsub.f32 %v8199_v16, %v1892_v55  ;;  %v1953_v6 = vsel %vm214_vm1, %v1925_v45, 0.0 }
 0xae3   :  { %v1862_v59 = vpop.xlane.xlu0 %1861  ;;  %1954 = vadd.xlane.f32.xlu1 %v1953_v6  ;;  %v1883_v51 = vpop.xlane.xlu1 %1882 }
 0xae4   :  { %v1894_v22 = vmul.f32 0.03125, %v1862_v59  ;;  %v1924_v58 = vmul.f32 %v8294_v18, %v8294_v18  ;;  %v1901_v30 = vmul.f32 0.03125, %v1883_v51  ;;  %v6646_v59 = vld [vmem:[%s10425_s11 + $0x8] sm:$0xff]  }
 0xae5   :  { %6266 = vmatprep.subr.bf16.mxu1 %v6646_v59 }
 0xae6   :  { %v8300_v37 = vsub.f32 %v8204_v43, %v1894_v22  ;;  %v1950_v8 = vsel %vm214_vm1, %v1924_v58, 0.0  ;;  %v8330_v9 = vsub.f32 %v8211_v46, %v1901_v30  ;;  %6267 = vmatpush3.bf16.msra.mxu1 %v6646_v59 }
 0xae7   :  { %v1871_v63 = vpop.xlane.xlu0 %1870  ;;  %1951 = vadd.xlane.f32.xlu0 %v1950_v8 }
 0xae8   :  { %v1926_v40 = vmul.f32 %v8300_v37, %v8300_v37  ;;  %v1897_v25 = vmul.f32 0.03125, %v1871_v63  ;;  %v1933_v45 = vmul.f32 %v8330_v9, %v8330_v9 }
 0xaea   :  { %v1956_v32 = vsel %vm214_vm1, %v1926_v40, 0.0  ;;  %v8307_v1 = vsub.f32 %v8214_v28, %v1897_v25  ;;  %v1977_v63 = vsel %vm214_vm1, %v1933_v45, 0.0 }
 0xaeb   :  { %v1865_v42 = vpop.xlane.xlu0 %1864  ;;  %1957 = vadd.xlane.f32.xlu0 %v1956_v32 }
 0xaec   :  { %v1895_v4 = vmul.f32 0.03125, %v1865_v42  ;;  %v1929_v61 = vmul.f32 %v8307_v1, %v8307_v1 }
 0xaee   :  { %v8310_v27 = vsub.f32 %v8222_v11, %v1895_v4  ;;  %v1965_v33 = vsel %vm214_vm1, %v1929_v61, 0.0 }
 0xaef   :  { %v1868_v36 = vpop.xlane.xlu0 %1867 }
 0xaf0   :  { %v1896_v7 = vmul.f32 0.03125, %v1868_v36  ;;  %v1927_v56 = vmul.f32 %v8310_v27, %v8310_v27 }
 0xaf2   :  { %v8315_v15 = vsub.f32 %v8229_v52, %v1896_v7  ;;  %v1959_v53 = vsel %vm214_vm1, %v1927_v56, 0.0 }
 0xaf3   :  { %v1874_v57 = vpop.xlane.xlu0 %1873  ;;  %1960 = vadd.xlane.f32.xlu1 %v1959_v53 }
 0xaf4   :  { %v1898_v41 = vmul.f32 0.03125, %v1874_v57  ;;  %v1928_v44 = vmul.f32 %v8315_v15, %v8315_v15 }
 0xaf6   :  { %v8323_v49 = vsub.f32 %v8234_v14, %v1898_v41  ;;  %v1962_v39 = vsel %vm214_vm1, %v1928_v44, 0.0 }
 0xaf7   :  { %1966 = vadd.xlane.f32.xlu1 %v1965_v33  ;;  %v1877_v47 = vpop.xlane.xlu0 %1876  ;;  %1963 = vadd.xlane.f32.xlu0 %v1962_v39 }
 0xaf8   :  { %v1899_v38 = vmul.f32 0.03125, %v1877_v47  ;;  %v1930_v20 = vmul.f32 %v8323_v49, %v8323_v49 }
 0xafa   :  { %v8333_v23 = vsub.f32 %v8240_v0, %v1899_v38  ;;  %v1968_v12 = vsel %vm214_vm1, %v1930_v20, 0.0 }
 0xafb   :  { %1969 = vadd.xlane.f32.xlu0 %v1968_v12  ;;  %v1880_v48 = vpop.xlane.xlu0 %1879 }
 0xafc   :  { %v1900_v50 = vmul.f32 0.03125, %v1880_v48  ;;  %v1931_v24 = vmul.f32 %v8333_v23, %v8333_v23 }
 0xafe   :  { %v8342_v60 = vsub.f32 %v8247_v19, %v1900_v50  ;;  %v1971_v55 = vsel %vm214_vm1, %v1931_v24, 0.0 }
 0xaff   :  { %1972 = vadd.xlane.f32.xlu1 %v1971_v55  ;;  %v1886_v6 = vpop.xlane.xlu0 %1885 }
 0xb00   :  { %v1902_v22 = vmul.f32 0.03125, %v1886_v6  ;;  %v1932_v58 = vmul.f32 %v8342_v60, %v8342_v60 }
 0xb02   :  { %v8353_v8 = vsub.f32 %v8252_v29, %v1902_v22  ;;  %v1974_v40 = vsel %vm214_vm1, %v1932_v58, 0.0 }
 0xb03   :  { %1978 = vadd.xlane.f32.xlu1 %v1977_v63  ;;  %1975 = vadd.xlane.f32.xlu0 %v1974_v40 }
 0xb04   :  { %v1934_v25 = vmul.f32 %v8353_v8, %v8353_v8 }
 0xb06   :  { %v1980_v32 = vsel %vm214_vm1, %v1934_v25, 0.0 }
 0xb07   :  { %1981 = vadd.xlane.f32.xlu0 %v1980_v32 }
 0xb64   :  { %v1937_v42 = vpop.xlane.xlu1 %1936 }
 0xb65   :  { %v1983_v4 = vmul.f32 0.03125, %v1937_v42 }
 0xb67   :  { %v1999_v36 = vadd.f32 1e-05, %v1983_v4 }
 0xb68   :  { %v1943_v7 = vpop.xlane.xlu1 %1942  ;;  %v1940_v56 = vpop.xlane.xlu0 %1939 }
 0xb69   :  { %6827 = vrsqrt.f32 %v1999_v36  ;;  %v1985_v53 = vmul.f32 0.03125, %v1943_v7  ;;  %v1984_v61 = vmul.f32 0.03125, %v1940_v56 }
 0xb6b   :  { %v2001_v51 = vadd.f32 1e-05, %v1985_v53  ;;  %v2000_v57 = vadd.f32 1e-05, %v1984_v61 }
 0xb6c   :  { %v1949_v41 = vpop.xlane.xlu1 %1948  ;;  %v1946_v44 = vpop.xlane.xlu0 %1945 }
 0xb6d   :  { %6829 = vrsqrt.f32 %v2001_v51  ;;  %v1987_v30 = vmul.f32 0.03125, %v1949_v41  ;;  %v1986_v33 = vmul.f32 0.03125, %v1946_v44 }
 0xb6e   :  { %6831 = vrsqrt.f32 %v2000_v57 }
 0xb6f   :  { %v2003_v39 = vadd.f32 1e-05, %v1987_v30  ;;  %v2002_v47 = vadd.f32 1e-05, %v1986_v33 }
 0xb70   :  { %v1955_v38 = vpop.xlane.xlu1 %1954 }
 0xb71   :  { %v1989_v20 = vmul.f32 0.03125, %v1955_v38  ;;  %6833 = vrsqrt.f32 %v2002_v47 }
 0xb72   :  { %6835 = vrsqrt.f32 %v2003_v39 }
 0xb73   :  { %v6828_v12 = vpop.eup %6827  ;;  %v2005_v48 = vadd.f32 1e-05, %v1989_v20 }
 0xb74   :  { %v1952_v50 = vpop.xlane.xlu0 %1951  ;;  %v2031_v24 = vmul.f32 %v6828_v12, %v8262_v54  ;;  %v8371_v54 = vld [vmem:[%s10427_s10] ss:$0 sm:$0xff] }
 0xb75   :  { %v1988_v55 = vmul.f32 0.03125, %v1952_v50  ;;  %6837 = vrsqrt.f32 %v2005_v48 }
 0xb76   :  { %v2053_v58 = vmul.f32 %v8364_v5, %v2031_v24 }
 0xb77   :  { %v6830_v45 = vpop.eup %6829  ;;  %v2004_v6 = vadd.f32 1e-05, %v1988_v55 }
 0xb78   :  { %v6832_v59 = vpop.eup %6831  ;;  %v1958_v22 = vpop.xlane.xlu0 %1957  ;;  %v2033_v63 = vmul.f32 %v6830_v45, %v8259_v31  ;;  %v2075_v36 = vadd.f32 %v8371_v54, %v2053_v58 }
 0xb79   :  { %6839 = vrsqrt.f32 %v2004_v6  ;;  %v1990_v40 = vmul.f32 0.03125, %v1958_v22  ;;  %v2032_v25 = vmul.f32 %v6832_v59, %v8267_v21 }
 0xb7a   :  { %v2055_v56 = vmul.f32 %v8364_v5, %v2033_v63 }
 0xb7b   :  { %v2006_v32 = vadd.f32 1e-05, %v1990_v40  ;;  %v2054_v42 = vmul.f32 %v8364_v5, %v2032_v25  ;;  %v6834_v4 = vpop.eup %6833 }
 0xb7c   :  { %v6836_v7 = vpop.eup %6835  ;;  %v2034_v31 = vmul.f32 %v6834_v4, %v8278_v62  ;;  %v2077_v30 = vadd.f32 %v8371_v54, %v2055_v56 }
 0xb7d   :  { %6841 = vrsqrt.f32 %v2006_v32  ;;  %v2076_v53 = vadd.f32 %v8371_v54, %v2054_v42  ;;  %v2035_v21 = vmul.f32 %v6836_v7, %v8273_v17 }
 0xb7e   :  { %v2056_v61 = vmul.f32 %v8364_v5, %v2034_v31 }
 0xb7f   :  { %v2095_v51 = vpack.c.bf16 %v2076_v53, %v2075_v36  ;;  %v6838_v41 = vpop.eup %6837  ;;  %v2057_v48 = vmul.f32 %v8364_v5, %v2035_v21 }
 0xb80   :  { %v1961_v57 = vpop.xlane.xlu1 %1960  ;;  %v2078_v33 = vadd.f32 %v8371_v54, %v2056_v61  ;;  %v2037_v50 = vmul.f32 %v6838_v41, %v8287_v2 }
 0xb81   :  { %v1991_v44 = vmul.f32 0.03125, %v1961_v57  ;;  %6268 = vmatprep.mubr.msk.bf16.mxu1 %vm214_vm1, %v2095_v51  ;;  %v2079_v58 = vadd.f32 %v8371_v54, %v2057_v48 }
 0xb82   :  { %v2096_v62 = vpack.c.bf16 %v2078_v33, %v2077_v30  ;;  %v2059_v40 = vmul.f32 %v8364_v5, %v2037_v50 }
 0xb83   :  { %v6840_v39 = vpop.eup %6839  ;;  %v2007_v47 = vadd.f32 1e-05, %v1991_v44 }
 0xb84   :  { %v1967_v38 = vpop.xlane.xlu1 %1966  ;;  %v1964_v20 = vpop.xlane.xlu0 %1963  ;;  %v2036_v12 = vmul.f32 %v6840_v39, %v8294_v18  ;;  %6269 = vmatmul.mubr.msk.bf16.vlgmr.msra.gmra.mrb[52].mxu1 %vm214_vm1, %v2096_v62  ;;  %v2081_v36 = vadd.f32 %v8371_v54, %v2059_v40 }
 0xb85   :  { %6843 = vrsqrt.f32 %v2007_v47  ;;  %v1993_v17 = vmul.f32 0.03125, %v1967_v38  ;;  %v1992_v24 = vmul.f32 0.03125, %v1964_v20 }
 0xb86   :  { %v2058_v55 = vmul.f32 %v8364_v5, %v2036_v12 }
 0xb87   :  { %v6842_v45 = vpop.eup %6841  ;;  %v2009_v6 = vadd.f32 1e-05, %v1993_v17  ;;  %v2008_v59 = vadd.f32 1e-05, %v1992_v24 }
 0xb88   :  { %v1970_v22 = vpop.xlane.xlu0 %1969  ;;  %v2080_v63 = vadd.f32 %v8371_v54, %v2058_v55  ;;  %v2038_v18 = vmul.f32 %v6842_v45, %v8300_v37 }
 0xb89   :  { %6845 = vrsqrt.f32 %v2009_v6  ;;  %v1994_v2 = vmul.f32 0.03125, %v1970_v22 }
 0xb8a   :  { %6847 = vrsqrt.f32 %v2008_v59  ;;  %v2097_v25 = vpack.c.bf16 %v2080_v63, %v2079_v58  ;;  %v2060_v32 = vmul.f32 %v8364_v5, %v2038_v18 }
 0xb8b   :  { %v2010_v42 = vadd.f32 1e-05, %v1994_v2 }
 0xb8c   :  { %v1973_v4 = vpop.xlane.xlu1 %1972  ;;  %6272 = vmatprep.mubr.msk.bf16.mxu1 %vm214_vm1, %v2097_v25  ;;  %v2082_v7 = vadd.f32 %v8371_v54, %v2060_v32 }
 0xb8d   :  { %6849 = vrsqrt.f32 %v2010_v42  ;;  %v1995_v56 = vmul.f32 0.03125, %v1973_v4 }
 0xb8e   :  { %v2098_v31 = vpack.c.bf16 %v2082_v7, %v2081_v36 }
 0xb8f   :  { %v6844_v37 = vpop.eup %6843  ;;  %v2011_v53 = vadd.f32 1e-05, %v1995_v56 }
 0xb90   :  { %v1979_v61 = vpop.xlane.xlu1 %1978  ;;  %6273 = vmatmul.mubr.msk.bf16.gmra.mrb[56].mxu1 %vm214_vm1, %v2098_v31  ;;  %v1976_v51 = vpop.xlane.xlu0 %1975  ;;  %v2039_v41 = vmul.f32 %v6844_v37, %v8310_v27 }
 0xb91   :  { %6851 = vrsqrt.f32 %v2011_v53  ;;  %v1997_v57 = vmul.f32 0.03125, %v1979_v61  ;;  %v1996_v21 = vmul.f32 0.03125, %v1976_v51  ;;  %v6650_v53 = vld [vmem:[%s10428_s13 + $0x18] sm:$0xff]   ;;  %v6651_v61 = vld [vmem:[%s10428_s13 + $0x20] sm:$0xff]   ;;  %v6652_v51 = vld [vmem:[%s10428_s13 + $0x28] sm:$0xff]  }
 0xb92   :  { %v2061_v12 = vmul.f32 %v8364_v5, %v2039_v41  ;;  %v8453_v41 = vld [vmem:[%s10429_s12] ss:$0 sm:$0xff] }
 0xb93   :  { %v6846_v44 = vpop.eup %6845  ;;  %v2013_v30 = vadd.f32 1e-05, %v1997_v57  ;;  %v2012_v33 = vadd.f32 1e-05, %v1996_v21  ;;  %v6653_v57 = vld [vmem:[%s10428_s13 + $0x30] sm:$0xff]   ;;  %v6654_v21 = vld [vmem:[%s10428_s13 + $0x38] sm:$0xff]  }
 0xb94   :  { %v6848_v39 = vpop.eup %6847  ;;  %v1982_v47 = vpop.xlane.xlu0 %1981  ;;  %v2041_v62 = vmul.f32 %v6846_v44, %v8307_v1  ;;  %v2083_v55 = vadd.f32 %v8371_v54, %v2061_v12 }
 0xb95   :  { %6853 = vrsqrt.f32 %v2013_v30  ;;  %v1998_v38 = vmul.f32 0.03125, %v1982_v47  ;;  %v2040_v20 = vmul.f32 %v6848_v39, %v8315_v15 }
 0xb96   :  { %6855 = vrsqrt.f32 %v2012_v33  ;;  %v2063_v24 = vmul.f32 %v8364_v5, %v2041_v62 }
 0xb97   :  { %v6850_v48 = vpop.eup %6849  ;;  %v2014_v50 = vadd.f32 1e-05, %v1998_v38  ;;  %v2062_v17 = vmul.f32 %v8364_v5, %v2040_v20 }
 0xb98   :  { %v2042_v27 = vmul.f32 %v6850_v48, %v8323_v49  ;;  %v2085_v59 = vadd.f32 %v8371_v54, %v2063_v24 }
 0xb99   :  { %6857 = vrsqrt.f32 %v2014_v50  ;;  %v2084_v1 = vadd.f32 %v8371_v54, %v2062_v17 }
 0xb9a   :  { %v2064_v45 = vmul.f32 %v8364_v5, %v2042_v27 }
 0xb9b   :  { %v6852_v6 = vpop.eup %6851  ;;  %v2099_v15 = vpack.c.bf16 %v2084_v1, %v2083_v55 }
 0xb9c   :  { %v2086_v22 = vadd.f32 %v8371_v54, %v2064_v45  ;;  %v2043_v58 = vmul.f32 %v6852_v6, %v8333_v23 }
 0xb9d   :  { %6276 = vmatprep.mubr.msk.bf16.mxu1 %vm214_vm1, %v2099_v15 }
 0xb9e   :  { %v2100_v49 = vpack.c.bf16 %v2086_v22, %v2085_v59  ;;  %v2065_v25 = vmul.f32 %v8364_v5, %v2043_v58 }
 0xb9f   :  { %v6854_v63 = vpop.eup %6853 }
 0xba0   :  { %v6856_v18 = vpop.eup %6855  ;;  %6277 = vmatmul.mubr.msk.bf16.gmra.mrb[60].mxu1 %vm214_vm1, %v2100_v49  ;;  %v2045_v40 = vmul.f32 %v6854_v63, %v8330_v9  ;;  %v2087_v23 = vadd.f32 %v8371_v54, %v2065_v25 }
 0xba1   :  { %v2044_v2 = vmul.f32 %v6856_v18, %v8342_v60 }
 0xba2   :  { %v2067_v36 = vmul.f32 %v8364_v5, %v2045_v40 }
 0xba3   :  { %v6858_v32 = vpop.eup %6857  ;;  %v2066_v42 = vmul.f32 %v8364_v5, %v2044_v2 }
 0xba4   :  { %v2046_v4 = vmul.f32 %v6858_v32, %v8353_v8  ;;  %v2089_v9 = vadd.f32 %v8371_v54, %v2067_v36  ;;  %v6647_v8 = vld [vmem:[%s10428_s13] sm:$0xff]  }
 0xba5   :  { %v2088_v7 = vadd.f32 %v8371_v54, %v2066_v42  ;;  %6284 = vmatprep.subr.bf16.mxu1 %v6647_v8 }
 0xba6   :  { %v2068_v56 = vmul.f32 %v8364_v5, %v2046_v4  ;;  %6285 = vmatpush3.bf16.msra.mxu1 %v6647_v8  ;;  %v6648_v5 = vld [vmem:[%s10428_s13 + $0x8] sm:$0xff]  }
 0xba7   :  { %v2101_v31 = vpack.c.bf16 %v2088_v7, %v2087_v23  ;;  %6286 = vmatprep.subr.bf16.mxu1 %v6648_v5 }
 0xba8   :  { %v2090_v60 = vadd.f32 %v8371_v54, %v2068_v56  ;;  %v6649_v54 = vld [vmem:[%s10428_s13 + $0x10] sm:$0xff]  }
 0xba9   :  { %6280 = vmatprep.mubr.msk.bf16.mxu1 %vm214_vm1, %v2101_v31 }
 0xbaa   :  { %v2102_v37 = vpack.c.bf16 %v2090_v60, %v2089_v9  ;;  %6287 = vmatpush3.bf16.msra.mxu1 %v6648_v5 }
 0xbab   :  { %6288 = vmatprep.subr.bf16.mxu1 %v6649_v54 }
 0xbac   :  { %6281 = vmatmul.mubr.msk.bf16.gmra.mrb[64].mxu1 %vm214_vm1, %v2102_v37 }
 0xbae   :  { %6289 = vmatpush3.bf16.msra.mxu1 %v6649_v54 }
 0xbaf   :  { %6290 = vmatprep.subr.bf16.mxu1 %v6650_v53 }
 0xbb2   :  { %6291 = vmatpush3.bf16.msra.mxu1 %v6650_v53 }
 0xbb3   :  { %6292 = vmatprep.subr.bf16.mxu1 %v6651_v61 }
 0xbb6   :  { %6293 = vmatpush3.bf16.msra.mxu1 %v6651_v61 }
 0xbb7   :  { %6294 = vmatprep.subr.bf16.mxu1 %v6652_v51 }
 0xbba   :  { %6295 = vmatpush3.bf16.msra.mxu1 %v6652_v51 }
 0xbbb   :  { %6296 = vmatprep.subr.bf16.mxu1 %v6653_v57 }
 0xbbe   :  { %6297 = vmatpush3.bf16.msra.mxu1 %v6653_v57 }
 0xbbf   :  { %6298 = vmatprep.subr.bf16.mxu1 %v6654_v21 }
 0xbc2   :  { %6299 = vmatpush3.bf16.msra.mxu1 %v6654_v21 }
 0xc57   :  { %v6270_v44 = vpop.f32.mrb[52].mxu1 }
 0xc58   :  { %v8456_v30 = vadd.f32 %v6270_v44, %v8453_v41  ;;  %v2180_v33 = vpop.f32.mrb[53].mxu1 }
 0xc59   :  { %v8459_v39 = vadd.f32 %v8453_v41, %v2180_v33  ;;  %v6271_v47 = vpop.f32.mrb[54].mxu1 }
 0xc5a   :  { %v8462_v62 = vmul.f32 0.70710677, %v8456_v30  ;;  %v8465_v38 = vadd.f32 %v6271_v47, %v8453_v41  ;;  %v2183_v20 = vpop.f32.mrb[55].mxu1 }
 0xc5b   :  { %v8468_v12 = vmul.f32 0.70710677, %v8459_v39  ;;  %v8471_v48 = vadd.f32 %v8453_v41, %v2183_v20 }
 0xc5c   :  { %v2277_v50 = vand.u32 2147483647, %v8462_v62  ;;  %v8475_v17 = vmul.f32 0.70710677, %v8465_v38  ;;  %vm2597_vm4 = vcmp.lt.f32.partialorder %v8462_v62, 0.0 }
 0xc5d   :  { %v2275_v27 = vand.u32 2147483647, %v8468_v12  ;;  %v8479_v24 = vmul.f32 0.70710677, %v8471_v48  ;;  %vm2595_vm7 = vcmp.lt.f32.partialorder %v8468_v12, 0.0 }
 0xc5e   :  { %v2293_v55 = vmul.f32 0.3275911, %v2277_v50  ;;  %v2278_v1 = vand.u32 2147483647, %v8475_v17  ;;  %v2501_v40 = vsub.f32 0.0, %v2277_v50  ;;  %vm2598_vm5 = vcmp.lt.f32.partialorder %v8475_v17, 0.0 }
 0xc5f   :  { %v2291_v45 = vmul.f32 0.3275911, %v2275_v27  ;;  %v2276_v6 = vand.u32 2147483647, %v8479_v24  ;;  %v2499_v7 = vsub.f32 0.0, %v2275_v27  ;;  %vm2596_vm6 = vcmp.lt.f32.partialorder %v8479_v24, 0.0 }
 0xc60   :  { %v2309_v15 = vadd.f32 1.0, %v2293_v55  ;;  %v2294_v59 = vmul.f32 0.3275911, %v2278_v1  ;;  %v2517_v9 = vmul.f32 %v2501_v40, %v2277_v50  ;;  %v2502_v8 = vsub.f32 0.0, %v2278_v1 }
 0xc61   :  { %v2307_v22 = vadd.f32 1.0, %v2291_v45  ;;  %v2292_v58 = vmul.f32 0.3275911, %v2276_v6  ;;  %v2515_v61 = vmul.f32 %v2499_v7, %v2275_v27  ;;  %v2500_v33 = vsub.f32 0.0, %v2276_v6 }
 0xc62   :  { %6859 = vrcp.f32 %v2309_v15  ;;  %v2310_v49 = vadd.f32 1.0, %v2294_v59  ;;  %v2535_v44 = vmul.f32 1.442695, %v2517_v9  ;;  %v2518_v45 = vmul.f32 %v2502_v8, %v2278_v1 }
 0xc63   :  { %v6274_v63 = vpop.f32.mrb[56].mxu1  ;;  %6861 = vrcp.f32 %v2307_v22  ;;  %v2308_v2 = vadd.f32 1.0, %v2292_v58  ;;  %v2531_v58 = vmul.f32 1.442695, %v2515_v61  ;;  %v2516_v40 = vmul.f32 %v2500_v33, %v2276_v6 }
 0xc64   :  { %v2196_v18 = vpop.f32.mrb[57].mxu1  ;;  %v8484_v25 = vadd.f32 %v6274_v63, %v8453_v41  ;;  %6863 = vrcp.f32 %v2310_v49 }
 0xc65   :  { %v8487_v32 = vadd.f32 %v8453_v41, %v2196_v18  ;;  %v6275_v42 = vpop.f32.mrb[58].mxu1  ;;  %6865 = vrcp.f32 %v2308_v2  ;;  %v2533_v6 = vmul.f32 1.442695, %v2516_v40 }
 0xc66   :  { %v8490_v4 = vadd.f32 %v6275_v42, %v8453_v41  ;;  %v2199_v36 = vpop.f32.mrb[59].mxu1  ;;  %v8493_v23 = vmul.f32 0.70710677, %v8484_v25  ;;  %v2537_v42 = vmul.f32 1.442695, %v2518_v45 }
 0xc67   :  { %v8496_v56 = vmul.f32 0.70710677, %v8487_v32  ;;  %v8503_v37 = vadd.f32 %v8453_v41, %v2199_v36 }
 0xc68   :  { %v8499_v31 = vmul.f32 0.70710677, %v8490_v4  ;;  %v2281_v60 = vand.u32 2147483647, %v8493_v23  ;;  %vm2601_vm8 = vcmp.lt.f32.partialorder %v8493_v23, 0.0 }
 0xc69   :  { %v2279_v5 = vand.u32 2147483647, %v8496_v56  ;;  %v8513_v20 = vmul.f32 0.70710677, %v8503_v37  ;;  %vm2599_vm10 = vcmp.lt.f32.partialorder %v8496_v56, 0.0 }
 0xc6a   :  { %v8507_v54 = vand.u32 2147483647, %v8499_v31  ;;  %v2297_v53 = vmul.f32 0.3275911, %v2281_v60  ;;  %v2505_v8 = vsub.f32 0.0, %v2281_v60  ;;  %vm2602_vm9 = vcmp.lt.f32.partialorder %v8499_v31, 0.0 }
 0xc6b   :  { %v2295_v51 = vmul.f32 0.3275911, %v2279_v5  ;;  %v8520_v49 = vand.u32 2147483647, %v8513_v20  ;;  %vm2600_vm11 = vcmp.lt.f32.partialorder %v8513_v20, 0.0 }
 0xc6c   :  { %v2298_v57 = vmul.f32 0.3275911, %v8507_v54  ;;  %v8510_v21 = vpop.eup %6859  ;;  %v2313_v47 = vadd.f32 1.0, %v2297_v53 }
 0xc6d   :  { %v8515_v50 = vpop.eup %6861  ;;  %v2357_v55 = vmul.f32 1.0614054, %v8510_v21  ;;  %v2311_v15 = vadd.f32 1.0, %v2295_v51  ;;  %v2296_v36 = vmul.f32 0.3275911, %v8520_v49 }
 0xc6e   :  { %v2355_v59 = vmul.f32 1.0614054, %v8515_v50  ;;  %6867 = vrcp.f32 %v2313_v47  ;;  %v2314_v27 = vadd.f32 1.0, %v2298_v57  ;;  %v8522_v63 = vpop.eup %6863 }
 0xc6f   :  { %v2373_v22 = vadd.f32 -1.4531521, %v2357_v55  ;;  %6869 = vrcp.f32 %v2311_v15  ;;  %v2358_v1 = vmul.f32 1.0614054, %v8522_v63  ;;  %v8527_v7 = vpop.eup %6865  ;;  %v2312_v33 = vadd.f32 1.0, %v2296_v36 }
 0xc70   :  { %6871 = vpow2.f32 %v2535_v44  ;;  %v2371_v18 = vadd.f32 -1.4531521, %v2355_v59  ;;  %v2356_v57 = vmul.f32 1.0614054, %v8527_v7  ;;  %v2503_v44 = vsub.f32 0.0, %v2279_v5 }
 0xc71   :  { %v2389_v2 = vmul.f32 %v8510_v21, %v2373_v22  ;;  %6873 = vrcp.f32 %v2314_v27  ;;  %v2374_v51 = vadd.f32 -1.4531521, %v2358_v1 }
 0xc72   :  { %v2387_v9 = vmul.f32 %v8515_v50, %v2371_v18  ;;  %6875 = vpow2.f32 %v2531_v58  ;;  %v2372_v59 = vadd.f32 -1.4531521, %v2356_v57  ;;  %v2521_v58 = vmul.f32 %v2505_v8, %v2281_v60 }
 0xc73   :  { %v6278_v53 = vpop.f32.mrb[60].mxu1  ;;  %v2405_v61 = vadd.f32 1.4214138, %v2389_v2  ;;  %v2390_v15 = vmul.f32 %v8522_v63, %v2374_v51  ;;  %6877 = vpow2.f32 %v2537_v42  ;;  %v2519_v42 = vmul.f32 %v2503_v44, %v2279_v5 }
 0xc74   :  { %v8532_v47 = vadd.f32 %v6278_v53, %v8453_v41  ;;  %v8534_v55 = vpop.f32.mrb[61].mxu1  ;;  %v2403_v22 = vadd.f32 1.4214138, %v2387_v9  ;;  %6879 = vrcp.f32 %v2312_v33  ;;  %v2388_v1 = vmul.f32 %v8527_v7, %v2372_v59 }
 0xc75   :  { %v2421_v45 = vmul.f32 %v8510_v21, %v2405_v61  ;;  %v8538_v27 = vpop.f32.mrb[62].mxu1  ;;  %v2406_v2 = vadd.f32 1.4214138, %v2390_v15  ;;  %v8549_v61 = vmul.f32 0.5, %v8456_v30  ;;  %6881 = vpow2.f32 %v2533_v6 }
 0xc76   :  { %v8540_v18 = vpop.f32.mrb[63].mxu1  ;;  %v8544_v36 = vmul.f32 0.70710677, %v8532_v47  ;;  %v2506_v9 = vsub.f32 0.0, %v8507_v54  ;;  %v2404_v57 = vadd.f32 1.4214138, %v2388_v1  ;;  %v2419_v15 = vmul.f32 %v8515_v50, %v2403_v22 }
 0xc77   :  { %v2437_v40 = vadd.f32 -0.28449672, %v2421_v45  ;;  %v2422_v51 = vmul.f32 %v8522_v63, %v2406_v2  ;;  %v2543_v59 = vmul.f32 1.442695, %v2521_v58  ;;  %v2539_v1 = vmul.f32 1.442695, %v2519_v42 }
 0xc78   :  { %v8546_v53 = vpop.eup %6867  ;;  %v8560_v6 = vand.u32 2147483647, %v8544_v36  ;;  %v2420_v19 = vmul.f32 %v8527_v7, %v2404_v57  ;;  %v2522_v0 = vmul.f32 %v2506_v9, %v8507_v54  ;;  %vm2605_vm12 = vcmp.lt.f32.partialorder %v8544_v36, 0.0 }
 0xc79   :  { %v8552_v60 = vpop.eup %6869  ;;  %v2453_v8 = vmul.f32 %v8510_v21, %v2437_v40  ;;  %v2361_v33 = vmul.f32 1.0614054, %v8546_v53  ;;  %v2438_v44 = vadd.f32 -0.28449672, %v2422_v51  ;;  %6883 = vpow2.f32 %v2543_v59 }
 0xc7a   :  { %v6872_v45 = vpop.eup %6871  ;;  %v2359_v30 = vmul.f32 1.0614054, %v8552_v60  ;;  %v2301_v22 = vmul.f32 0.3275911, %v8560_v6  ;;  %v2436_v51 = vadd.f32 -0.28449672, %v2420_v19 }
 0xc7b   :  { %v2469_v5 = vadd.f32 0.2548296, %v2453_v8  ;;  %v2377_v29 = vadd.f32 -1.4531521, %v2361_v33  ;;  %v8563_v40 = vpop.eup %6873  ;;  %v2454_v8 = vmul.f32 %v8522_v63, %v2438_v44  ;;  %v2435_v33 = vadd.f32 -0.28449672, %v2419_v15 }
 0xc7c   :  { %v2375_v2 = vadd.f32 -1.4531521, %v2359_v30  ;;  %v8568_v58 = vpop.eup %6875  ;;  %v2362_v14 = vmul.f32 1.0614054, %v8563_v40  ;;  %v2317_v30 = vadd.f32 1.0, %v2301_v22  ;;  %v2452_v22 = vmul.f32 %v8527_v7, %v2436_v51 }
 0xc7d   :  { %v2485_v46 = vmul.f32 %v8510_v21, %v2469_v5  ;;  %v2393_v57 = vmul.f32 %v8546_v53, %v2377_v29  ;;  %v6878_v54 = vpop.eup %6877  ;;  %v2470_v11 = vadd.f32 0.2548296, %v2454_v8  ;;  %v2504_v29 = vsub.f32 0.0, %v8520_v49 }
 0xc7e   :  { %v2391_v52 = vmul.f32 %v8552_v60, %v2375_v2  ;;  %v8579_v21 = vpop.eup %6879  ;;  %v2378_v5 = vadd.f32 -1.4531521, %v2362_v14  ;;  %6885 = vrcp.f32 %v2317_v30  ;;  %v2545_v14 = vmul.f32 1.442695, %v2522_v0 }
 0xc7f   :  { %v8575_v42 = vpop.f32.mrb[64].mxu1  ;;  %v2565_v9 = vmul.f32 %v6872_v45, %v2485_v46  ;;  %v2409_v28 = vadd.f32 1.4214138, %v2393_v57  ;;  %v2486_v2 = vmul.f32 %v8522_v63, %v2470_v11  ;;  %v6882_v59 = vpop.eup %6881  ;;  %6887 = vpow2.f32 %v2539_v1 }
 0xc80   :  { %v8577_v16 = vpop.f32.mrb[65].mxu1  ;;  %v2407_v19 = vadd.f32 1.4214138, %v2391_v52  ;;  %v2394_v52 = vmul.f32 %v8563_v40, %v2378_v5  ;;  %v2451_v30 = vmul.f32 %v8515_v50, %v2435_v33  ;;  %v2360_v63 = vmul.f32 1.0614054, %v8579_v21 }
 0xc81   :  { %v8582_v15 = vpop.f32.mrb[66].mxu1  ;;  %v2581_v44 = vsub.f32 1.0, %v2565_v9  ;;  %v2425_v46 = vmul.f32 %v8546_v53, %v2409_v28  ;;  %v2566_v43 = vmul.f32 %v6878_v54, %v2486_v2  ;;  %v2520_v28 = vmul.f32 %v2504_v29, %v8520_v49 }
 0xc82   :  { %v8587_v45 = vpop.f32.mrb[67].mxu1  ;;  %v2423_v8 = vmul.f32 %v8552_v60, %v2407_v19  ;;  %v2410_v11 = vadd.f32 1.4214138, %v2394_v52  ;;  %v2468_v19 = vadd.f32 0.2548296, %v2452_v22  ;;  %6889 = vpow2.f32 %v2545_v14 }
 0xc83   :  { %v2613_v57 = vsub.f32 0.0, %v2581_v44  ;;  %v2441_v9 = vadd.f32 -0.28449672, %v2425_v46  ;;  %v2582_v10 = vsub.f32 1.0, %v2566_v43  ;;  %v2467_v5 = vadd.f32 0.2548296, %v2451_v30 }
 0xc84   :  { %v2439_v34 = vadd.f32 -0.28449672, %v2423_v8  ;;  %v2426_v33 = vmul.f32 %v8563_v40, %v2410_v11  ;;  %v8602_v49 = vadd.f32 %v8453_v41, %v8534_v55  ;;  %v2376_v43 = vadd.f32 -1.4531521, %v2360_v63 }
 0xc85   :  { %v2629_v51 = vsel %vm2597_vm4, %v2613_v57, %v2581_v44  ;;  %v2457_v1 = vmul.f32 %v8546_v53, %v2441_v9  ;;  %v2614_v2 = vsub.f32 0.0, %v2582_v10  ;;  %v6884_v44 = vpop.eup %6883  ;;  %v2246_v22 = vmul.f32 0.5, %v8465_v38 }
 0xc86   :  { %v2455_v0 = vmul.f32 %v8552_v60, %v2439_v34  ;;  %v2645_v54 = vadd.f32 1.0, %v2629_v51  ;;  %v2442_v29 = vadd.f32 -0.28449672, %v2426_v33  ;;  %v2484_v17 = vmul.f32 %v8527_v7, %v2468_v19 }
 0xc87   :  { %v2473_v62 = vadd.f32 0.2548296, %v2457_v1  ;;  %v2630_v46 = vsel %vm2598_vm5, %v2614_v2, %v2582_v10  ;;  %v2541_v34 = vmul.f32 1.442695, %v2520_v28  ;;  %v2392_v30 = vmul.f32 %v8579_v21, %v2376_v43 }
 0xc88   :  { %v8606_v8 = vpop.eup %6885  ;;  %v2646_v52 = vadd.f32 1.0, %v2630_v46  ;;  %v2471_v14 = vadd.f32 0.2548296, %v2455_v0  ;;  %v2458_v57 = vmul.f32 %v8563_v40, %v2442_v29  ;;  %v2483_v55 = vmul.f32 %v8515_v50, %v2467_v5 }
 0xc89   :  { %v2365_v9 = vmul.f32 1.0614054, %v8606_v8  ;;  %v8613_v11 = vmul.f32 0.70710677, %v8602_v49  ;;  %v6888_v38 = vpop.eup %6887  ;;  %v8616_v10 = vmul.f32 %v2645_v54, %v8549_v61  ;;  %v2489_v63 = vmul.f32 %v8546_v53, %v2473_v62 }
 0xc8a   :  { %v8618_v7 = vmul.f32 %v2646_v52, %v2246_v22  ;;  %v2474_v28 = vadd.f32 0.2548296, %v2458_v57  ;;  %v8622_v51 = vmul.f32 0.5, %v8459_v39  ;;  %v2564_v19 = vmul.f32 %v6882_v59, %v2484_v17 }
 0xc8b   :  { %v2408_v1 = vadd.f32 1.4214138, %v2392_v30  ;;  %v2381_v50 = vadd.f32 -1.4531521, %v2365_v9  ;;  %v2487_v33 = vmul.f32 %v8552_v60, %v2471_v14  ;;  %6891 = vpow2.f32 %v2541_v34 }
 0xc8c   :  { %v2692_v0 = vpack.c.bf16 %v8618_v7, %v8616_v10  ;;  %v2490_v5 = vmul.f32 %v8563_v40, %v2474_v28  ;;  %v2563_v61 = vmul.f32 %v8568_v58, %v2483_v55  ;;  %v8630_v54 = vmul.f32 0.5, %v8471_v48  ;;  %v6890_v59 = vpop.eup %6889 }
 0xc8d   :  { %v2424_v53 = vmul.f32 %v8579_v21, %v2408_v1  ;;  %v2397_v39 = vmul.f32 %v8606_v8, %v2381_v50  ;;  %v8636_v2 = vmul.f32 0.5, %v8484_v25  ;;  %v2569_v62 = vmul.f32 %v6884_v44, %v2489_v63 }
 0xc8e   :  { %v8639_v60 = vand.u32 2147483647, %v8613_v11  ;;  %v8643_v40 = vadd.f32 %v8538_v27, %v8453_v41  ;;  %v2580_v48 = vsub.f32 1.0, %v2564_v19  ;;  %v2570_v58 = vmul.f32 %v6890_v59, %v2490_v5 }
 0xc8f   :  { %v2440_v29 = vadd.f32 -0.28449672, %v2424_v53  ;;  %v2509_v43 = vsub.f32 0.0, %v8560_v6  ;;  %v8648_v22 = vmul.f32 0.5, %v8487_v32  ;;  %v2567_v25 = vmul.f32 %v6888_v38, %v2487_v33 }
 0xc90   :  { %v2413_v46 = vadd.f32 1.4214138, %v2397_v39  ;;  %v2299_v44 = vmul.f32 0.3275911, %v8639_v60  ;;  %v2579_v17 = vsub.f32 1.0, %v2563_v61  ;;  %v8653_v27 = vmul.f32 0.5, %v8490_v4 }
 0xc91   :  { %v2456_v34 = vmul.f32 %v8579_v21, %v2440_v29  ;;  %v2585_v52 = vsub.f32 1.0, %v2569_v62  ;;  %v8658_v57 = vmul.f32 0.70710677, %v8643_v40  ;;  %v2612_v32 = vsub.f32 0.0, %v2580_v48 }
 0xc92   :  { %v2315_v14 = vadd.f32 1.0, %v2299_v44  ;;  %v2586_v30 = vsub.f32 1.0, %v2570_v58  ;;  %v2525_v9 = vmul.f32 %v2509_v43, %v8560_v6  ;;  %v2583_v38 = vsub.f32 1.0, %v2567_v25 }
 0xc93   :  { %v2472_v55 = vadd.f32 0.2548296, %v2456_v34  ;;  %v2429_v4 = vmul.f32 %v8606_v8, %v2413_v46  ;;  %v2286_v63 = vand.u32 2147483647, %v8658_v57  ;;  %v2611_v28 = vsub.f32 0.0, %v2579_v17 }
 0xc94   :  { %6893 = vrcp.f32 %v2315_v14  ;;  %v2248_v19 = vmul.f32 0.5, %v8503_v37  ;;  %v2617_v33 = vsub.f32 0.0, %v2585_v52  ;;  %v8669_v61 = vadd.f32 %v8453_v41, %v8540_v18 }
 0xc95   :  { %v2488_v1 = vmul.f32 %v8579_v21, %v2472_v55  ;;  %v6892_v50 = vpop.eup %6891  ;;  %v2302_v5 = vmul.f32 0.3275911, %v2286_v63  ;;  %v8673_v6 = vadd.f32 %v8575_v42, %v8453_v41  ;;  %v2628_v53 = vsel %vm2596_vm6, %v2612_v32, %v2580_v48 }
 0xc96   :  { %v2618_v39 = vsub.f32 0.0, %v2586_v30  ;;  %v2551_v59 = vmul.f32 1.442695, %v2525_v9  ;;  %v2615_v21 = vsub.f32 0.0, %v2583_v38  ;;  %v2445_v62 = vadd.f32 -0.28449672, %v2429_v4 }
 0xc97   :  { %v2568_v37 = vmul.f32 %v6892_v50, %v2488_v1  ;;  %v2318_v58 = vadd.f32 1.0, %v2302_v5  ;;  %v8678_v29 = vmul.f32 0.70710677, %v8669_v61  ;;  %v2627_v18 = vsel %vm2595_vm7, %v2611_v28, %v2579_v17 }
 0xc98   :  { %v2507_v25 = vsub.f32 0.0, %v8639_v60  ;;  %v8684_v42 = vmul.f32 0.70710677, %v8673_v6  ;;  %v2644_v24 = vadd.f32 1.0, %v2628_v53  ;;  %v2633_v48 = vsel %vm2601_vm8, %v2617_v33, %v2585_v52 }
 0xc99   :  { %v2584_v43 = vsub.f32 1.0, %v2568_v37  ;;  %6895 = vrcp.f32 %v2318_v58  ;;  %v8689_v46 = vand.u32 2147483647, %v8678_v29  ;;  %v2634_v44 = vsel %vm2602_vm9, %v2618_v39, %v2586_v30 }
 0xc9a   :  { %6897 = vpow2.f32 %v2551_v59  ;;  %v8694_v12 = vand.u32 2147483647, %v8684_v42  ;;  %v2631_v17 = vsel %vm2599_vm10, %v2615_v21, %v2583_v38  ;;  %v2461_v14 = vmul.f32 %v8606_v8, %v2445_v62 }
 0xc9b   :  { %v2616_v34 = vsub.f32 0.0, %v2584_v43  ;;  %v2300_v23 = vmul.f32 0.3275911, %v8689_v46  ;;  %v8702_v52 = vadd.f32 %v8453_v41, %v8577_v16  ;;  %v2523_v32 = vmul.f32 %v2507_v25, %v8639_v60 }
 0xc9c   :  { %v2510_v30 = vsub.f32 0.0, %v2286_v63  ;;  %v2305_v55 = vmul.f32 0.3275911, %v8694_v12  ;;  %v2643_v56 = vadd.f32 1.0, %v2627_v18  ;;  %v2649_v38 = vadd.f32 1.0, %v2633_v48 }
 0xc9d   :  { %v2632_v31 = vsel %vm2600_vm11, %v2616_v34, %v2584_v43  ;;  %v2650_v4 = vadd.f32 1.0, %v2634_v44  ;;  %v2316_v28 = vadd.f32 1.0, %v2300_v23  ;;  %v2660_v1 = vmul.f32 %v2644_v24, %v8630_v54 }
 0xc9e   :  { %v8708_v9 = vpop.eup %6893  ;;  %v2648_v50 = vadd.f32 1.0, %v2632_v31  ;;  %v2321_v33 = vadd.f32 1.0, %v2305_v55  ;;  %v2647_v5 = vadd.f32 1.0, %v2631_v17  ;;  %v2477_v20 = vadd.f32 0.2548296, %v2461_v14 }
 0xc9f   :  { %v2363_v16 = vmul.f32 1.0614054, %v8708_v9  ;;  %6899 = vrcp.f32 %v2316_v28  ;;  %v8713_v60 = vmul.f32 0.70710677, %v8702_v52  ;;  %v2547_v39 = vmul.f32 1.442695, %v2523_v32 }
 0xca0   :  { %v2526_v37 = vmul.f32 %v2510_v30, %v2286_v63  ;;  %6901 = vrcp.f32 %v2321_v33  ;;  %v2659_v59 = vmul.f32 %v2643_v56, %v8622_v51  ;;  %v2665_v21 = vmul.f32 %v2649_v38, %v8636_v2 }
 0xca1   :  { %v2379_v53 = vadd.f32 -1.4531521, %v2363_v16  ;;  %v2666_v54 = vmul.f32 %v2650_v4, %v8653_v27  ;;  %v8719_v62 = vand.u32 2147483647, %v8713_v60  ;;  %v2664_v58 = vmul.f32 %v2648_v50, %v2248_v19 }
 0xca2   :  { %v8724_v43 = vadd.f32 %v8582_v15, %v8453_v41  ;;  %v8728_v63 = vadd.f32 %v8453_v41, %v8587_v45  ;;  %v2663_v51 = vmul.f32 %v2647_v5, %v8648_v22  ;;  %v2493_v2 = vmul.f32 %v8606_v8, %v2477_v20 }
 0xca3   :  { %v2395_v18 = vmul.f32 %v8708_v9, %v2379_v53  ;;  %v8730_v25 = vpop.eup %6895  ;;  %v2303_v27 = vmul.f32 0.3275911, %v8719_v62  ;;  %v2691_v24 = vpack.c.bf16 %v2660_v1, %v2659_v59  ;;  %6903 = vpow2.f32 %v2547_v39 }
 0xca4   :  { %v6898_v19 = vpop.eup %6897  ;;  %v2366_v44 = vmul.f32 1.0614054, %v8730_v25  ;;  %v2553_v15 = vmul.f32 1.442695, %v2526_v37  ;;  %v2508_v34 = vsub.f32 0.0, %v8689_v46  ;;  %v2693_v14 = vpack.c.bf16 %v2664_v58, %v2663_v51 }
 0xca5   :  { %v2411_v48 = vadd.f32 1.4214138, %v2395_v18  ;;  %v2319_v17 = vadd.f32 1.0, %v2303_v27  ;;  %v8738_v41 = vmul.f32 0.70710677, %v8724_v43  ;;  %6300 = vmatprep.mubr.bf16.mxu1 %v2691_v24  ;;  %v2694_v23 = vpack.c.bf16 %v2666_v54, %v2665_v21 }
 0xca6   :  { %v8741_v45 = vmul.f32 0.70710677, %v8728_v63  ;;  %v2382_v22 = vadd.f32 -1.4531521, %v2366_v44  ;;  %6301 = vmatmul.mubr.bf16.vlgmr.msra.gmra.mrb[68].mxu1 %v2692_v0  ;;  %v2573_v31 = vmul.f32 %v6898_v19, %v2493_v2  ;;  %v2513_v32 = vsub.f32 0.0, %v8694_v12 }
 0xca7   :  { %v2427_v8 = vmul.f32 %v8708_v9, %v2411_v48  ;;  %6905 = vrcp.f32 %v2319_v17  ;;  %v8749_v30 = vand.u32 2147483647, %v8738_v41  ;;  %6304 = vmatprep.mubr.bf16.mxu1 %v2693_v14  ;;  %v2524_v10 = vmul.f32 %v2508_v34, %v8689_v46 }
 0xca8   :  { %v2398_v56 = vmul.f32 %v8730_v25, %v2382_v22  ;;  %v8753_v38 = vand.u32 2147483647, %v8741_v45  ;;  %6907 = vpow2.f32 %v2553_v15  ;;  %v2589_v33 = vsub.f32 1.0, %v2573_v31 }
 0xca9   :  { %v2443_v55 = vadd.f32 -0.28449672, %v2427_v8  ;;  %v8755_v4 = vpop.eup %6899  ;;  %v2306_v7 = vmul.f32 0.3275911, %v8749_v30  ;;  %v2529_v20 = vmul.f32 %v2513_v32, %v8694_v12  ;;  %v2549_v21 = vmul.f32 1.442695, %v2524_v10 }
 0xcaa   :  { %v8759_v0 = vpop.eup %6901  ;;  %v2414_v1 = vadd.f32 1.4214138, %v2398_v56  ;;  %v2364_v50 = vmul.f32 1.0614054, %v8755_v4  ;;  %v2304_v16 = vmul.f32 0.3275911, %v8753_v38 }
 0xcab   :  { %v2459_v28 = vmul.f32 %v8708_v9, %v2443_v55  ;;  %v2369_v5 = vmul.f32 1.0614054, %v8759_v0  ;;  %v2322_v53 = vadd.f32 1.0, %v2306_v7  ;;  %v2511_v58 = vsub.f32 0.0, %v8719_v62 }
 0xcac   :  { %v2430_v46 = vmul.f32 %v8730_v25, %v2414_v1  ;;  %v2380_v37 = vadd.f32 -1.4531521, %v2364_v50  ;;  %v2320_v59 = vadd.f32 1.0, %v2304_v16  ;;  %v8771_v12 = vmul.f32 0.5, %v8532_v47 }
 0xcad   :  { %v2475_v39 = vadd.f32 0.2548296, %v2459_v28  ;;  %v2385_v54 = vadd.f32 -1.4531521, %v2369_v5  ;;  %6909 = vrcp.f32 %v2322_v53  ;;  %v6904_v18 = vpop.eup %6903  ;;  %v2621_v24 = vsub.f32 0.0, %v2589_v33 }
 0xcae   :  { %v2446_v2 = vadd.f32 -0.28449672, %v2430_v46  ;;  %v2396_v27 = vmul.f32 %v8755_v4, %v2380_v37  ;;  %6911 = vrcp.f32 %v2320_v59  ;;  %6305 = vmatmul.mubr.bf16.gmra.mrb[72].mxu1 %v2694_v23  ;;  %v2559_v17 = vmul.f32 1.442695, %v2529_v20 }
 0xcaf   :  { %v2491_v51 = vmul.f32 %v8708_v9, %v2475_v39  ;;  %v2401_v19 = vmul.f32 %v8759_v0, %v2385_v54  ;;  %6913 = vpow2.f32 %v2549_v21  ;;  %v2527_v8 = vmul.f32 %v2511_v58, %v8719_v62 }
 0xcb0   :  { %v2462_v44 = vmul.f32 %v8730_v25, %v2446_v2  ;;  %v2412_v15 = vadd.f32 1.4214138, %v2396_v27  ;;  %v2514_v23 = vsub.f32 0.0, %v8749_v30  ;;  %v2637_v36 = vsel %vm2605_vm12, %v2621_v24, %v2589_v33 }
 0xcb1   :  { %v2571_v48 = vmul.f32 %v6904_v18, %v2491_v51  ;;  %v8776_v34 = vpop.eup %6905  ;;  %v2417_v9 = vadd.f32 1.4214138, %v2401_v19  ;;  %vm2603_vm13 = vcmp.lt.f32.partialorder %v8613_v11, 0.0  ;;  %v2512_v55 = vsub.f32 0.0, %v8753_v38 }
 0xcb2   :  { %v2478_v22 = vadd.f32 0.2548296, %v2462_v44  ;;  %v2428_v47 = vmul.f32 %v8755_v4, %v2412_v15  ;;  %v2367_v14 = vmul.f32 1.0614054, %v8776_v34  ;;  %v6908_v31 = vpop.eup %6907  ;;  %v2254_v28 = vmul.f32 0.5, %v8643_v40 }
 0xcb3   :  { %v2433_v32 = vmul.f32 %v8759_v0, %v2417_v9  ;;  %v2587_v56 = vsub.f32 1.0, %v2571_v48  ;;  %6915 = vpow2.f32 %v2559_v17  ;;  %v2555_v50 = vmul.f32 1.442695, %v2527_v8 }
 0xcb4   :  { %v2494_v10 = vmul.f32 %v8730_v25, %v2478_v22  ;;  %v2444_v7 = vadd.f32 -0.28449672, %v2428_v47  ;;  %v2383_v62 = vadd.f32 -1.4531521, %v2367_v14  ;;  %v2530_v20 = vmul.f32 %v2514_v23, %v8749_v30 }
 0xcb5   :  { %v2449_v1 = vadd.f32 -0.28449672, %v2433_v32  ;;  %v2653_v39 = vadd.f32 1.0, %v2637_v36  ;;  %vm2606_vm14 = vcmp.lt.f32.partialorder %v8658_v57, 0.0  ;;  %v2528_v46 = vmul.f32 %v2512_v55, %v8753_v38 }
 0xcb6   :  { %v2574_v16 = vmul.f32 %v6908_v31, %v2494_v10  ;;  %v2460_v5 = vmul.f32 %v8755_v4, %v2444_v7  ;;  %v2399_v33 = vmul.f32 %v8776_v34, %v2383_v62  ;;  %v2619_v37 = vsub.f32 0.0, %v2587_v56 }
 0xcb7   :  { %v8790_v53 = vpop.eup %6909  ;;  %v2465_v25 = vmul.f32 %v8759_v0, %v2449_v1  ;;  %6917 = vpow2.f32 %v2555_v50  ;;  %v2561_v24 = vmul.f32 1.442695, %v2530_v20  ;;  %v2557_v44 = vmul.f32 1.442695, %v2528_v46 }
 0xcb8   :  { %v8795_v40 = vpop.eup %6911  ;;  %v2590_v59 = vsub.f32 1.0, %v2574_v16  ;;  %v2476_v21 = vadd.f32 0.2548296, %v2460_v5  ;;  %v2415_v54 = vadd.f32 1.4214138, %v2399_v33  ;;  %v2635_v15 = vsel %vm2603_vm13, %v2619_v37, %v2587_v56 }
 0xcb9   :  { %v2481_v58 = vadd.f32 0.2548296, %v2465_v25  ;;  %v2370_v18 = vmul.f32 1.0614054, %v8790_v53  ;;  %v2368_v30 = vmul.f32 1.0614054, %v8795_v40  ;;  %v6914_v19 = vpop.eup %6913  ;;  %v2669_v23 = vmul.f32 %v2653_v39, %v8771_v12 }
 0xcba   :  { %v2622_v51 = vsub.f32 0.0, %v2590_v59  ;;  %v2492_v2 = vmul.f32 %v8755_v4, %v2476_v21  ;;  %v2431_v27 = vmul.f32 %v8776_v34, %v2415_v54  ;;  %vm2604_vm15 = vcmp.lt.f32.partialorder %v8678_v29, 0.0 }
 0xcbb   :  { %v2386_v38 = vadd.f32 -1.4531521, %v2370_v18  ;;  %v2384_v48 = vadd.f32 -1.4531521, %v2368_v30  ;;  %v2497_v47 = vmul.f32 %v8759_v0, %v2481_v58  ;;  %6919 = vpow2.f32 %v2561_v24 }
 0xcbc   :  { %v2638_v9 = vsel %vm2606_vm14, %v2622_v51, %v2590_v59  ;;  %v2572_v17 = vmul.f32 %v6914_v19, %v2492_v2  ;;  %v2447_v8 = vadd.f32 -0.28449672, %v2431_v27  ;;  %v2651_v56 = vadd.f32 1.0, %v2635_v15 }
 0xcbd   :  { %v2654_v22 = vadd.f32 1.0, %v2638_v9  ;;  %v2402_v4 = vmul.f32 %v8790_v53, %v2386_v38  ;;  %v2400_v14 = vmul.f32 %v8795_v40, %v2384_v48  ;;  %v6916_v36 = vpop.eup %6915  ;;  %6921 = vpow2.f32 %v2557_v44 }
 0xcbe   :  { %v2588_v31 = vsub.f32 1.0, %v2572_v17  ;;  %v2463_v11 = vmul.f32 %v8776_v34, %v2447_v8  ;;  %v2577_v0 = vmul.f32 %v6916_v36, %v2497_v47  ;;  %v2251_v50 = vmul.f32 0.5, %v8602_v49 }
 0xcbf   :  { %v2670_v32 = vmul.f32 %v2654_v22, %v2254_v28  ;;  %v2418_v57 = vadd.f32 1.4214138, %v2402_v4  ;;  %v2416_v55 = vadd.f32 1.4214138, %v2400_v14  ;;  %v2252_v33 = vmul.f32 0.5, %v8669_v61 }
 0xcc0   :  { %v2620_v10 = vsub.f32 0.0, %v2588_v31  ;;  %v2479_v7 = vadd.f32 0.2548296, %v2463_v11  ;;  %v2667_v46 = vmul.f32 %v2651_v56, %v2251_v50  ;;  %v2593_v21 = vsub.f32 1.0, %v2577_v0 }
 0xcc1   :  { %v2434_v62 = vmul.f32 %v8790_v53, %v2418_v57  ;;  %v2432_v1 = vmul.f32 %v8795_v40, %v2416_v55  ;;  %v2696_v12 = vpack.c.bf16 %v2670_v32, %v2669_v23  ;;  %v6918_v5 = vpop.eup %6917  ;;  %vm2609_vm0 = vcmp.lt.f32.partialorder %v8684_v42, 0.0 }
 0xcc2   :  { %v2636_v16 = vsel %vm2604_vm15, %v2620_v10, %v2588_v31  ;;  %v2495_v28 = vmul.f32 %v8776_v34, %v2479_v7  ;;  %v2625_v34 = vsub.f32 0.0, %v2593_v21  ;;  %vm2607_vm4 = vcmp.lt.f32.partialorder %v8713_v60, 0.0 }
 0xcc3   :  { %v2652_v20 = vadd.f32 1.0, %v2636_v16  ;;  %v2450_v39 = vadd.f32 -0.28449672, %v2434_v62  ;;  %v2448_v25 = vadd.f32 -0.28449672, %v2432_v1  ;;  %vm2610_vm5 = vcmp.lt.f32.partialorder %v8738_v41, 0.0 }
 0xcc4   :  { %v2575_v37 = vmul.f32 %v6918_v5, %v2495_v28  ;;  %v2641_v48 = vsel %vm2609_vm0, %v2625_v34, %v2593_v21  ;;  %vm2608_vm6 = vcmp.lt.f32.partialorder %v8741_v45, 0.0  ;;  %v2258_v60 = vmul.f32 0.5, %v8724_v43  ;;  %v10516_v28 = vld [vmem:[#allocation2_spill] sm:$0xff] }
 0xcc5   :  { %v2668_v59 = vmul.f32 %v2652_v20, %v2252_v33  ;;  %v2466_v54 = vmul.f32 %v8790_v53, %v2450_v39  ;;  %v2464_v58 = vmul.f32 %v8795_v40, %v2448_v25  ;;  %v6920_v51 = vpop.eup %6919  ;;  %v2657_v22 = vadd.f32 1.0, %v2641_v48  ;;  %v10517_v33 = vld [vmem:[#allocation3_spill] sm:$0xff] }
 0xcc6   :  { %v2591_v49 = vsub.f32 1.0, %v2575_v37  ;;  %v2256_v23 = vmul.f32 0.5, %v8728_v63 }
 0xcc7   :  { %v2482_v18 = vadd.f32 0.2548296, %v2466_v54  ;;  %v2480_v29 = vadd.f32 0.2548296, %v2464_v58  ;;  %v2695_v30 = vpack.c.bf16 %v2668_v59, %v2667_v46  ;;  %v6922_v24 = vpop.eup %6921  ;;  %v10518_v59 = vld [vmem:[#allocation4_spill] sm:$0xff]  ;;  %v10519_v54 = vld [vmem:[#allocation5_spill] sm:$0xff] }
 0xcc8   :  { %v2623_v2 = vsub.f32 0.0, %v2591_v49 }
 0xcc9   :  { %v2498_v61 = vmul.f32 %v8790_v53, %v2482_v18  ;;  %v2496_v27 = vmul.f32 %v8795_v40, %v2480_v29  ;;  %6308 = vmatprep.mubr.bf16.mxu1 %v2695_v30  ;;  %v2257_v53 = vmul.f32 0.5, %v8673_v6  ;;  %v2255_v40 = vmul.f32 0.5, %v8702_v52  ;;  %v8833_v6 = vld [vmem:[%s10430_s14] ss:$0 sm:$0xff] }
 0xcca   :  { %6309 = vmatmul.mubr.bf16.gmra.mrb[76].mxu1 %v2696_v12  ;;  %v2639_v44 = vsel %vm2607_vm4, %v2623_v2, %v2591_v49 }
 0xccb   :  { %v2578_v19 = vmul.f32 %v6920_v51, %v2498_v61  ;;  %v2576_v38 = vmul.f32 %v6922_v24, %v2496_v27  ;;  %v2655_v47 = vadd.f32 1.0, %v2639_v44  ;;  %v2673_v11 = vmul.f32 %v2657_v22, %v2257_v53  ;;  %v10523_v24 = vld [vmem:[#allocation10_spill] sm:$0xff]  ;;  %v10527_v22 = vld [vmem:[#allocation9_spill] sm:$0xff] }
 0xccd   :  { %v2594_v15 = vsub.f32 1.0, %v2578_v19  ;;  %v2592_v9 = vsub.f32 1.0, %v2576_v38  ;;  %v2671_v36 = vmul.f32 %v2655_v47, %v2255_v40  ;;  %v10524_v38 = vld [vmem:[#allocation7_spill] sm:$0xff] }
 0xccf   :  { %v2626_v17 = vsub.f32 0.0, %v2594_v15  ;;  %v2624_v8 = vsub.f32 0.0, %v2592_v9 }
 0xcd1   :  { %v2642_v4 = vsel %vm2610_vm5, %v2626_v17, %v2594_v15  ;;  %v2640_v42 = vsel %vm2608_vm6, %v2624_v8, %v2592_v9  ;;  %v10526_v17 = vld [vmem:[#allocation8_spill] sm:$0xff] }
 0xcd2   :  { %v2658_v14 = vadd.f32 1.0, %v2642_v4  ;;  %v2656_v31 = vadd.f32 1.0, %v2640_v42 }
 0xcd4   :  { %v2674_v32 = vmul.f32 %v2658_v14, %v2258_v60  ;;  %v2672_v57 = vmul.f32 %v2656_v31, %v2256_v23 }
 0xcd6   :  { %v2697_v55 = vpack.c.bf16 %v2672_v57, %v2671_v36  ;;  %v2698_v41 = vpack.c.bf16 %v2674_v32, %v2673_v11  ;;  %v10531_v36 = vld [vmem:[#allocation6_spill] sm:$0xff]  ;;  %v10532_v57 = vld [vmem:[#allocation11_spill] sm:$0xff] }
 0xcd8   :  { %6312 = vmatprep.mubr.bf16.mxu1 %v2697_v55 }
 0xcd9   :  { %6313 = vmatmul.mubr.bf16.gmra.mrb[80].mxu1 %v2698_v41 }
 0xd79   :  { %v6302_v45 = vpop.f32.mrb[68].mxu1 }
 0xd7a   :  { %v2781_v52 = vpop.f32.mrb[69].mxu1  ;;  %v2846_v43 = vadd.f32 %v6302_v45, %v8165_v35 }
 0xd7b   :  { %v2844_v63 = vadd.f32 %v2781_v52, %v8168_v13  ;;  %v6303_v56 = vpop.f32.mrb[70].mxu1 }
 0xd7c   :  { %v2784_v10 = vpop.f32.mrb[71].mxu1  ;;  %v2847_v0 = vadd.f32 %v6303_v56, %v8184_v3  ;;  %v8843_v1 = vadd.f32 %v8833_v6, %v2846_v43  ;;  %v10534_v43 = vld [vmem:[#allocation12_spill] sm:$0xff]  ;;  %v10535_v56 = vld [vmem:[#allocation13_spill] sm:$0xff] }
 0xd7d   :  { %v8838_v7 = vadd.f32 %v8833_v6, %v2844_v63  ;;  %v2845_v62 = vadd.f32 %v2784_v10, %v8175_v26 }
 0xd7e   :  { %v8851_v13 = vadd.f32 %v8833_v6, %v2847_v0  ;;  %v2893_v26 = vsel %vm214_vm1, %v8843_v1, 0.0 }
 0xd7f   :  { %v8846_v12 = vadd.f32 %v8833_v6, %v2845_v62  ;;  %v2887_v35 = vsel %vm214_vm1, %v8838_v7, 0.0 }
 0xd80   :  { %2888 = vadd.xlane.f32.xlu1 %v2887_v35  ;;  %v2896_v46 = vsel %vm214_vm1, %v8851_v13, 0.0 }
 0xd81   :  { %v2890_v50 = vsel %vm214_vm1, %v8846_v12, 0.0  ;;  %v6306_v16 = vpop.f32.mrb[72].mxu1 }
 0xd82   :  { %2891 = vadd.xlane.f32.xlu0 %v2890_v50  ;;  %v2797_v3 = vpop.f32.mrb[73].mxu1  ;;  %v2850_v5 = vadd.f32 %v6306_v16, %v10516_v28  ;;  %v6655_v28 = vld [vmem:[%s10419_s5 + $0x10] sm:$0xff]  }
 0xd83   :  { %v2848_v20 = vadd.f32 %v2797_v3, %v10517_v33  ;;  %v6307_v39 = vpop.f32.mrb[74].mxu1  ;;  %6316 = vmatprep.subr.bf16.mxu0 %v6655_v28 }
 0xd84   :  { %2894 = vadd.xlane.f32.xlu1 %v2893_v26  ;;  %v2800_v25 = vpop.f32.mrb[75].mxu1  ;;  %v2851_v21 = vadd.f32 %v6307_v39, %v10518_v59  ;;  %v8867_v49 = vadd.f32 %v8833_v6, %v2850_v5  ;;  %6317 = vmatpush3.bf16.msra.mxu0 %v6655_v28 }
 0xd85   :  { %v8862_v37 = vadd.f32 %v8833_v6, %v2848_v20  ;;  %v2849_v58 = vadd.f32 %v2800_v25, %v10519_v54 }
 0xd86   :  { %2897 = vadd.xlane.f32.xlu0 %v2896_v46  ;;  %10520 = vst [vmem:[#allocation2_spill] sm:$0xff] %v8867_v49  ;;  %v8875_v30 = vadd.f32 %v8833_v6, %v2851_v21  ;;  %v2905_v34 = vsel %vm214_vm1, %v8867_v49, 0.0 }
 0xd87   :  { %v8870_v18 = vadd.f32 %v8833_v6, %v2849_v58  ;;  %v2899_v29 = vsel %vm214_vm1, %v8862_v37, 0.0 }
 0xd88   :  { %2900 = vadd.xlane.f32.xlu1 %v2899_v29  ;;  %10522 = vst [vmem:[#allocation4_spill] sm:$0xff] %v8875_v30  ;;  %v2908_v2 = vsel %vm214_vm1, %v8875_v30, 0.0 }
 0xd89   :  { %10521 = vst [vmem:[#allocation3_spill] sm:$0xff] %v8870_v18  ;;  %v2902_v51 = vsel %vm214_vm1, %v8870_v18, 0.0 }
 0xd8a   :  { %2903 = vadd.xlane.f32.xlu0 %v2902_v51 }
 0xd8c   :  { %2906 = vadd.xlane.f32.xlu1 %v2905_v34 }
 0xd8e   :  { %2909 = vadd.xlane.f32.xlu0 %v2908_v2 }
 0xd9d   :  { %v6310_v61 = vpop.f32.mrb[76].mxu1 }
 0xd9e   :  { %v2813_v27 = vpop.f32.mrb[77].mxu1  ;;  %v2854_v19 = vadd.f32 %v6310_v61, %v10523_v24 }
 0xd9f   :  { %v2852_v48 = vadd.f32 %v2813_v27, %v10524_v38  ;;  %v6311_v44 = vpop.f32.mrb[78].mxu1 }
 0xda0   :  { %v2816_v15 = vpop.f32.mrb[79].mxu1  ;;  %v2855_v8 = vadd.f32 %v6311_v44, %v10526_v17  ;;  %v8891_v53 = vadd.f32 %v8833_v6, %v2854_v19 }
 0xda1   :  { %v8886_v9 = vadd.f32 %v8833_v6, %v2852_v48  ;;  %v2853_v47 = vadd.f32 %v2816_v15, %v10527_v22 }
 0xda2   :  { %10528 = vst [vmem:[#allocation10_spill] sm:$0xff] %v8891_v53  ;;  %v8899_v42 = vadd.f32 %v8833_v6, %v2855_v8  ;;  %v2917_v14 = vsel %vm214_vm1, %v8891_v53, 0.0 }
 0xda3   :  { %10525 = vst [vmem:[#allocation5_spill] sm:$0xff] %v8886_v9  ;;  %v8894_v40 = vadd.f32 %v8833_v6, %v2853_v47  ;;  %v2911_v4 = vsel %vm214_vm1, %v8886_v9, 0.0 }
 0xda4   :  { %2912 = vadd.xlane.f32.xlu1 %v2911_v4  ;;  %10530 = vst [vmem:[#allocation8_spill] sm:$0xff] %v8899_v42  ;;  %v2920_v23 = vsel %vm214_vm1, %v8899_v42, 0.0 }
 0xda5   :  { %10529 = vst [vmem:[#allocation7_spill] sm:$0xff] %v8894_v40  ;;  %v2914_v60 = vsel %vm214_vm1, %v8894_v40, 0.0 }
 0xda6   :  { %2915 = vadd.xlane.f32.xlu0 %v2914_v60 }
 0xda8   :  { %2918 = vadd.xlane.f32.xlu1 %v2917_v14 }
 0xdaa   :  { %2921 = vadd.xlane.f32.xlu0 %v2920_v23 }
 0xdac   :  { %v6314_v31 = vpop.f32.mrb[80].mxu1 }
 0xdad   :  { %v2829_v11 = vpop.f32.mrb[81].mxu1  ;;  %v2858_v32 = vadd.f32 %v6314_v31, %v10531_v36 }
 0xdae   :  { %v2856_v55 = vadd.f32 %v2829_v11, %v10532_v57  ;;  %v6315_v41 = vpop.f32.mrb[82].mxu1 }
 0xdaf   :  { %v2832_v45 = vpop.f32.mrb[83].mxu1  ;;  %v2859_v63 = vadd.f32 %v6315_v41, %v10534_v43  ;;  %v8915_v0 = vadd.f32 %v8833_v6, %v2858_v32 }
 0xdb0   :  { %v8910_v52 = vadd.f32 %v8833_v6, %v2856_v55  ;;  %v2857_v10 = vadd.f32 %v2832_v45, %v10535_v56 }
 0xdb1   :  { %10536 = vst [vmem:[#allocation6_spill] sm:$0xff] %v8915_v0  ;;  %v8923_v50 = vadd.f32 %v8833_v6, %v2859_v63  ;;  %v2929_v3 = vsel %vm214_vm1, %v8915_v0, 0.0 }
 0xdb2   :  { %10533 = vst [vmem:[#allocation9_spill] sm:$0xff] %v8910_v52  ;;  %v8918_v62 = vadd.f32 %v8833_v6, %v2857_v10  ;;  %v2923_v35 = vsel %vm214_vm1, %v8910_v52, 0.0 }
 0xdb3   :  { %2924 = vadd.xlane.f32.xlu1 %v2923_v35  ;;  %10538 = vst [vmem:[#allocation12_spill] sm:$0xff] %v8923_v50  ;;  %v2932_v26 = vsel %vm214_vm1, %v8923_v50, 0.0 }
 0xdb4   :  { %10537 = vst [vmem:[#allocation11_spill] sm:$0xff] %v8918_v62  ;;  %v2926_v16 = vsel %vm214_vm1, %v8918_v62, 0.0 }
 0xdb5   :  { %2927 = vadd.xlane.f32.xlu0 %v2926_v16 }
 0xdb7   :  { %2930 = vadd.xlane.f32.xlu1 %v2929_v3 }
 0xdb9   :  { %2933 = vadd.xlane.f32.xlu0 %v2932_v26 }
 0xe0d   :  { %v2889_v6 = vpop.xlane.xlu1 %2888 }
 0xe0e   :  { %v2935_v5 = vmul.f32 0.03125, %v2889_v6 }
 0xe0f   :  { %v2892_v33 = vpop.xlane.xlu0 %2891 }
 0xe10   :  { %v8935_v20 = vsub.f32 %v8838_v7, %v2935_v5  ;;  %v2936_v39 = vmul.f32 0.03125, %v2892_v33 }
 0xe11   :  { %v2895_v25 = vpop.xlane.xlu1 %2894 }
 0xe12   :  { %v8938_v46 = vsub.f32 %v8846_v12, %v2936_v39  ;;  %v2937_v59 = vmul.f32 0.03125, %v2895_v25  ;;  %v2967_v21 = vmul.f32 %v8935_v20, %v8935_v20 }
 0xe13   :  { %v2898_v54 = vpop.xlane.xlu0 %2897 }
 0xe14   :  { %v8943_v58 = vsub.f32 %v8843_v1, %v2937_v59  ;;  %v2938_v29 = vmul.f32 0.03125, %v2898_v54  ;;  %v2983_v51 = vsel %vm214_vm1, %v2967_v21, 0.0  ;;  %v2968_v34 = vmul.f32 %v8938_v46, %v8938_v46 }
 0xe15   :  { %2984 = vadd.xlane.f32.xlu1 %v2983_v51  ;;  %v2901_v2 = vpop.xlane.xlu1 %2900 }
 0xe16   :  { %v8949_v61 = vsub.f32 %v8851_v13, %v2938_v29  ;;  %v2986_v27 = vsel %vm214_vm1, %v2968_v34, 0.0  ;;  %v2939_v24 = vmul.f32 0.03125, %v2901_v2  ;;  %v2969_v19 = vmul.f32 %v8943_v58, %v8943_v58  ;;  %v6656_v2 = vld [vmem:[%s10419_s5 + $0x18] sm:$0xff]  }
 0xe17   :  { %2987 = vadd.xlane.f32.xlu0 %v2986_v27  ;;  %v2904_v38 = vpop.xlane.xlu0 %2903  ;;  %6318 = vmatprep.subr.bf16.mxu0 %v6656_v2 }
 0xe18   :  { %v8955_v48 = vsub.f32 %v8862_v37, %v2939_v24  ;;  %v2989_v44 = vsel %vm214_vm1, %v2969_v19, 0.0  ;;  %v2940_v15 = vmul.f32 0.03125, %v2904_v38  ;;  %v2970_v17 = vmul.f32 %v8949_v61, %v8949_v61  ;;  %6319 = vmatpush3.bf16.msra.mxu0 %v6656_v2 }
 0xe19   :  { %2990 = vadd.xlane.f32.xlu1 %v2989_v44  ;;  %v2907_v8 = vpop.xlane.xlu1 %2906 }
 0xe1a   :  { %v8961_v22 = vsub.f32 %v8870_v18, %v2940_v15  ;;  %v2992_v47 = vsel %vm214_vm1, %v2970_v17, 0.0  ;;  %v2941_v4 = vmul.f32 0.03125, %v2907_v8  ;;  %v2971_v60 = vmul.f32 %v8955_v48, %v8955_v48 }
 0xe1b   :  { %2993 = vadd.xlane.f32.xlu0 %v2992_v47  ;;  %v2910_v14 = vpop.xlane.xlu0 %2909 }
 0xe1c   :  { %v8967_v23 = vsub.f32 %v8867_v49, %v2941_v4  ;;  %v2942_v31 = vmul.f32 0.03125, %v2910_v14  ;;  %v2995_v11 = vsel %vm214_vm1, %v2971_v60, 0.0  ;;  %v2972_v36 = vmul.f32 %v8961_v22, %v8961_v22 }
 0xe1d   :  { %2996 = vadd.xlane.f32.xlu1 %v2995_v11 }
 0xe1e   :  { %v8973_v32 = vsub.f32 %v8875_v30, %v2942_v31  ;;  %v2998_v57 = vsel %vm214_vm1, %v2972_v36, 0.0  ;;  %v2973_v55 = vmul.f32 %v8967_v23, %v8967_v23 }
 0xe1f   :  { %2999 = vadd.xlane.f32.xlu0 %v2998_v57 }
 0xe20   :  { %v3001_v41 = vsel %vm214_vm1, %v2973_v55, 0.0  ;;  %v2974_v45 = vmul.f32 %v8973_v32, %v8973_v32 }
 0xe21   :  { %3002 = vadd.xlane.f32.xlu1 %v3001_v41 }
 0xe22   :  { %v3004_v43 = vsel %vm214_vm1, %v2974_v45, 0.0 }
 0xe23   :  { %3005 = vadd.xlane.f32.xlu0 %v3004_v43 }
 0xe31   :  { %v2913_v63 = vpop.xlane.xlu1 %2912 }
 0xe32   :  { %v2943_v56 = vmul.f32 0.03125, %v2913_v63 }
 0xe33   :  { %v2916_v10 = vpop.xlane.xlu0 %2915 }
 0xe34   :  { %v8983_v35 = vsub.f32 %v8886_v9, %v2943_v56  ;;  %v2944_v16 = vmul.f32 0.03125, %v2916_v10 }
 0xe35   :  { %v2919_v3 = vpop.xlane.xlu1 %2918 }
 0xe36   :  { %v8986_v26 = vsub.f32 %v8894_v40, %v2944_v16  ;;  %v2945_v28 = vmul.f32 0.03125, %v2919_v3  ;;  %v2975_v6 = vmul.f32 %v8983_v35, %v8983_v35 }
 0xe37   :  { %v2922_v5 = vpop.xlane.xlu0 %2921 }
 0xe38   :  { %v8991_v33 = vsub.f32 %v8891_v53, %v2945_v28  ;;  %v2946_v39 = vmul.f32 0.03125, %v2922_v5  ;;  %v3007_v25 = vsel %vm214_vm1, %v2975_v6, 0.0  ;;  %v2976_v59 = vmul.f32 %v8986_v26, %v8986_v26 }
 0xe39   :  { %3008 = vadd.xlane.f32.xlu1 %v3007_v25 }
 0xe3a   :  { %v8997_v21 = vsub.f32 %v8899_v42, %v2946_v39  ;;  %v3010_v54 = vsel %vm214_vm1, %v2976_v59, 0.0  ;;  %v2977_v29 = vmul.f32 %v8991_v33, %v8991_v33 }
 0xe3b   :  { %3011 = vadd.xlane.f32.xlu0 %v3010_v54 }
 0xe3c   :  { %v3013_v51 = vsel %vm214_vm1, %v2977_v29, 0.0  ;;  %v2978_v34 = vmul.f32 %v8997_v21, %v8997_v21 }
 0xe3d   :  { %3014 = vadd.xlane.f32.xlu1 %v3013_v51 }
 0xe3e   :  { %v3016_v27 = vsel %vm214_vm1, %v2978_v34, 0.0 }
 0xe3f   :  { %3017 = vadd.xlane.f32.xlu0 %v3016_v27 }
 0xe40   :  { %v2925_v24 = vpop.xlane.xlu1 %2924 }
 0xe41   :  { %v2947_v19 = vmul.f32 0.03125, %v2925_v24 }
 0xe42   :  { %v2928_v38 = vpop.xlane.xlu0 %2927 }
 0xe43   :  { %v9010_v44 = vsub.f32 %v8910_v52, %v2947_v19  ;;  %v2948_v15 = vmul.f32 0.03125, %v2928_v38 }
 0xe44   :  { %v2931_v17 = vpop.xlane.xlu1 %2930 }
 0xe45   :  { %v9013_v8 = vsub.f32 %v8918_v62, %v2948_v15  ;;  %v2949_v47 = vmul.f32 0.03125, %v2931_v17  ;;  %v2979_v4 = vmul.f32 %v9010_v44, %v9010_v44 }
 0xe46   :  { %v2934_v60 = vpop.xlane.xlu0 %2933 }
 0xe47   :  { %v9018_v14 = vsub.f32 %v8915_v0, %v2949_v47  ;;  %v2950_v31 = vmul.f32 0.03125, %v2934_v60  ;;  %v3019_v11 = vsel %vm214_vm1, %v2979_v4, 0.0  ;;  %v2980_v36 = vmul.f32 %v9013_v8, %v9013_v8  ;;  %v9036_v4 = vld [vmem:[%s10420_s3 + $0x1] ss:$0 sm:$0xff] }
 0xe48   :  { %3020 = vadd.xlane.f32.xlu1 %v3019_v11 }
 0xe49   :  { %v9024_v57 = vsub.f32 %v8923_v50, %v2950_v31  ;;  %v3022_v55 = vsel %vm214_vm1, %v2980_v36, 0.0  ;;  %v2981_v41 = vmul.f32 %v9018_v14, %v9018_v14 }
 0xe4a   :  { %3023 = vadd.xlane.f32.xlu0 %v3022_v55  ;;  %v9042_v55 = vld [vmem:[%s10421_s4 + $0x1] ss:$0 sm:$0xff] }
 0xe4b   :  { %v3025_v45 = vsel %vm214_vm1, %v2981_v41, 0.0  ;;  %v2982_v43 = vmul.f32 %v9024_v57, %v9024_v57 }
 0xe4c   :  { %3026 = vadd.xlane.f32.xlu1 %v3025_v45 }
 0xe4d   :  { %v3028_v63 = vsel %vm214_vm1, %v2982_v43, 0.0 }
 0xe4e   :  { %3029 = vadd.xlane.f32.xlu0 %v3028_v63 }
 0xea2   :  { %v2985_v56 = vpop.xlane.xlu1 %2984 }
 0xea3   :  { %v3031_v10 = vmul.f32 0.03125, %v2985_v56 }
 0xea4   :  { %v2988_v16 = vpop.xlane.xlu0 %2987 }
 0xea5   :  { %v3047_v3 = vadd.f32 1e-05, %v3031_v10  ;;  %v3032_v28 = vmul.f32 0.03125, %v2988_v16 }
 0xea6   :  { %v2991_v6 = vpop.xlane.xlu1 %2990 }
 0xea7   :  { %6923 = vrsqrt.f32 %v3047_v3  ;;  %v3048_v5 = vadd.f32 1e-05, %v3032_v28  ;;  %v3033_v39 = vmul.f32 0.03125, %v2991_v6 }
 0xea8   :  { %v2994_v25 = vpop.xlane.xlu0 %2993 }
 0xea9   :  { %6925 = vrsqrt.f32 %v3048_v5  ;;  %v3049_v59 = vadd.f32 1e-05, %v3033_v39  ;;  %v3034_v54 = vmul.f32 0.03125, %v2994_v25 }
 0xeaa   :  { %v2997_v29 = vpop.xlane.xlu1 %2996 }
 0xeab   :  { %6927 = vrsqrt.f32 %v3049_v59  ;;  %v3050_v51 = vadd.f32 1e-05, %v3034_v54  ;;  %v3035_v34 = vmul.f32 0.03125, %v2997_v29 }
 0xeac   :  { %v3000_v2 = vpop.xlane.xlu0 %2999 }
 0xead   :  { %6929 = vrsqrt.f32 %v3050_v51  ;;  %v3051_v27 = vadd.f32 1e-05, %v3035_v34  ;;  %v3036_v24 = vmul.f32 0.03125, %v3000_v2 }
 0xeae   :  { %v3003_v19 = vpop.xlane.xlu1 %3002 }
 0xeaf   :  { %6931 = vrsqrt.f32 %v3051_v27  ;;  %v3052_v38 = vadd.f32 1e-05, %v3036_v24  ;;  %v3037_v15 = vmul.f32 0.03125, %v3003_v19 }
 0xeb0   :  { %v3006_v17 = vpop.xlane.xlu0 %3005 }
 0xeb1   :  { %v6924_v47 = vpop.eup %6923  ;;  %6933 = vrsqrt.f32 %v3052_v38  ;;  %v3053_v60 = vadd.f32 1e-05, %v3037_v15  ;;  %v3038_v31 = vmul.f32 0.03125, %v3006_v17 }
 0xeb2   :  { %v3079_v11 = vmul.f32 %v6924_v47, %v8935_v20 }
 0xeb3   :  { %v6926_v36 = vpop.eup %6925  ;;  %6935 = vrsqrt.f32 %v3053_v60  ;;  %v3054_v41 = vadd.f32 1e-05, %v3038_v31 }
 0xeb4   :  { %v3080_v45 = vmul.f32 %v6926_v36, %v8938_v46  ;;  %v3101_v43 = vmul.f32 %v9036_v4, %v3079_v11 }
 0xeb5   :  { %v6928_v63 = vpop.eup %6927  ;;  %6937 = vrsqrt.f32 %v3054_v41 }
 0xeb6   :  { %v3081_v56 = vmul.f32 %v6928_v63, %v8943_v58  ;;  %v3102_v10 = vmul.f32 %v9036_v4, %v3080_v45  ;;  %v3123_v20 = vadd.f32 %v9042_v55, %v3101_v43 }
 0xeb7   :  { %v6930_v16 = vpop.eup %6929 }
 0xeb8   :  { %v3103_v3 = vmul.f32 %v9036_v4, %v3081_v56  ;;  %v3082_v28 = vmul.f32 %v6930_v16, %v8949_v61  ;;  %v3124_v6 = vadd.f32 %v9042_v55, %v3102_v10 }
 0xeb9   :  { %v6932_v5 = vpop.eup %6931 }
 0xeba   :  { %v3125_v46 = vadd.f32 %v9042_v55, %v3103_v3  ;;  %v3104_v39 = vmul.f32 %v9036_v4, %v3082_v28  ;;  %v3144_v25 = vpack.c.bf16 %v3124_v6, %v3123_v20  ;;  %v3083_v59 = vmul.f32 %v6932_v5, %v8955_v48 }
 0xebb   :  { %v6934_v58 = vpop.eup %6933 }
 0xebc   :  { %v3126_v54 = vadd.f32 %v9042_v55, %v3104_v39  ;;  %6320 = vmatprep.mubr.msk.bf16.mxu0 %vm214_vm1, %v3144_v25  ;;  %v3084_v29 = vmul.f32 %v6934_v58, %v8961_v22  ;;  %v3105_v51 = vmul.f32 %v9036_v4, %v3083_v59 }
 0xebd   :  { %v6936_v61 = vpop.eup %6935 }
 0xebe   :  { %v3145_v34 = vpack.c.bf16 %v3126_v54, %v3125_v46  ;;  %v3106_v2 = vmul.f32 %v9036_v4, %v3084_v29  ;;  %v3127_v27 = vadd.f32 %v9042_v55, %v3105_v51  ;;  %v3085_v24 = vmul.f32 %v6936_v61, %v8967_v23 }
 0xebf   :  { %v6938_v19 = vpop.eup %6937 }
 0xec0   :  { %6321 = vmatmul.mubr.msk.bf16.vlgmr.msra.gmra.mrb[60].mxu0 %vm214_vm1, %v3145_v34  ;;  %v3128_v48 = vadd.f32 %v9042_v55, %v3106_v2  ;;  %v3086_v38 = vmul.f32 %v6938_v19, %v8973_v32  ;;  %v3107_v15 = vmul.f32 %v9036_v4, %v3085_v24 }
 0xec2   :  { %v3146_v22 = vpack.c.bf16 %v3128_v48, %v3127_v27  ;;  %v3108_v17 = vmul.f32 %v9036_v4, %v3086_v38  ;;  %v3129_v47 = vadd.f32 %v9042_v55, %v3107_v15 }
 0xec4   :  { %6324 = vmatprep.mubr.msk.bf16.mxu0 %vm214_vm1, %v3146_v22  ;;  %v3130_v60 = vadd.f32 %v9042_v55, %v3108_v17 }
 0xec6   :  { %v3009_v31 = vpop.xlane.xlu1 %3008  ;;  %v3147_v23 = vpack.c.bf16 %v3130_v60, %v3129_v47 }
 0xec7   :  { %v3039_v11 = vmul.f32 0.03125, %v3009_v31 }
 0xec8   :  { %v3012_v36 = vpop.xlane.xlu0 %3011  ;;  %6325 = vmatmul.mubr.msk.bf16.gmra.mrb[64].mxu0 %vm214_vm1, %v3147_v23 }
 0xec9   :  { %v3055_v41 = vadd.f32 1e-05, %v3039_v11  ;;  %v3040_v45 = vmul.f32 0.03125, %v3012_v36 }
 0xeca   :  { %v3015_v32 = vpop.xlane.xlu1 %3014 }
 0xecb   :  { %6939 = vrsqrt.f32 %v3055_v41  ;;  %v3056_v43 = vadd.f32 1e-05, %v3040_v45  ;;  %v3041_v63 = vmul.f32 0.03125, %v3015_v32 }
 0xecc   :  { %v3018_v56 = vpop.xlane.xlu0 %3017 }
 0xecd   :  { %6941 = vrsqrt.f32 %v3056_v43  ;;  %v3057_v10 = vadd.f32 1e-05, %v3041_v63  ;;  %v3042_v20 = vmul.f32 0.03125, %v3018_v56 }
 0xecf   :  { %6943 = vrsqrt.f32 %v3057_v10  ;;  %v3058_v16 = vadd.f32 1e-05, %v3042_v20 }
 0xed1   :  { %6945 = vrsqrt.f32 %v3058_v16 }
 0xed5   :  { %v6940_v3 = vpop.eup %6939  ;;  %v3021_v28 = vpop.xlane.xlu1 %3020 }
 0xed6   :  { %v3043_v6 = vmul.f32 0.03125, %v3021_v28  ;;  %v3087_v5 = vmul.f32 %v6940_v3, %v8983_v35 }
 0xed7   :  { %v6942_v46 = vpop.eup %6941  ;;  %v3024_v39 = vpop.xlane.xlu0 %3023 }
 0xed8   :  { %v3059_v25 = vadd.f32 1e-05, %v3043_v6  ;;  %v3044_v59 = vmul.f32 0.03125, %v3024_v39  ;;  %v3088_v58 = vmul.f32 %v6942_v46, %v8986_v26  ;;  %v3109_v54 = vmul.f32 %v9036_v4, %v3087_v5 }
 0xed9   :  { %v6944_v29 = vpop.eup %6943  ;;  %v3027_v51 = vpop.xlane.xlu1 %3026 }
 0xeda   :  { %6947 = vrsqrt.f32 %v3059_v25  ;;  %v3060_v61 = vadd.f32 1e-05, %v3044_v59  ;;  %v3045_v34 = vmul.f32 0.03125, %v3027_v51  ;;  %v3110_v2 = vmul.f32 %v9036_v4, %v3088_v58 }
 0xedb   :  { %v6946_v27 = vpop.eup %6945  ;;  %v3030_v24 = vpop.xlane.xlu0 %3029  ;;  %v3131_v19 = vadd.f32 %v9042_v55, %v3109_v54  ;;  %v3089_v35 = vmul.f32 %v6944_v29, %v8991_v33 }
 0xedc   :  { %6949 = vrsqrt.f32 %v3060_v61  ;;  %v3061_v48 = vadd.f32 1e-05, %v3045_v34  ;;  %v3046_v38 = vmul.f32 0.03125, %v3030_v24  ;;  %v3132_v26 = vadd.f32 %v9042_v55, %v3110_v2 }
 0xedd   :  { %v3090_v15 = vmul.f32 %v6946_v27, %v8997_v21  ;;  %v3111_v22 = vmul.f32 %v9036_v4, %v3089_v35 }
 0xede   :  { %6951 = vrsqrt.f32 %v3061_v48  ;;  %v3062_v17 = vadd.f32 1e-05, %v3046_v38  ;;  %v3148_v47 = vpack.c.bf16 %v3132_v26, %v3131_v19 }
 0xedf   :  { %v3112_v60 = vmul.f32 %v9036_v4, %v3090_v15  ;;  %v3133_v31 = vadd.f32 %v9042_v55, %v3111_v22 }
 0xee0   :  { %6953 = vrsqrt.f32 %v3062_v17  ;;  %6328 = vmatprep.mubr.msk.bf16.mxu0 %vm214_vm1, %v3148_v47 }
 0xee1   :  { %v3134_v33 = vadd.f32 %v9042_v55, %v3112_v60 }
 0xee3   :  { %v3149_v23 = vpack.c.bf16 %v3134_v33, %v3133_v31 }
 0xee4   :  { %v6948_v11 = vpop.eup %6947 }
 0xee5   :  { %6329 = vmatmul.mubr.msk.bf16.gmra.mrb[68].mxu0 %vm214_vm1, %v3149_v23  ;;  %v3091_v21 = vmul.f32 %v6948_v11, %v9010_v44 }
 0xee6   :  { %v6950_v36 = vpop.eup %6949 }
 0xee7   :  { %v3092_v41 = vmul.f32 %v6950_v36, %v9013_v8  ;;  %v3113_v45 = vmul.f32 %v9036_v4, %v3091_v21 }
 0xee8   :  { %v6952_v32 = vpop.eup %6951 }
 0xee9   :  { %v3114_v43 = vmul.f32 %v9036_v4, %v3092_v41  ;;  %v3135_v63 = vadd.f32 %v9042_v55, %v3113_v45  ;;  %v3093_v56 = vmul.f32 %v6952_v32, %v9018_v14 }
 0xeea   :  { %v6954_v10 = vpop.eup %6953 }
 0xeeb   :  { %v3136_v20 = vadd.f32 %v9042_v55, %v3114_v43  ;;  %v3094_v16 = vmul.f32 %v6954_v10, %v9024_v57  ;;  %v3115_v3 = vmul.f32 %v9036_v4, %v3093_v56 }
 0xeed   :  { %v3150_v44 = vpack.c.bf16 %v3136_v20, %v3135_v63  ;;  %v3116_v28 = vmul.f32 %v9036_v4, %v3094_v16  ;;  %v3137_v8 = vadd.f32 %v9042_v55, %v3115_v3 }
 0xeef   :  { %6332 = vmatprep.mubr.msk.bf16.mxu0 %vm214_vm1, %v3150_v44  ;;  %v3138_v6 = vadd.f32 %v9042_v55, %v3116_v28 }
 0xef1   :  { %v3151_v5 = vpack.c.bf16 %v3138_v6, %v3137_v8 }
 0xef3   :  { %6333 = vmatmul.mubr.msk.bf16.gmra.mrb[72].mxu0 %vm214_vm1, %v3151_v5 }
 0xf93   :  { %v6322_v14 = vpop.f32.mrb[60].mxu0 }
 0xf94   :  { %v3222_v46 = vpop.f32.mrb[61].mxu0 }
 0xf95   :  { %v6323_v39 = vpop.f32.mrb[62].mxu0 }
 0xf96   :  { %v9099_v25 = vpack.c.bf16 %v6323_v39, %v6322_v14  ;;  %v3225_v57 = vpop.f32.mrb[63].mxu0  ;;  %v9182_v14 = vld [vmem:[%s10422_s8 + $0x90] sm:$0xff] }
 0xf97   :  { %v9101_v59 = vpack.c.bf16 %v3225_v57, %v3222_v46 }
 0xf98   :  { %3320 = vrot.lane.b32.xlu0 %v9099_v25, %s7179_s1 }
 0xf99   :  { %3318 = vrot.lane.b32.xlu1 %v9101_v59, %s7179_s1  ;;  %6352 = vmatprep.mubr.msk.bf16.mxu1 %vm661_vm2, %v9101_v59 }
 0xf9b   :  { %v6326_v4 = vpop.f32.mrb[64].mxu0 }
 0xf9c   :  { %v3238_v55 = vpop.f32.mrb[65].mxu0 }
 0xf9d   :  { %v6327_v58 = vpop.f32.mrb[66].mxu0 }
 0xf9e   :  { %v9109_v54 = vpack.c.bf16 %v6327_v58, %v6326_v4  ;;  %v3241_v29 = vpop.f32.mrb[67].mxu0  ;;  %v9190_v4 = vld [vmem:[%s10422_s8 + $0x88] sm:$0xff] }
 0xf9f   :  { %v9111_v51 = vpack.c.bf16 %v3241_v29, %v3238_v55  ;;  %v9195_v55 = vld [vmem:[%s10422_s8 + $0x80] sm:$0xff] }
 0xfa1   :  { %3322 = vrot.lane.b32.xlu1 %v9111_v51, %s7179_s1 }
 0xfa5   :  { %3324 = vrot.lane.b32.xlu1 %v9109_v54, %s7179_s1 }
 0xfb8   :  { %v6330_v61 = vpop.f32.mrb[68].mxu0 }
 0xfb9   :  { %v3254_v34 = vpop.f32.mrb[69].mxu0 }
 0xfba   :  { %v6331_v2 = vpop.f32.mrb[70].mxu0 }
 0xfbb   :  { %v9117_v27 = vpack.c.bf16 %v6331_v2, %v6330_v61  ;;  %v3257_v24 = vpop.f32.mrb[71].mxu0  ;;  %v9207_v2 = vld [vmem:[%s10422_s8 + $0x98] sm:$0xff] }
 0xfbc   :  { %v9119_v19 = vpack.c.bf16 %v3257_v24, %v3254_v34 }
 0xfbd   :  { %3328 = vrot.lane.b32.xlu1 %v9117_v27, %s7179_s1 }
 0xfbe   :  { %3326 = vrot.lane.b32.xlu0 %v9119_v19, %s7179_s1 }
 0xfc6   :  { %v6334_v35 = vpop.f32.mrb[72].mxu0 }
 0xfc7   :  { %v3270_v48 = vpop.f32.mrb[73].mxu0 }
 0xfc8   :  { %v6335_v38 = vpop.f32.mrb[74].mxu0 }
 0xfc9   :  { %v9125_v26 = vpack.c.bf16 %v6335_v38, %v6334_v35  ;;  %v3273_v15 = vpop.f32.mrb[75].mxu0 }
 0xfca   :  { %v9127_v22 = vpack.c.bf16 %v3273_v15, %v3270_v48 }
 0xfcb   :  { %3332 = vrot.lane.b32.xlu1 %v9125_v26, %s7179_s1 }
 0xfcc   :  { %3330 = vrot.lane.b32.xlu0 %v9127_v22, %s7179_s1 }
 0xfcf   :  { %3631 = vrot.lane.b32.xlu1 %v9101_v59, %s7180_s28 }
 0xfd0   :  { %3633 = vrot.lane.b32.xlu0 %v9099_v25, %s7180_s28 }
 0xfd3   :  { %3635 = vrot.lane.b32.xlu1 %v9111_v51, %s7180_s28 }
 0xfd4   :  { %3637 = vrot.lane.b32.xlu0 %v9109_v54, %s7180_s28 }
 0xfd7   :  { %3639 = vrot.lane.b32.xlu1 %v9119_v19, %s7180_s28 }
 0xfdb   :  { %3641 = vrot.lane.b32.xlu1 %v9117_v27, %s7180_s28 }
 0xfdf   :  { %3645 = vrot.lane.b32.xlu1 %v9125_v26, %s7180_s28 }
 0xfe3   :  { %3643 = vrot.lane.b32.xlu1 %v9127_v22, %s7180_s28 }
0x100a   :  { %v3321_v60 = vpop.permute.xlu0 %3320 }
0x100b   :  { %v3319_v17 = vpop.permute.xlu1 %3318  ;;  %v3362_v33 = vsel %vm661_vm2, %v3321_v60, 0 }
0x100c   :  { %6618 = vmatprep.subr.msk.bf16.mxu1 %vm661_vm2, %v3319_v17  ;;  %v3359_v47 = vsel %vm661_vm2, %v3319_v17, 0 }
0x100d   :  { %6337 = vmatpush3.bf16.xpose.msra.mxu1 %v3359_v47 }
0x100e   :  { %6619 = vmatprep.subr.msk.bf16.mxu1 %vm661_vm2, %v3321_v60 }
0x1013   :  { %v3323_v31 = vpop.permute.xlu1 %3322 }
0x1014   :  { %v3365_v23 = vsel %vm661_vm2, %v3323_v31, 0 }
0x1015   :  { %6339 = vmatpush3.bf16.xpose.msra.mxu1 %v3362_v33 }
0x1016   :  { %6620 = vmatprep.subr.msk.bf16.mxu1 %vm661_vm2, %v3323_v31 }
0x1017   :  { %v3325_v11 = vpop.permute.xlu1 %3324 }
0x1018   :  { %v3368_v21 = vsel %vm661_vm2, %v3325_v11, 0 }
0x101d   :  { %6341 = vmatpush3.bf16.xpose.msra.mxu1 %v3365_v23 }
0x101e   :  { %6621 = vmatprep.subr.msk.bf16.mxu1 %vm661_vm2, %v3325_v11 }
0x1025   :  { %6343 = vmatpush3.bf16.xpose.msra.mxu1 %v3368_v21 }
0x102f   :  { %v3329_v45 = vpop.permute.xlu1 %3328 }
0x1030   :  { %v3327_v36 = vpop.permute.xlu0 %3326  ;;  %v3374_v32 = vsel %vm661_vm2, %v3329_v45, 0 }
0x1031   :  { %6622 = vmatprep.subr.msk.bf16.mxu1 %vm661_vm2, %v3327_v36  ;;  %v3371_v41 = vsel %vm661_vm2, %v3327_v36, 0  ;;  %v9222_v36 = vld [vmem:[%s10422_s8 + $0xb0] sm:$0xff] }
0x1032   :  { %6345 = vmatpush3.bf16.xpose.msra.mxu1 %v3371_v41 }
0x1033   :  { %6623 = vmatprep.subr.msk.bf16.mxu1 %vm661_vm2, %v3329_v45  ;;  %v9230_v45 = vld [vmem:[%s10422_s8 + $0xa0] sm:$0xff] }
0x103a   :  { %6347 = vmatpush3.bf16.xpose.msra.mxu1 %v3374_v32  ;;  %v9235_v32 = vld [vmem:[%s10422_s8 + $0xb8] sm:$0xff] }
0x103d   :  { %v3333_v43 = vpop.permute.xlu1 %3332 }
0x103e   :  { %v3331_v63 = vpop.permute.xlu0 %3330  ;;  %v3380_v44 = vsel %vm661_vm2, %v3333_v43, 0 }
0x103f   :  { %6624 = vmatprep.subr.msk.bf16.mxu1 %vm661_vm2, %v3331_v63  ;;  %v3377_v10 = vsel %vm661_vm2, %v3331_v63, 0 }
0x1041   :  { %v3632_v56 = vpop.permute.xlu1 %3631 }
0x1042   :  { %6368 = vmatprep.subr.bf16.mxu0 %v3632_v56  ;;  %v3634_v20 = vpop.permute.xlu0 %3633  ;;  %6349 = vmatpush3.bf16.xpose.msra.mxu1 %v3377_v10  ;;  %v9252_v10 = vld [vmem:[%s10422_s8 + $0xa8] sm:$0xff] }
0x1043   :  { %6369 = vmatpush3.bf16.msra.mxu0 %v3632_v56  ;;  %6625 = vmatprep.subr.msk.bf16.mxu1 %vm661_vm2, %v3333_v43  ;;  %v9247_v56 = vld [vmem:[%s10422_s8 + $0xd0] sm:$0xff] }
0x1044   :  { %6370 = vmatprep.subr.bf16.mxu0 %v3634_v20 }
0x1045   :  { %v3636_v16 = vpop.permute.xlu1 %3635 }
0x1046   :  { %v3638_v28 = vpop.permute.xlu0 %3637 }
0x1047   :  { %6371 = vmatpush3.bf16.msra.mxu0 %v3634_v20 }
0x1048   :  { %6372 = vmatprep.subr.bf16.mxu0 %v3636_v16 }
0x1049   :  { %v3640_v3 = vpop.permute.xlu1 %3639 }
0x104a   :  { %6351 = vmatpush3.bf16.xpose.msra.mxu1 %v3380_v44  ;;  %v9270_v44 = vld [vmem:[%s10422_s8 + $0xd8] sm:$0xff] }
0x104b   :  { %6373 = vmatpush3.bf16.msra.mxu0 %v3636_v16 }
0x104c   :  { %6374 = vmatprep.subr.bf16.mxu0 %v3638_v28 }
0x104d   :  { %v3642_v8 = vpop.permute.xlu1 %3641 }
0x104f   :  { %6375 = vmatpush3.bf16.msra.mxu0 %v3638_v28 }
0x1050   :  { %6376 = vmatprep.subr.bf16.mxu0 %v3640_v3 }
0x1051   :  { %v3646_v6 = vpop.permute.xlu1 %3645  ;;  %6353 = vmatmul.mubr.msk.bf16.vlgmr.msra.gmra.mrb[84].mxu1 %vm661_vm2, %v9099_v25 }
0x1052   :  { %6356 = vmatprep.mubr.msk.bf16.mxu1 %vm661_vm2, %v9111_v51 }
0x1053   :  { %6377 = vmatpush3.bf16.msra.mxu0 %v3640_v3  ;;  %v9265_v3 = vld [vmem:[%s10422_s8 + $0xc0] sm:$0xff] }
0x1054   :  { %6378 = vmatprep.subr.bf16.mxu0 %v3642_v8 }
0x1055   :  { %v3644_v5 = vpop.permute.xlu1 %3643 }
0x1057   :  { %6379 = vmatpush3.bf16.msra.mxu0 %v3642_v8 }
0x1058   :  { %6380 = vmatprep.subr.bf16.mxu0 %v3644_v5 }
0x1059   :  { %6357 = vmatmul.mubr.msk.bf16.gmra.mrb[88].mxu1 %vm661_vm2, %v9109_v54 }
0x105a   :  { %6360 = vmatprep.mubr.msk.bf16.mxu1 %vm661_vm2, %v9119_v19 }
0x105b   :  { %6381 = vmatpush3.bf16.msra.mxu0 %v3644_v5  ;;  %v9288_v5 = vld [vmem:[%s10422_s8 + $0xc8] sm:$0xff] }
0x105c   :  { %6382 = vmatprep.subr.bf16.mxu0 %v3646_v6 }
0x105f   :  { %6383 = vmatpush3.bf16.msra.mxu0 %v3646_v6  ;;  %v9283_v6 = vld [vmem:[%s10422_s8 + $0xf0] sm:$0xff] }
0x1061   :  { %6361 = vmatmul.mubr.msk.bf16.gmra.mrb[92].mxu1 %vm661_vm2, %v9117_v27 }
0x1062   :  { %6364 = vmatprep.mubr.msk.bf16.mxu1 %vm661_vm2, %v9127_v22 }
0x1069   :  { %6365 = vmatmul.mubr.msk.bf16.gmra.mrb[96].mxu1 %vm661_vm2, %v9125_v26 }
0x1124   :  { %v6354_v46 = vpop.f32.mrb[84].mxu1 }
0x1125   :  { %v9185_v39 = vadd.f32 %v6354_v46, %v9182_v14  ;;  %v3416_v57 = vpop.f32.mrb[85].mxu1 }
0x1126   :  { %v6355_v58 = vpop.f32.mrb[86].mxu1  ;;  %v9202_v34 = vadd.f32 %v9195_v55, %v3416_v57 }
0x1127   :  { %3483 = vmax.xlane.f32.xlu0 %v9185_v39  ;;  %v3419_v29 = vpop.f32.mrb[87].mxu1  ;;  %v9212_v35 = vadd.f32 %v6355_v58, %v9207_v2  ;;  %v9301_v58 = vld [vmem:[%s10422_s8 + $0xe0] sm:$0xff] }
0x1128   :  { %v9199_v61 = vadd.f32 %v9190_v4, %v3419_v29  ;;  %v9306_v29 = vld [vmem:[%s10422_s8 + $0xf8] sm:$0xff] }
0x112a   :  { %3481 = vmax.xlane.f32.xlu1 %v9199_v61 }
0x112b   :  { %3479 = vmax.xlane.f32.xlu0 %v9202_v34 }
0x112c   :  { %v6358_v24 = vpop.f32.mrb[88].mxu1 }
0x112d   :  { %v3432_v48 = vpop.f32.mrb[89].mxu1  ;;  %v9225_v41 = vadd.f32 %v6358_v24, %v9222_v36 }
0x112e   :  { %v6359_v38 = vpop.f32.mrb[90].mxu1  ;;  %v9239_v43 = vadd.f32 %v9230_v45, %v3432_v48 }
0x112f   :  { %v3435_v15 = vpop.f32.mrb[91].mxu1  ;;  %3485 = vmax.xlane.f32.xlu0 %v9212_v35  ;;  %v9242_v63 = vadd.f32 %v6359_v38, %v9235_v32  ;;  %v9319_v38 = vld [vmem:[%s10422_s8 + $0xe8] sm:$0xff] }
0x1130   :  { %v9260_v16 = vadd.f32 %v9252_v10, %v3435_v15 }
0x1134   :  { %v6362_v17 = vpop.f32.mrb[92].mxu1 }
0x1135   :  { %v3448_v47 = vpop.f32.mrb[93].mxu1  ;;  %v9257_v20 = vadd.f32 %v6362_v17, %v9247_v56 }
0x1136   :  { %v6363_v60 = vpop.f32.mrb[94].mxu1  ;;  %v9275_v28 = vadd.f32 %v9265_v3, %v3448_v47 }
0x1137   :  { %v3451_v31 = vpop.f32.mrb[95].mxu1  ;;  %v9278_v8 = vadd.f32 %v6363_v60, %v9270_v44 }
0x1138   :  { %v9296_v57 = vadd.f32 %v9288_v5, %v3451_v31 }
0x113b   :  { %3780 = vrot.lane.b32.xlu1 %v9099_v25, %s7181_s29 }
0x113c   :  { %v6366_v33 = vpop.f32.mrb[96].mxu1 }
0x113d   :  { %v3464_v23 = vpop.f32.mrb[97].mxu1  ;;  %v9293_v46 = vadd.f32 %v6366_v33, %v9283_v6 }
0x113e   :  { %v6367_v11 = vpop.f32.mrb[98].mxu1  ;;  %v9311_v24 = vadd.f32 %v9301_v58, %v3464_v23 }
0x113f   :  { %v3467_v21 = vpop.f32.mrb[99].mxu1  ;;  %v9314_v48 = vadd.f32 %v6367_v11, %v9306_v29 }
0x1140   :  { %v9324_v15 = vadd.f32 %v9319_v38, %v3467_v21 }
0x1145   :  { %3778 = vrot.lane.b32.xlu0 %v9101_v59, %s7181_s29 }
0x115f   :  { %3491 = vmax.xlane.f32.xlu1 %v9225_v41 }
0x1163   :  { %3487 = vmax.xlane.f32.xlu1 %v9239_v43 }
0x1164   :  { %3493 = vmax.xlane.f32.xlu0 %v9242_v63 }
0x1167   :  { %3499 = vmax.xlane.f32.xlu1 %v9257_v20 }
0x1168   :  { %3489 = vmax.xlane.f32.xlu0 %v9260_v16 }
0x116b   :  { %3495 = vmax.xlane.f32.xlu1 %v9275_v28 }
0x116c   :  { %3501 = vmax.xlane.f32.xlu0 %v9278_v8 }
0x116f   :  { %3507 = vmax.xlane.f32.xlu1 %v9293_v46 }
0x1170   :  { %3497 = vmax.xlane.f32.xlu0 %v9296_v57 }
0x1173   :  { %3503 = vmax.xlane.f32.xlu1 %v9311_v24 }
0x1174   :  { %3509 = vmax.xlane.f32.xlu0 %v9314_v48 }
0x1178   :  { %3505 = vmax.xlane.f32.xlu0 %v9324_v15 }
0x1184   :  { %3782 = vrot.lane.b32.xlu1 %v9111_v51, %s7181_s29 }
0x11b4   :  { %v3484_v17 = vpop.xlane.xlu0 %3483 }
0x11b5   :  { %v3513_v47 = vsub.f32 %v9185_v39, %v3484_v17 }
0x11b7   :  { %v3531_v60 = vmul.f32 1.442695, %v3513_v47  ;;  %v3482_v23 = vpop.xlane.xlu1 %3481 }
0x11b8   :  { %v3480_v31 = vpop.xlane.xlu0 %3479  ;;  %v3512_v62 = vsub.f32 %v9199_v61, %v3482_v23 }
0x11b9   :  { %6955 = vpow2.f32 %v3531_v60  ;;  %v3511_v33 = vsub.f32 %v9202_v34, %v3480_v31 }
0x11ba   :  { %v3529_v42 = vmul.f32 1.442695, %v3512_v62 }
0x11bb   :  { %v3527_v11 = vmul.f32 1.442695, %v3511_v33 }
0x11bc   :  { %v3486_v50 = vpop.xlane.xlu0 %3485 }
0x11bd   :  { %6957 = vpow2.f32 %v3527_v11  ;;  %v3514_v21 = vsub.f32 %v9212_v35, %v3486_v50 }
0x11bf   :  { %v3533_v52 = vmul.f32 1.442695, %v3514_v21 }
0x11c0   :  { %v9333_v40 = vpop.permute.xlu0 %3778 }
0x11c1   :  { %6959 = vpow2.f32 %v3533_v52  ;;  %6626 = vmatprep.subr.msk.bf16.mxu0 %vm661_vm2, %v9333_v40  ;;  %v9349_v52 = vpop.permute.xlu1 %3780 }
0x11c2   :  { %6961 = vpow2.f32 %v3529_v42 }
0x11c3   :  { %v9337_v39 = vpop.eup %6955 }
0x11c4   :  { %3563 = vadd.xlane.f32.xlu0 %v9337_v39 }
0x11c7   :  { %v9340_v34 = vpop.eup %6957 }
0x11c8   :  { %3559 = vadd.xlane.f32.xlu1 %v9340_v34 }
0x11cb   :  { %v9343_v61 = vpop.eup %6959 }
0x11cc   :  { %3565 = vadd.xlane.f32.xlu0 %v9343_v61  ;;  %v9346_v50 = vpop.eup %6961 }
0x11d0   :  { %3561 = vadd.xlane.f32.xlu0 %v9346_v50 }
0x11ec   :  { %v3492_v62 = vpop.xlane.xlu1 %3491 }
0x11ed   :  { %v3517_v35 = vsub.f32 %v9225_v41, %v3492_v62 }
0x11ef   :  { %v3539_v17 = vmul.f32 1.442695, %v3517_v35 }
0x11f0   :  { %v3488_v47 = vpop.xlane.xlu1 %3487 }
0x11f1   :  { %6963 = vpow2.f32 %v3539_v17  ;;  %v3515_v42 = vsub.f32 %v9239_v43, %v3488_v47  ;;  %v3494_v60 = vpop.xlane.xlu0 %3493 }
0x11f2   :  { %v3518_v31 = vsub.f32 %v9242_v63, %v3494_v60 }
0x11f3   :  { %v3535_v33 = vmul.f32 1.442695, %v3515_v42 }
0x11f4   :  { %v3541_v23 = vmul.f32 1.442695, %v3518_v31  ;;  %v3500_v17 = vpop.xlane.xlu1 %3499 }
0x11f5   :  { %6965 = vpow2.f32 %v3535_v33  ;;  %v3490_v11 = vpop.xlane.xlu0 %3489  ;;  %v3521_v42 = vsub.f32 %v9257_v20, %v3500_v17 }
0x11f6   :  { %v3516_v21 = vsub.f32 %v9260_v16, %v3490_v11  ;;  %6967 = vpow2.f32 %v3541_v23 }
0x11f7   :  { %v3547_v33 = vmul.f32 1.442695, %v3521_v42 }
0x11f8   :  { %v3537_v9 = vmul.f32 1.442695, %v3516_v21  ;;  %v3496_v60 = vpop.xlane.xlu1 %3495 }
0x11f9   :  { %v3502_v16 = vpop.xlane.xlu0 %3501  ;;  %v3519_v23 = vsub.f32 %v9275_v28, %v3496_v60 }
0x11fa   :  { %6969 = vpow2.f32 %v3537_v9  ;;  %v3522_v21 = vsub.f32 %v9278_v8, %v3502_v16 }
0x11fb   :  { %v9355_v0 = vpop.eup %6963  ;;  %v3543_v11 = vmul.f32 1.442695, %v3519_v23 }
0x11fc   :  { %3571 = vadd.xlane.f32.xlu0 %v9355_v0  ;;  %v3508_v53 = vpop.xlane.xlu1 %3507  ;;  %v3549_v18 = vmul.f32 1.442695, %v3522_v21 }
0x11fd   :  { %v3498_v9 = vpop.xlane.xlu0 %3497  ;;  %v3525_v20 = vsub.f32 %v9293_v46, %v3508_v53 }
0x11fe   :  { %v3520_v30 = vsub.f32 %v9296_v57, %v3498_v9 }
0x11ff   :  { %v9358_v41 = vpop.eup %6965  ;;  %v3555_v17 = vmul.f32 1.442695, %v3525_v20 }
0x1200   :  { %3567 = vadd.xlane.f32.xlu0 %v9358_v41  ;;  %v9361_v43 = vpop.eup %6967 }
0x1201   :  { %v3510_v62 = vpop.xlane.xlu0 %3509 }
0x1202   :  { %v3526_v53 = vsub.f32 %v9314_v48, %v3510_v62 }
0x1204   :  { %v9363_v63 = vpop.eup %6969  ;;  %3573 = vadd.xlane.f32.xlu0 %v9361_v43  ;;  %v3557_v46 = vmul.f32 1.442695, %v3526_v53  ;;  %v3819_v53 = vsel %vm661_vm2, %v9333_v40, 0 }
0x1205   :  { %3569 = vadd.xlane.f32.xlu1 %v9363_v63  ;;  %v3506_v35 = vpop.xlane.xlu0 %3505 }
0x1206   :  { %v3524_v47 = vsub.f32 %v9324_v15, %v3506_v35  ;;  %v3545_v15 = vmul.f32 1.442695, %v3520_v30  ;;  %v3504_v35 = vpop.xlane.xlu1 %3503 }
0x1207   :  { %v3523_v8 = vsub.f32 %v9311_v24, %v3504_v35 }
0x1208   :  { %v3553_v31 = vmul.f32 1.442695, %v3524_v47 }
0x120a   :  { %6971 = vpow2.f32 %v3553_v31  ;;  %v3783_v62 = vpop.permute.xlu1 %3782 }
0x120b   :  { %6973 = vpow2.f32 %v3547_v33  ;;  %v3825_v40 = vsel %vm661_vm2, %v3783_v62, 0 }
0x120c   :  { %6975 = vpow2.f32 %v3543_v11 }
0x120d   :  { %6977 = vpow2.f32 %v3549_v18  ;;  %v3551_v18 = vmul.f32 1.442695, %v3523_v8 }
0x120e   :  { %6979 = vpow2.f32 %v3545_v15 }
0x120f   :  { %6981 = vpow2.f32 %v3555_v17 }
0x1210   :  { %6983 = vpow2.f32 %v3551_v18 }
0x1211   :  { %6985 = vpow2.f32 %v3557_v46 }
0x1214   :  { %v9378_v49 = vpop.eup %6971 }
0x1215   :  { %v9382_v28 = vpop.eup %6973 }
0x1216   :  { %3784 = vrot.lane.b32.xlu1 %v9109_v54, %s7181_s29  ;;  %v9386_v16 = vpop.eup %6975 }
0x1217   :  { %v9390_v30 = vpop.eup %6977 }
0x1218   :  { %v9393_v57 = vpop.eup %6979 }
0x1219   :  { %v9398_v24 = vpop.eup %6981 }
0x121a   :  { %3786 = vrot.lane.b32.xlu0 %v9119_v19, %s7181_s29  ;;  %v9403_v48 = vpop.eup %6983 }
0x121b   :  { %v9408_v9 = vpop.eup %6985 }
0x121e   :  { %3788 = vrot.lane.b32.xlu0 %v9117_v27, %s7181_s29 }
0x123a   :  { %3585 = vadd.xlane.f32.xlu1 %v9378_v49 }
0x123d   :  { %3579 = vadd.xlane.f32.xlu0 %v9382_v28 }
0x1241   :  { %3575 = vadd.xlane.f32.xlu0 %v9386_v16 }
0x1245   :  { %3581 = vadd.xlane.f32.xlu0 %v9390_v30 }
0x1249   :  { %3577 = vadd.xlane.f32.xlu0 %v9393_v57 }
0x124b   :  { %3792 = vrot.lane.b32.xlu1 %v9125_v26, %s7181_s29 }
0x124d   :  { %3587 = vadd.xlane.f32.xlu0 %v9398_v24 }
0x124f   :  { %3770 = vrot.lane.b32.xlu1 %v9119_v19, %s7182_s17 }
0x1251   :  { %3583 = vadd.xlane.f32.xlu0 %v9403_v48  ;;  %v3564_v47 = vpop.xlane.xlu0 %3563 }
0x1253   :  { %3774 = vrot.lane.b32.xlu1 %v9127_v22, %s7182_s17 }
0x1255   :  { %3589 = vadd.xlane.f32.xlu0 %v9408_v9  ;;  %v3560_v42 = vpop.xlane.xlu1 %3559 }
0x1257   :  { %4093 = vrot.lane.b32.xlu1 %v9099_v25, %s7183_s18 }
0x1259   :  { %v3566_v60 = vpop.xlane.xlu0 %3565 }
0x125a   :  { %6987 = vrcp.f32 %v3566_v60 }
0x125b   :  { %6989 = vrcp.f32 %v3560_v42 }
0x125c   :  { %6991 = vrcp.f32 %v3564_v47 }
0x125d   :  { %v3562_v31 = vpop.xlane.xlu0 %3561 }
0x125e   :  { %6993 = vrcp.f32 %v3562_v31 }
0x1264   :  { %v6988_v33 = vpop.eup %6987 }
0x1265   :  { %v6990_v23 = vpop.eup %6989  ;;  %v3610_v20 = vmul.f32 %v6988_v33, %v9343_v61 }
0x1266   :  { %v6992_v11 = vpop.eup %6991  ;;  %v3607_v15 = vmul.f32 %v6990_v23, %v9340_v34 }
0x1267   :  { %v3609_v17 = vmul.f32 %v6992_v11, %v9337_v39  ;;  %v3822_v39 = vsel %vm661_vm2, %v9349_v52, 0 }
0x1268   :  { %v6994_v21 = vpop.eup %6993 }
0x1269   :  { %v3608_v35 = vmul.f32 %v6994_v21, %v9346_v50  ;;  %v3624_v18 = vpack.c.bf16 %v3610_v20, %v3609_v17 }
0x126b   :  { %3790 = vrot.lane.b32.xlu0 %v9127_v22, %s7181_s29  ;;  %v3623_v8 = vpack.c.bf16 %v3608_v35, %v3607_v15 }
0x126d   :  { %6384 = vmatprep.mubr.bf16.mxu0 %v3623_v8 }
0x126e   :  { %6385 = vmatmul.mubr.bf16.vlgmr.msra.gmra.mrb[76].mxu0 %v3624_v18 }
0x126f   :  { %6401 = vmatpush3.bf16.xpose.msra.mxu0 %v3819_v53  ;;  %3762 = vrot.lane.b32.xlu0 %v9101_v59, %s7182_s17 }
0x1270   :  { %6627 = vmatprep.subr.msk.bf16.mxu0 %vm661_vm2, %v9349_v52 }
0x1273   :  { %3764 = vrot.lane.b32.xlu0 %v9099_v25, %s7182_s17 }
0x1277   :  { %6403 = vmatpush3.bf16.xpose.msra.mxu0 %v3822_v39  ;;  %3766 = vrot.lane.b32.xlu0 %v9111_v51, %s7182_s17 }
0x1278   :  { %6628 = vmatprep.subr.msk.bf16.mxu0 %vm661_vm2, %v3783_v62 }
0x127b   :  { %3768 = vrot.lane.b32.xlu0 %v9109_v54, %s7182_s17 }
0x127f   :  { %6405 = vmatpush3.bf16.xpose.msra.mxu0 %v3825_v40  ;;  %3772 = vrot.lane.b32.xlu0 %v9117_v27, %s7182_s17 }
0x1283   :  { %3776 = vrot.lane.b32.xlu0 %v9125_v26, %s7182_s17 }
0x1287   :  { %4091 = vrot.lane.b32.xlu0 %v9101_v59, %s7183_s18 }
0x1289   :  { %v3572_v25 = vpop.xlane.xlu0 %3571 }
0x128a   :  { %6995 = vrcp.f32 %v3572_v25 }
0x128d   :  { %v3568_v34 = vpop.xlane.xlu0 %3567 }
0x128e   :  { %6997 = vrcp.f32 %v3568_v34 }
0x1291   :  { %v3574_v61 = vpop.xlane.xlu0 %3573 }
0x1292   :  { %6999 = vrcp.f32 %v3574_v61  ;;  %v3570_v50 = vpop.xlane.xlu1 %3569 }
0x1293   :  { %7001 = vrcp.f32 %v3570_v50 }
0x1294   :  { %v6996_v47 = vpop.eup %6995 }
0x1295   :  { %v3787_v62 = vpop.permute.xlu0 %3786  ;;  %v3613_v21 = vmul.f32 %v6996_v47, %v9355_v0 }
0x1296   :  { %v3785_v52 = vpop.permute.xlu1 %3784  ;;  %v3831_v11 = vsel %vm661_vm2, %v3787_v62, 0 }
0x1297   :  { %v3828_v46 = vsel %vm661_vm2, %v3785_v52, 0  ;;  %6629 = vmatprep.subr.msk.bf16.mxu0 %vm661_vm2, %v3785_v52 }
0x1298   :  { %6407 = vmatpush3.bf16.xpose.msra.mxu0 %v3828_v46  ;;  %v6998_v42 = vpop.eup %6997 }
0x1299   :  { %6630 = vmatprep.subr.msk.bf16.mxu0 %vm661_vm2, %v3787_v62  ;;  %v3611_v33 = vmul.f32 %v6998_v42, %v9358_v41  ;;  %v3789_v20 = vpop.permute.xlu0 %3788 }
0x129a   :  { %v3834_v17 = vsel %vm661_vm2, %v3789_v20, 0 }
0x129c   :  { %v7000_v59 = vpop.eup %6999 }
0x129d   :  { %v7002_v60 = vpop.eup %7001  ;;  %v3614_v31 = vmul.f32 %v7000_v59, %v9361_v43 }
0x129e   :  { %v3612_v23 = vmul.f32 %v7002_v60, %v9363_v63 }
0x129f   :  { %v3626_v35 = vpack.c.bf16 %v3614_v31, %v3613_v21 }
0x12a0   :  { %6409 = vmatpush3.bf16.xpose.msra.mxu0 %v3831_v11  ;;  %v3625_v15 = vpack.c.bf16 %v3612_v23, %v3611_v33 }
0x12a1   :  { %6631 = vmatprep.subr.msk.bf16.mxu0 %vm661_vm2, %v3789_v20 }
0x12a2   :  { %6388 = vmatprep.mubr.bf16.mxu0 %v3625_v15 }
0x12a3   :  { %6389 = vmatmul.mubr.bf16.gmra.mrb[80].mxu0 %v3626_v35 }
0x12a8   :  { %6411 = vmatpush3.bf16.xpose.msra.mxu0 %v3834_v17 }
0x12c7   :  { %v3586_v0 = vpop.xlane.xlu1 %3585 }
0x12ca   :  { %v3580_v43 = vpop.xlane.xlu0 %3579 }
0x12cb   :  { %v3793_v33 = vpop.permute.xlu1 %3792 }
0x12cc   :  { %v3840_v17 = vsel %vm661_vm2, %v3793_v33, 0 }
0x12ce   :  { %v3576_v8 = vpop.xlane.xlu0 %3575 }
0x12d2   :  { %v3582_v41 = vpop.xlane.xlu0 %3581 }
0x12d3   :  { %7003 = vrcp.f32 %v3582_v41  ;;  %v3771_v41 = vpop.permute.xlu1 %3770 }
0x12d4   :  { %7005 = vrcp.f32 %v3576_v8 }
0x12d5   :  { %7007 = vrcp.f32 %v3580_v43 }
0x12d6   :  { %v3578_v63 = vpop.xlane.xlu0 %3577 }
0x12d7   :  { %7009 = vrcp.f32 %v3578_v63  ;;  %v3775_v63 = vpop.permute.xlu1 %3774 }
0x12d8   :  { %7011 = vrcp.f32 %v3586_v0 }
0x12da   :  { %v3588_v18 = vpop.xlane.xlu0 %3587 }
0x12dd   :  { %v7004_v53 = vpop.eup %7003 }
0x12de   :  { %v3584_v39 = vpop.xlane.xlu0 %3583  ;;  %v7006_v40 = vpop.eup %7005  ;;  %v3618_v61 = vmul.f32 %v7004_v53, %v9390_v30 }
0x12df   :  { %7013 = vrcp.f32 %v3584_v39  ;;  %v7008_v25 = vpop.eup %7007  ;;  %v3615_v52 = vmul.f32 %v7006_v40, %v9386_v16 }
0x12e0   :  { %7015 = vrcp.f32 %v3588_v18  ;;  %v3617_v62 = vmul.f32 %v7008_v25, %v9382_v28 }
0x12e1   :  { %v7010_v34 = vpop.eup %7009 }
0x12e2   :  { %v3590_v50 = vpop.xlane.xlu0 %3589  ;;  %v3616_v46 = vmul.f32 %v7010_v34, %v9393_v57  ;;  %v3628_v42 = vpack.c.bf16 %v3618_v61, %v3617_v62  ;;  %v7012_v60 = vpop.eup %7011 }
0x12e3   :  { %7017 = vrcp.f32 %v3590_v50  ;;  %v3620_v28 = vmul.f32 %v7012_v60, %v9378_v49 }
0x12e4   :  { %v3627_v47 = vpack.c.bf16 %v3616_v46, %v3615_v52 }
0x12e6   :  { %6392 = vmatprep.mubr.bf16.mxu0 %v3627_v47  ;;  %v3791_v59 = vpop.permute.xlu0 %3790 }
0x12e7   :  { %6393 = vmatmul.mubr.bf16.gmra.mrb[84].mxu0 %v3628_v42  ;;  %6632 = vmatprep.subr.msk.bf16.mxu0 %vm661_vm2, %v3791_v59  ;;  %v3837_v31 = vsel %vm661_vm2, %v3791_v59, 0 }
0x12e8   :  { %6413 = vmatpush3.bf16.xpose.msra.mxu0 %v3837_v31 }
0x12e9   :  { %v7014_v30 = vpop.eup %7013  ;;  %6633 = vmatprep.subr.msk.bf16.mxu0 %vm661_vm2, %v3793_v33 }
0x12ea   :  { %v3763_v16 = vpop.permute.xlu0 %3762  ;;  %v3619_v57 = vmul.f32 %v7014_v30, %v9403_v48  ;;  %v7016_v23 = vpop.eup %7015 }
0x12eb   :  { %v3621_v15 = vmul.f32 %v7016_v23, %v9398_v24 }
0x12ec   :  { %v3629_v11 = vpack.c.bf16 %v3620_v28, %v3619_v57 }
0x12ed   :  { %v7018_v21 = vpop.eup %7017 }
0x12ee   :  { %6396 = vmatprep.mubr.bf16.mxu0 %v3629_v11  ;;  %v3765_v20 = vpop.permute.xlu0 %3764  ;;  %v3622_v35 = vmul.f32 %v7018_v21, %v9408_v9  ;;  %v4094_v9 = vpop.permute.xlu1 %4093 }
0x12f0   :  { %6415 = vmatpush3.bf16.xpose.msra.mxu0 %v3840_v17  ;;  %v3630_v43 = vpack.c.bf16 %v3622_v35, %v3621_v15 }
0x12f2   :  { %6397 = vmatmul.mubr.bf16.gmra.mrb[88].mxu0 %v3630_v43  ;;  %v3767_v8 = vpop.permute.xlu0 %3766 }
0x12f3   :  { %6416 = vmatprep.mubr.msk.bf16.mxu0 %vm661_vm2, %v3763_v16 }
0x12f6   :  { %v3769_v48 = vpop.permute.xlu0 %3768 }
0x12fa   :  { %6417 = vmatmul.mubr.msk.bf16.vlgmr.msra.gmra.mrb[92].mxu0 %vm661_vm2, %v3765_v20  ;;  %v3773_v49 = vpop.permute.xlu0 %3772 }
0x12fb   :  { %6420 = vmatprep.mubr.msk.bf16.mxu0 %vm661_vm2, %v3767_v8 }
0x12fe   :  { %v3777_v0 = vpop.permute.xlu0 %3776 }
0x1302   :  { %6421 = vmatmul.mubr.msk.bf16.gmra.mrb[96].mxu0 %vm661_vm2, %v3769_v48  ;;  %v4092_v24 = vpop.permute.xlu0 %4091 }
0x1303   :  { %6424 = vmatprep.mubr.msk.bf16.mxu0 %vm661_vm2, %v3771_v41  ;;  %6432 = vmatprep.subr.bf16.mxu1 %v4092_v24 }
0x1304   :  { %6433 = vmatpush3.bf16.msra.mxu1 %v4092_v24 }
0x1305   :  { %6434 = vmatprep.subr.bf16.mxu1 %v4094_v9 }
0x1308   :  { %6435 = vmatpush3.bf16.msra.mxu1 %v4094_v9 }
0x130a   :  { %6425 = vmatmul.mubr.msk.bf16.gmra.mrb[100].mxu0 %vm661_vm2, %v3773_v49 }
0x130b   :  { %6428 = vmatprep.mubr.msk.bf16.mxu0 %vm661_vm2, %v3775_v63 }
0x1312   :  { %6429 = vmatmul.mubr.msk.bf16.gmra.mrb[104].mxu0 %vm661_vm2, %v3777_v0 }
0x1341   :  { %v9471_v18 = vpop.f32.mrb[76].mxu0 }
0x1342   :  { %v9473_v53 = vpop.f32.mrb[77].mxu0 }
0x1343   :  { %v9475_v39 = vpop.f32.mrb[78].mxu0 }
0x1344   :  { %v3755_v40 = vpack.c.bf16 %v9475_v39, %v9471_v18  ;;  %v9479_v25 = vpop.f32.mrb[79].mxu0 }
0x1345   :  { %v3754_v34 = vpack.c.bf16 %v9479_v25, %v9473_v53  ;;  %v9708_v53 = vld [vmem:[%s10424_s7 + $0x1] ss:$0 sm:$0xff]  ;;  %s7184_s7 = smov 64  }
0x1376   :  { %v9483_v61 = vpop.f32.mrb[80].mxu0 }
0x1377   :  { %v9485_v50 = vpop.f32.mrb[81].mxu0 }
0x1378   :  { %v9487_v52 = vpop.f32.mrb[82].mxu0 }
0x1379   :  { %v3757_v46 = vpack.c.bf16 %v9487_v52, %v9483_v61  ;;  %v9491_v62 = vpop.f32.mrb[83].mxu0 }
0x137a   :  { %v3756_v47 = vpack.c.bf16 %v9491_v62, %v9485_v50 }
0x13ba   :  { %v9495_v42 = vpop.f32.mrb[84].mxu0 }
0x13bb   :  { %v9497_v59 = vpop.f32.mrb[85].mxu0 }
0x13bc   :  { %v9499_v60 = vpop.f32.mrb[86].mxu0 }
0x13bd   :  { %v3759_v31 = vpack.c.bf16 %v9499_v60, %v9495_v42  ;;  %v9503_v33 = vpop.f32.mrb[87].mxu0 }
0x13be   :  { %v3758_v30 = vpack.c.bf16 %v9503_v33, %v9497_v59 }
0x13c5   :  { %v9507_v16 = vpop.f32.mrb[88].mxu0 }
0x13c6   :  { %v9509_v57 = vpop.f32.mrb[89].mxu0 }
0x13c7   :  { %v9511_v28 = vpop.f32.mrb[90].mxu0 }
0x13c8   :  { %v3761_v23 = vpack.c.bf16 %v9511_v28, %v9507_v16  ;;  %v9515_v11 = vpop.f32.mrb[91].mxu0  ;;  %v10540_v16 = vld [vmem:[#allocation2_spill] sm:$0xff] }
0x13c9   :  { %v3760_v21 = vpack.c.bf16 %v9515_v11, %v9509_v57  ;;  %v10542_v11 = vld [vmem:[#allocation4_spill] sm:$0xff] }
0x13cd   :  { %v6418_v20 = vpop.f32.mrb[92].mxu0 }
0x13ce   :  { %v3885_v15 = vadd.f32 %v6418_v20, %v9182_v14  ;;  %v3876_v35 = vpop.f32.mrb[93].mxu0 }
0x13cf   :  { %v3877_v17 = vadd.f32 %v9195_v55, %v3876_v35  ;;  %v6419_v43 = vpop.f32.mrb[94].mxu0 }
0x13d0   :  { %3943 = vmax.xlane.f32.xlu0 %v3885_v15  ;;  %v3879_v8 = vpop.f32.mrb[95].mxu0  ;;  %v3888_v41 = vadd.f32 %v6419_v43, %v9207_v2 }
0x13d1   :  { %v9522_v48 = vadd.f32 %v9190_v4, %v3879_v8  ;;  %3939 = vmax.xlane.f32.xlu1 %v3877_v17 }
0x13d4   :  { %3941 = vmax.xlane.f32.xlu0 %v9522_v48 }
0x13d5   :  { %3945 = vmax.xlane.f32.xlu1 %v3888_v41  ;;  %v6422_v49 = vpop.f32.mrb[96].mxu0 }
0x13d6   :  { %v3901_v63 = vadd.f32 %v6422_v49, %v9222_v36  ;;  %v3892_v0 = vpop.f32.mrb[97].mxu0 }
0x13d7   :  { %v6423_v14 = vpop.f32.mrb[98].mxu0  ;;  %v3893_v9 = vadd.f32 %v9230_v45, %v3892_v0 }
0x13d8   :  { %v9528_v24 = vadd.f32 %v6423_v14, %v9235_v32  ;;  %3951 = vmax.xlane.f32.xlu0 %v3901_v63  ;;  %v3895_v55 = vpop.f32.mrb[99].mxu0 }
0x13d9   :  { %v9533_v4 = vadd.f32 %v9252_v10, %v3895_v55 }
0x13da   :  { %3953 = vmax.xlane.f32.xlu1 %v9528_v24 }
0x13dc   :  { %3947 = vmax.xlane.f32.xlu0 %v3893_v9 }
0x13dd   :  { %v6426_v2 = vpop.f32.mrb[100].mxu0 }
0x13de   :  { %v9536_v20 = vadd.f32 %v6426_v2, %v9247_v56  ;;  %3949 = vmax.xlane.f32.xlu1 %v9533_v4  ;;  %v3908_v36 = vpop.f32.mrb[101].mxu0 }
0x13df   :  { %v6427_v35 = vpop.f32.mrb[102].mxu0  ;;  %v9544_v43 = vadd.f32 %v9265_v3, %v3908_v36 }
0x13e0   :  { %v9540_v32 = vadd.f32 %v6427_v35, %v9270_v44  ;;  %3959 = vmax.xlane.f32.xlu0 %v9536_v20  ;;  %v3911_v45 = vpop.f32.mrb[103].mxu0 }
0x13e1   :  { %v9548_v10 = vadd.f32 %v9288_v5, %v3911_v45 }
0x13e2   :  { %3961 = vmax.xlane.f32.xlu1 %v9540_v32 }
0x13e4   :  { %3955 = vmax.xlane.f32.xlu0 %v9544_v43 }
0x13e5   :  { %v6430_v56 = vpop.f32.mrb[104].mxu0 }
0x13e6   :  { %v9552_v8 = vadd.f32 %v6430_v56, %v9283_v6  ;;  %3957 = vmax.xlane.f32.xlu1 %v9548_v10  ;;  %v3924_v44 = vpop.f32.mrb[105].mxu0 }
0x13e7   :  { %v6431_v49 = vpop.f32.mrb[106].mxu0  ;;  %v9557_v3 = vadd.f32 %v9301_v58, %v3924_v44 }
0x13e8   :  { %3967 = vmax.xlane.f32.xlu0 %v9552_v8  ;;  %v3927_v0 = vpop.f32.mrb[107].mxu0  ;;  %v9569_v6 = vadd.f32 %v6431_v49, %v9306_v29 }
0x13e9   :  { %v9573_v5 = vadd.f32 %v9319_v38, %v3927_v0 }
0x13ec   :  { %3963 = vmax.xlane.f32.xlu0 %v9557_v3 }
0x13f7   :  { %4099 = vrot.lane.b32.xlu1 %v9119_v19, %s7183_s18 }
0x1402   :  { %4095 = vrot.lane.b32.xlu0 %v9111_v51, %s7183_s18 }
0x1406   :  { %4097 = vrot.lane.b32.xlu0 %v9109_v54, %s7183_s18 }
0x140a   :  { %4103 = vrot.lane.b32.xlu0 %v9127_v22, %s7183_s18 }
0x141b   :  { %3969 = vmax.xlane.f32.xlu1 %v9569_v6 }
0x141f   :  { %3965 = vmax.xlane.f32.xlu1 %v9573_v5 }
0x1430   :  { %4101 = vrot.lane.b32.xlu1 %v9117_v27, %s7183_s18 }
0x145d   :  { %v3944_v51 = vpop.xlane.xlu0 %3943 }
0x145e   :  { %v3973_v19 = vsub.f32 %v3885_v15, %v3944_v51  ;;  %v3940_v58 = vpop.xlane.xlu1 %3939 }
0x145f   :  { %v3971_v54 = vsub.f32 %v3877_v17, %v3940_v58 }
0x1460   :  { %v3991_v14 = vmul.f32 1.442695, %v3973_v19 }
0x1461   :  { %v3942_v55 = vpop.xlane.xlu0 %3941  ;;  %v3987_v22 = vmul.f32 1.442695, %v3971_v54 }
0x1462   :  { %7019 = vpow2.f32 %v3991_v14  ;;  %v3946_v29 = vpop.xlane.xlu1 %3945  ;;  %v3972_v36 = vsub.f32 %v9522_v48, %v3942_v55 }
0x1463   :  { %v3974_v2 = vsub.f32 %v3888_v41, %v3946_v29  ;;  %7021 = vpow2.f32 %v3987_v22 }
0x1464   :  { %v3989_v49 = vmul.f32 1.442695, %v3972_v36 }
0x1465   :  { %v3993_v35 = vmul.f32 1.442695, %v3974_v2  ;;  %v3952_v38 = vpop.xlane.xlu0 %3951 }
0x1466   :  { %v3977_v45 = vsub.f32 %v3901_v63, %v3952_v38 }
0x1467   :  { %v3954_v56 = vpop.xlane.xlu1 %3953  ;;  %7023 = vpow2.f32 %v3993_v35 }
0x1468   :  { %v3999_v44 = vmul.f32 1.442695, %v3977_v45  ;;  %v3978_v27 = vsub.f32 %v9528_v24, %v3954_v56 }
0x1469   :  { %v3948_v15 = vpop.xlane.xlu0 %3947 }
0x146a   :  { %7025 = vpow2.f32 %v3999_v44  ;;  %v3975_v17 = vsub.f32 %v3893_v9, %v3948_v15  ;;  %v4001_v48 = vmul.f32 1.442695, %v3978_v27 }
0x146b   :  { %v3950_v0 = vpop.xlane.xlu1 %3949  ;;  %7027 = vpow2.f32 %v3989_v49 }
0x146c   :  { %v9580_v51 = vpop.eup %7019  ;;  %v3995_v19 = vmul.f32 1.442695, %v3975_v17  ;;  %v3976_v41 = vsub.f32 %v9533_v4, %v3950_v0 }
0x146d   :  { %4023 = vadd.xlane.f32.xlu1 %v9580_v51  ;;  %v3960_v63 = vpop.xlane.xlu0 %3959  ;;  %v9585_v24 = vpop.eup %7021 }
0x146e   :  { %7029 = vpow2.f32 %v3995_v19  ;;  %v3997_v58 = vmul.f32 1.442695, %v3976_v41  ;;  %v3981_v54 = vsub.f32 %v9536_v20, %v3960_v63 }
0x146f   :  { %v3962_v14 = vpop.xlane.xlu1 %3961  ;;  %7031 = vpow2.f32 %v4001_v48 }
0x1470   :  { %7033 = vpow2.f32 %v3997_v58  ;;  %v4007_v55 = vmul.f32 1.442695, %v3981_v54  ;;  %v3982_v20 = vsub.f32 %v9540_v32, %v3962_v14 }
0x1471   :  { %4019 = vadd.xlane.f32.xlu1 %v9585_v24  ;;  %v3956_v9 = vpop.xlane.xlu0 %3955  ;;  %v9589_v22 = vpop.eup %7023 }
0x1472   :  { %v3979_v4 = vsub.f32 %v9544_v43, %v3956_v9  ;;  %7035 = vpow2.f32 %v4007_v55 }
0x1473   :  { %v3958_v29 = vpop.xlane.xlu1 %3957 }
0x1474   :  { %v9591_v2 = vpop.eup %7025  ;;  %v3980_v36 = vsub.f32 %v9548_v10, %v3958_v29  ;;  %v4003_v38 = vmul.f32 1.442695, %v3979_v4  ;;  %v4009_v10 = vmul.f32 1.442695, %v3982_v20 }
0x1475   :  { %4025 = vadd.xlane.f32.xlu1 %v9589_v22  ;;  %4031 = vadd.xlane.f32.xlu0 %v9591_v2  ;;  %v3968_v35 = vpop.xlane.xlu0 %3967  ;;  %v9598_v43 = vpop.eup %7027 }
0x1476   :  { %v4005_v45 = vmul.f32 1.442695, %v3980_v36  ;;  %v3985_v56 = vsub.f32 %v9552_v8, %v3968_v35 }
0x1477   :  { %v4100_v48 = vpop.permute.xlu1 %4099 }
0x1478   :  { %v9600_v44 = vpop.eup %7029  ;;  %7037 = vpow2.f32 %v4005_v45  ;;  %v4015_v49 = vmul.f32 1.442695, %v3985_v56 }
0x1479   :  { %4021 = vadd.xlane.f32.xlu1 %v9598_v43  ;;  %4027 = vadd.xlane.f32.xlu0 %v9600_v44  ;;  %v3964_v32 = vpop.xlane.xlu0 %3963  ;;  %7039 = vpow2.f32 %v4003_v38  ;;  %v9605_v15 = vpop.eup %7031 }
0x147a   :  { %v3983_v27 = vsub.f32 %v9557_v3, %v3964_v32  ;;  %v9607_v17 = vpop.eup %7033  ;;  %7041 = vpow2.f32 %v4015_v49 }
0x147b   :  { %7043 = vpow2.f32 %v4009_v10 }
0x147c   :  { %v4011_v8 = vmul.f32 1.442695, %v3983_v27  ;;  %v9611_v19 = vpop.eup %7035 }
0x147d   :  { %4029 = vadd.xlane.f32.xlu1 %v9607_v17  ;;  %4033 = vadd.xlane.f32.xlu0 %v9605_v15  ;;  %v4096_v0 = vpop.permute.xlu0 %4095 }
0x147e   :  { %6436 = vmatprep.subr.bf16.mxu1 %v4096_v0  ;;  %7045 = vpow2.f32 %v4011_v8 }
0x147f   :  { %6437 = vmatpush3.bf16.msra.mxu1 %v4096_v0 }
0x1481   :  { %4039 = vadd.xlane.f32.xlu0 %v9611_v19  ;;  %v4098_v3 = vpop.permute.xlu0 %4097 }
0x1482   :  { %v9614_v41 = vpop.eup %7037  ;;  %6438 = vmatprep.subr.bf16.mxu1 %v4098_v3 }
0x1483   :  { %4037 = vadd.xlane.f32.xlu1 %v9614_v41  ;;  %6439 = vmatpush3.bf16.msra.mxu1 %v4098_v3  ;;  %v9617_v63 = vpop.eup %7039 }
0x1484   :  { %6440 = vmatprep.subr.bf16.mxu1 %v4100_v48  ;;  %v9620_v58 = vpop.eup %7041 }
0x1485   :  { %4035 = vadd.xlane.f32.xlu0 %v9617_v63  ;;  %v9623_v54 = vpop.eup %7043  ;;  %v4104_v38 = vpop.permute.xlu0 %4103 }
0x1487   :  { %4047 = vadd.xlane.f32.xlu1 %v9620_v58  ;;  %6441 = vmatpush3.bf16.msra.mxu1 %v4100_v48 }
0x1488   :  { %v9626_v14 = vpop.eup %7045 }
0x1489   :  { %4041 = vadd.xlane.f32.xlu0 %v9623_v54 }
0x148b   :  { %4043 = vadd.xlane.f32.xlu1 %v9626_v14 }
0x149c   :  { %4105 = vrot.lane.b32.xlu1 %v9125_v26, %s7183_s18 }
0x14a8   :  { %v3970_v9 = vpop.xlane.xlu1 %3969 }
0x14a9   :  { %v3986_v4 = vsub.f32 %v9569_v6, %v3970_v9 }
0x14ab   :  { %v4017_v35 = vmul.f32 1.442695, %v3986_v4 }
0x14ac   :  { %v3966_v55 = vpop.xlane.xlu1 %3965 }
0x14ad   :  { %v3984_v29 = vsub.f32 %v9573_v5, %v3966_v55 }
0x14af   :  { %v4013_v36 = vmul.f32 1.442695, %v3984_v29 }
0x14b0   :  { %v4102_v20 = vpop.permute.xlu1 %4101 }
0x14b1   :  { %7047 = vpow2.f32 %v4013_v36  ;;  %6442 = vmatprep.subr.bf16.mxu1 %v4102_v20 }
0x14b2   :  { %6443 = vmatpush3.bf16.msra.mxu1 %v4102_v20  ;;  %7049 = vpow2.f32 %v4017_v35 }
0x14b3   :  { %6444 = vmatprep.subr.bf16.mxu1 %v4104_v38 }
0x14b6   :  { %6445 = vmatpush3.bf16.msra.mxu1 %v4104_v38 }
0x14bb   :  { %v9633_v45 = vpop.eup %7047 }
0x14bc   :  { %4045 = vadd.xlane.f32.xlu0 %v9633_v45  ;;  %v9636_v26 = vpop.eup %7049 }
0x14c0   :  { %4049 = vadd.xlane.f32.xlu0 %v9636_v26 }
0x14fa   :  { %v4024_v6 = vpop.xlane.xlu1 %4023 }
0x14fe   :  { %v4020_v5 = vpop.xlane.xlu1 %4019 }
0x14ff   :  { %7051 = vrcp.f32 %v4020_v5 }
0x1502   :  { %v4026_v56 = vpop.xlane.xlu1 %4025  ;;  %v4032_v49 = vpop.xlane.xlu0 %4031 }
0x1506   :  { %v4022_v32 = vpop.xlane.xlu1 %4021  ;;  %v4028_v10 = vpop.xlane.xlu0 %4027 }
0x1507   :  { %7053 = vrcp.f32 %v4022_v32 }
0x1508   :  { %7055 = vrcp.f32 %v4026_v56 }
0x1509   :  { %v7052_v3 = vpop.eup %7051 }
0x150a   :  { %v4034_v27 = vpop.xlane.xlu0 %4033  ;;  %v4030_v8 = vpop.xlane.xlu1 %4029  ;;  %v4067_v55 = vmul.f32 %v7052_v3, %v9585_v24 }
0x150b   :  { %7057 = vrcp.f32 %v4030_v8 }
0x150c   :  { %7059 = vrcp.f32 %v4024_v6 }
0x150d   :  { %7061 = vrcp.f32 %v4028_v10 }
0x150e   :  { %v4040_v0 = vpop.xlane.xlu0 %4039  ;;  %7063 = vrcp.f32 %v4034_v27 }
0x1510   :  { %v4038_v48 = vpop.xlane.xlu1 %4037 }
0x1511   :  { %v7054_v9 = vpop.eup %7053 }
0x1512   :  { %v4068_v4 = vmul.f32 %v7054_v9, %v9598_v43  ;;  %v4036_v29 = vpop.xlane.xlu0 %4035  ;;  %v7056_v35 = vpop.eup %7055 }
0x1513   :  { %7065 = vrcp.f32 %v4036_v29  ;;  %v4070_v32 = vmul.f32 %v7056_v35, %v9589_v22 }
0x1514   :  { %v4048_v36 = vpop.xlane.xlu1 %4047  ;;  %v4083_v20 = vpack.c.bf16 %v4068_v4, %v4067_v55  ;;  %7067 = vrcp.f32 %v4032_v49 }
0x1515   :  { %v7058_v5 = vpop.eup %7057  ;;  %7069 = vrcp.f32 %v4038_v48 }
0x1516   :  { %6448 = vmatprep.mubr.bf16.mxu1 %v4083_v20  ;;  %v7060_v56 = vpop.eup %7059  ;;  %v4042_v10 = vpop.xlane.xlu0 %4041  ;;  %v4072_v24 = vmul.f32 %v7058_v5, %v9607_v17 }
0x1517   :  { %v7062_v6 = vpop.eup %7061  ;;  %v4069_v43 = vmul.f32 %v7060_v56, %v9580_v51  ;;  %7071 = vrcp.f32 %v4042_v10 }
0x1518   :  { %v4044_v38 = vpop.xlane.xlu1 %4043  ;;  %v4071_v27 = vmul.f32 %v7062_v6, %v9600_v44  ;;  %v7064_v49 = vpop.eup %7063  ;;  %7073 = vrcp.f32 %v4040_v0 }
0x1519   :  { %v4084_v3 = vpack.c.bf16 %v4070_v32, %v4069_v43  ;;  %v4074_v4 = vmul.f32 %v7064_v49, %v9605_v15  ;;  %7075 = vrcp.f32 %v4044_v38 }
0x151a   :  { %v4085_v9 = vpack.c.bf16 %v4072_v24, %v4071_v27 }
0x151c   :  { %v4106_v8 = vpop.permute.xlu1 %4105 }
0x151d   :  { %6446 = vmatprep.subr.bf16.mxu1 %v4106_v8  ;;  %v7066_v48 = vpop.eup %7065 }
0x151e   :  { %6447 = vmatpush3.bf16.msra.mxu1 %v4106_v8  ;;  %v7068_v55 = vpop.eup %7067  ;;  %v4075_v17 = vmul.f32 %v7066_v48, %v9617_v63 }
0x151f   :  { %v7070_v22 = vpop.eup %7069  ;;  %v4073_v51 = vmul.f32 %v7068_v55, %v9591_v2 }
0x1520   :  { %v4076_v29 = vmul.f32 %v7070_v22, %v9614_v41 }
0x1521   :  { %6449 = vmatmul.mubr.bf16.vlgmr.msra.gmra.mrb[100].mxu1 %v4084_v3  ;;  %v4086_v20 = vpack.c.bf16 %v4074_v4, %v4073_v51  ;;  %v7072_v35 = vpop.eup %7071 }
0x1522   :  { %6452 = vmatprep.mubr.bf16.mxu1 %v4085_v9  ;;  %v4087_v44 = vpack.c.bf16 %v4076_v29, %v4075_v17  ;;  %v7074_v5 = vpop.eup %7073  ;;  %v4078_v0 = vmul.f32 %v7072_v35, %v9623_v54 }
0x1523   :  { %v4077_v56 = vmul.f32 %v7074_v5, %v9611_v19  ;;  %v7076_v2 = vpop.eup %7075 }
0x1524   :  { %v4079_v32 = vmul.f32 %v7076_v2, %v9626_v14 }
0x1525   :  { %v4088_v6 = vpack.c.bf16 %v4078_v0, %v4077_v56 }
0x1529   :  { %6453 = vmatmul.mubr.bf16.gmra.mrb[104].mxu1 %v4086_v20 }
0x152a   :  { %6456 = vmatprep.mubr.bf16.mxu1 %v4087_v44 }
0x1531   :  { %6457 = vmatmul.mubr.bf16.gmra.mrb[108].mxu1 %v4088_v6 }
0x1549   :  { %v4046_v15 = vpop.xlane.xlu0 %4045 }
0x154a   :  { %7077 = vrcp.f32 %v4046_v15 }
0x154b   :  { %7079 = vrcp.f32 %v4048_v36  ;;  %v5752_v36 = vld [vmem:[%s10423_s6 + $0xc] sm:$0xf] }
0x154c   :  { %6634 = vmatprep.subr.msk.bf16.mxu1 %vm1573_vm3, %v5752_v36  ;;  %v4247_v14 = vsel %vm1573_vm3, %v5752_v36, 0 }
0x154d   :  { %v4050_v63 = vpop.xlane.xlu0 %4049  ;;  %6465 = vmatpush3.bf16.msra.mxu1 %v4247_v14 }
0x154e   :  { %7081 = vrcp.f32 %v4050_v63 }
0x1554   :  { %v7078_v41 = vpop.eup %7077 }
0x1555   :  { %v4080_v10 = vmul.f32 %v7078_v41, %v9633_v45  ;;  %v7080_v8 = vpop.eup %7079  ;;  %v5743_v45 = vld [vmem:[%s10423_s6 + $0x8] sm:$0xf] }
0x1556   :  { %v4081_v19 = vmul.f32 %v7080_v8, %v9620_v58  ;;  %6635 = vmatprep.subr.msk.bf16.mxu1 %vm1573_vm3, %v5743_v45  ;;  %v4371_v48 = vsel %vm1573_vm3, %v5743_v45, 0 }
0x1557   :  { %v4089_v24 = vpack.c.bf16 %v4080_v10, %v4079_v32 }
0x1558   :  { %v7082_v43 = vpop.eup %7081 }
0x1559   :  { %6460 = vmatprep.mubr.bf16.mxu1 %v4089_v24  ;;  %v4082_v54 = vmul.f32 %v7082_v43, %v9636_v26 }
0x155b   :  { %v4090_v38 = vpack.c.bf16 %v4082_v54, %v4081_v19  ;;  %v10544_v54 = vld [vmem:[#allocation3_spill] sm:$0xff] }
0x155d   :  { %6461 = vmatmul.mubr.bf16.gmra.mrb[112].mxu1 %v4090_v38 }
0x15f4   :  { %v6450_v58 = vpop.f32.mrb[100].mxu1 }
0x15f5   :  { %v4149_v27 = vpop.f32.mrb[101].mxu1 }
0x15f6   :  { %v6451_v26 = vpop.f32.mrb[102].mxu1 }
0x15f7   :  { %v4215_v3 = vpack.c.bf16 %v6451_v26, %v6450_v58  ;;  %v4152_v49 = vpop.f32.mrb[103].mxu1  ;;  %v10546_v58 = vld [vmem:[#allocation10_spill] sm:$0xff] }
0x15f8   :  { %v4214_v9 = vpack.c.bf16 %v4152_v49, %v4149_v27  ;;  %v10547_v26 = vld [vmem:[#allocation6_spill] sm:$0xff] }
0x15fa   :  { %6466 = vmatprep.mubr.msk.bf16.mxu1 %vm661_vm2, %v4214_v9 }
0x15fb   :  { %6467 = vmatmul.mubr.msk.bf16.vlgmr.msra.gmra.mrb[116].mxu1 %vm661_vm2, %v4215_v3 }
0x15fc   :  { %v6454_v55 = vpop.f32.mrb[104].mxu1  ;;  %6483 = vmatpush3.bf16.msra.mxu1 %v4371_v48 }
0x15fd   :  { %v4165_v22 = vpop.f32.mrb[105].mxu1 }
0x15fe   :  { %v6455_v4 = vpop.f32.mrb[106].mxu1 }
0x15ff   :  { %v4217_v17 = vpack.c.bf16 %v6455_v4, %v6454_v55  ;;  %v4168_v51 = vpop.f32.mrb[107].mxu1 }
0x1600   :  { %v4216_v29 = vpack.c.bf16 %v4168_v51, %v4165_v22 }
0x1602   :  { %6470 = vmatprep.mubr.msk.bf16.mxu1 %vm661_vm2, %v4216_v29 }
0x1603   :  { %6471 = vmatmul.mubr.msk.bf16.gmra.mrb[120].mxu1 %vm661_vm2, %v4217_v17  ;;  %v10550_v17 = vld [vmem:[#allocation5_spill] sm:$0xff] }
0x1604   :  { %v6458_v20 = vpop.f32.mrb[108].mxu1 }
0x1605   :  { %v4181_v35 = vpop.f32.mrb[109].mxu1 }
0x1606   :  { %v6459_v44 = vpop.f32.mrb[110].mxu1 }
0x1607   :  { %v4219_v5 = vpack.c.bf16 %v6459_v44, %v6458_v20  ;;  %v4184_v0 = vpop.f32.mrb[111].mxu1  ;;  %v10552_v44 = vld [vmem:[#allocation8_spill] sm:$0xff] }
0x1608   :  { %v4218_v56 = vpack.c.bf16 %v4184_v0, %v4181_v35 }
0x160a   :  { %6474 = vmatprep.mubr.msk.bf16.mxu1 %vm661_vm2, %v4218_v56 }
0x160b   :  { %6475 = vmatmul.mubr.msk.bf16.gmra.mrb[124].mxu1 %vm661_vm2, %v4219_v5 }
0x1630   :  { %v6462_v6 = vpop.f32.mrb[112].mxu1 }
0x1631   :  { %v4197_v15 = vpop.f32.mrb[113].mxu1 }
0x1632   :  { %v6463_v63 = vpop.f32.mrb[114].mxu1 }
0x1633   :  { %v4221_v2 = vpack.c.bf16 %v6463_v63, %v6462_v6  ;;  %v4200_v41 = vpop.f32.mrb[115].mxu1  ;;  %v10554_v6 = vld [vmem:[#allocation7_spill] sm:$0xff] }
0x1634   :  { %v4220_v32 = vpack.c.bf16 %v4200_v41, %v4197_v15  ;;  %v10556_v41 = vld [vmem:[#allocation9_spill] sm:$0xff] }
0x1636   :  { %6478 = vmatprep.mubr.msk.bf16.mxu1 %vm661_vm2, %v4220_v32 }
0x1637   :  { %6479 = vmatmul.mubr.msk.bf16.gmra.mrb[128].mxu1 %vm661_vm2, %v4221_v2 }
0x1638   :  { %6484 = vmatprep.mubr.msk.bf16.mxu1 %vm661_vm2, %v3754_v34 }
0x163f   :  { %6485 = vmatmul.mubr.msk.bf16.vlgmr.msra.gmra.mrb[116].mxu1 %vm661_vm2, %v3755_v40 }
0x1640   :  { %6488 = vmatprep.mubr.msk.bf16.mxu1 %vm661_vm2, %v3756_v47 }
0x1647   :  { %6489 = vmatmul.mubr.msk.bf16.gmra.mrb[120].mxu1 %vm661_vm2, %v3757_v46 }
0x1648   :  { %6492 = vmatprep.mubr.msk.bf16.mxu1 %vm661_vm2, %v3758_v30 }
0x164f   :  { %6493 = vmatmul.mubr.msk.bf16.gmra.mrb[124].mxu1 %vm661_vm2, %v3759_v31 }
0x1650   :  { %6496 = vmatprep.mubr.msk.bf16.mxu1 %vm661_vm2, %v3760_v21 }
0x1657   :  { %6497 = vmatmul.mubr.msk.bf16.gmra.mrb[128].mxu1 %vm661_vm2, %v3761_v23 }
0x1712   :  { %v6486_v18 = vpop.f32.mrb[116].mxu1 }
0x1713   :  { %v4472_v39 = vadd.f32 %v6486_v18, %v8843_v1  ;;  %v4407_v40 = vpop.f32.mrb[117].mxu1 }
0x1714   :  { %v4470_v25 = vadd.f32 %v4407_v40, %v8838_v7  ;;  %v6487_v34 = vpop.f32.mrb[118].mxu1  ;;  %v10558_v40 = vld [vmem:[#allocation11_spill] sm:$0xff] }
0x1715   :  { %v9713_v61 = vadd.f32 %v9708_v53, %v4472_v39  ;;  %v4410_v50 = vpop.f32.mrb[119].mxu1  ;;  %v4473_v46 = vadd.f32 %v6487_v34, %v8851_v13 }
0x1716   :  { %v9716_v52 = vadd.f32 %v9708_v53, %v4470_v25  ;;  %v4471_v7 = vadd.f32 %v4410_v50, %v8846_v12  ;;  %v10559_v50 = vld [vmem:[#allocation12_spill] sm:$0xff] }
0x1717   :  { %v4520_v62 = vsel %vm214_vm1, %v9713_v61, 0.0  ;;  %v9722_v1 = vadd.f32 %v9708_v53, %v4473_v46 }
0x1718   :  { %4521 = vadd.xlane.f32.xlu0 %v4520_v62  ;;  %v4514_v59 = vsel %vm214_vm1, %v9716_v52, 0.0  ;;  %v9732_v30 = vadd.f32 %v9708_v53, %v4471_v7 }
0x1719   :  { %v4523_v12 = vsel %vm214_vm1, %v9722_v1, 0.0 }
0x171a   :  { %v6490_v47 = vpop.f32.mrb[120].mxu1  ;;  %v4517_v8 = vsel %vm214_vm1, %v9732_v30, 0.0 }
0x171b   :  { %v4423_v42 = vpop.f32.mrb[121].mxu1  ;;  %v4476_v57 = vadd.f32 %v6490_v47, %v10540_v16 }
0x171c   :  { %v4474_v60 = vadd.f32 %v4423_v42, %v8862_v37  ;;  %4515 = vadd.xlane.f32.xlu0 %v4514_v59  ;;  %v6491_v31 = vpop.f32.mrb[122].mxu1 }
0x171d   :  { %v4426_v33 = vpop.f32.mrb[123].mxu1  ;;  %v9740_v23 = vadd.f32 %v9708_v53, %v4476_v57  ;;  %v4477_v21 = vadd.f32 %v6491_v31, %v10542_v11 }
0x171e   :  { %v9729_v13 = vadd.f32 %v9708_v53, %v4474_v60  ;;  %v4475_v38 = vadd.f32 %v4426_v33, %v10544_v54 }
0x171f   :  { %10541 = vst [vmem:[#allocation2_spill] sm:$0xff] %v9740_v23  ;;  %v9746_v19 = vadd.f32 %v9708_v53, %v4477_v21  ;;  %v4532_v36 = vsel %vm214_vm1, %v9740_v23, 0.0 }
0x1720   :  { %10539 = vst [vmem:[#allocation13_spill] sm:$0xff] %v9729_v13  ;;  %4524 = vadd.xlane.f32.xlu0 %v4523_v12  ;;  %v4526_v28 = vsel %vm214_vm1, %v9729_v13, 0.0  ;;  %v9752_v45 = vadd.f32 %v9708_v53, %v4475_v38 }
0x1721   :  { %4527 = vadd.xlane.f32.xlu1 %v4526_v28  ;;  %10543 = vst [vmem:[#allocation4_spill] sm:$0xff] %v9746_v19  ;;  %v4535_v9 = vsel %vm214_vm1, %v9746_v19, 0.0 }
0x1722   :  { %v6494_v37 = vpop.f32.mrb[124].mxu1  ;;  %10545 = vst [vmem:[#allocation3_spill] sm:$0xff] %v9752_v45  ;;  %v4529_v29 = vsel %vm214_vm1, %v9752_v45, 0.0 }
0x1723   :  { %v4439_v10 = vpop.f32.mrb[125].mxu1  ;;  %v4480_v27 = vadd.f32 %v6494_v37, %v10546_v58 }
0x1724   :  { %4518 = vadd.xlane.f32.xlu0 %v4517_v8  ;;  %v6495_v24 = vpop.f32.mrb[126].mxu1  ;;  %v4478_v51 = vadd.f32 %v4439_v10, %v10550_v17 }
0x1725   :  { %v4442_v43 = vpop.f32.mrb[127].mxu1  ;;  %v9762_v4 = vadd.f32 %v9708_v53, %v4480_v27  ;;  %v4481_v5 = vadd.f32 %v6495_v24, %v10552_v44 }
0x1726   :  { %v9770_v35 = vadd.f32 %v9708_v53, %v4478_v51  ;;  %v4479_v15 = vadd.f32 %v4442_v43, %v10554_v6 }
0x1727   :  { %10549 = vst [vmem:[#allocation6_spill] sm:$0xff] %v9762_v4  ;;  %v4544_v0 = vsel %vm214_vm1, %v9762_v4, 0.0  ;;  %v9776_v56 = vadd.f32 %v9708_v53, %v4481_v5 }
0x1728   :  { %4533 = vadd.xlane.f32.xlu0 %v4532_v36  ;;  %10551 = vst [vmem:[#allocation5_spill] sm:$0xff] %v9770_v35  ;;  %v4538_v63 = vsel %vm214_vm1, %v9770_v35, 0.0  ;;  %v9782_v2 = vadd.f32 %v9708_v53, %v4479_v15 }
0x1729   :  { %10553 = vst [vmem:[#allocation8_spill] sm:$0xff] %v9776_v56  ;;  %v4547_v18 = vsel %vm214_vm1, %v9776_v56, 0.0 }
0x172a   :  { %v6498_v14 = vpop.f32.mrb[128].mxu1  ;;  %10555 = vst [vmem:[#allocation7_spill] sm:$0xff] %v9782_v2  ;;  %v4541_v34 = vsel %vm214_vm1, %v9782_v2, 0.0 }
0x172b   :  { %v4484_v3 = vadd.f32 %v6498_v14, %v10547_v26  ;;  %v4455_v49 = vpop.f32.mrb[129].mxu1 }
0x172c   :  { %4536 = vadd.xlane.f32.xlu0 %v4535_v9  ;;  %v6499_v48 = vpop.f32.mrb[130].mxu1  ;;  %v4482_v32 = vadd.f32 %v4455_v49, %v10556_v41 }
0x172d   :  { %v9759_v55 = vadd.f32 %v9708_v53, %v4484_v3  ;;  %v4458_v22 = vpop.f32.mrb[131].mxu1  ;;  %v4485_v46 = vadd.f32 %v6499_v48, %v10559_v50 }
0x172e   :  { %v9788_v39 = vadd.f32 %v9708_v53, %v4482_v32  ;;  %v4483_v25 = vadd.f32 %v4458_v22, %v10558_v40 }
0x172f   :  { %10548 = vst [vmem:[#allocation10_spill] sm:$0xff] %v9759_v55  ;;  %v4556_v20 = vsel %vm214_vm1, %v9759_v55, 0.0  ;;  %v9800_v7 = vadd.f32 %v9708_v53, %v4485_v46 }
0x1730   :  { %4530 = vadd.xlane.f32.xlu0 %v4529_v29  ;;  %4557 = vadd.xlane.f32.xlu1 %v4556_v20  ;;  %10557 = vst [vmem:[#allocation9_spill] sm:$0xff] %v9788_v39  ;;  %v9795_v62 = vadd.f32 %v9708_v53, %v4483_v25  ;;  %v4550_v47 = vsel %vm214_vm1, %v9788_v39, 0.0 }
0x1731   :  { %10561 = vst [vmem:[#allocation12_spill] sm:$0xff] %v9800_v7  ;;  %v4559_v59 = vsel %vm214_vm1, %v9800_v7, 0.0 }
0x1732   :  { %10560 = vst [vmem:[#allocation11_spill] sm:$0xff] %v9795_v62  ;;  %v4553_v42 = vsel %vm214_vm1, %v9795_v62, 0.0 }
0x1734   :  { %4545 = vadd.xlane.f32.xlu0 %v4544_v0 }
0x1738   :  { %4539 = vadd.xlane.f32.xlu0 %v4538_v63 }
0x173c   :  { %4548 = vadd.xlane.f32.xlu0 %v4547_v18 }
0x1740   :  { %4542 = vadd.xlane.f32.xlu0 %v4541_v34 }
0x1744   :  { %4551 = vadd.xlane.f32.xlu0 %v4550_v47 }
0x1748   :  { %4554 = vadd.xlane.f32.xlu0 %v4553_v42 }
0x174c   :  { %4560 = vadd.xlane.f32.xlu0 %v4559_v59 }
0x17a5   :  { %v4522_v60 = vpop.xlane.xlu0 %4521 }
0x17a6   :  { %v4564_v31 = vmul.f32 0.03125, %v4522_v60 }
0x17a8   :  { %v9807_v57 = vsub.f32 %v9713_v61, %v4564_v31 }
0x17a9   :  { %v4516_v33 = vpop.xlane.xlu0 %4515 }
0x17aa   :  { %v4562_v16 = vmul.f32 0.03125, %v4516_v33  ;;  %v4596_v8 = vmul.f32 %v9807_v57, %v9807_v57 }
0x17ac   :  { %v9810_v12 = vsub.f32 %v9716_v52, %v4562_v16  ;;  %v4616_v14 = vsel %vm214_vm1, %v4596_v8, 0.0 }
0x17ad   :  { %v4525_v53 = vpop.xlane.xlu0 %4524 }
0x17ae   :  { %v4528_v28 = vpop.xlane.xlu1 %4527  ;;  %v4594_v37 = vmul.f32 %v9810_v12, %v9810_v12  ;;  %v4565_v21 = vmul.f32 0.03125, %v4525_v53 }
0x17af   :  { %v4566_v11 = vmul.f32 0.03125, %v4528_v28 }
0x17b0   :  { %v4610_v10 = vsel %vm214_vm1, %v4594_v37, 0.0  ;;  %v9821_v38 = vsub.f32 %v9722_v1, %v4565_v21  ;;  %v6657_v37 = vld [vmem:[%s10425_s11 + $0x10] sm:$0xff]  }
0x17b1   :  { %v9818_v24 = vsub.f32 %v9729_v13, %v4566_v11  ;;  %v4519_v43 = vpop.xlane.xlu0 %4518  ;;  %4611 = vadd.xlane.f32.xlu1 %v4610_v10  ;;  %6500 = vmatprep.subr.bf16.mxu0 %v6657_v37 }
0x17b2   :  { %v4563_v54 = vmul.f32 0.03125, %v4519_v43  ;;  %v4597_v22 = vmul.f32 %v9821_v38, %v9821_v38  ;;  %6501 = vmatpush3.bf16.msra.mxu0 %v6657_v37 }
0x17b3   :  { %v4598_v58 = vmul.f32 %v9818_v24, %v9818_v24 }
0x17b4   :  { %v9824_v36 = vsub.f32 %v9732_v30, %v4563_v54  ;;  %v4619_v44 = vsel %vm214_vm1, %v4597_v22, 0.0 }
0x17b5   :  { %v4534_v27 = vpop.xlane.xlu0 %4533  ;;  %4617 = vadd.xlane.f32.xlu1 %v4616_v14  ;;  %v4622_v9 = vsel %vm214_vm1, %v4598_v58, 0.0 }
0x17b6   :  { %v4568_v26 = vmul.f32 0.03125, %v4534_v27  ;;  %v4595_v3 = vmul.f32 %v9824_v36, %v9824_v36 }
0x17b8   :  { %v9832_v49 = vsub.f32 %v9740_v23, %v4568_v26  ;;  %v4613_v48 = vsel %vm214_vm1, %v4595_v3, 0.0 }
0x17b9   :  { %v4537_v17 = vpop.xlane.xlu0 %4536  ;;  %4623 = vadd.xlane.f32.xlu1 %v4622_v9  ;;  %4614 = vadd.xlane.f32.xlu0 %v4613_v48 }
0x17ba   :  { %v4600_v51 = vmul.f32 %v9832_v49, %v9832_v49  ;;  %v4569_v29 = vmul.f32 0.03125, %v4537_v17 }
0x17bc   :  { %v4628_v20 = vsel %vm214_vm1, %v4600_v51, 0.0  ;;  %v9843_v6 = vsub.f32 %v9746_v19, %v4569_v29 }
0x17bd   :  { %v4531_v5 = vpop.xlane.xlu0 %4530  ;;  %4629 = vadd.xlane.f32.xlu1 %v4628_v20  ;;  %4620 = vadd.xlane.f32.xlu0 %v4619_v44  ;;  %v4558_v16 = vpop.xlane.xlu1 %4557 }
0x17be   :  { %v4567_v0 = vmul.f32 0.03125, %v4531_v5  ;;  %v4601_v40 = vmul.f32 %v9843_v6, %v9843_v6  ;;  %v4576_v11 = vmul.f32 0.03125, %v4558_v16 }
0x17c0   :  { %v9846_v15 = vsub.f32 %v9752_v45, %v4567_v0  ;;  %v4631_v47 = vsel %vm214_vm1, %v4601_v40, 0.0  ;;  %v9878_v58 = vsub.f32 %v9759_v55, %v4576_v11  ;;  %v6658_v40 = vld [vmem:[%s10425_s11 + $0x18] sm:$0xff]  }
0x17c1   :  { %v4546_v63 = vpop.xlane.xlu0 %4545  ;;  %6502 = vmatprep.subr.bf16.mxu0 %v6658_v40 }
0x17c2   :  { %v4599_v41 = vmul.f32 %v9846_v15, %v9846_v15  ;;  %v4572_v32 = vmul.f32 0.03125, %v4546_v63  ;;  %v4608_v20 = vmul.f32 %v9878_v58, %v9878_v58  ;;  %6503 = vmatpush3.bf16.msra.mxu0 %v6658_v40 }
0x17c4   :  { %v4625_v18 = vsel %vm214_vm1, %v4599_v41, 0.0  ;;  %v9854_v50 = vsub.f32 %v9762_v4, %v4572_v32  ;;  %v4652_v41 = vsel %vm214_vm1, %v4608_v20, 0.0 }
0x17c5   :  { %v4540_v25 = vpop.xlane.xlu0 %4539  ;;  %4626 = vadd.xlane.f32.xlu0 %v4625_v18 }
0x17c6   :  { %v4570_v34 = vmul.f32 0.03125, %v4540_v25  ;;  %v4604_v33 = vmul.f32 %v9854_v50, %v9854_v50 }
0x17c8   :  { %v9857_v46 = vsub.f32 %v9770_v35, %v4570_v34  ;;  %v4640_v8 = vsel %vm214_vm1, %v4604_v33, 0.0 }
0x17c9   :  { %v4549_v42 = vpop.xlane.xlu0 %4548  ;;  %4632 = vadd.xlane.f32.xlu0 %v4631_v47 }
0x17ca   :  { %v4602_v59 = vmul.f32 %v9857_v46, %v9857_v46  ;;  %v4573_v60 = vmul.f32 0.03125, %v4549_v42 }
0x17cc   :  { %v4634_v31 = vsel %vm214_vm1, %v4602_v59, 0.0  ;;  %v9869_v21 = vsub.f32 %v9776_v56, %v4573_v60 }
0x17cd   :  { %v4543_v53 = vpop.xlane.xlu0 %4542  ;;  %4635 = vadd.xlane.f32.xlu1 %v4634_v31 }
0x17ce   :  { %v4571_v28 = vmul.f32 0.03125, %v4543_v53  ;;  %v4605_v3 = vmul.f32 %v9869_v21, %v9869_v21 }
0x17d0   :  { %v9872_v10 = vsub.f32 %v9782_v2, %v4571_v28  ;;  %v4643_v29 = vsel %vm214_vm1, %v4605_v3, 0.0 }
0x17d1   :  { %4641 = vadd.xlane.f32.xlu1 %v4640_v8  ;;  %v4552_v43 = vpop.xlane.xlu0 %4551 }
0x17d2   :  { %v4574_v54 = vmul.f32 0.03125, %v4552_v43  ;;  %v4603_v14 = vmul.f32 %v9872_v10, %v9872_v10 }
0x17d4   :  { %v9881_v27 = vsub.f32 %v9788_v39, %v4574_v54  ;;  %v4637_v26 = vsel %vm214_vm1, %v4603_v14, 0.0 }
0x17d5   :  { %4638 = vadd.xlane.f32.xlu0 %v4637_v26  ;;  %v4555_v9 = vpop.xlane.xlu0 %4554 }
0x17d6   :  { %v4575_v48 = vmul.f32 0.03125, %v4555_v9  ;;  %v4606_v22 = vmul.f32 %v9881_v27, %v9881_v27 }
0x17d8   :  { %v9889_v17 = vsub.f32 %v9795_v62, %v4575_v48  ;;  %v4646_v51 = vsel %vm214_vm1, %v4606_v22, 0.0 }
0x17d9   :  { %4647 = vadd.xlane.f32.xlu1 %v4646_v51  ;;  %4644 = vadd.xlane.f32.xlu0 %v4643_v29  ;;  %v4561_v44 = vpop.xlane.xlu0 %4560  ;;  %v9912_v29 = vld [vmem:[%s10426_s9 + $0x1] ss:$0 sm:$0xff] }
0x17da   :  { %v4577_v5 = vmul.f32 0.03125, %v4561_v44  ;;  %v4607_v0 = vmul.f32 %v9889_v17, %v9889_v17 }
0x17dc   :  { %v9898_v63 = vsub.f32 %v9800_v7, %v4577_v5  ;;  %v4649_v32 = vsel %vm214_vm1, %v4607_v0, 0.0 }
0x17dd   :  { %4653 = vadd.xlane.f32.xlu1 %v4652_v41  ;;  %4650 = vadd.xlane.f32.xlu0 %v4649_v32 }
0x17de   :  { %v4609_v18 = vmul.f32 %v9898_v63, %v9898_v63 }
0x17e0   :  { %v4655_v25 = vsel %vm214_vm1, %v4609_v18, 0.0 }
0x17e1   :  { %4656 = vadd.xlane.f32.xlu0 %v4655_v25 }
0x183e   :  { %v4612_v34 = vpop.xlane.xlu1 %4611 }
0x183f   :  { %v4658_v47 = vmul.f32 0.03125, %v4612_v34 }
0x1841   :  { %v4674_v42 = vadd.f32 1e-05, %v4658_v47 }
0x1842   :  { %v4618_v59 = vpop.xlane.xlu1 %4617 }
0x1843   :  { %v4660_v60 = vmul.f32 0.03125, %v4618_v59  ;;  %7083 = vrsqrt.f32 %v4674_v42 }
0x1845   :  { %v4676_v31 = vadd.f32 1e-05, %v4660_v60 }
0x1846   :  { %v4624_v33 = vpop.xlane.xlu1 %4623  ;;  %v4615_v16 = vpop.xlane.xlu0 %4614 }
0x1847   :  { %v4662_v53 = vmul.f32 0.03125, %v4624_v33  ;;  %v4659_v28 = vmul.f32 0.03125, %v4615_v16  ;;  %7085 = vrsqrt.f32 %v4676_v31 }
0x1849   :  { %v4675_v37 = vadd.f32 1e-05, %v4659_v28  ;;  %v4678_v43 = vadd.f32 1e-05, %v4662_v53 }
0x184a   :  { %v4630_v11 = vpop.xlane.xlu1 %4629  ;;  %v4621_v8 = vpop.xlane.xlu0 %4620 }
0x184b   :  { %v4661_v54 = vmul.f32 0.03125, %v4621_v8  ;;  %7087 = vrsqrt.f32 %v4675_v37  ;;  %v4664_v14 = vmul.f32 0.03125, %v4630_v11 }
0x184c   :  { %7089 = vrsqrt.f32 %v4678_v43 }
0x184d   :  { %v4677_v26 = vadd.f32 1e-05, %v4661_v54  ;;  %v7084_v3 = vpop.eup %7083  ;;  %v4680_v9 = vadd.f32 1e-05, %v4664_v14 }
0x184e   :  { %v4706_v48 = vmul.f32 %v7084_v3, %v9810_v12  ;;  %v9919_v12 = vld [vmem:[%s10427_s10 + $0x1] ss:$0 sm:$0xff] }
0x184f   :  { %7091 = vrsqrt.f32 %v4677_v26 }
0x1850   :  { %7093 = vrsqrt.f32 %v4680_v9  ;;  %v4728_v32 = vmul.f32 %v9912_v29, %v4706_v48 }
0x1851   :  { %v7086_v51 = vpop.eup %7085 }
0x1852   :  { %v4627_v22 = vpop.xlane.xlu0 %4626  ;;  %v4708_v0 = vmul.f32 %v7086_v51, %v9807_v57  ;;  %v4750_v60 = vadd.f32 %v9919_v12, %v4728_v32 }
0x1853   :  { %v4663_v20 = vmul.f32 0.03125, %v4627_v22 }
0x1854   :  { %v4730_v59 = vmul.f32 %v9912_v29, %v4708_v0 }
0x1855   :  { %v4679_v44 = vadd.f32 1e-05, %v4663_v20  ;;  %v7088_v5 = vpop.eup %7087 }
0x1856   :  { %v4633_v41 = vpop.xlane.xlu0 %4632  ;;  %v4707_v18 = vmul.f32 %v7088_v5, %v9824_v36  ;;  %v7090_v25 = vpop.eup %7089  ;;  %v4752_v43 = vadd.f32 %v9919_v12, %v4730_v59 }
0x1857   :  { %7095 = vrsqrt.f32 %v4679_v44  ;;  %v4665_v40 = vmul.f32 0.03125, %v4633_v41  ;;  %v4710_v36 = vmul.f32 %v7090_v25, %v9818_v24 }
0x1858   :  { %v4729_v47 = vmul.f32 %v9912_v29, %v4707_v18 }
0x1859   :  { %v4681_v34 = vadd.f32 1e-05, %v4665_v40  ;;  %v7092_v42 = vpop.eup %7091  ;;  %v4732_v3 = vmul.f32 %v9912_v29, %v4710_v36 }
0x185a   :  { %v4636_v57 = vpop.xlane.xlu1 %4635  ;;  %v4709_v31 = vmul.f32 %v7092_v42, %v9821_v38  ;;  %v4751_v16 = vadd.f32 %v9919_v12, %v4729_v47  ;;  %v7094_v8 = vpop.eup %7093 }
0x185b   :  { %7097 = vrsqrt.f32 %v4681_v34  ;;  %v4666_v33 = vmul.f32 0.03125, %v4636_v57  ;;  %v4712_v24 = vmul.f32 %v7094_v8, %v9832_v49  ;;  %v4754_v0 = vadd.f32 %v9919_v12, %v4732_v3 }
0x185c   :  { %v4731_v53 = vmul.f32 %v9912_v29, %v4709_v31  ;;  %v4771_v37 = vpack.c.bf16 %v4751_v16, %v4750_v60 }
0x185d   :  { %v4682_v28 = vadd.f32 1e-05, %v4666_v33 }
0x185e   :  { %v4642_v11 = vpop.xlane.xlu1 %4641  ;;  %v4753_v54 = vadd.f32 %v9919_v12, %v4731_v53  ;;  %6504 = vmatprep.mubr.msk.bf16.mxu0 %vm214_vm1, %v4771_v37 }
0x185f   :  { %v4668_v14 = vmul.f32 0.03125, %v4642_v11  ;;  %7099 = vrsqrt.f32 %v4682_v28 }
0x1860   :  { %v4772_v26 = vpack.c.bf16 %v4753_v54, %v4752_v43 }
0x1861   :  { %v7096_v38 = vpop.eup %7095  ;;  %v4684_v48 = vadd.f32 1e-05, %v4668_v14 }
0x1862   :  { %v4711_v9 = vmul.f32 %v7096_v38, %v9846_v15  ;;  %v4639_v22 = vpop.xlane.xlu0 %4638  ;;  %6505 = vmatmul.mubr.msk.bf16.vlgmr.msra.gmra.mrb[108].mxu0 %vm214_vm1, %v4772_v26  ;;  %v4734_v15 = vmul.f32 %v9912_v29, %v4712_v24 }
0x1863   :  { %v4667_v51 = vmul.f32 0.03125, %v4639_v22  ;;  %7101 = vrsqrt.f32 %v4684_v48 }
0x1864   :  { %v4733_v20 = vmul.f32 %v9912_v29, %v4711_v9 }
0x1865   :  { %v7098_v44 = vpop.eup %7097  ;;  %v4683_v5 = vadd.f32 1e-05, %v4667_v51 }
0x1866   :  { %v4713_v41 = vmul.f32 %v7098_v44, %v9843_v6  ;;  %v4648_v32 = vpop.xlane.xlu1 %4647  ;;  %v4645_v18 = vpop.xlane.xlu0 %4644  ;;  %v4755_v49 = vadd.f32 %v9919_v12, %v4733_v20  ;;  %v4756_v6 = vadd.f32 %v9919_v12, %v4734_v15 }
0x1867   :  { %7103 = vrsqrt.f32 %v4683_v5  ;;  %v4670_v40 = vmul.f32 0.03125, %v4648_v32  ;;  %v4669_v25 = vmul.f32 0.03125, %v4645_v18 }
0x1868   :  { %v4773_v34 = vpack.c.bf16 %v4755_v49, %v4754_v0  ;;  %v4735_v47 = vmul.f32 %v9912_v29, %v4713_v41 }
0x1869   :  { %v4686_v42 = vadd.f32 1e-05, %v4670_v40  ;;  %v4685_v59 = vadd.f32 1e-05, %v4669_v25  ;;  %v7100_v33 = vpop.eup %7099 }
0x186a   :  { %v4654_v57 = vpop.xlane.xlu1 %4653  ;;  %6508 = vmatprep.mubr.msk.bf16.mxu0 %vm214_vm1, %v4773_v34  ;;  %v4651_v60 = vpop.xlane.xlu0 %4650  ;;  %v4757_v31 = vadd.f32 %v9919_v12, %v4735_v47  ;;  %v4714_v11 = vmul.f32 %v7100_v33, %v9857_v46  ;;  %v6663_v33 = vld [vmem:[%s10428_s13 + $0x60] sm:$0xff]  }
0x186b   :  { %7105 = vrsqrt.f32 %v4686_v42  ;;  %v4672_v16 = vmul.f32 0.03125, %v4654_v57  ;;  %v4671_v36 = vmul.f32 0.03125, %v4651_v60 }
0x186c   :  { %7107 = vrsqrt.f32 %v4685_v59  ;;  %v4774_v53 = vpack.c.bf16 %v4757_v31, %v4756_v6  ;;  %v4736_v3 = vmul.f32 %v9912_v29, %v4714_v11  ;;  %v6662_v31 = vld [vmem:[%s10428_s13 + $0x58] sm:$0xff]  }
0x186d   :  { %v4688_v28 = vadd.f32 1e-05, %v4672_v16  ;;  %v4687_v37 = vadd.f32 1e-05, %v4671_v36  ;;  %v7102_v54 = vpop.eup %7101  ;;  %v6664_v16 = vld [vmem:[%s10428_s13 + $0x68] sm:$0xff]   ;;  %v6665_v36 = vld [vmem:[%s10428_s13 + $0x70] sm:$0xff]  }
0x186e   :  { %6509 = vmatmul.mubr.msk.bf16.gmra.mrb[112].mxu0 %vm214_vm1, %v4774_v53  ;;  %v4657_v8 = vpop.xlane.xlu0 %4656  ;;  %v4716_v24 = vmul.f32 %v7102_v54, %v9854_v50  ;;  %v4758_v22 = vadd.f32 %v9919_v12, %v4736_v3  ;;  %v6666_v53 = vld [vmem:[%s10428_s13 + $0x78] sm:$0xff]  }
0x186f   :  { %7109 = vrsqrt.f32 %v4688_v28  ;;  %v4673_v43 = vmul.f32 0.03125, %v4657_v8  ;;  %v10001_v28 = vld [vmem:[%s10429_s12 + $0x1] ss:$0 sm:$0xff] }
0x1870   :  { %7111 = vrsqrt.f32 %v4687_v37  ;;  %v4738_v5 = vmul.f32 %v9912_v29, %v4716_v24 }
0x1871   :  { %v7104_v14 = vpop.eup %7103  ;;  %v4689_v38 = vadd.f32 1e-05, %v4673_v43 }
0x1872   :  { %v4715_v26 = vmul.f32 %v7104_v14, %v9872_v10  ;;  %v4760_v49 = vadd.f32 %v9919_v12, %v4738_v5 }
0x1873   :  { %7113 = vrsqrt.f32 %v4689_v38 }
0x1874   :  { %v4737_v9 = vmul.f32 %v9912_v29, %v4715_v26 }
0x1875   :  { %v7106_v48 = vpop.eup %7105 }
0x1876   :  { %v7108_v46 = vpop.eup %7107  ;;  %v4759_v51 = vadd.f32 %v9919_v12, %v4737_v9  ;;  %v4718_v20 = vmul.f32 %v7106_v48, %v9881_v27 }
0x1877   :  { %v4717_v44 = vmul.f32 %v7108_v46, %v9869_v21 }
0x1878   :  { %v4775_v10 = vpack.c.bf16 %v4759_v51, %v4758_v22  ;;  %v4740_v27 = vmul.f32 %v9912_v29, %v4718_v20 }
0x1879   :  { %v7110_v0 = vpop.eup %7109  ;;  %v4739_v41 = vmul.f32 %v9912_v29, %v4717_v44 }
0x187a   :  { %v7112_v50 = vpop.eup %7111  ;;  %v4720_v32 = vmul.f32 %v7110_v0, %v9878_v58  ;;  %6512 = vmatprep.mubr.msk.bf16.mxu0 %vm214_vm1, %v4775_v10  ;;  %v4762_v58 = vadd.f32 %v9919_v12, %v4740_v27 }
0x187b   :  { %v4719_v18 = vmul.f32 %v7112_v50, %v9889_v17  ;;  %v4761_v15 = vadd.f32 %v9919_v12, %v4739_v41 }
0x187c   :  { %v4742_v47 = vmul.f32 %v9912_v29, %v4720_v32 }
0x187d   :  { %v7114_v21 = vpop.eup %7113  ;;  %v4776_v40 = vpack.c.bf16 %v4761_v15, %v4760_v49  ;;  %v4741_v25 = vmul.f32 %v9912_v29, %v4719_v18 }
0x187e   :  { %v4721_v34 = vmul.f32 %v7114_v21, %v9898_v63  ;;  %v4764_v57 = vadd.f32 %v9919_v12, %v4742_v47  ;;  %v6659_v63 = vld [vmem:[%s10428_s13 + $0x40] sm:$0xff]  }
0x187f   :  { %6513 = vmatmul.mubr.msk.bf16.gmra.mrb[116].mxu0 %vm214_vm1, %v4776_v40  ;;  %v4763_v17 = vadd.f32 %v9919_v12, %v4741_v25  ;;  %6520 = vmatprep.subr.bf16.mxu0 %v6659_v63 }
0x1880   :  { %v4743_v42 = vmul.f32 %v9912_v29, %v4721_v34  ;;  %6521 = vmatpush3.bf16.msra.mxu0 %v6659_v63  ;;  %v6660_v29 = vld [vmem:[%s10428_s13 + $0x48] sm:$0xff]  }
0x1881   :  { %v4777_v59 = vpack.c.bf16 %v4763_v17, %v4762_v58  ;;  %6522 = vmatprep.subr.bf16.mxu0 %v6660_v29 }
0x1882   :  { %v4765_v60 = vadd.f32 %v9919_v12, %v4743_v42  ;;  %v6661_v12 = vld [vmem:[%s10428_s13 + $0x50] sm:$0xff]  }
0x1883   :  { %6516 = vmatprep.mubr.msk.bf16.mxu0 %vm214_vm1, %v4777_v59 }
0x1884   :  { %v4778_v6 = vpack.c.bf16 %v4765_v60, %v4764_v57  ;;  %6523 = vmatpush3.bf16.msra.mxu0 %v6660_v29 }
0x1885   :  { %6524 = vmatprep.subr.bf16.mxu0 %v6661_v12 }
0x1887   :  { %6517 = vmatmul.mubr.msk.bf16.gmra.mrb[120].mxu0 %vm214_vm1, %v4778_v6 }
0x1888   :  { %6525 = vmatpush3.bf16.msra.mxu0 %v6661_v12 }
0x1889   :  { %6526 = vmatprep.subr.bf16.mxu0 %v6662_v31 }
0x188c   :  { %6527 = vmatpush3.bf16.msra.mxu0 %v6662_v31 }
0x188d   :  { %6528 = vmatprep.subr.bf16.mxu0 %v6663_v33 }
0x1890   :  { %6529 = vmatpush3.bf16.msra.mxu0 %v6663_v33 }
0x1891   :  { %6530 = vmatprep.subr.bf16.mxu0 %v6664_v16 }
0x1894   :  { %6531 = vmatpush3.bf16.msra.mxu0 %v6664_v16 }
0x1895   :  { %6532 = vmatprep.subr.bf16.mxu0 %v6665_v36 }
0x1898   :  { %6533 = vmatpush3.bf16.msra.mxu0 %v6665_v36 }
0x1899   :  { %6534 = vmatprep.subr.bf16.mxu0 %v6666_v53 }
0x189c   :  { %6535 = vmatpush3.bf16.msra.mxu0 %v6666_v53 }
0x1935   :  { %v6506_v37 = vpop.f32.mrb[108].mxu0 }
0x1936   :  { %v10004_v11 = vadd.f32 %v6506_v37, %v10001_v28  ;;  %v4857_v8 = vpop.f32.mrb[109].mxu0 }
0x1937   :  { %v10007_v43 = vadd.f32 %v10001_v28, %v4857_v8  ;;  %v6507_v54 = vpop.f32.mrb[110].mxu0 }
0x1938   :  { %v10010_v14 = vmul.f32 0.70710677, %v10004_v11  ;;  %v10013_v38 = vadd.f32 %v6507_v54, %v10001_v28  ;;  %v4860_v26 = vpop.f32.mrb[111].mxu0 }
0x1939   :  { %v10016_v3 = vmul.f32 0.70710677, %v10007_v43  ;;  %v10019_v24 = vadd.f32 %v10001_v28, %v4860_v26 }
0x193a   :  { %v4954_v9 = vand.u32 2147483647, %v10010_v14  ;;  %v10023_v48 = vmul.f32 0.70710677, %v10013_v38  ;;  %vm5274_vm1 = vcmp.lt.f32.partialorder %v10010_v14, 0.0 }
0x193b   :  { %v4952_v46 = vand.u32 2147483647, %v10016_v3  ;;  %v10027_v22 = vmul.f32 0.70710677, %v10019_v24  ;;  %vm5272_vm3 = vcmp.lt.f32.partialorder %v10016_v3, 0.0 }
0x193c   :  { %v4970_v51 = vmul.f32 0.3275911, %v4954_v9  ;;  %v4955_v20 = vand.u32 2147483647, %v10023_v48  ;;  %v5178_v42 = vsub.f32 0.0, %v4954_v9  ;;  %vm5275_vm2 = vcmp.lt.f32.partialorder %v10023_v48, 0.0 }
0x193d   :  { %v4968_v44 = vmul.f32 0.3275911, %v4952_v46  ;;  %v4953_v5 = vand.u32 2147483647, %v10027_v22  ;;  %v5176_v36 = vsub.f32 0.0, %v4952_v46  ;;  %vm5273_vm7 = vcmp.lt.f32.partialorder %v10027_v22, 0.0 }
0x193e   :  { %v4986_v10 = vadd.f32 1.0, %v4970_v51  ;;  %v4971_v0 = vmul.f32 0.3275911, %v4955_v20  ;;  %v5179_v63 = vsub.f32 0.0, %v4955_v20  ;;  %v5194_v16 = vmul.f32 %v5178_v42, %v4954_v9 }
0x193f   :  { %v4984_v41 = vadd.f32 1.0, %v4968_v44  ;;  %v4969_v50 = vmul.f32 0.3275911, %v4953_v5  ;;  %v5177_v26 = vsub.f32 0.0, %v4953_v5 }
0x1940   :  { %7115 = vrcp.f32 %v4986_v10  ;;  %v4987_v32 = vadd.f32 1.0, %v4971_v0  ;;  %v5195_v10 = vmul.f32 %v5179_v63, %v4955_v20 }
0x1941   :  { %v6510_v18 = vpop.f32.mrb[112].mxu0  ;;  %7117 = vrcp.f32 %v4984_v41  ;;  %v4985_v15 = vadd.f32 1.0, %v4969_v50 }
0x1942   :  { %v4873_v49 = vpop.f32.mrb[113].mxu0  ;;  %v10032_v27 = vadd.f32 %v6510_v18, %v10001_v28  ;;  %7119 = vrcp.f32 %v4987_v32  ;;  %v5212_v32 = vmul.f32 1.442695, %v5194_v16 }
0x1943   :  { %v10035_v21 = vadd.f32 %v10001_v28, %v4873_v49  ;;  %v6511_v40 = vpop.f32.mrb[114].mxu0  ;;  %7121 = vrcp.f32 %v4985_v15  ;;  %v5192_v49 = vmul.f32 %v5176_v36, %v4952_v46 }
0x1944   :  { %v10038_v25 = vadd.f32 %v6511_v40, %v10001_v28  ;;  %v4876_v34 = vpop.f32.mrb[115].mxu0  ;;  %v10041_v47 = vmul.f32 0.70710677, %v10032_v27 }
0x1945   :  { %v10044_v58 = vmul.f32 0.70710677, %v10035_v21  ;;  %v10051_v57 = vadd.f32 %v10001_v28, %v4876_v34  ;;  %v5193_v34 = vmul.f32 %v5177_v26, %v4953_v5 }
0x1946   :  { %v10047_v17 = vmul.f32 0.70710677, %v10038_v25  ;;  %v4958_v59 = vand.u32 2147483647, %v10041_v47  ;;  %vm5278_vm8 = vcmp.lt.f32.partialorder %v10041_v47, 0.0 }
0x1947   :  { %v4956_v60 = vand.u32 2147483647, %v10044_v58  ;;  %v10061_v37 = vmul.f32 0.70710677, %v10051_v57  ;;  %vm5276_vm9 = vcmp.lt.f32.partialorder %v10044_v58, 0.0 }
0x1948   :  { %v10055_v6 = vand.u32 2147483647, %v10047_v17  ;;  %v4974_v29 = vmul.f32 0.3275911, %v4958_v59  ;;  %vm5279_vm10 = vcmp.lt.f32.partialorder %v10047_v17, 0.0 }
0x1949   :  { %v4972_v12 = vmul.f32 0.3275911, %v4956_v60  ;;  %v10068_v9 = vand.u32 2147483647, %v10061_v37  ;;  %v5180_v36 = vsub.f32 0.0, %v4956_v60  ;;  %vm5277_vm11 = vcmp.lt.f32.partialorder %v10061_v37, 0.0 }
0x194a   :  { %v4975_v31 = vmul.f32 0.3275911, %v10055_v6  ;;  %v10058_v33 = vpop.eup %7115  ;;  %v4990_v53 = vadd.f32 1.0, %v4974_v29  ;;  %v5214_v29 = vmul.f32 1.442695, %v5195_v10  ;;  %v5183_v7 = vsub.f32 0.0, %v10055_v6 }
0x194b   :  { %v10063_v8 = vpop.eup %7117  ;;  %v5034_v54 = vmul.f32 1.0614054, %v10058_v33  ;;  %v4988_v51 = vadd.f32 1.0, %v4972_v12  ;;  %v4973_v42 = vmul.f32 0.3275911, %v10068_v9  ;;  %v5182_v12 = vsub.f32 0.0, %v4958_v59 }
0x194c   :  { %v5032_v44 = vmul.f32 1.0614054, %v10063_v8  ;;  %7123 = vrcp.f32 %v4990_v53  ;;  %v4991_v0 = vadd.f32 1.0, %v4975_v31  ;;  %v10070_v50 = vpop.eup %7119  ;;  %v5181_v35 = vsub.f32 0.0, %v10068_v9 }
0x194d   :  { %v5050_v41 = vadd.f32 -1.4531521, %v5034_v54  ;;  %7125 = vrcp.f32 %v4988_v51  ;;  %v5035_v40 = vmul.f32 1.0614054, %v10070_v50  ;;  %v10075_v20 = vpop.eup %7121  ;;  %v4989_v54 = vadd.f32 1.0, %v4973_v42 }
0x194e   :  { %v5048_v18 = vadd.f32 -1.4531521, %v5032_v44  ;;  %7127 = vrcp.f32 %v4991_v0  ;;  %v5033_v16 = vmul.f32 1.0614054, %v10075_v20  ;;  %v5208_v0 = vmul.f32 1.442695, %v5192_v49 }
0x194f   :  { %v5066_v15 = vmul.f32 %v10058_v33, %v5050_v41  ;;  %v5051_v53 = vadd.f32 -1.4531521, %v5035_v40  ;;  %7129 = vpow2.f32 %v5212_v32 }
0x1950   :  { %v5064_v63 = vmul.f32 %v10063_v8, %v5048_v18  ;;  %v5049_v44 = vadd.f32 -1.4531521, %v5033_v16  ;;  %7131 = vpow2.f32 %v5214_v29  ;;  %v5210_v18 = vmul.f32 1.442695, %v5193_v34 }
0x1951   :  { %v5082_v31 = vadd.f32 1.4214138, %v5066_v15  ;;  %v5067_v26 = vmul.f32 %v10070_v50, %v5051_v53  ;;  %v5198_v15 = vmul.f32 %v5182_v12, %v4958_v59  ;;  %7133 = vrcp.f32 %v4989_v54 }
0x1952   :  { %v5080_v46 = vadd.f32 1.4214138, %v5064_v63  ;;  %v6514_v51 = vpop.f32.mrb[116].mxu0  ;;  %v5065_v42 = vmul.f32 %v10075_v20, %v5049_v44  ;;  %7135 = vpow2.f32 %v5208_v0 }
0x1953   :  { %v5098_v5 = vmul.f32 %v10058_v33, %v5082_v31  ;;  %v10082_v41 = vadd.f32 %v6514_v51, %v10001_v28  ;;  %v10084_v10 = vpop.f32.mrb[117].mxu0  ;;  %v5083_v63 = vadd.f32 1.4214138, %v5067_v26  ;;  %v5196_v51 = vmul.f32 %v5180_v36, %v4956_v60 }
0x1954   :  { %v10086_v40 = vpop.f32.mrb[118].mxu0  ;;  %v5096_v16 = vmul.f32 %v10063_v8, %v5080_v46  ;;  %v5081_v12 = vadd.f32 1.4214138, %v5065_v42  ;;  %v5199_v42 = vmul.f32 %v5183_v7, %v10055_v6  ;;  %7137 = vpow2.f32 %v5210_v18 }
0x1955   :  { %v5114_v32 = vadd.f32 -0.28449672, %v5098_v5  ;;  %v10089_v31 = vpop.f32.mrb[119].mxu0  ;;  %v10096_v49 = vmul.f32 0.70710677, %v10082_v41  ;;  %v5099_v29 = vmul.f32 %v10070_v50, %v5083_v63 }
0x1956   :  { %v10091_v53 = vpop.eup %7123  ;;  %v5220_v5 = vmul.f32 1.442695, %v5198_v15  ;;  %v5097_v44 = vmul.f32 %v10075_v20, %v5081_v12  ;;  %v5216_v63 = vmul.f32 1.442695, %v5196_v51  ;;  %v5112_v39 = vadd.f32 -0.28449672, %v5096_v16 }
0x1957   :  { %v10098_v59 = vpop.eup %7125  ;;  %v5130_v34 = vmul.f32 %v10058_v33, %v5114_v32  ;;  %v5038_v54 = vmul.f32 1.0614054, %v10091_v53  ;;  %v10105_v60 = vand.u32 2147483647, %v10096_v49  ;;  %v5115_v36 = vadd.f32 -0.28449672, %v5099_v29 }
0x1958   :  { %v5036_v26 = vmul.f32 1.0614054, %v10098_v59  ;;  %v10108_v62 = vpop.eup %7127  ;;  %vm5282_vm12 = vcmp.lt.f32.partialorder %v10096_v49, 0.0 }
0x1959   :  { %v5146_v46 = vadd.f32 0.2548296, %v5130_v34  ;;  %v5054_v55 = vadd.f32 -1.4531521, %v5038_v54  ;;  %v4978_v0 = vmul.f32 0.3275911, %v10105_v60  ;;  %v5131_v56 = vmul.f32 %v10070_v50, %v5115_v36  ;;  %v7130_v12 = vpop.eup %7129 }
0x195a   :  { %v5052_v32 = vadd.f32 -1.4531521, %v5036_v26  ;;  %v10116_v29 = vpop.f32.mrb[120].mxu0  ;;  %v5113_v54 = vadd.f32 -0.28449672, %v5097_v44 }
0x195b   :  { %v5162_v15 = vmul.f32 %v10058_v33, %v5146_v46  ;;  %v5070_v34 = vmul.f32 %v10091_v53, %v5054_v55  ;;  %v5039_v26 = vmul.f32 1.0614054, %v10108_v62  ;;  %v4994_v51 = vadd.f32 1.0, %v4978_v0  ;;  %v10120_v2 = vpop.f32.mrb[121].mxu0  ;;  %v7132_v46 = vpop.eup %7131 }
0x195c   :  { %v5068_v4 = vmul.f32 %v10098_v59, %v5052_v32  ;;  %v5147_v6 = vadd.f32 0.2548296, %v5131_v56  ;;  %v10122_v16 = vpop.f32.mrb[122].mxu0  ;;  %v10127_v32 = vpop.eup %7133  ;;  %v5128_v0 = vmul.f32 %v10063_v8, %v5112_v39 }
0x195d   :  { %v5242_v7 = vmul.f32 %v7130_v12, %v5162_v15  ;;  %v5086_v33 = vadd.f32 1.4214138, %v5070_v34  ;;  %v5055_v55 = vadd.f32 -1.4531521, %v5039_v26  ;;  %7139 = vrcp.f32 %v4994_v51  ;;  %v10125_v44 = vpop.f32.mrb[123].mxu0  ;;  %v7136_v45 = vpop.eup %7135 }
0x195e   :  { %v5084_v36 = vadd.f32 1.4214138, %v5068_v4  ;;  %v5163_v15 = vmul.f32 %v10070_v50, %v5147_v6  ;;  %7141 = vpow2.f32 %v5220_v5  ;;  %v5222_v34 = vmul.f32 1.442695, %v5199_v42  ;;  %v7138_v14 = vpop.eup %7137 }
0x195f   :  { %v5258_v19 = vsub.f32 1.0, %v5242_v7  ;;  %v5102_v56 = vmul.f32 %v10091_v53, %v5086_v33  ;;  %v5071_v4 = vmul.f32 %v10108_v62, %v5055_v55  ;;  %v5129_v51 = vmul.f32 %v10075_v20, %v5113_v54 }
0x1960   :  { %v5100_v18 = vmul.f32 %v10098_v59, %v5084_v36  ;;  %v5243_v26 = vmul.f32 %v7132_v46, %v5163_v15  ;;  %v5037_v39 = vmul.f32 1.0614054, %v10127_v32  ;;  %v5197_v50 = vmul.f32 %v5181_v35, %v10068_v9 }
0x1961   :  { %v5290_v12 = vsub.f32 0.0, %v5258_v19  ;;  %v5118_v23 = vadd.f32 -0.28449672, %v5102_v56  ;;  %v5087_v7 = vadd.f32 1.4214138, %v5071_v4  ;;  %v4922_v42 = vmul.f32 0.5, %v10004_v11 }
0x1962   :  { %v5116_v13 = vadd.f32 -0.28449672, %v5100_v18  ;;  %v5144_v6 = vadd.f32 0.2548296, %v5128_v0  ;;  %v5259_v33 = vsub.f32 1.0, %v5243_v26  ;;  %7143 = vpow2.f32 %v5216_v63 }
0x1963   :  { %v5306_v5 = vsel %vm5274_vm1, %v5290_v12, %v5258_v19  ;;  %v5134_v36 = vmul.f32 %v10091_v53, %v5118_v23  ;;  %v5103_v46 = vmul.f32 %v10108_v62, %v5087_v7  ;;  %v5145_v56 = vadd.f32 0.2548296, %v5129_v51 }
0x1964   :  { %v5132_v54 = vmul.f32 %v10098_v59, %v5116_v13  ;;  %v5322_v55 = vadd.f32 1.0, %v5306_v5  ;;  %v5291_v15 = vsub.f32 0.0, %v5259_v33  ;;  %7145 = vpow2.f32 %v5222_v34 }
0x1965   :  { %v5150_v35 = vadd.f32 0.2548296, %v5134_v36  ;;  %v5119_v9 = vadd.f32 -0.28449672, %v5103_v46  ;;  %v5053_v19 = vadd.f32 -1.4531521, %v5037_v39  ;;  %v5160_v0 = vmul.f32 %v10063_v8, %v5144_v6 }
0x1966   :  { %v4923_v23 = vmul.f32 0.5, %v10013_v38  ;;  %v5307_v11 = vsel %vm5275_vm2, %v5291_v15, %v5259_v33  ;;  %v5218_v18 = vmul.f32 1.442695, %v5197_v50  ;;  %v5148_v4 = vadd.f32 0.2548296, %v5132_v54 }
0x1967   :  { %v10146_v48 = vpop.eup %7139  ;;  %v5323_v13 = vadd.f32 1.0, %v5307_v11  ;;  %v5135_v12 = vmul.f32 %v10108_v62, %v5119_v9  ;;  %v5069_v26 = vmul.f32 %v10127_v32, %v5053_v19  ;;  %v5161_v63 = vmul.f32 %v10075_v20, %v5145_v56 }
0x1968   :  { %v5042_v34 = vmul.f32 1.0614054, %v10146_v48  ;;  %v10154_v51 = vadd.f32 %v10001_v28, %v10084_v10  ;;  %v7142_v8 = vpop.eup %7141  ;;  %v10156_v38 = vmul.f32 %v5322_v55, %v4922_v42  ;;  %v5166_v39 = vmul.f32 %v10091_v53, %v5150_v35 }
0x1969   :  { %v10158_v7 = vmul.f32 %v5323_v13, %v4923_v23  ;;  %v5151_v50 = vadd.f32 0.2548296, %v5135_v12  ;;  %v10162_v5 = vmul.f32 0.5, %v10007_v43  ;;  %v5085_v6 = vadd.f32 1.4214138, %v5069_v26 }
0x196a   :  { %v5058_v33 = vadd.f32 -1.4531521, %v5042_v34  ;;  %v10166_v20 = vadd.f32 %v10086_v40, %v10001_v28  ;;  %v5240_v36 = vmul.f32 %v7136_v45, %v5160_v0  ;;  %v5164_v42 = vmul.f32 %v10098_v59, %v5148_v4 }
0x196b   :  { %v5370_v10 = vpack.c.bf16 %v10158_v7, %v10156_v38  ;;  %7147 = vpow2.f32 %v5218_v18  ;;  %v10172_v54 = vmul.f32 0.5, %v10019_v24  ;;  %v5167_v53 = vmul.f32 %v10108_v62, %v5151_v50 }
0x196c   :  { %v5101_v43 = vmul.f32 %v10127_v32, %v5085_v6  ;;  %v5074_v46 = vmul.f32 %v10146_v48, %v5058_v33  ;;  %v5241_v55 = vmul.f32 %v7138_v14, %v5161_v63  ;;  %v10178_v40 = vmul.f32 0.5, %v10032_v27  ;;  %v7144_v56 = vpop.eup %7143 }
0x196d   :  { %v5246_v45 = vmul.f32 %v7142_v8, %v5166_v39  ;;  %v10181_v15 = vmul.f32 0.70710677, %v10154_v51  ;;  %v10185_v35 = vmul.f32 0.70710677, %v10166_v20  ;;  %v5256_v9 = vsub.f32 1.0, %v5240_v36 }
0x196e   :  { %v5117_v59 = vadd.f32 -0.28449672, %v5101_v43  ;;  %v5090_v24 = vadd.f32 1.4214138, %v5074_v46  ;;  %v7146_v62 = vpop.eup %7145  ;;  %v5244_v19 = vmul.f32 %v7144_v56, %v5164_v42  ;;  %v5186_v14 = vsub.f32 0.0, %v10105_v60 }
0x196f   :  { %v10189_v27 = vand.u32 2147483647, %v10181_v15  ;;  %v10193_v0 = vmul.f32 0.5, %v10035_v21  ;;  %v10196_v23 = vmul.f32 0.5, %v10038_v25  ;;  %v5247_v11 = vmul.f32 %v7146_v62, %v5167_v53 }
0x1970   :  { %v5133_v18 = vmul.f32 %v10127_v32, %v5117_v59  ;;  %v5257_v13 = vsub.f32 1.0, %v5241_v55  ;;  %v5262_v4 = vsub.f32 1.0, %v5246_v45  ;;  %v10203_v26 = vmul.f32 0.5, %v10051_v57 }
0x1971   :  { %v4976_v12 = vmul.f32 0.3275911, %v10189_v27  ;;  %v5106_v21 = vmul.f32 %v10146_v48, %v5090_v24  ;;  %v4963_v25 = vand.u32 2147483647, %v10185_v35  ;;  %v5288_v34 = vsub.f32 0.0, %v5256_v9 }
0x1972   :  { %v5149_v63 = vadd.f32 0.2548296, %v5133_v18  ;;  %v5260_v8 = vsub.f32 1.0, %v5244_v19  ;;  %v5202_v39 = vmul.f32 %v5186_v14, %v10105_v60  ;;  %v5263_v6 = vsub.f32 1.0, %v5247_v11 }
0x1973   :  { %v4992_v50 = vadd.f32 1.0, %v4976_v12  ;;  %v4979_v36 = vmul.f32 0.3275911, %v4963_v25  ;;  %v5289_v42 = vsub.f32 0.0, %v5257_v13  ;;  %v5294_v53 = vsub.f32 0.0, %v5262_v4 }
0x1974   :  { %v5165_v33 = vmul.f32 %v10127_v32, %v5149_v63  ;;  %v10213_v43 = vadd.f32 %v10001_v28, %v10089_v31  ;;  %v10216_v55 = vmul.f32 0.5, %v10082_v41  ;;  %v5122_v60 = vadd.f32 -0.28449672, %v5106_v21 }
0x1975   :  { %v7148_v57 = vpop.eup %7147  ;;  %7149 = vrcp.f32 %v4992_v50  ;;  %v4995_v45 = vadd.f32 1.0, %v4979_v36  ;;  %v5304_v32 = vsel %vm5272_vm3, %v5288_v34, %v5256_v9  ;;  %v5292_v56 = vsub.f32 0.0, %v5260_v8 }
0x1976   :  { %v5245_v46 = vmul.f32 %v7148_v57, %v5165_v33  ;;  %v5228_v59 = vmul.f32 1.442695, %v5202_v39  ;;  %v10221_v24 = vmul.f32 0.70710677, %v10213_v43  ;;  %v5295_v62 = vsub.f32 0.0, %v5263_v6 }
0x1977   :  { %7151 = vrcp.f32 %v4995_v45  ;;  %v10225_v31 = vadd.f32 %v10116_v29, %v10001_v28  ;;  %v5305_v41 = vsel %vm5273_vm7, %v5289_v42, %v5257_v13  ;;  %v5310_v14 = vsel %vm5278_vm8, %v5294_v53, %v5262_v4 }
0x1978   :  { %v5261_v19 = vsub.f32 1.0, %v5245_v46  ;;  %v4961_v3 = vand.u32 2147483647, %v10221_v24  ;;  %v10234_v9 = vadd.f32 %v10001_v28, %v10120_v2  ;;  %v5320_v11 = vadd.f32 1.0, %v5304_v32 }
0x1979   :  { %v5138_v12 = vmul.f32 %v10146_v48, %v5122_v60  ;;  %v10238_v63 = vmul.f32 0.70710677, %v10225_v31  ;;  %v5308_v22 = vsel %vm5276_vm9, %v5292_v56, %v5260_v8  ;;  %7153 = vpow2.f32 %v5228_v59 }
0x197a   :  { %v5293_v18 = vsub.f32 0.0, %v5261_v19  ;;  %v5184_v47 = vsub.f32 0.0, %v10189_v27  ;;  %v4977_v29 = vmul.f32 0.3275911, %v4961_v3  ;;  %v5321_v13 = vadd.f32 1.0, %v5305_v41 }
0x197b   :  { %v5326_v4 = vadd.f32 1.0, %v5310_v14  ;;  %v5311_v2 = vsel %vm5279_vm10, %v5295_v62, %v5263_v6  ;;  %v10246_v21 = vand.u32 2147483647, %v10238_v63  ;;  %v5187_v39 = vsub.f32 0.0, %v4963_v25 }
0x197c   :  { %v5309_v34 = vsel %vm5277_vm11, %v5293_v18, %v5261_v19  ;;  %v4993_v50 = vadd.f32 1.0, %v4977_v29  ;;  %v10251_v58 = vmul.f32 0.70710677, %v10234_v9  ;;  %v5336_v8 = vmul.f32 %v5320_v11, %v10162_v5 }
0x197d   :  { %v5324_v33 = vadd.f32 1.0, %v5308_v22  ;;  %v5154_v36 = vadd.f32 0.2548296, %v5138_v12  ;;  %v4982_v57 = vmul.f32 0.3275911, %v10246_v21  ;;  %v5327_v17 = vadd.f32 1.0, %v5311_v2 }
0x197e   :  { %v5200_v6 = vmul.f32 %v5184_v47, %v10189_v27  ;;  %7155 = vrcp.f32 %v4993_v50  ;;  %v10259_v37 = vand.u32 2147483647, %v10251_v58  ;;  %v5325_v53 = vadd.f32 1.0, %v5309_v34 }
0x197f   :  { %v10255_v42 = vpop.eup %7149  ;;  %v4998_v60 = vadd.f32 1.0, %v4982_v57  ;;  %v10264_v5 = vadd.f32 %v10122_v16, %v10001_v28  ;;  %v5337_v45 = vmul.f32 %v5321_v13, %v10172_v54  ;;  %v10268_v32 = vmul.f32 %v5326_v4, %v10178_v40 }
0x1980   :  { %v5040_v46 = vmul.f32 1.0614054, %v10255_v42  ;;  %v5203_v56 = vmul.f32 %v5187_v39, %v4963_v25  ;;  %v4980_v27 = vmul.f32 0.3275911, %v10259_v37  ;;  %v5340_v62 = vmul.f32 %v5324_v33, %v10193_v0 }
0x1981   :  { %v10271_v59 = vpop.eup %7151  ;;  %v5170_v19 = vmul.f32 %v10146_v48, %v5154_v36  ;;  %7157 = vrcp.f32 %v4998_v60  ;;  %v5224_v14 = vmul.f32 1.442695, %v5200_v6  ;;  %v5185_v11 = vsub.f32 0.0, %v4961_v3 }
0x1982   :  { %v5056_v41 = vadd.f32 -1.4531521, %v5040_v46  ;;  %v5043_v16 = vmul.f32 1.0614054, %v10271_v59  ;;  %v4996_v18 = vadd.f32 1.0, %v4980_v27  ;;  %v10277_v54 = vmul.f32 %v5327_v17, %v10196_v23 }
0x1983   :  { %v5341_v40 = vmul.f32 %v5325_v53, %v10203_v26  ;;  %v10282_v12 = vmul.f32 0.70710677, %v10264_v5  ;;  %v7154_v0 = vpop.eup %7153  ;;  %v5230_v48 = vmul.f32 1.442695, %v5203_v56  ;;  %v10286_v47 = vadd.f32 %v10001_v28, %v10125_v44 }
0x1984   :  { %v5072_v25 = vmul.f32 %v10255_v42, %v5056_v41  ;;  %v5059_v22 = vadd.f32 -1.4531521, %v5043_v16  ;;  %7159 = vrcp.f32 %v4996_v18  ;;  %v10288_v29 = vmul.f32 %v7154_v0, %v5170_v19 }
0x1985   :  { %v4967_v23 = vand.u32 2147483647, %v10282_v12  ;;  %v5369_v4 = vpack.c.bf16 %v5337_v45, %v5336_v8  ;;  %7161 = vpow2.f32 %v5224_v14  ;;  %v5201_v2 = vmul.f32 %v5185_v11, %v4961_v3 }
0x1986   :  { %v5088_v13 = vadd.f32 1.4214138, %v5072_v25  ;;  %v5075_v26 = vmul.f32 %v10271_v59, %v5059_v22  ;;  %v10293_v34 = vmul.f32 0.70710677, %v10286_v47  ;;  %v5190_v50 = vsub.f32 0.0, %v10246_v21 }
0x1987   :  { %v4983_v33 = vmul.f32 0.3275911, %v4967_v23  ;;  %6536 = vmatprep.mubr.bf16.mxu0 %v5369_v4  ;;  %v5371_v28 = vpack.c.bf16 %v5341_v40, %v5340_v62  ;;  %7163 = vpow2.f32 %v5230_v48  ;;  %v5372_v3 = vpack.c.bf16 %v10277_v54, %v10268_v32 }
0x1988   :  { %v5104_v39 = vmul.f32 %v10255_v42, %v5088_v13  ;;  %v10297_v44 = vpop.eup %7155  ;;  %v5091_v36 = vadd.f32 1.4214138, %v5075_v26  ;;  %v10300_v8 = vand.u32 2147483647, %v10293_v34  ;;  %6537 = vmatmul.mubr.bf16.vlgmr.msra.gmra.mrb[124].mxu0 %v5370_v10  ;;  %v5266_v57 = vsub.f32 1.0, %v10288_v29 }
0x1989   :  { %v5041_v6 = vmul.f32 1.0614054, %v10297_v44  ;;  %v4999_v53 = vadd.f32 1.0, %v4983_v33  ;;  %6540 = vmatprep.mubr.bf16.mxu0 %v5371_v28  ;;  %v5226_v60 = vmul.f32 1.442695, %v5201_v2  ;;  %v5188_v45 = vsub.f32 0.0, %v10259_v37 }
0x198a   :  { %v5120_v17 = vadd.f32 -0.28449672, %v5104_v39  ;;  %v5107_v46 = vmul.f32 %v10271_v59, %v5091_v36  ;;  %v4981_v56 = vmul.f32 0.3275911, %v10300_v8  ;;  %v5206_v10 = vmul.f32 %v5190_v50, %v10246_v21 }
0x198b   :  { %v10312_v27 = vpop.eup %7157  ;;  %v5057_v7 = vadd.f32 -1.4531521, %v5041_v6  ;;  %7165 = vrcp.f32 %v4999_v53  ;;  %v5298_v41 = vsub.f32 0.0, %v5266_v57  ;;  %v5191_v11 = vsub.f32 0.0, %v4967_v23 }
0x198c   :  { %v5136_v38 = vmul.f32 %v10255_v42, %v5120_v17  ;;  %v5123_v32 = vadd.f32 -0.28449672, %v5107_v46  ;;  %v5046_v62 = vmul.f32 1.0614054, %v10312_v27  ;;  %v4997_v19 = vadd.f32 1.0, %v4981_v56 }
0x198d   :  { %v5073_v16 = vmul.f32 %v10297_v44, %v5057_v7  ;;  %v5204_v25 = vmul.f32 %v5188_v45, %v10259_v37  ;;  %v5236_v22 = vmul.f32 1.442695, %v5206_v10  ;;  %v4931_v13 = vmul.f32 0.5, %v10166_v20 }
0x198e   :  { %v5152_v14 = vadd.f32 0.2548296, %v5136_v38  ;;  %v10319_v18 = vpop.eup %7159  ;;  %v5139_v54 = vmul.f32 %v10271_v59, %v5123_v32  ;;  %v5062_v40 = vadd.f32 -1.4531521, %v5046_v62  ;;  %7167 = vrcp.f32 %v4997_v19 }
0x198f   :  { %v5089_v0 = vadd.f32 1.4214138, %v5073_v16  ;;  %v5044_v48 = vmul.f32 1.0614054, %v10319_v18  ;;  %v7162_v29 = vpop.eup %7161  ;;  %7169 = vpow2.f32 %v5226_v60  ;;  %v5207_v37 = vmul.f32 %v5191_v11, %v4967_v23 }
0x1990   :  { %v5168_v21 = vmul.f32 %v10255_v42, %v5152_v14  ;;  %v5155_v4 = vadd.f32 0.2548296, %v5139_v54  ;;  %v5078_v26 = vmul.f32 %v10312_v27, %v5062_v40  ;;  %6541 = vmatmul.mubr.bf16.gmra.mrb[128].mxu0 %v5372_v3  ;;  %v5314_v42 = vsel %vm5282_vm12, %v5298_v41, %v5266_v57 }
0x1991   :  { %v5105_v39 = vmul.f32 %v10297_v44, %v5089_v0  ;;  %v5060_v50 = vadd.f32 -1.4531521, %v5044_v48  ;;  %v7164_v33 = vpop.eup %7163  ;;  %v5232_v17 = vmul.f32 1.442695, %v5204_v25  ;;  %7171 = vpow2.f32 %v5236_v22 }
0x1992   :  { %v5248_v2 = vmul.f32 %v7162_v29, %v5168_v21  ;;  %v5171_v28 = vmul.f32 %v10271_v59, %v5155_v4  ;;  %v5094_v36 = vadd.f32 1.4214138, %v5078_v26  ;;  %v5189_v53 = vsub.f32 0.0, %v10300_v8 }
0x1993   :  { %v5121_v6 = vadd.f32 -0.28449672, %v5105_v39  ;;  %v5076_v20 = vmul.f32 %v10319_v18, %v5060_v50  ;;  %vm5280_vm13 = vcmp.lt.f32.partialorder %v10181_v15, 0.0  ;;  %v5330_v49 = vadd.f32 1.0, %v5314_v42 }
0x1994   :  { %v5264_v3 = vsub.f32 1.0, %v5248_v2  ;;  %v5251_v46 = vmul.f32 %v7164_v33, %v5171_v28  ;;  %v5110_v23 = vmul.f32 %v10312_v27, %v5094_v36  ;;  %v5238_v45 = vmul.f32 1.442695, %v5207_v37 }
0x1995   :  { %v10335_v60 = vpop.eup %7165  ;;  %v5137_v57 = vmul.f32 %v10297_v44, %v5121_v6  ;;  %v5092_v59 = vadd.f32 1.4214138, %v5076_v20  ;;  %7173 = vpow2.f32 %v5232_v17  ;;  %vm5283_vm14 = vcmp.lt.f32.partialorder %v10185_v35, 0.0 }
0x1996   :  { %v5267_v56 = vsub.f32 1.0, %v5251_v46  ;;  %v5126_v38 = vadd.f32 -0.28449672, %v5110_v23  ;;  %v5047_v7 = vmul.f32 1.0614054, %v10335_v60  ;;  %v5205_v62 = vmul.f32 %v5189_v53, %v10300_v8 }
0x1997   :  { %v5153_v10 = vadd.f32 0.2548296, %v5137_v57  ;;  %v5108_v32 = vmul.f32 %v10319_v18, %v5092_v59  ;;  %v5296_v41 = vsub.f32 0.0, %v5264_v3  ;;  %v5346_v54 = vmul.f32 %v5330_v49, %v10216_v55 }
0x1998   :  { %v7168_v19 = vpop.eup %7167  ;;  %v5299_v14 = vsub.f32 0.0, %v5267_v56  ;;  %v5142_v16 = vmul.f32 %v10312_v27, %v5126_v38  ;;  %v5063_v11 = vadd.f32 -1.4531521, %v5047_v7  ;;  %7175 = vpow2.f32 %v5238_v45 }
0x1999   :  { %v5169_v40 = vmul.f32 %v10297_v44, %v5153_v10  ;;  %v5124_v25 = vadd.f32 -0.28449672, %v5108_v32  ;;  %v5045_v21 = vmul.f32 1.0614054, %v7168_v19  ;;  %v7170_v0 = vpop.eup %7169  ;;  %v5312_v2 = vsel %vm5280_vm13, %v5296_v41, %v5264_v3 }
0x199a   :  { %v5315_v22 = vsel %vm5283_vm14, %v5299_v14, %v5267_v56  ;;  %v5158_v35 = vadd.f32 0.2548296, %v5142_v16  ;;  %v5079_v48 = vmul.f32 %v10335_v60, %v5063_v11  ;;  %v5234_v44 = vmul.f32 1.442695, %v5205_v62 }
0x199b   :  { %v5331_v29 = vadd.f32 1.0, %v5315_v22  ;;  %v5249_v8 = vmul.f32 %v7170_v0, %v5169_v40  ;;  %v5140_v4 = vmul.f32 %v10319_v18, %v5124_v25  ;;  %v5061_v26 = vadd.f32 -1.4531521, %v5045_v21  ;;  %v7172_v50 = vpop.eup %7171 }
0x199c   :  { %v5174_v55 = vmul.f32 %v10312_v27, %v5158_v35  ;;  %v5095_v39 = vadd.f32 1.4214138, %v5079_v48  ;;  %v5328_v15 = vadd.f32 1.0, %v5312_v2  ;;  %vm5281_vm15 = vcmp.lt.f32.partialorder %v10221_v24, 0.0 }
0x199d   :  { %v5347_v37 = vmul.f32 %v5331_v29, %v4931_v13  ;;  %v5265_v33 = vsub.f32 1.0, %v5249_v8  ;;  %v5156_v42 = vadd.f32 0.2548296, %v5140_v4  ;;  %v5077_v28 = vmul.f32 %v7168_v19, %v5061_v26 }
0x199e   :  { %v5254_v36 = vmul.f32 %v7172_v50, %v5174_v55  ;;  %v5111_v17 = vmul.f32 %v10335_v60, %v5095_v39  ;;  %7177 = vpow2.f32 %v5234_v44  ;;  %v4928_v3 = vmul.f32 0.5, %v10154_v51 }
0x199f   :  { %v5297_v6 = vsub.f32 0.0, %v5265_v33  ;;  %v5172_v20 = vmul.f32 %v10319_v18, %v5156_v42  ;;  %v5093_v53 = vadd.f32 1.4214138, %v5077_v28  ;;  %v5374_v46 = vpack.c.bf16 %v5347_v37, %v5346_v54  ;;  %v7174_v23 = vpop.eup %7173 }
0x19a0   :  { %v5127_v27 = vadd.f32 -0.28449672, %v5111_v17  ;;  %v4929_v59 = vmul.f32 0.5, %v10213_v43  ;;  %v5270_v56 = vsub.f32 1.0, %v5254_v36  ;;  %v5344_v10 = vmul.f32 %v5328_v15, %v4928_v3 }
0x19a1   :  { %v5313_v13 = vsel %vm5281_vm15, %v5297_v6, %v5265_v33  ;;  %v5252_v49 = vmul.f32 %v7174_v23, %v5172_v20  ;;  %v5109_v57 = vmul.f32 %v7168_v19, %v5093_v53  ;;  %vm5286_vm0 = vcmp.lt.f32.partialorder %v10238_v63, 0.0 }
0x19a2   :  { %v5329_v45 = vadd.f32 1.0, %v5313_v13  ;;  %v5143_v38 = vmul.f32 %v10335_v60, %v5127_v27  ;;  %v7176_v7 = vpop.eup %7175  ;;  %v5302_v14 = vsub.f32 0.0, %v5270_v56  ;;  %vm5284_vm4 = vcmp.lt.f32.partialorder %v10251_v58, 0.0 }
0x19a3   :  { %v5125_v18 = vadd.f32 -0.28449672, %v5109_v57  ;;  %v5268_v41 = vsub.f32 1.0, %v5252_v49  ;;  %vm5287_vm5 = vcmp.lt.f32.partialorder %v10282_v12, 0.0  ;;  %v4934_v4 = vmul.f32 0.5, %v10225_v31 }
0x19a4   :  { %v5345_v32 = vmul.f32 %v5329_v45, %v4929_v59  ;;  %v5159_v62 = vadd.f32 0.2548296, %v5143_v38  ;;  %v5318_v21 = vsel %vm5286_vm0, %v5302_v14, %v5270_v56  ;;  %v4935_v63 = vmul.f32 0.5, %v10264_v5  ;;  %v5816_v5 = vld [vmem:[%s10430_s14 + $0x1] ss:$0 sm:$0xff]  ;;  %v10563_v45 = vld [vmem:[#allocation3_spill] sm:$0xff] }
0x19a5   :  { %v5141_v24 = vmul.f32 %v7168_v19, %v5125_v18  ;;  %v5300_v43 = vsub.f32 0.0, %v5268_v41  ;;  %v5334_v48 = vadd.f32 1.0, %v5318_v21  ;;  %vm5285_vm6 = vcmp.lt.f32.partialorder %v10293_v34, 0.0  ;;  %v10564_v56 = vld [vmem:[#allocation2_spill] sm:$0xff] }
0x19a6   :  { %v5175_v16 = vmul.f32 %v10335_v60, %v5159_v62  ;;  %v5373_v51 = vpack.c.bf16 %v5345_v32, %v5344_v10  ;;  %v4932_v58 = vmul.f32 0.5, %v10234_v9  ;;  %v4933_v50 = vmul.f32 0.5, %v10286_v47 }
0x19a7   :  { %v5157_v11 = vadd.f32 0.2548296, %v5141_v24  ;;  %v5316_v29 = vsel %vm5284_vm4, %v5300_v43, %v5268_v41  ;;  %v5350_v55 = vmul.f32 %v5334_v48, %v4934_v4  ;;  %v10566_v41 = vld [vmem:[#allocation5_spill] sm:$0xff]  ;;  %v10568_v43 = vld [vmem:[#allocation6_spill] sm:$0xff]  ;;  %vm5594_vm1 = vcmask 523264  }
0x19a8   :  { %v5255_v54 = vmul.f32 %v7176_v7, %v5175_v16  ;;  %6544 = vmatprep.mubr.bf16.mxu0 %v5373_v51  ;;  %v7178_v25 = vpop.eup %7177  ;;  %v5332_v2 = vadd.f32 1.0, %v5316_v29  ;;  %v10565_v7 = vld [vmem:[#allocation4_spill] sm:$0xff] }
0x19a9   :  { %v5173_v40 = vmul.f32 %v7168_v19, %v5157_v11  ;;  %6545 = vmatmul.mubr.bf16.gmra.mrb[132].mxu0 %v5374_v46  ;;  %v10567_v11 = vld [vmem:[#allocation7_spill] sm:$0xff] }
0x19aa   :  { %v5271_v0 = vsub.f32 1.0, %v5255_v54  ;;  %v5348_v33 = vmul.f32 %v5332_v2, %v4932_v58 }
0x19ab   :  { %v5253_v22 = vmul.f32 %v7178_v25, %v5173_v40 }
0x19ac   :  { %v5303_v35 = vsub.f32 0.0, %v5271_v0 }
0x19ad   :  { %v5269_v60 = vsub.f32 1.0, %v5253_v22 }
0x19ae   :  { %v5319_v8 = vsel %vm5287_vm5, %v5303_v35, %v5271_v0  ;;  %v10569_v0 = vld [vmem:[#allocation8_spill] sm:$0xff] }
0x19af   :  { %v5335_v26 = vadd.f32 1.0, %v5319_v8  ;;  %v5301_v19 = vsub.f32 0.0, %v5269_v60 }
0x19b1   :  { %v5351_v39 = vmul.f32 %v5335_v26, %v4935_v63  ;;  %v5317_v44 = vsel %vm5285_vm6, %v5301_v19, %v5269_v60  ;;  %v10570_v60 = vld [vmem:[#allocation9_spill] sm:$0xff]  ;;  %v10571_v19 = vld [vmem:[#allocation11_spill] sm:$0xff] }
0x19b2   :  { %v5333_v37 = vadd.f32 1.0, %v5317_v44 }
0x19b3   :  { %v5376_v12 = vpack.c.bf16 %v5351_v39, %v5350_v55  ;;  %v10572_v55 = vld [vmem:[#allocation10_spill] sm:$0xff] }
0x19b4   :  { %v5349_v42 = vmul.f32 %v5333_v37, %v4933_v50  ;;  %v10573_v50 = vld [vmem:[#allocation12_spill] sm:$0xff] }
0x19b6   :  { %v5375_v28 = vpack.c.bf16 %v5349_v42, %v5348_v33 }
0x19b8   :  { %6548 = vmatprep.mubr.bf16.mxu0 %v5375_v28 }
0x19b9   :  { %6549 = vmatmul.mubr.bf16.gmra.mrb[136].mxu0 %v5376_v12 }
0x1a5b   :  { %v6538_v31 = vpop.f32.mrb[124].mxu0 }
0x1a5c   :  { %v5459_v34 = vpop.f32.mrb[125].mxu0  ;;  %v5524_v20 = vadd.f32 %v6538_v31, %v9713_v61 }
0x1a5d   :  { %v5522_v36 = vadd.f32 %v5459_v34, %v9716_v52  ;;  %v6539_v17 = vpop.f32.mrb[126].mxu0  ;;  %v10562_v52 = vld [vmem:[#allocation13_spill] sm:$0xff] }
0x1a5e   :  { %v5462_v6 = vpop.f32.mrb[127].mxu0  ;;  %v5548_v3 = vadd.f32 %v5816_v5, %v5524_v20  ;;  %v5525_v13 = vadd.f32 %v6539_v17, %v9722_v1 }
0x1a5f   :  { %v5546_v9 = vadd.f32 %v5816_v5, %v5522_v36  ;;  %v5523_v47 = vadd.f32 %v5462_v6, %v9732_v30 }
0x1a60   :  { %v5549_v49 = vadd.f32 %v5816_v5, %v5525_v13 }
0x1a61   :  { %5562 = vxpose.xlu1.b32.start [1/16] (narrow) %v5546_v9, 32  ;;  %v5547_v53 = vadd.f32 %v5816_v5, %v5523_v47 }
0x1a63   :  { %v6542_v46 = vpop.f32.mrb[128].mxu0 }
0x1a64   :  { %v5475_v23 = vpop.f32.mrb[129].mxu0  ;;  %v5528_v61 = vadd.f32 %v6542_v46, %v10564_v56 }
0x1a65   :  { %5563 = vxpose.xlu1.b32.cont [2/16] (narrow) %v5547_v53, 32  ;;  %v6543_v15 = vpop.f32.mrb[130].mxu0  ;;  %v5526_v57 = vadd.f32 %v5475_v23, %v10562_v52 }
0x1a66   :  { %v5478_v27 = vpop.f32.mrb[131].mxu0  ;;  %v5552_v18 = vadd.f32 %v5816_v5, %v5528_v61  ;;  %v5529_v10 = vadd.f32 %v6543_v15, %v10565_v7 }
0x1a67   :  { %v5550_v59 = vadd.f32 %v5816_v5, %v5526_v57  ;;  %v5527_v30 = vadd.f32 %v5478_v27, %v10563_v45 }
0x1a68   :  { %v5553_v32 = vadd.f32 %v5816_v5, %v5529_v10 }
0x1a69   :  { %5564 = vxpose.xlu1.b32.cont [3/16] (narrow) %v5548_v3, 32  ;;  %v5551_v38 = vadd.f32 %v5816_v5, %v5527_v30 }
0x1a6d   :  { %5565 = vxpose.xlu1.b32.cont [4/16] (narrow) %v5549_v49, 32 }
0x1a71   :  { %5566 = vxpose.xlu1.b32.cont [5/16] (narrow) %v5550_v59, 32 }
0x1a75   :  { %5567 = vxpose.xlu1.b32.cont [6/16] (narrow) %v5551_v38, 32 }
0x1a79   :  { %5568 = vxpose.xlu1.b32.cont [7/16] (narrow) %v5552_v18, 32 }
0x1a7c   :  { %v6546_v62 = vpop.f32.mrb[132].mxu0 }
0x1a7d   :  { %v5491_v1 = vpop.f32.mrb[133].mxu0  ;;  %5569 = vxpose.xlu1.b32.cont [8/16] (narrow) %v5553_v32, 32  ;;  %v5532_v40 = vadd.f32 %v6546_v62, %v10568_v43 }
0x1a7e   :  { %v5530_v24 = vadd.f32 %v5491_v1, %v10566_v41  ;;  %v6547_v14 = vpop.f32.mrb[134].mxu0 }
0x1a7f   :  { %v5494_v16 = vpop.f32.mrb[135].mxu0  ;;  %v5556_v21 = vadd.f32 %v5816_v5, %v5532_v40  ;;  %v5533_v22 = vadd.f32 %v6547_v14, %v10569_v0 }
0x1a80   :  { %v5554_v51 = vadd.f32 %v5816_v5, %v5530_v24  ;;  %v5531_v54 = vadd.f32 %v5494_v16, %v10567_v11 }
0x1a81   :  { %v5557_v35 = vadd.f32 %v5816_v5, %v5533_v22 }
0x1a82   :  { %5570 = vxpose.xlu1.b32.cont [9/16] (narrow) %v5554_v51, 32  ;;  %v5555_v25 = vadd.f32 %v5816_v5, %v5531_v54 }
0x1a86   :  { %5571 = vxpose.xlu1.b32.cont [10/16] (narrow) %v5555_v25, 32 }
0x1a8a   :  { %5572 = vxpose.xlu1.b32.cont [11/16] (narrow) %v5556_v21, 32 }
0x1a8c   :  { %v6550_v48 = vpop.f32.mrb[136].mxu0 }
0x1a8d   :  { %v5507_v29 = vpop.f32.mrb[137].mxu0  ;;  %v5536_v39 = vadd.f32 %v6550_v48, %v10572_v55 }
0x1a8e   :  { %v5534_v8 = vadd.f32 %v5507_v29, %v10570_v60  ;;  %v6551_v4 = vpop.f32.mrb[138].mxu0  ;;  %5573 = vxpose.xlu1.b32.cont [12/16] (narrow) %v5557_v35, 32 }
0x1a8f   :  { %v5510_v63 = vpop.f32.mrb[139].mxu0  ;;  %v5560_v58 = vadd.f32 %v5816_v5, %v5536_v39  ;;  %v5537_v37 = vadd.f32 %v6551_v4, %v10573_v50 }
0x1a90   :  { %v5558_v26 = vadd.f32 %v5816_v5, %v5534_v8  ;;  %v5535_v2 = vadd.f32 %v5510_v63, %v10571_v19 }
0x1a91   :  { %v5561_v12 = vadd.f32 %v5816_v5, %v5537_v37 }
0x1a92   :  { %5574 = vxpose.xlu1.b32.cont [13/16] (narrow) %v5558_v26, 32  ;;  %v5559_v44 = vadd.f32 %v5816_v5, %v5535_v2 }
0x1a96   :  { %5575 = vxpose.xlu1.b32.cont [14/16] (narrow) %v5559_v44, 32 }
0x1a9a   :  { %5576 = vxpose.xlu1.b32.cont [15/16] (narrow) %v5560_v58, 32 }
0x1a9e   :  { %5577 = vxpose.xlu1.b32.end [16/16] (narrow) %v5561_v12, 32 }
0x1ae2   :  { %v5578_v33 = vpop.trf.xlu1 }
0x1ae3   :  { %5595 = vst.msk [vmem:[%s10431_s15] sm:$0xff] %vm5594_vm1, %v5578_v33  ;;  %5603 = vrot.lane.b32.xlu0 %v5578_v33, %s7184_s7 }
0x1ae6   :  { %v5579_v42 = vpop.trf.xlu1 }
0x1ae7   :  { %5596 = vst.msk [vmem:[%s10431_s15 + $0x8] sm:$0xff] %vm5594_vm1, %v5579_v42  ;;  %5605 = vrot.lane.b32.xlu0 %v5579_v42, %s7184_s7 }
0x1aea   :  { %v5580_v28 = vpop.trf.xlu1 }
0x1aeb   :  { %5597 = vst.msk [vmem:[%s10431_s15 + $0x10] sm:$0xff] %vm5594_vm1, %v5580_v28  ;;  %5607 = vrot.lane.b32.xlu0 %v5580_v28, %s7184_s7 }
0x1aee   :  { %v5581_v31 = vpop.trf.xlu1 }
0x1aef   :  { %5598 = vst.msk [vmem:[%s10431_s15 + $0x18] sm:$0xff] %vm5594_vm1, %v5581_v31  ;;  %5609 = vrot.lane.b32.xlu0 %v5581_v31, %s7184_s7 }
0x1b55   :  { %v5604_v5 = vpop.permute.xlu0 %5603 }
0x1b56   :  { %5615 = vst.msk [vmem:[%s10431_s15 + $0x20] sm:$0xff] %vm5594_vm1, %v5604_v5 }
0x1b59   :  { %v5606_v34 = vpop.permute.xlu0 %5605 }
0x1b5a   :  { %5616 = vst.msk [vmem:[%s10431_s15 + $0x28] sm:$0xff] %vm5594_vm1, %v5606_v34 }
0x1b5d   :  { %v5608_v36 = vpop.permute.xlu0 %5607 }
0x1b5e   :  { %5617 = vst.msk [vmem:[%s10431_s15 + $0x30] sm:$0xff] %vm5594_vm1, %v5608_v36 }
0x1b61   :  { %v5610_v17 = vpop.permute.xlu0 %5609 }
0x1b62   :  { %5618 = vst.msk [vmem:[%s10431_s15 + $0x38] sm:$0xff] %vm5594_vm1, %v5610_v17 }

</bundles_post_ra>
